<compile_context>
chip_gen: v7x
topology: tpu7x:2x2x1
jax: 0.10.0
libtpu: 0.0.40
codegen_flags: <defaults>
</compile_context>

<pallas_src>
import jax
import jax.numpy as jnp
from jax.experimental import pallas as pl
from jax.experimental.pallas import tpu as pltpu

BN_EPS = 1e-5


def fused_block_kernel(x_ref, w_ref, b0_ref, gamma_ref, beta1_ref, alpha_ref,
                       b2_ref, o_ref, pad_ref, col_ref):
    """Whole BasicBlock forward for the full (small) batch in one invocation.

    x_ref:     (N, H, W, C)     f32   NHWC input (also the identity residual)
    w_ref:     (9*C, Cout)      bf16  conv weights, repacked tap-major along K
    b0_ref:    (1, C)           f32   move0 bias
    gamma_ref: (1, Cout)        f32   BN weight
    beta1_ref: (1, Cout)        f32   BN bias + move1 bias (pre-folded)
    alpha_ref: (1, Cout)        f32   PReLU slope
    b2_ref:    (1, Cout)        f32   move2 bias
    o_ref:     (N*H*W, Cout)    f32   output (flattened NHWC)
    pad_ref:   (N*(H+2), W+2, C) bf16 scratch: zero-padded binarized acts
    col_ref:   (N*H, W, 9*C)     bf16 scratch: im2col slab (tap-major K)
    """
    N, H, W, C = x_ref.shape
    HW = H * W
    NHW = N * HW

    # Zero the padded scratch once (covers the 1-pixel halo); the interior is
    # fully overwritten below.  Single invocation -> this runs exactly once.
    pad_ref[...] = jnp.zeros_like(pad_ref)

    # move0 (learnable per-channel bias) + BinaryActivation (forward == sign).
    # Compare/select in f32 (v5e has no bf16 VPU); down-cast only at the store.
    for n in range(N):                            # static unroll, N is small
        a = x_ref[n] + b0_ref[...]                # (H, W, C) f32
        a = jnp.where(a > 0.0, 1.0, jnp.where(a < 0.0, -1.0, 0.0))
        r0 = n * (H + 2)
        pad_ref[r0 + 1:r0 + 1 + H, 1:W + 1, :] = a.astype(jnp.bfloat16)

    # im2col: (N*H, W, 9*C) bf16 slab, tap-major along K to match the weight
    # repack.  Plain slice assignments; no per-tap reshape of strided windows.
    for n in range(N):
        r0 = n * (H + 2)
        c0 = n * H
        for t in range(9):
            ky, kx = divmod(t, 3)
            col_ref[c0:c0 + H, :, t * C:(t + 1) * C] = (
                pad_ref[r0 + ky:r0 + ky + H, kx:kx + W, :])

    # One MXU matmul, K = 9*C, M = N*H*W.  bf16 operands (exact for +/-1/0
    # activations), f32 accumulation.  The reshape only merges leading dims
    # (W is a multiple of the 8 sublanes) so it is layout-preserving.
    y = jnp.dot(col_ref[...].reshape(NHW, 9 * C), w_ref[...],
                preferred_element_type=jnp.float32)              # (NHW, Cout)

    # BatchNorm2d, training mode: batch statistics over N*H*W, biased variance.
    inv_cnt = 1.0 / float(NHW)
    mean = jnp.sum(y, axis=0, keepdims=True) * inv_cnt           # (1, Cout)
    var = jnp.sum(y * y, axis=0, keepdims=True) * inv_cnt - mean * mean
    inv_std = jax.lax.rsqrt(var + BN_EPS)
    scale = gamma_ref[...] * inv_std
    shift = beta1_ref[...] - mean * scale        # move1 folded into the shift

    out = y * scale + shift                                      # BN (+ move1)
    out = out + x_ref[...].reshape(NHW, C)                       # residual
    out = jnp.where(out >= 0.0, out, alpha_ref[...] * out)       # PReLU
    out = out + b2_ref[...]                                      # move2
    o_ref[...] = out


@jax.jit
def basic_block(x_nchw, w, b0, gamma, beta, b1, alpha, b2):
    """x_nchw: (N, C, H, W) f32; w: (Cout, Cin, 3, 3) f32.  Returns NCHW f32."""
    N, C, H, W = x_nchw.shape
    Cout = w.shape[0]
    NHW = N * H * W

    x_nhwc = jnp.transpose(x_nchw, (0, 2, 3, 1))                 # (N, H, W, C)
    # (Cout, Cin, 3, 3) -> (3, 3, Cin, Cout) -> (9*Cin, Cout), bf16 for the MXU.
    w_k = jnp.transpose(w, (2, 3, 1, 0)).reshape(9 * C, Cout).astype(jnp.bfloat16)

    b0_r = b0.reshape(1, C)
    gamma_r = gamma.reshape(1, Cout)
    beta1_r = (beta + b1).reshape(1, Cout)        # fold move1 into the BN shift
    alpha_r = alpha.reshape(1, Cout)
    b2_r = b2.reshape(1, Cout)

    out = pl.pallas_call(
        fused_block_kernel,
        out_shape=jax.ShapeDtypeStruct((NHW, Cout), jnp.float32),
        grid_spec=pltpu.PrefetchScalarGridSpec(
            num_scalar_prefetch=0,
            grid=(1,),                      # whole batch in one step (fits VMEM)
            in_specs=[
                pl.BlockSpec((N, H, W, C), lambda i: (0, 0, 0, 0)),   # x (NHWC)
                pl.BlockSpec((9 * C, Cout), lambda i: (0, 0)),        # weights
                pl.BlockSpec((1, C), lambda i: (0, 0)),               # move0 bias
                pl.BlockSpec((1, Cout), lambda i: (0, 0)),            # gamma
                pl.BlockSpec((1, Cout), lambda i: (0, 0)),            # beta + b1
                pl.BlockSpec((1, Cout), lambda i: (0, 0)),            # prelu alpha
                pl.BlockSpec((1, Cout), lambda i: (0, 0)),            # move2 bias
            ],
            out_specs=pl.BlockSpec((NHW, Cout), lambda i: (0, 0)),
            scratch_shapes=[
                pltpu.VMEM((N * (H + 2), W + 2, C), jnp.bfloat16),  # padded acts
                pltpu.VMEM((N * H, W, 9 * C), jnp.bfloat16),        # im2col slab
            ]),
    )(x_nhwc, w_k, b0_r, gamma_r, beta1_r, alpha_r, b2_r)

    return jnp.transpose(out.reshape(N, H, W, Cout), (0, 3, 1, 2))


def reference(x, w, b0, gamma, beta, b1, alpha, b2):
    """Pure-JAX NCHW reference mirroring the PyTorch forward."""
    a = x + b0.reshape(1, -1, 1, 1)
    a = jnp.sign(a)
    conv = jax.lax.conv_general_dilated(
        a, w, window_strides=(1, 1), padding=((1, 1), (1, 1)),
        dimension_numbers=('NCHW', 'OIHW', 'NCHW'),
        precision=jax.lax.Precision.HIGHEST)
    mean = jnp.mean(conv, axis=(0, 2, 3), keepdims=True)
    var = jnp.mean((conv - mean) ** 2, axis=(0, 2, 3), keepdims=True)
    out = (conv - mean) * jax.lax.rsqrt(var + BN_EPS)
    out = out * gamma.reshape(1, -1, 1, 1) + beta.reshape(1, -1, 1, 1)
    out = out + x
    out = out + b1.reshape(1, -1, 1, 1)
    al = alpha.reshape(1, -1, 1, 1)
    out = jnp.where(out >= 0.0, out, al * out)
    out = out + b2.reshape(1, -1, 1, 1)
    return out


if __name__ == "__main__":
    key = jax.random.PRNGKey(0)
    N, C, H, W = 2, 16, 16, 16          # inplanes == planes, stride == 1
    planes = C
    ks = jax.random.split(key, 7)

    x = jax.random.normal(ks[0], (N, C, H, W), jnp.float32)
    w = 0.1 * jax.random.normal(ks[1], (planes, C, 3, 3), jnp.float32)
    b0 = 0.1 * jax.random.normal(ks[2], (C,), jnp.float32)          # move0.bias
    gamma = 1.0 + 0.1 * jax.random.normal(ks[3], (planes,), jnp.float32)
    beta = 0.1 * jax.random.normal(ks[4], (planes,), jnp.float32)
    b1 = 0.1 * jax.random.normal(ks[5], (planes,), jnp.float32)     # move1.bias
    alpha = jnp.full((planes,), 0.25, jnp.float32)                  # PReLU default
    b2 = 0.1 * jax.random.normal(ks[6], (planes,), jnp.float32)     # move2.bias

    out = basic_block(x, w, b0, gamma, beta, b1, alpha, b2)
    out = jax.block_until_ready(out)
    assert out.shape == (N, planes, H, W)

    # Tight check against a reference that uses the same bf16-rounded conv
    # weights the kernel feeds the MXU (binarized activations are exact in
    # bf16; only weight rounding differs from full f32).
    w_bf = w.astype(jnp.bfloat16).astype(jnp.float32)
    ref_bf = reference(x, w_bf, b0, gamma, beta, b1, alpha, b2)
    err_bf = float(jnp.max(jnp.abs(out - ref_bf)))
    assert jnp.allclose(out, ref_bf, atol=1e-4, rtol=1e-4), err_bf

    # Loose sanity check against the exact f32-weight module forward
    # (bounds the bf16 weight-rounding effect).
    ref = reference(x, w, b0, gamma, beta, b1, alpha, b2)
    err = float(jnp.max(jnp.abs(out - ref)))
    assert jnp.allclose(out, ref, atol=5e-2, rtol=5e-2), err

    print("KERNEL_OK")
</pallas_src>

<mosaic_0001>
module attributes {stable_mosaic.version = 11 : i64} {
  func.func @fused_block_kernel(%arg0: i32, %arg1: memref<2x16x16x16xf32, #tpu.memory_space<vmem>>, %arg2: memref<144x16xbf16, #tpu.memory_space<vmem>>, %arg3: memref<1x16xf32, #tpu.memory_space<vmem>>, %arg4: memref<1x16xf32, #tpu.memory_space<vmem>>, %arg5: memref<1x16xf32, #tpu.memory_space<vmem>>, %arg6: memref<1x16xf32, #tpu.memory_space<vmem>>, %arg7: memref<1x16xf32, #tpu.memory_space<vmem>>, %arg8: memref<512x16xf32, #tpu.memory_space<vmem>>, %arg9: memref<36x18x16xbf16, #tpu.memory_space<vmem>>, %arg10: memref<32x16x144xbf16, #tpu.memory_space<vmem>>) attributes {dimension_semantics = [#tpu.dimension_semantics<arbitrary>], iteration_bounds = array<i64: 1>, scalar_prefetch = 0 : i64, scratch_operands = 2 : i64, tpu.core_type = #tpu.core_type<tc>, window_params = [{pipeline_mode = #tpu.pipeline_mode<synchronous>, transform_indices = @transform_0, window_bounds = array<i64: 2, 16, 16, 16>}, {pipeline_mode = #tpu.pipeline_mode<synchronous>, transform_indices = @transform_1, window_bounds = array<i64: 144, 16>}, {pipeline_mode = #tpu.pipeline_mode<synchronous>, transform_indices = @transform_2, window_bounds = array<i64: 1, 16>}, {pipeline_mode = #tpu.pipeline_mode<synchronous>, transform_indices = @transform_3, window_bounds = array<i64: 1, 16>}, {pipeline_mode = #tpu.pipeline_mode<synchronous>, transform_indices = @transform_4, window_bounds = array<i64: 1, 16>}, {pipeline_mode = #tpu.pipeline_mode<synchronous>, transform_indices = @transform_5, window_bounds = array<i64: 1, 16>}, {pipeline_mode = #tpu.pipeline_mode<synchronous>, transform_indices = @transform_6, window_bounds = array<i64: 1, 16>}, {pipeline_mode = #tpu.pipeline_mode<synchronous>, transform_indices = @transform_7, window_bounds = array<i64: 512, 16>}]} {
    %cst = arith.constant 0.000000e+00 : bf16
    %0 = vector.broadcast %cst : bf16 to vector<36x18x16xbf16>
    %c0 = arith.constant 0 : index
    %c0_0 = arith.constant 0 : index
    %c0_1 = arith.constant 0 : index
    %1 = vector.load %arg9[%c0, %c0_0, %c0_1] : memref<36x18x16xbf16, #tpu.memory_space<vmem>>, vector<36x18x16xbf16>
    tpu.vector_store %arg9[%c0, %c0_0, %c0_1], %0 {strides = array<i32>} : memref<36x18x16xbf16, #tpu.memory_space<vmem>>, vector<36x18x16xbf16>,
    %c0_2 = arith.constant 0 : index
    %c0_3 = arith.constant 0 : index
    %c0_4 = arith.constant 0 : index
    %c0_5 = arith.constant 0 : index
    %2 = vector.load %arg1[%c0_2, %c0_3, %c0_4, %c0_5] : memref<2x16x16x16xf32, #tpu.memory_space<vmem>>, vector<1x16x16x16xf32>
    %3 = vector.shape_cast %2 : vector<1x16x16x16xf32> to vector<16x16x16xf32>
    %c0_6 = arith.constant 0 : index
    %c0_7 = arith.constant 0 : index
    %4 = vector.load %arg3[%c0_6, %c0_7] : memref<1x16xf32, #tpu.memory_space<vmem>>, vector<1x16xf32>
    %5 = vector.shape_cast %4 : vector<1x16xf32> to vector<1x1x16xf32>
    %6 = vector.broadcast %5 : vector<1x1x16xf32> to vector<16x16x16xf32>
    %7 = arith.addf %3, %6 : vector<16x16x16xf32>
    %cst_8 = arith.constant 0.000000e+00 : f32
    %8 = vector.broadcast %cst_8 : f32 to vector<16x16x16xf32>
    %9 = arith.cmpf ogt, %7, %8 : vector<16x16x16xf32>
    %cst_9 = arith.constant 0.000000e+00 : f32
    %10 = vector.broadcast %cst_9 : f32 to vector<16x16x16xf32>
    %11 = arith.cmpf olt, %7, %10 : vector<16x16x16xf32>
    %cst_10 = arith.constant -1.000000e+00 : f32
    %cst_11 = arith.constant 0.000000e+00 : f32
    %12 = vector.broadcast %cst_10 : f32 to vector<16x16x16xf32>
    %13 = vector.broadcast %cst_11 : f32 to vector<16x16x16xf32>
    %14 = arith.select %11, %12, %13 : vector<16x16x16xi1>, vector<16x16x16xf32>
    %cst_12 = arith.constant 1.000000e+00 : f32
    %15 = vector.broadcast %cst_12 : f32 to vector<16x16x16xf32>
    %16 = arith.select %9, %15, %14 : vector<16x16x16xi1>, vector<16x16x16xf32>
    %17 = arith.truncf %16 : vector<16x16x16xf32> to vector<16x16x16xbf16>
    %c1 = arith.constant 1 : index
    %c1_13 = arith.constant 1 : index
    %c0_14 = arith.constant 0 : index
    %18 = vector.load %arg9[%c1, %c1_13, %c0_14] : memref<36x18x16xbf16, #tpu.memory_space<vmem>>, vector<16x16x16xbf16>
    tpu.vector_store %arg9[%c1, %c1_13, %c0_14], %17 {strides = array<i32>} : memref<36x18x16xbf16, #tpu.memory_space<vmem>>, vector<16x16x16xbf16>,
    %c1_15 = arith.constant 1 : index
    %c0_16 = arith.constant 0 : index
    %c0_17 = arith.constant 0 : index
    %c0_18 = arith.constant 0 : index
    %19 = vector.load %arg1[%c1_15, %c0_16, %c0_17, %c0_18] : memref<2x16x16x16xf32, #tpu.memory_space<vmem>>, vector<1x16x16x16xf32>
    %20 = vector.shape_cast %19 : vector<1x16x16x16xf32> to vector<16x16x16xf32>
    %c0_19 = arith.constant 0 : index
    %c0_20 = arith.constant 0 : index
    %21 = vector.load %arg3[%c0_19, %c0_20] : memref<1x16xf32, #tpu.memory_space<vmem>>, vector<1x16xf32>
    %22 = vector.shape_cast %21 : vector<1x16xf32> to vector<1x1x16xf32>
    %23 = vector.broadcast %22 : vector<1x1x16xf32> to vector<16x16x16xf32>
    %24 = arith.addf %20, %23 : vector<16x16x16xf32>
    %cst_21 = arith.constant 0.000000e+00 : f32
    %25 = vector.broadcast %cst_21 : f32 to vector<16x16x16xf32>
    %26 = arith.cmpf ogt, %24, %25 : vector<16x16x16xf32>
    %cst_22 = arith.constant 0.000000e+00 : f32
    %27 = vector.broadcast %cst_22 : f32 to vector<16x16x16xf32>
    %28 = arith.cmpf olt, %24, %27 : vector<16x16x16xf32>
    %cst_23 = arith.constant -1.000000e+00 : f32
    %cst_24 = arith.constant 0.000000e+00 : f32
    %29 = vector.broadcast %cst_23 : f32 to vector<16x16x16xf32>
    %30 = vector.broadcast %cst_24 : f32 to vector<16x16x16xf32>
    %31 = arith.select %28, %29, %30 : vector<16x16x16xi1>, vector<16x16x16xf32>
    %cst_25 = arith.constant 1.000000e+00 : f32
    %32 = vector.broadcast %cst_25 : f32 to vector<16x16x16xf32>
    %33 = arith.select %26, %32, %31 : vector<16x16x16xi1>, vector<16x16x16xf32>
    %34 = arith.truncf %33 : vector<16x16x16xf32> to vector<16x16x16xbf16>
    %c19 = arith.constant 19 : index
    %c1_26 = arith.constant 1 : index
    %c0_27 = arith.constant 0 : index
    %35 = vector.load %arg9[%c19, %c1_26, %c0_27] : memref<36x18x16xbf16, #tpu.memory_space<vmem>>, vector<16x16x16xbf16>
    tpu.vector_store %arg9[%c19, %c1_26, %c0_27], %34 {strides = array<i32>} : memref<36x18x16xbf16, #tpu.memory_space<vmem>>, vector<16x16x16xbf16>,
    %c0_28 = arith.constant 0 : index
    %c0_29 = arith.constant 0 : index
    %c0_30 = arith.constant 0 : index
    %36 = vector.load %arg9[%c0_28, %c0_29, %c0_30] : memref<36x18x16xbf16, #tpu.memory_space<vmem>>, vector<16x16x16xbf16>
    %c0_31 = arith.constant 0 : index
    %c0_32 = arith.constant 0 : index
    %c0_33 = arith.constant 0 : index
    %37 = vector.load %arg10[%c0_31, %c0_32, %c0_33] : memref<32x16x144xbf16, #tpu.memory_space<vmem>>, vector<16x16x16xbf16>
    tpu.vector_store %arg10[%c0_31, %c0_32, %c0_33], %36 {strides = array<i32>} : memref<32x16x144xbf16, #tpu.memory_space<vmem>>, vector<16x16x16xbf16>,
    %c0_34 = arith.constant 0 : index
    %c1_35 = arith.constant 1 : index
    %c0_36 = arith.constant 0 : index
    %38 = vector.load %arg9[%c0_34, %c1_35, %c0_36] : memref<36x18x16xbf16, #tpu.memory_space<vmem>>, vector<16x16x16xbf16>
    %c0_37 = arith.constant 0 : index
    %c0_38 = arith.constant 0 : index
    %c16 = arith.constant 16 : index
    %39 = vector.load %arg10[%c0_37, %c0_38, %c16] : memref<32x16x144xbf16, #tpu.memory_space<vmem>>, vector<16x16x16xbf16>
    tpu.vector_store %arg10[%c0_37, %c0_38, %c16], %38 {strides = array<i32>} : memref<32x16x144xbf16, #tpu.memory_space<vmem>>, vector<16x16x16xbf16>,
    %c0_39 = arith.constant 0 : index
    %c2 = arith.constant 2 : index
    %c0_40 = arith.constant 0 : index
    %40 = vector.load %arg9[%c0_39, %c2, %c0_40] : memref<36x18x16xbf16, #tpu.memory_space<vmem>>, vector<16x16x16xbf16>
    %c0_41 = arith.constant 0 : index
    %c0_42 = arith.constant 0 : index
    %c32 = arith.constant 32 : index
    %41 = vector.load %arg10[%c0_41, %c0_42, %c32] : memref<32x16x144xbf16, #tpu.memory_space<vmem>>, vector<16x16x16xbf16>
    tpu.vector_store %arg10[%c0_41, %c0_42, %c32], %40 {strides = array<i32>} : memref<32x16x144xbf16, #tpu.memory_space<vmem>>, vector<16x16x16xbf16>,
    %c1_43 = arith.constant 1 : index
    %c0_44 = arith.constant 0 : index
    %c0_45 = arith.constant 0 : index
    %42 = vector.load %arg9[%c1_43, %c0_44, %c0_45] : memref<36x18x16xbf16, #tpu.memory_space<vmem>>, vector<16x16x16xbf16>
    %c0_46 = arith.constant 0 : index
    %c0_47 = arith.constant 0 : index
    %c48 = arith.constant 48 : index
    %43 = vector.load %arg10[%c0_46, %c0_47, %c48] : memref<32x16x144xbf16, #tpu.memory_space<vmem>>, vector<16x16x16xbf16>
    tpu.vector_store %arg10[%c0_46, %c0_47, %c48], %42 {strides = array<i32>} : memref<32x16x144xbf16, #tpu.memory_space<vmem>>, vector<16x16x16xbf16>,
    %c1_48 = arith.constant 1 : index
    %c1_49 = arith.constant 1 : index
    %c0_50 = arith.constant 0 : index
    %44 = vector.load %arg9[%c1_48, %c1_49, %c0_50] : memref<36x18x16xbf16, #tpu.memory_space<vmem>>, vector<16x16x16xbf16>
    %c0_51 = arith.constant 0 : index
    %c0_52 = arith.constant 0 : index
    %c64 = arith.constant 64 : index
    %45 = vector.load %arg10[%c0_51, %c0_52, %c64] : memref<32x16x144xbf16, #tpu.memory_space<vmem>>, vector<16x16x16xbf16>
    tpu.vector_store %arg10[%c0_51, %c0_52, %c64], %44 {strides = array<i32>} : memref<32x16x144xbf16, #tpu.memory_space<vmem>>, vector<16x16x16xbf16>,
    %c1_53 = arith.constant 1 : index
    %c2_54 = arith.constant 2 : index
    %c0_55 = arith.constant 0 : index
    %46 = vector.load %arg9[%c1_53, %c2_54, %c0_55] : memref<36x18x16xbf16, #tpu.memory_space<vmem>>, vector<16x16x16xbf16>
    %c0_56 = arith.constant 0 : index
    %c0_57 = arith.constant 0 : index
    %c80 = arith.constant 80 : index
    %47 = vector.load %arg10[%c0_56, %c0_57, %c80] : memref<32x16x144xbf16, #tpu.memory_space<vmem>>, vector<16x16x16xbf16>
    tpu.vector_store %arg10[%c0_56, %c0_57, %c80], %46 {strides = array<i32>} : memref<32x16x144xbf16, #tpu.memory_space<vmem>>, vector<16x16x16xbf16>,
    %c2_58 = arith.constant 2 : index
    %c0_59 = arith.constant 0 : index
    %c0_60 = arith.constant 0 : index
    %48 = vector.load %arg9[%c2_58, %c0_59, %c0_60] : memref<36x18x16xbf16, #tpu.memory_space<vmem>>, vector<16x16x16xbf16>
    %c0_61 = arith.constant 0 : index
    %c0_62 = arith.constant 0 : index
    %c96 = arith.constant 96 : index
    %49 = vector.load %arg10[%c0_61, %c0_62, %c96] : memref<32x16x144xbf16, #tpu.memory_space<vmem>>, vector<16x16x16xbf16>
    tpu.vector_store %arg10[%c0_61, %c0_62, %c96], %48 {strides = array<i32>} : memref<32x16x144xbf16, #tpu.memory_space<vmem>>, vector<16x16x16xbf16>,
    %c2_63 = arith.constant 2 : index
    %c1_64 = arith.constant 1 : index
    %c0_65 = arith.constant 0 : index
    %50 = vector.load %arg9[%c2_63, %c1_64, %c0_65] : memref<36x18x16xbf16, #tpu.memory_space<vmem>>, vector<16x16x16xbf16>
    %c0_66 = arith.constant 0 : index
    %c0_67 = arith.constant 0 : index
    %c112 = arith.constant 112 : index
    %51 = vector.load %arg10[%c0_66, %c0_67, %c112] : memref<32x16x144xbf16, #tpu.memory_space<vmem>>, vector<16x16x16xbf16>
    tpu.vector_store %arg10[%c0_66, %c0_67, %c112], %50 {strides = array<i32>} : memref<32x16x144xbf16, #tpu.memory_space<vmem>>, vector<16x16x16xbf16>,
    %c2_68 = arith.constant 2 : index
    %c2_69 = arith.constant 2 : index
    %c0_70 = arith.constant 0 : index
    %52 = vector.load %arg9[%c2_68, %c2_69, %c0_70] : memref<36x18x16xbf16, #tpu.memory_space<vmem>>, vector<16x16x16xbf16>
    %c0_71 = arith.constant 0 : index
    %c0_72 = arith.constant 0 : index
    %c128 = arith.constant 128 : index
    %53 = vector.load %arg10[%c0_71, %c0_72, %c128] : memref<32x16x144xbf16, #tpu.memory_space<vmem>>, vector<16x16x16xbf16>
    tpu.vector_store %arg10[%c0_71, %c0_72, %c128], %52 {strides = array<i32>} : memref<32x16x144xbf16, #tpu.memory_space<vmem>>, vector<16x16x16xbf16>,
    %c18 = arith.constant 18 : index
    %c0_73 = arith.constant 0 : index
    %c0_74 = arith.constant 0 : index
    %54 = vector.load %arg9[%c18, %c0_73, %c0_74] : memref<36x18x16xbf16, #tpu.memory_space<vmem>>, vector<16x16x16xbf16>
    %c16_75 = arith.constant 16 : index
    %c0_76 = arith.constant 0 : index
    %c0_77 = arith.constant 0 : index
    %55 = vector.load %arg10[%c16_75, %c0_76, %c0_77] : memref<32x16x144xbf16, #tpu.memory_space<vmem>>, vector<16x16x16xbf16>
    tpu.vector_store %arg10[%c16_75, %c0_76, %c0_77], %54 {strides = array<i32>} : memref<32x16x144xbf16, #tpu.memory_space<vmem>>, vector<16x16x16xbf16>,
    %c18_78 = arith.constant 18 : index
    %c1_79 = arith.constant 1 : index
    %c0_80 = arith.constant 0 : index
    %56 = vector.load %arg9[%c18_78, %c1_79, %c0_80] : memref<36x18x16xbf16, #tpu.memory_space<vmem>>, vector<16x16x16xbf16>
    %c16_81 = arith.constant 16 : index
    %c0_82 = arith.constant 0 : index
    %c16_83 = arith.constant 16 : index
    %57 = vector.load %arg10[%c16_81, %c0_82, %c16_83] : memref<32x16x144xbf16, #tpu.memory_space<vmem>>, vector<16x16x16xbf16>
    tpu.vector_store %arg10[%c16_81, %c0_82, %c16_83], %56 {strides = array<i32>} : memref<32x16x144xbf16, #tpu.memory_space<vmem>>, vector<16x16x16xbf16>,
    %c18_84 = arith.constant 18 : index
    %c2_85 = arith.constant 2 : index
    %c0_86 = arith.constant 0 : index
    %58 = vector.load %arg9[%c18_84, %c2_85, %c0_86] : memref<36x18x16xbf16, #tpu.memory_space<vmem>>, vector<16x16x16xbf16>
    %c16_87 = arith.constant 16 : index
    %c0_88 = arith.constant 0 : index
    %c32_89 = arith.constant 32 : index
    %59 = vector.load %arg10[%c16_87, %c0_88, %c32_89] : memref<32x16x144xbf16, #tpu.memory_space<vmem>>, vector<16x16x16xbf16>
    tpu.vector_store %arg10[%c16_87, %c0_88, %c32_89], %58 {strides = array<i32>} : memref<32x16x144xbf16, #tpu.memory_space<vmem>>, vector<16x16x16xbf16>,
    %c19_90 = arith.constant 19 : index
    %c0_91 = arith.constant 0 : index
    %c0_92 = arith.constant 0 : index
    %60 = vector.load %arg9[%c19_90, %c0_91, %c0_92] : memref<36x18x16xbf16, #tpu.memory_space<vmem>>, vector<16x16x16xbf16>
    %c16_93 = arith.constant 16 : index
    %c0_94 = arith.constant 0 : index
    %c48_95 = arith.constant 48 : index
    %61 = vector.load %arg10[%c16_93, %c0_94, %c48_95] : memref<32x16x144xbf16, #tpu.memory_space<vmem>>, vector<16x16x16xbf16>
    tpu.vector_store %arg10[%c16_93, %c0_94, %c48_95], %60 {strides = array<i32>} : memref<32x16x144xbf16, #tpu.memory_space<vmem>>, vector<16x16x16xbf16>,
    %c19_96 = arith.constant 19 : index
    %c1_97 = arith.constant 1 : index
    %c0_98 = arith.constant 0 : index
    %62 = vector.load %arg9[%c19_96, %c1_97, %c0_98] : memref<36x18x16xbf16, #tpu.memory_space<vmem>>, vector<16x16x16xbf16>
    %c16_99 = arith.constant 16 : index
    %c0_100 = arith.constant 0 : index
    %c64_101 = arith.constant 64 : index
    %63 = vector.load %arg10[%c16_99, %c0_100, %c64_101] : memref<32x16x144xbf16, #tpu.memory_space<vmem>>, vector<16x16x16xbf16>
    tpu.vector_store %arg10[%c16_99, %c0_100, %c64_101], %62 {strides = array<i32>} : memref<32x16x144xbf16, #tpu.memory_space<vmem>>, vector<16x16x16xbf16>,
    %c19_102 = arith.constant 19 : index
    %c2_103 = arith.constant 2 : index
    %c0_104 = arith.constant 0 : index
    %64 = vector.load %arg9[%c19_102, %c2_103, %c0_104] : memref<36x18x16xbf16, #tpu.memory_space<vmem>>, vector<16x16x16xbf16>
    %c16_105 = arith.constant 16 : index
    %c0_106 = arith.constant 0 : index
    %c80_107 = arith.constant 80 : index
    %65 = vector.load %arg10[%c16_105, %c0_106, %c80_107] : memref<32x16x144xbf16, #tpu.memory_space<vmem>>, vector<16x16x16xbf16>
    tpu.vector_store %arg10[%c16_105, %c0_106, %c80_107], %64 {strides = array<i32>} : memref<32x16x144xbf16, #tpu.memory_space<vmem>>, vector<16x16x16xbf16>,
    %c20 = arith.constant 20 : index
    %c0_108 = arith.constant 0 : index
    %c0_109 = arith.constant 0 : index
    %66 = vector.load %arg9[%c20, %c0_108, %c0_109] : memref<36x18x16xbf16, #tpu.memory_space<vmem>>, vector<16x16x16xbf16>
    %c16_110 = arith.constant 16 : index
    %c0_111 = arith.constant 0 : index
    %c96_112 = arith.constant 96 : index
    %67 = vector.load %arg10[%c16_110, %c0_111, %c96_112] : memref<32x16x144xbf16, #tpu.memory_space<vmem>>, vector<16x16x16xbf16>
    tpu.vector_store %arg10[%c16_110, %c0_111, %c96_112], %66 {strides = array<i32>} : memref<32x16x144xbf16, #tpu.memory_space<vmem>>, vector<16x16x16xbf16>,
    %c20_113 = arith.constant 20 : index
    %c1_114 = arith.constant 1 : index
    %c0_115 = arith.constant 0 : index
    %68 = vector.load %arg9[%c20_113, %c1_114, %c0_115] : memref<36x18x16xbf16, #tpu.memory_space<vmem>>, vector<16x16x16xbf16>
    %c16_116 = arith.constant 16 : index
    %c0_117 = arith.constant 0 : index
    %c112_118 = arith.constant 112 : index
    %69 = vector.load %arg10[%c16_116, %c0_117, %c112_118] : memref<32x16x144xbf16, #tpu.memory_space<vmem>>, vector<16x16x16xbf16>
    tpu.vector_store %arg10[%c16_116, %c0_117, %c112_118], %68 {strides = array<i32>} : memref<32x16x144xbf16, #tpu.memory_space<vmem>>, vector<16x16x16xbf16>,
    %c20_119 = arith.constant 20 : index
    %c2_120 = arith.constant 2 : index
    %c0_121 = arith.constant 0 : index
    %70 = vector.load %arg9[%c20_119, %c2_120, %c0_121] : memref<36x18x16xbf16, #tpu.memory_space<vmem>>, vector<16x16x16xbf16>
    %c16_122 = arith.constant 16 : index
    %c0_123 = arith.constant 0 : index
    %c128_124 = arith.constant 128 : index
    %71 = vector.load %arg10[%c16_122, %c0_123, %c128_124] : memref<32x16x144xbf16, #tpu.memory_space<vmem>>, vector<16x16x16xbf16>
    tpu.vector_store %arg10[%c16_122, %c0_123, %c128_124], %70 {strides = array<i32>} : memref<32x16x144xbf16, #tpu.memory_space<vmem>>, vector<16x16x16xbf16>,
    %c0_125 = arith.constant 0 : index
    %c0_126 = arith.constant 0 : index
    %c0_127 = arith.constant 0 : index
    %72 = vector.load %arg10[%c0_125, %c0_126, %c0_127] : memref<32x16x144xbf16, #tpu.memory_space<vmem>>, vector<32x16x144xbf16>
    %73 = vector.shape_cast %72 : vector<32x16x144xbf16> to vector<512x144xbf16>
    %c0_128 = arith.constant 0 : index
    %c0_129 = arith.constant 0 : index
    %74 = vector.load %arg2[%c0_128, %c0_129] : memref<144x16xbf16, #tpu.memory_space<vmem>>, vector<144x16xbf16>
    %cst_130 = arith.constant dense<0.000000e+00> : vector<512x16xf32>
    %75 = tpu.matmul %73, %74, %cst_130 {dimension_numbers = #tpu.dot_dimension_numbers<[1], [0], [0], [1], [0, 0, 1, 1], [], []>} : vector<512x144xbf16>, vector<144x16xbf16>, vector<512x16xf32> -> vector<512x16xf32>
    %cst_131 = arith.constant dense<0.000000e+00> : vector<16xf32>
    %76 = vector.multi_reduction <add>, %75, %cst_131 [0] : vector<512x16xf32> to vector<16xf32>
    %77 = vector.shape_cast %76 : vector<16xf32> to vector<1x16xf32>
    %cst_132 = arith.constant 0.001953125 : f32
    %78 = vector.broadcast %cst_132 : f32 to vector<1x16xf32>
    %79 = arith.mulf %77, %78 : vector<1x16xf32>
    %80 = arith.mulf %75, %75 : vector<512x16xf32>
    %cst_133 = arith.constant dense<0.000000e+00> : vector<16xf32>
    %81 = vector.multi_reduction <add>, %80, %cst_133 [0] : vector<512x16xf32> to vector<16xf32>
    %82 = vector.shape_cast %81 : vector<16xf32> to vector<1x16xf32>
    %cst_134 = arith.constant 0.001953125 : f32
    %83 = vector.broadcast %cst_134 : f32 to vector<1x16xf32>
    %84 = arith.mulf %82, %83 : vector<1x16xf32>
    %85 = arith.mulf %79, %79 : vector<1x16xf32>
    %86 = arith.subf %84, %85 : vector<1x16xf32>
    %cst_135 = arith.constant 9.99999974E-6 : f32
    %87 = vector.broadcast %cst_135 : f32 to vector<1x16xf32>
    %88 = arith.addf %86, %87 : vector<1x16xf32>
    %89 = math.rsqrt %88 : vector<1x16xf32>
    %c0_136 = arith.constant 0 : index
    %c0_137 = arith.constant 0 : index
    %90 = vector.load %arg4[%c0_136, %c0_137] : memref<1x16xf32, #tpu.memory_space<vmem>>, vector<1x16xf32>
    %91 = arith.mulf %90, %89 : vector<1x16xf32>
    %c0_138 = arith.constant 0 : index
    %c0_139 = arith.constant 0 : index
    %92 = vector.load %arg5[%c0_138, %c0_139] : memref<1x16xf32, #tpu.memory_space<vmem>>, vector<1x16xf32>
    %93 = arith.mulf %79, %91 : vector<1x16xf32>
    %94 = arith.subf %92, %93 : vector<1x16xf32>
    %95 = vector.broadcast %91 : vector<1x16xf32> to vector<512x16xf32>
    %96 = arith.mulf %75, %95 : vector<512x16xf32>
    %97 = vector.broadcast %94 : vector<1x16xf32> to vector<512x16xf32>
    %98 = arith.addf %96, %97 : vector<512x16xf32>
    %c0_140 = arith.constant 0 : index
    %c0_141 = arith.constant 0 : index
    %c0_142 = arith.constant 0 : index
    %c0_143 = arith.constant 0 : index
    %99 = vector.load %arg1[%c0_140, %c0_141, %c0_142, %c0_143] : memref<2x16x16x16xf32, #tpu.memory_space<vmem>>, vector<2x16x16x16xf32>
    %100 = vector.shape_cast %99 : vector<2x16x16x16xf32> to vector<512x16xf32>
    %101 = arith.addf %98, %100 : vector<512x16xf32>
    %cst_144 = arith.constant 0.000000e+00 : f32
    %102 = vector.broadcast %cst_144 : f32 to vector<512x16xf32>
    %103 = arith.cmpf oge, %101, %102 : vector<512x16xf32>
    %c0_145 = arith.constant 0 : index
    %c0_146 = arith.constant 0 : index
    %104 = vector.load %arg6[%c0_145, %c0_146] : memref<1x16xf32, #tpu.memory_space<vmem>>, vector<1x16xf32>
    %105 = vector.broadcast %104 : vector<1x16xf32> to vector<512x16xf32>
    %106 = arith.mulf %105, %101 : vector<512x16xf32>
    %107 = arith.select %103, %101, %106 : vector<512x16xi1>, vector<512x16xf32>
    %c0_147 = arith.constant 0 : index
    %c0_148 = arith.constant 0 : index
    %108 = vector.load %arg7[%c0_147, %c0_148] : memref<1x16xf32, #tpu.memory_space<vmem>>, vector<1x16xf32>
    %109 = vector.broadcast %108 : vector<1x16xf32> to vector<512x16xf32>
    %110 = arith.addf %107, %109 : vector<512x16xf32>
    %c0_149 = arith.constant 0 : index
    %c0_150 = arith.constant 0 : index
    %111 = vector.load %arg8[%c0_149, %c0_150] : memref<512x16xf32, #tpu.memory_space<vmem>>, vector<512x16xf32>
    tpu.vector_store %arg8[%c0_149, %c0_150], %110 {strides = array<i32>} : memref<512x16xf32, #tpu.memory_space<vmem>>, vector<512x16xf32>,
    return
  }
  func.func @transform_0(%arg0: i32) -> (i32, i32, i32, i32) {
    %c0_i32 = arith.constant 0 : i32
    %c0_i32_0 = arith.constant 0 : i32
    %c0_i32_1 = arith.constant 0 : i32
    %c0_i32_2 = arith.constant 0 : i32
    %c0_i32_3 = arith.constant 0 : i32
    return %c0_i32, %c0_i32_0, %c0_i32_1, %c0_i32_2 : i32, i32, i32, i32
  }
  func.func @transform_1(%arg0: i32) -> (i32, i32) {
    %c0_i32 = arith.constant 0 : i32
    %c0_i32_0 = arith.constant 0 : i32
    %c0_i32_1 = arith.constant 0 : i32
    return %c0_i32, %c0_i32_0 : i32, i32
  }
  func.func @transform_2(%arg0: i32) -> (i32, i32) {
    %c0_i32 = arith.constant 0 : i32
    %c0_i32_0 = arith.constant 0 : i32
    %c0_i32_1 = arith.constant 0 : i32
    return %c0_i32, %c0_i32_0 : i32, i32
  }
  func.func @transform_3(%arg0: i32) -> (i32, i32) {
    %c0_i32 = arith.constant 0 : i32
    %c0_i32_0 = arith.constant 0 : i32
    %c0_i32_1 = arith.constant 0 : i32
    return %c0_i32, %c0_i32_0 : i32, i32
  }
  func.func @transform_4(%arg0: i32) -> (i32, i32) {
    %c0_i32 = arith.constant 0 : i32
    %c0_i32_0 = arith.constant 0 : i32
    %c0_i32_1 = arith.constant 0 : i32
    return %c0_i32, %c0_i32_0 : i32, i32
  }
  func.func @transform_5(%arg0: i32) -> (i32, i32) {
    %c0_i32 = arith.constant 0 : i32
    %c0_i32_0 = arith.constant 0 : i32
    %c0_i32_1 = arith.constant 0 : i32
    return %c0_i32, %c0_i32_0 : i32, i32
  }
  func.func @transform_6(%arg0: i32) -> (i32, i32) {
    %c0_i32 = arith.constant 0 : i32
    %c0_i32_0 = arith.constant 0 : i32
    %c0_i32_1 = arith.constant 0 : i32
    return %c0_i32, %c0_i32_0 : i32, i32
  }
  func.func @transform_7(%arg0: i32) -> (i32, i32) {
    %c0_i32 = arith.constant 0 : i32
    %c0_i32_0 = arith.constant 0 : i32
    %c0_i32_1 = arith.constant 0 : i32
    return %c0_i32, %c0_i32_0 : i32, i32
  }
}

</mosaic_0001>

<bundles_post_ra>
// kernel: basic_block.1
= control target key start
LH: loop header
LB: loop body
LE: loop exit
PB: predicated region body
PF: predicated region fallthrough
CT: control target
= control target key end

     0   :  { %vm27_vm0 = vcmask 125952   ;;  %vm30_vm1 = vcmask 122880   ;;  %v9544_v0 = vmov 0   ;;  %vm2357_vm2 = vcmask 1046528   ;;  %s9546_s15 = smov 32   ;;  %s9547_s20 = smov 16   ;;  %s14435_s0 = inlined_call_operand.vmem [shape: f32[2,16,16,16], index: 0, kind: input, shape index: {}]   ;;  %s14436_s2 = inlined_call_operand.vmem [shape: f32[1,16], index: 2, kind: input, shape index: {}]   ;;  %s14437_s1 = inlined_call_operand.vmem [shape: bf16[144,16], index: 1, kind: input, shape index: {}]   ;;  %s14438_s3 = inlined_call_operand.vmem [shape: f32[1,16], index: 3, kind: input, shape index: {}]   ;;  %s14439_s4 = inlined_call_operand.vmem [shape: f32[1,16], index: 4, kind: input, shape index: {}]   ;;  %s14440_s5 = inlined_call_operand.vmem [shape: f32[1,16], index: 5, kind: input, shape index: {}]   ;;  %s14441_s6 = inlined_call_operand.vmem [shape: f32[1,16], index: 6, kind: input, shape index: {}]   ;;  %s14442_s7 = inlined_call_operand.vmem [shape: f32[512,16], index: 7, kind: output, shape index: {}]  }
   0x1   :  { %28 = vst.msk [vmem:[#allocation2] sm:$0xf] %vm27_vm0, %v9544_v0  ;;  %29 = vst.msk [vmem:[#allocation2 + $0x4] sm:$0xf] %vm27_vm0, %v9544_v0  ;;  %v141_v1 = vld [vmem:[%s14435_s0 + $0x20] sm:$0xff]  ;;  %v142_v2 = vld [vmem:[%s14435_s0 + $0x28] sm:$0xff]  ;;  %7096 = vmatprep.subr.bf16.mxu0 %v9544_v0  ;;  %9017 = vmatprep.subr.bf16.mxu1 %v9544_v0 }
   0x2   :  { %31 = vst.msk [vmem:[#allocation2 + $0x8] sm:$0x1] %vm30_vm1, %v9544_v0  ;;  %34 = vst.msk [vmem:[#allocation2 + $0x14] sm:$0x1] %vm30_vm1, %v9544_v0  ;;  %v9818_v3 = vld [vmem:[%s14436_s2] ss:$0 sm:$0xff] }
   0x3   :  { %32 = vst.msk [vmem:[#allocation2 + $0xc] sm:$0xf] %vm27_vm0, %v9544_v0  ;;  %33 = vst.msk [vmem:[#allocation2 + $0x10] sm:$0xf] %vm27_vm0, %v9544_v0  ;;  %v180_v4 = vadd.f32 %v9818_v3, %v141_v1  ;;  %v181_v5 = vadd.f32 %v9818_v3, %v142_v2  ;;  %v137_v6 = vld [vmem:[%s14435_s0] sm:$0xff]  ;;  %v138_v7 = vld [vmem:[%s14435_s0 + $0x8] sm:$0xff] }
   0x4   :  { %35 = vst.msk [vmem:[#allocation2 + $0x18] sm:$0xf] %vm27_vm0, %v9544_v0  ;;  %36 = vst.msk [vmem:[#allocation2 + $0x1c] sm:$0xf] %vm27_vm0, %v9544_v0  ;;  %vm432_vm3 = vsmask.f32 256  ;;  %v176_v8 = vadd.f32 %v9818_v3, %v137_v6  ;;  %v177_v9 = vadd.f32 %v9818_v3, %v138_v7 }
   0x5   :  { %37 = vst.msk [vmem:[#allocation2 + $0x20] sm:$0x1] %vm30_vm1, %v9544_v0  ;;  %40 = vst.msk [vmem:[#allocation2 + $0x2c] sm:$0x1] %vm30_vm1, %v9544_v0  ;;  %vm212_vm4 = vcmp.gt.f32.partialorder %v180_v4, 0.0  ;;  %vm213_vm5 = vcmp.gt.f32.partialorder %v181_v5, 0.0 }
   0x6   :  { %38 = vst.msk [vmem:[#allocation2 + $0x24] sm:$0xf] %vm27_vm0, %v9544_v0  ;;  %39 = vst.msk [vmem:[#allocation2 + $0x28] sm:$0xf] %vm27_vm0, %v9544_v0  ;;  %vm244_vm6 = vcmp.lt.f32.partialorder %v180_v4, 0.0  ;;  %vm245_vm7 = vcmp.lt.f32.partialorder %v181_v5, 0.0 }
   0x7   :  { %41 = vst.msk [vmem:[#allocation2 + $0x30] sm:$0xf] %vm27_vm0, %v9544_v0  ;;  %42 = vst.msk [vmem:[#allocation2 + $0x34] sm:$0xf] %vm27_vm0, %v9544_v0  ;;  %v9545_v10 = vmov 0.0   ;;  %vm240_vm10 = vcmp.lt.f32.partialorder %v176_v8, 0.0 }
   0x8   :  { %43 = vst.msk [vmem:[#allocation2 + $0x38] sm:$0x1] %vm30_vm1, %v9544_v0  ;;  %46 = vst.msk [vmem:[#allocation2 + $0x44] sm:$0x1] %vm30_vm1, %v9544_v0  ;;  %v276_v11 = vsel %vm244_vm6, -1.0, %v9545_v10  ;;  %v277_v12 = vsel %vm245_vm7, -1.0, %v9545_v10 }
   0x9   :  { %44 = vst.msk [vmem:[#allocation2 + $0x3c] sm:$0xf] %vm27_vm0, %v9544_v0  ;;  %45 = vst.msk [vmem:[#allocation2 + $0x40] sm:$0xf] %vm27_vm0, %v9544_v0  ;;  %vm433_vm8 = vsmask.f32 4368 }
   0xa   :  { %47 = vst.msk [vmem:[#allocation2 + $0x48] sm:$0xf] %vm27_vm0, %v9544_v0  ;;  %48 = vst.msk [vmem:[#allocation2 + $0x4c] sm:$0xf] %vm27_vm0, %v9544_v0  ;;  %vm757_vm9 = vsmask.f32 7938 }
   0xb   :  { %49 = vst.msk [vmem:[#allocation2 + $0x50] sm:$0x1] %vm30_vm1, %v9544_v0  ;;  %52 = vst.msk [vmem:[#allocation2 + $0x5c] sm:$0x1] %vm30_vm1, %v9544_v0  ;;  %v308_v13 = vsel %vm212_vm4, 1.0, %v276_v11  ;;  %v309_v14 = vsel %vm213_vm5, 1.0, %v277_v12 }
   0xc   :  { %50 = vst.msk [vmem:[#allocation2 + $0x54] sm:$0xf] %vm27_vm0, %v9544_v0  ;;  %51 = vst.msk [vmem:[#allocation2 + $0x58] sm:$0xf] %vm27_vm0, %v9544_v0  ;;  %vm241_vm11 = vcmp.lt.f32.partialorder %v177_v9, 0.0  ;;  %vm208_vm13 = vcmp.gt.f32.partialorder %v176_v8, 0.0  ;;  %v8957_v19 = vpack.c.bf16 %v308_v13, %v308_v13  ;;  %v8958_v20 = vpack.c.bf16 %v309_v14, %v309_v14 }
   0xd   :  { %53 = vst.msk [vmem:[#allocation2 + $0x60] sm:$0xf] %vm27_vm0, %v9544_v0  ;;  %54 = vst.msk [vmem:[#allocation2 + $0x64] sm:$0xf] %vm27_vm0, %v9544_v0  ;;  %vm14446_vm12 = vsmask.f32 7424 }
   0xe   :  { %55 = vst.msk [vmem:[#allocation2 + $0x68] sm:$0x1] %vm30_vm1, %v9544_v0  ;;  %58 = vst.msk [vmem:[#allocation2 + $0x74] sm:$0x1] %vm30_vm1, %v9544_v0  ;;  %vm209_vm14 = vcmp.gt.f32.partialorder %v177_v9, 0.0  ;;  %v272_v15 = vsel %vm240_vm10, -1.0, %v9545_v10 }
   0xf   :  { %56 = vst.msk [vmem:[#allocation2 + $0x6c] sm:$0xf] %vm27_vm0, %v9544_v0  ;;  %57 = vst.msk [vmem:[#allocation2 + $0x70] sm:$0xf] %vm27_vm0, %v9544_v0  ;;  %v273_v16 = vsel %vm241_vm11, -1.0, %v9545_v10  ;;  %v139_v17 = vld [vmem:[%s14435_s0 + $0x10] sm:$0xff] }
  0x10   :  { %59 = vst.msk [vmem:[#allocation2 + $0x78] sm:$0xf] %vm27_vm0, %v9544_v0  ;;  %60 = vst.msk [vmem:[#allocation2 + $0x7c] sm:$0xf] %vm27_vm0, %v9544_v0  ;;  %v140_v18 = vld [vmem:[%s14435_s0 + $0x18] sm:$0xff]  ;;  %v9046_v23 = vld [vmem:[#allocation2] sm:$0xff]   ;;  %v178_v24 = vadd.f32 %v9818_v3, %v139_v17 }
  0x11   :  { %61 = vst.msk [vmem:[#allocation2 + $0x80] sm:$0x1] %vm30_vm1, %v9544_v0  ;;  %64 = vst.msk [vmem:[#allocation2 + $0x8c] sm:$0x1] %vm30_vm1, %v9544_v0  ;;  %v9044_v21 = vld [vmem:[#allocation2] sm:$0xfe]   ;;  %v179_v29 = vadd.f32 %v9818_v3, %v140_v18 }
  0x12   :  { %62 = vst.msk [vmem:[#allocation2 + $0x84] sm:$0xf] %vm27_vm0, %v9544_v0  ;;  %63 = vst.msk [vmem:[#allocation2 + $0x88] sm:$0xf] %vm27_vm0, %v9544_v0  ;;  %v2358_v25 = vrot.slane %v9044_v21, 1  ;;  %v1925_v28 = vshrl.u32 %v9046_v23, 16 }
  0x13   :  { %65 = vst.msk [vmem:[#allocation2 + $0x90] sm:$0xf] %vm27_vm0, %v9544_v0  ;;  %66 = vst.msk [vmem:[#allocation2 + $0x94] sm:$0xf] %vm27_vm0, %v9544_v0  ;;  %v1927_v30 = vshll.u32 %v9046_v23, 16  ;;  %v470_v31 = vshrl.u32 %v8957_v19, 16 }
  0x14   :  { %67 = vst.msk [vmem:[#allocation2 + $0x98] sm:$0x1] %vm30_vm1, %v9544_v0  ;;  %70 = vst.msk [vmem:[#allocation2 + $0xa4] sm:$0x1] %vm30_vm1, %v9544_v0  ;;  %v473_v32 = vshll.u32 %v8957_v19, 16  ;;  %v478_v33 = vshrl.u32 %v8958_v20, 16 }
  0x15   :  { %68 = vst.msk [vmem:[#allocation2 + $0x9c] sm:$0xf] %vm27_vm0, %v9544_v0  ;;  %69 = vst.msk [vmem:[#allocation2 + $0xa0] sm:$0xf] %vm27_vm0, %v9544_v0  ;;  %v481_v36 = vshll.u32 %v8958_v20, 16  ;;  %v304_v37 = vsel %vm208_vm13, 1.0, %v272_v15 }
  0x16   :  { %71 = vst.msk [vmem:[#allocation2 + $0xa8] sm:$0xf] %vm27_vm0, %v9544_v0  ;;  %72 = vst.msk [vmem:[#allocation2 + $0xac] sm:$0xf] %vm27_vm0, %v9544_v0  ;;  %v1929_v38 = vrot.slane %v1927_v30, 1  ;;  %v472_v40 = vrot.slane %v470_v31, 7  ;;  %v8953_v46 = vpack.c.bf16 %v304_v37, %v304_v37 }
  0x17   :  { %73 = vst.msk [vmem:[#allocation2 + $0xb0] sm:$0x1] %vm30_vm1, %v9544_v0  ;;  %76 = vst.msk [vmem:[#allocation2 + $0xbc] sm:$0x1] %vm30_vm1, %v9544_v0  ;;  %v480_v41 = vrot.slane %v478_v33, 7  ;;  %v305_v42 = vsel %vm209_vm14, 1.0, %v273_v16 }
  0x18   :  { %74 = vst.msk [vmem:[#allocation2 + $0xb4] sm:$0xf] %vm27_vm0, %v9544_v0  ;;  %75 = vst.msk [vmem:[#allocation2 + $0xb8] sm:$0xf] %vm27_vm0, %v9544_v0  ;;  %v775_v45 = vld [vmem:[#allocation2 + $0x24] sm:$0xf]  ;;  %v8954_v47 = vpack.c.bf16 %v305_v42, %v305_v42  ;;  %v1930_v48 = vor.u32 %v1929_v38, %v1925_v28  ;;  %v475_v49 = vor.u32 %v473_v32, %v472_v40 }
  0x19   :  { %77 = vst.msk [vmem:[#allocation2 + $0xc0] sm:$0xf] %vm27_vm0, %v9544_v0  ;;  %78 = vst.msk [vmem:[#allocation2 + $0xc4] sm:$0xf] %vm27_vm0, %v9544_v0  ;;  %vm210_vm5 = vcmp.gt.f32.partialorder %v178_v24, 0.0  ;;  %v476_v50 = vrot.slane %v472_v40, 4  ;;  %v483_v51 = vor.u32 %v481_v36, %v480_v41 }
  0x1a   :  { %79 = vst.msk [vmem:[#allocation2 + $0xc8] sm:$0x1] %vm30_vm1, %v9544_v0  ;;  %82 = vst.msk [vmem:[#allocation2 + $0xd4] sm:$0x1] %vm30_vm1, %v9544_v0  ;;  %v436_v52 = vshrl.u32 %v8953_v46, 16  ;;  %v439_v53 = vshll.u32 %v8953_v46, 16 }
  0x1b   :  { %80 = vst.msk [vmem:[#allocation2 + $0xcc] sm:$0xf] %vm27_vm0, %v9544_v0  ;;  %81 = vst.msk [vmem:[#allocation2 + $0xd0] sm:$0xf] %vm27_vm0, %v9544_v0  ;;  %v444_v54 = vshrl.u32 %v8954_v47, 16  ;;  %v447_v55 = vshll.u32 %v8954_v47, 16 }
  0x1c   :  { %83 = vst.msk [vmem:[#allocation2 + $0xd8] sm:$0xf] %vm27_vm0, %v9544_v0  ;;  %84 = vst.msk [vmem:[#allocation2 + $0xdc] sm:$0xf] %vm27_vm0, %v9544_v0  ;;  %v143_v56 = vld [vmem:[%s14435_s0 + $0x30] sm:$0xff]  ;;  %vm211_vm6 = vcmp.gt.f32.partialorder %v179_v29, 0.0 }
  0x1d   :  { %85 = vst.msk [vmem:[#allocation2 + $0xe0] sm:$0x1] %vm30_vm1, %v9544_v0  ;;  %88 = vst.msk [vmem:[#allocation2 + $0xec] sm:$0x1] %vm30_vm1, %v9544_v0  ;;  %v144_v60 = vld [vmem:[%s14435_s0 + $0x38] sm:$0xff]  ;;  %v438_v61 = vrot.slane %v436_v52, 7  ;;  %v9876_v6 = vadd.f32 %v9818_v3, %v143_v56 }
  0x1e   :  { %86 = vst.msk [vmem:[#allocation2 + $0xe4] sm:$0xf] %vm27_vm0, %v9544_v0  ;;  %87 = vst.msk [vmem:[#allocation2 + $0xe8] sm:$0xf] %vm27_vm0, %v9544_v0  ;;  %v446_v62 = vrot.slane %v444_v54, 7  ;;  %vm242_vm7 = vcmp.lt.f32.partialorder %v178_v24, 0.0  ;;  %v9889_v17 = vadd.f32 %v9818_v3, %v144_v60 }
  0x1f   :  { %89 = vst.msk [vmem:[#allocation2 + $0xf0] sm:$0xf] %vm27_vm0, %v9544_v0  ;;  %90 = vst.msk [vmem:[#allocation2 + $0xf4] sm:$0xf] %vm27_vm0, %v9544_v0  ;;  %v779_v63 = vld [vmem:[#allocation2 + $0x2c] sm:$0x1]  ;;  %v441_v7 = vor.u32 %v439_v53, %v438_v61 }
  0x20   :  { %91 = vst.msk [vmem:[#allocation2 + $0xf8] sm:$0x1] %vm30_vm1, %v9544_v0  ;;  %94 = vst.msk [vmem:[#allocation2 + $0x104] sm:$0x1] %vm30_vm1, %v9544_v0  ;;  %v759_v1 = vld [vmem:[#allocation2 + $0xc] sm:$0xf]  ;;  %v449_v9 = vor.u32 %v447_v55, %v446_v62 }
  0x21   :  { %92 = vst.msk [vmem:[#allocation2 + $0xfc] sm:$0xf] %vm27_vm0, %v9544_v0  ;;  %93 = vst.msk [vmem:[#allocation2 + $0x100] sm:$0xf] %vm27_vm0, %v9544_v0  ;;  %v274_v2 = vsel %vm242_vm7, -1.0, %v9545_v10  ;;  %v485_v5 = vrot.slane %v480_v41, 4 }
  0x22   :  { %95 = vst.msk [vmem:[#allocation2 + $0x108] sm:$0xf] %vm27_vm0, %v9544_v0  ;;  %96 = vst.msk [vmem:[#allocation2 + $0x10c] sm:$0xf] %vm27_vm0, %v9544_v0  ;;  %v442_v8 = vrot.slane %v438_v61, 4  ;;  %v451_v11 = vrot.slane %v446_v62, 4 }
  0x23   :  { %97 = vst.msk [vmem:[#allocation2 + $0x110] sm:$0x1] %vm30_vm1, %v9544_v0  ;;  %100 = vst.msk [vmem:[#allocation2 + $0x11c] sm:$0x1] %vm30_vm1, %v9544_v0  ;;  %v765_v13 = vld [vmem:[#allocation2 + $0x14] sm:$0x1] }
  0x24   :  { %98 = vst.msk [vmem:[#allocation2 + $0x114] sm:$0xf] %vm27_vm0, %v9544_v0  ;;  %99 = vst.msk [vmem:[#allocation2 + $0x118] sm:$0xf] %vm27_vm0, %v9544_v0  ;;  %v306_v14 = vsel %vm210_vm5, 1.0, %v274_v2  ;;  %s9548_s21 = smov 96  }
  0x25   :  { %101 = vst.msk [vmem:[#allocation2 + $0x120] sm:$0xf] %vm27_vm0, %v9544_v0  ;;  %102 = vst.msk [vmem:[#allocation2 + $0x124] sm:$0xf] %vm27_vm0, %v9544_v0  ;;  %v8955_v20 = vpack.c.bf16 %v306_v14, %v306_v14  ;;  %v768_v28 = vld [vmem:[#allocation2 + $0x18] sm:$0xf] }
  0x26   :  { %103 = vst.msk [vmem:[#allocation2 + $0x128] sm:$0x1] %vm30_vm1, %v9544_v0  ;;  %106 = vst.msk [vmem:[#allocation2 + $0x134] sm:$0x1] %vm30_vm1, %v9544_v0  ;;  %s9549_s22 = smov 48   ;;  %s9550_s23 = smov 80  }
  0x27   :  { %104 = vst.msk [vmem:[#allocation2 + $0x12c] sm:$0xf] %vm27_vm0, %v9544_v0  ;;  %105 = vst.msk [vmem:[#allocation2 + $0x130] sm:$0xf] %vm27_vm0, %v9544_v0  ;;  %v453_v23 = vshrl.u32 %v8955_v20, 16  ;;  %v456_v24 = vshll.u32 %v8955_v20, 16 }
  0x28   :  { %107 = vst.msk [vmem:[#allocation2 + $0x138] sm:$0xf] %vm27_vm0, %v9544_v0  ;;  %108 = vst.msk [vmem:[#allocation2 + $0x13c] sm:$0xf] %vm27_vm0, %v9544_v0  ;;  %vm214_vm10 = vcmp.gt.f32.partialorder %v9876_v6, 0.0  ;;  %vm215_vm11 = vcmp.gt.f32.partialorder %v9889_v17, 0.0 }
  0x29   :  { %109 = vst.msk [vmem:[#allocation2 + $0x140] sm:$0x1] %vm30_vm1, %v9544_v0  ;;  %112 = vst.msk [vmem:[#allocation2 + $0x14c] sm:$0x1] %vm30_vm1, %v9544_v0  ;;  %s9551_s24 = smov 112   ;;  %s9552_s29 = smov 64  }
  0x2a   :  { %110 = vst.msk [vmem:[#allocation2 + $0x144] sm:$0xf] %vm27_vm0, %v9544_v0  ;;  %111 = vst.msk [vmem:[#allocation2 + $0x148] sm:$0xf] %vm27_vm0, %v9544_v0 }
  0x2b   :  { %113 = vst.msk [vmem:[#allocation2 + $0x150] sm:$0xf] %vm27_vm0, %v9544_v0  ;;  %114 = vst.msk [vmem:[#allocation2 + $0x154] sm:$0xf] %vm27_vm0, %v9544_v0 }
  0x2c   :  { %115 = vst.msk [vmem:[#allocation2 + $0x158] sm:$0x1] %vm30_vm1, %v9544_v0  ;;  %118 = vst.msk [vmem:[#allocation2 + $0x164] sm:$0x1] %vm30_vm1, %v9544_v0 }
  0x2d   :  { %116 = vst.msk [vmem:[#allocation2 + $0x15c] sm:$0xf] %vm27_vm0, %v9544_v0  ;;  %117 = vst.msk [vmem:[#allocation2 + $0x160] sm:$0xf] %vm27_vm0, %v9544_v0 }
  0x2e   :  { %119 = vst.msk [vmem:[#allocation2 + $0x168] sm:$0xf] %vm27_vm0, %v9544_v0  ;;  %120 = vst.msk [vmem:[#allocation2 + $0x16c] sm:$0xf] %vm27_vm0, %v9544_v0 }
  0x2f   :  { %121 = vst.msk [vmem:[#allocation2 + $0x170] sm:$0x1] %vm30_vm1, %v9544_v0  ;;  %124 = vst.msk [vmem:[#allocation2 + $0x17c] sm:$0x1] %vm30_vm1, %v9544_v0 }
  0x30   :  { %122 = vst.msk [vmem:[#allocation2 + $0x174] sm:$0xf] %vm27_vm0, %v9544_v0  ;;  %123 = vst.msk [vmem:[#allocation2 + $0x178] sm:$0xf] %vm27_vm0, %v9544_v0 }
  0x31   :  { %125 = vst.msk [vmem:[#allocation2 + $0x180] sm:$0xf] %vm27_vm0, %v9544_v0  ;;  %126 = vst.msk [vmem:[#allocation2 + $0x184] sm:$0xf] %vm27_vm0, %v9544_v0 }
  0x32   :  { %127 = vst.msk [vmem:[#allocation2 + $0x188] sm:$0x1] %vm30_vm1, %v9544_v0  ;;  %130 = vst.msk [vmem:[#allocation2 + $0x194] sm:$0x1] %vm30_vm1, %v9544_v0 }
  0x33   :  { %128 = vst.msk [vmem:[#allocation2 + $0x18c] sm:$0xf] %vm27_vm0, %v9544_v0  ;;  %129 = vst.msk [vmem:[#allocation2 + $0x190] sm:$0xf] %vm27_vm0, %v9544_v0 }
  0x34   :  { %131 = vst.msk [vmem:[#allocation2 + $0x198] sm:$0xf] %vm27_vm0, %v9544_v0  ;;  %132 = vst.msk [vmem:[#allocation2 + $0x19c] sm:$0xf] %vm27_vm0, %v9544_v0 }
  0x35   :  { %133 = vst.msk [vmem:[#allocation2 + $0x1a0] sm:$0x1] %vm30_vm1, %v9544_v0  ;;  %136 = vst.msk [vmem:[#allocation2 + $0x1ac] sm:$0x1] %vm30_vm1, %v9544_v0 }
  0x36   :  { %134 = vst.msk [vmem:[#allocation2 + $0x1a4] sm:$0xf] %vm27_vm0, %v9544_v0  ;;  %135 = vst.msk [vmem:[#allocation2 + $0x1a8] sm:$0xf] %vm27_vm0, %v9544_v0 }
  0x37   :  { %v9045_v22 = vld [vmem:[#allocation2 + $0x8] ss:$0 sps:$4 sm:$0x11]   ;;  %vm9849_vm15 = vmor %vm432_vm3, %vm433_vm8  ;;  %vm243_vm8 = vcmp.lt.f32.partialorder %v179_v29, 0.0  ;;  %v455_v29 = vrot.slane %v453_v23, 7 }
  0x38   :  { %v2359_v26 = vrot.slane %v9045_v22, 1  ;;  %v9047_v27 = vld [vmem:[#allocation2 + $0x8] ss:$0 sps:$4 sm:$0x11]   ;;  %vm9856_vm4 = vmand %vm27_vm0, %vm757_vm9  ;;  %v484_v58 = vsel %vm9849_vm15, %v476_v50, %v483_v51  ;;  %v275_v4 = vsel %vm243_vm8, -1.0, %v9545_v10  ;;  %v450_v18 = vsel %vm9849_vm15, %v442_v8, %v449_v9 }
  0x39   :  { %v1932_v35 = vshll.u32 %v9047_v27, 16  ;;  %v776_v59 = vsel %vm9856_vm4, %v475_v49, %v775_v45  ;;  %778 = vst.msk [vmem:[#allocation2 + $0x28] sm:$0xf] %vm27_vm0, %v484_v58  ;;  %vm9880_vm9 = vmand %vm30_vm1, %vm432_vm3  ;;  %v307_v15 = vsel %vm211_vm6, 1.0, %v275_v4  ;;  %v760_v19 = vsel %vm9856_vm4, %v441_v7, %v759_v1 }
  0x3a   :  { %v2360_v34 = vsel %vm2357_vm2, %v2358_v25, %v2359_v26  ;;  %777 = vst [vmem:[#allocation2 + $0x24] sm:$0xf] %v776_v59  ;;  %v780_v16 = vsel %vm9880_vm9, %v485_v5, %v779_v63  ;;  %v8956_v21 = vpack.c.bf16 %v307_v15, %v307_v15  ;;  %761 = vst [vmem:[#allocation2 + $0xc] sm:$0xf] %v760_v19  ;;  %vm246_vm1 = vcmp.lt.f32.partialorder %v9876_v6, 0.0 }
  0x3b   :  { %2406 = vrot.lane.b32.xlu0 %v2360_v34, %s9546_s15  ;;  %v1934_v43 = vrot.slane %v1932_v35, 1  ;;  %781 = vst [vmem:[#allocation2 + $0x2c] sm:$0x1] %v780_v16  ;;  %762 = vst.msk [vmem:[#allocation2 + $0x10] sm:$0xf] %vm27_vm0, %v450_v18  ;;  %v766_v22 = vsel %vm9880_vm9, %v451_v11, %v765_v13  ;;  %vm247_vm3 = vcmp.lt.f32.partialorder %v9889_v17, 0.0  ;;  %v458_v32 = vor.u32 %v456_v24, %v455_v29 }
  0x3c   :  { %v461_v25 = vshrl.u32 %v8956_v21, 16  ;;  %767 = vst [vmem:[#allocation2 + $0x14] sm:$0x1] %v766_v22  ;;  %v464_v27 = vshll.u32 %v8956_v21, 16  ;;  %v459_v33 = vrot.slane %v455_v29, 4  ;;  %v9902_v37 = vsel %vm246_vm1, -1.0, %v9545_v10 }
  0x3d   :  { %v1935_v57 = vsel %vm14446_vm12, %v1930_v48, %v1934_v43  ;;  %v772_v34 = vld [vmem:[#allocation2 + $0x20] sm:$0x1]  ;;  %v769_v40 = vsel %vm9856_vm4, %v458_v32, %v768_v28  ;;  %v9907_v41 = vsel %vm247_vm3, -1.0, %v9545_v10  ;;  %v147_v17 = vld [vmem:[%s14435_s0 + $0x50] sm:$0xff] }
  0x3e   :  { %v463_v31 = vrot.slane %v461_v25, 7  ;;  %770 = vst [vmem:[#allocation2 + $0x18] sm:$0xf] %v769_v40 }
  0x3f   :  { %2116 = vrot.lane.b32.xlu0 %v1935_v57, %s9547_s20 }
  0x40   :  { %v466_v35 = vor.u32 %v464_v27, %v463_v31  ;;  %v468_v36 = vrot.slane %v463_v31, 4 }
  0x41   :  { %v9048_v26 = vld [vmem:[#allocation2 + $0x24] sm:$0xff]  }
  0x42   :  { %v9050_v30 = vld [vmem:[#allocation2 + $0x24] sm:$0xff]   ;;  %v9049_v38 = vld [vmem:[#allocation2 + $0xc] sm:$0xff]   ;;  %v467_v42 = vsel %vm9849_vm15, %v459_v33, %v466_v35  ;;  %v773_v43 = vsel %vm9880_vm9, %v468_v36, %v772_v34 }
  0x43   :  { %3485 = vrot.lane.b32.xlu0 %v9048_v26, %s9548_s21  ;;  %2583 = vrot.lane.b32.xlu1 %v9049_v38, %s9549_s22  ;;  %771 = vst.msk [vmem:[#allocation2 + $0x1c] sm:$0xf] %vm27_vm0, %v467_v42  ;;  %v9052_v45 = vld [vmem:[#allocation2 + $0xc] sm:$0xfe]   ;;  %774 = vst [vmem:[#allocation2 + $0x20] sm:$0x1] %v773_v43 }
  0x44   :  { %v9053_v46 = vld [vmem:[#allocation2 + $0x14] ss:$0 sps:$4 sm:$0x11]   ;;  %v9063_v47 = vld [vmem:[#allocation2 + $0xc] sm:$0xff]   ;;  %v3257_v48 = vrot.slane %v9052_v45, 1  ;;  %v9073_v34 = vld [vmem:[#allocation2 + $0x24] sm:$0xff]  }
  0x45   :  { %v3258_v49 = vrot.slane %v9053_v46, 1  ;;  %v9057_v50 = vld [vmem:[#allocation2 + $0xc] sm:$0xfe]   ;;  %v9058_v51 = vld [vmem:[#allocation2 + $0x14] ss:$0 sps:$4 sm:$0x11]  }
  0x46   :  { %v2825_v52 = vshrl.u32 %v9063_v47, 16  ;;  %v2361_v54 = vrot.slane %v9057_v50, 1  ;;  %v9064_v55 = vld [vmem:[#allocation2 + $0x14] ss:$0 sps:$4 sm:$0x11]   ;;  %v2362_v56 = vrot.slane %v9058_v51, 1 }
  0x47   :  { %2587 = vrot.lane.b32.xlu0 %v9050_v30, %s9549_s22  ;;  %v3259_v53 = vsel %vm2357_vm2, %v3257_v48, %v3258_v49  ;;  %v2827_v57 = vshll.u32 %v9063_v47, 16  ;;  %v2832_v62 = vshll.u32 %v9064_v55, 16  ;;  %v9925_v22 = vld [vmem:[#allocation2 + $0x24] sm:$0xfe]   ;;  %v9069_v26 = vld [vmem:[#allocation2 + $0xc] sm:$0xff]  }
  0x48   :  { %v2363_v59 = vsel %vm2357_vm2, %v2361_v54, %v2362_v56  ;;  %v1937_v40 = vshrl.u32 %v9069_v26, 16  ;;  %v9072_v42 = vld [vmem:[#allocation2 + $0x2c] ss:$0 sps:$4 sm:$0x11]   ;;  %v1939_v48 = vshll.u32 %v9069_v26, 16  ;;  %v3263_v51 = vrot.slane %v9925_v22, 1 }
  0x49   :  { %v2829_v60 = vrot.slane %v2827_v57, 1  ;;  %v2834_v18 = vrot.slane %v2832_v62, 1  ;;  %v9070_v47 = vld [vmem:[#allocation2 + $0x14] ss:$0 sps:$4 sm:$0x11]  }
  0x4a   :  { %v9051_v58 = vld [vmem:[#allocation2 + $0x18] sm:$0xff]   ;;  %v9056_v1 = vld [vmem:[#allocation2 + $0x20] ss:$0 sps:$4 sm:$0x11]   ;;  %v1941_v54 = vrot.slane %v1939_v48, 1  ;;  %v1944_v55 = vshll.u32 %v9070_v47, 16 }
  0x4b   :  { %3305 = vrot.lane.b32.xlu0 %v3259_v53, %s9550_s23  ;;  %v9054_v61 = vld [vmem:[#allocation2 + $0x18] sm:$0xff]   ;;  %3483 = vrot.lane.b32.xlu1 %v9051_v58, %s9548_s21  ;;  %v3261_v5 = vrot.slane %v9056_v1, 1  ;;  %v9060_v8 = vld [vmem:[#allocation2 + $0x20] ss:$0 sps:$4 sm:$0x11]   ;;  %v2830_v31 = vor.u32 %v2829_v60, %v2825_v52  ;;  %v9077_v60 = vld [vmem:[#allocation2 + $0x24] sm:$0xff]  }
  0x4c   :  { %v9055_v63 = vld [vmem:[#allocation2 + $0x18] sm:$0xfe]   ;;  %v9062_v13 = vld [vmem:[#allocation2 + $0x20] ss:$0 sps:$4 sm:$0x11]   ;;  %v2365_v15 = vrot.slane %v9060_v8, 1  ;;  %v1942_v62 = vor.u32 %v1941_v54, %v1937_v40 }
  0x4d   :  { %v9061_v2 = vld [vmem:[#allocation2 + $0x18] sm:$0xff]   ;;  %v3260_v4 = vrot.slane %v9055_v63, 1  ;;  %v3732_v20 = vshll.u32 %v9062_v13, 16  ;;  %v9066_v24 = vld [vmem:[#allocation2 + $0x20] ss:$0 sps:$4 sm:$0x11]   ;;  %v2835_v52 = vsel %vm14446_vm12, %v2830_v31, %v2834_v18 }
  0x4e   :  { %v9059_v7 = vld [vmem:[#allocation2 + $0x18] sm:$0xfe]   ;;  %v3725_v9 = vshrl.u32 %v9061_v2, 16  ;;  %v3727_v16 = vshll.u32 %v9061_v2, 16  ;;  %v2844_v32 = vshll.u32 %v9066_v24, 16  ;;  %v1946_v63 = vrot.slane %v1944_v55, 1 }
  0x4f   :  { %2408 = vrot.lane.b32.xlu0 %v2363_v59, %s9546_s15  ;;  %2585 = vrot.lane.b32.xlu1 %v9054_v61, %s9549_s22  ;;  %v2364_v11 = vrot.slane %v9059_v7, 1  ;;  %v3262_v14 = vsel %vm2357_vm2, %v3260_v4, %v3261_v5  ;;  %v9065_v19 = vld [vmem:[#allocation2 + $0x18] sm:$0xff]   ;;  %v3734_v27 = vrot.slane %v3732_v20, 1  ;;  %v9068_v33 = vld [vmem:[#allocation2 + $0x20] ss:$0 sps:$4 sm:$0x11]  }
  0x50   :  { %v9067_v21 = vld [vmem:[#allocation2 + $0x18] sm:$0xff]   ;;  %v3729_v23 = vrot.slane %v3727_v16, 1  ;;  %v2837_v25 = vshrl.u32 %v9065_v19, 16  ;;  %v2839_v28 = vshll.u32 %v9065_v19, 16  ;;  %v2846_v45 = vrot.slane %v2844_v32, 1  ;;  %v145_v61 = vld [vmem:[%s14435_s0 + $0x40] sm:$0xff] }
  0x51   :  { %v2366_v29 = vsel %vm2357_vm2, %v2364_v11, %v2365_v15  ;;  %v1949_v36 = vshrl.u32 %v9067_v21, 16  ;;  %v1951_v38 = vshll.u32 %v9067_v21, 16  ;;  %v1956_v46 = vshll.u32 %v9068_v33, 16  ;;  %v9074_v56 = vld [vmem:[#allocation2 + $0x2c] ss:$0 sps:$4 sm:$0x11]  }
  0x52   :  { %v3730_v30 = vor.u32 %v3729_v23, %v3725_v9  ;;  %v2841_v35 = vrot.slane %v2839_v28, 1  ;;  %v3737_v59 = vshrl.u32 %v9073_v34, 16  ;;  %v3739_v1 = vshll.u32 %v9073_v34, 16  ;;  %v146_v4 = vld [vmem:[%s14435_s0 + $0x48] sm:$0xff]  ;;  %v782_v32 = vld [vmem:[#allocation2 + $0x30] sm:$0xf] }
  0x53   :  { %3307 = vrot.lane.b32.xlu1 %v3262_v14, %s9550_s23  ;;  %v1953_v50 = vrot.slane %v1951_v38, 1  ;;  %v1958_v53 = vrot.slane %v1956_v46, 1  ;;  %v3744_v2 = vshll.u32 %v9074_v56, 16  ;;  %v3264_v7 = vrot.slane %v9072_v42, 1  ;;  %v786_v42 = vld [vmem:[#allocation2 + $0x38] sm:$0x1] }
  0x54   :  { %v3735_v43 = vsel %vm14446_vm12, %v3730_v30, %v3734_v27  ;;  %v2842_v49 = vor.u32 %v2841_v35, %v2837_v25  ;;  %v310_v8 = vsel %vm214_vm10, 1.0, %v9902_v37  ;;  %v311_v9 = vsel %vm215_vm11, 1.0, %v9907_v41  ;;  %v9078_v11 = vld [vmem:[#allocation2 + $0x2c] ss:$0 sps:$4 sm:$0x11]   ;;  %v148_v37 = vld [vmem:[%s14435_s0 + $0x58] sm:$0xff] }
  0x55   :  { %3916 = vrot.lane.b32.xlu0 %v3735_v43, %s9551_s24  ;;  %v1954_v58 = vor.u32 %v1953_v50, %v1949_v36  ;;  %v1947_v13 = vsel %vm14446_vm12, %v1942_v62, %v1946_v63  ;;  %v3741_v14 = vrot.slane %v3739_v1, 1  ;;  %v3746_v15 = vrot.slane %v3744_v2, 1  ;;  %v9960_v27 = vld [vmem:[#allocation2 + $0x24] sm:$0xff]   ;;  %v9085_v36 = vld [vmem:[#allocation2 + $0x2c] ss:$0 sps:$4 sm:$0x11]  }
  0x56   :  { %v2847_v57 = vsel %vm14446_vm12, %v2842_v49, %v2846_v45  ;;  %v8959_v16 = vpack.c.bf16 %v310_v8, %v310_v8  ;;  %v8960_v18 = vpack.c.bf16 %v311_v9, %v311_v9  ;;  %v2849_v19 = vshrl.u32 %v9077_v60, 16  ;;  %v9968_v47 = vld [vmem:[#allocation2 + $0x24] sm:$0xfe]   ;;  %v9970_v48 = vld [vmem:[#allocation2 + $0x2c] ss:$0 sps:$4 sm:$0x11]  }
  0x57   :  { %2410 = vrot.lane.b32.xlu1 %v2366_v29, %s9546_s15  ;;  %v1959_v5 = vsel %vm14446_vm12, %v1954_v58, %v1958_v53  ;;  %v2851_v20 = vshll.u32 %v9077_v60, 16  ;;  %v2856_v21 = vshll.u32 %v9078_v11, 16  ;;  %v3742_v22 = vor.u32 %v3741_v14, %v3737_v59  ;;  %v9145_v53 = vld [vmem:[%s14437_s1] sm:$0xff]   ;;  %v9149_v2 = vld [vmem:[%s14437_s1 + $0x8] sm:$0xff]  }
  0x58   :  { %v487_v23 = vshrl.u32 %v8959_v16, 16  ;;  %v490_v24 = vshll.u32 %v8959_v16, 16  ;;  %v184_v6 = vadd.f32 %v9818_v3, %v145_v61  ;;  %v495_v41 = vshrl.u32 %v8960_v18, 16  ;;  %7097 = vmatpush1.bf16.msra.mxu0 %v9145_v53  ;;  %9026 = vmatpush1.bf16.msra.mxu1 %v9145_v53 }
  0x59   :  { %3018 = vrot.lane.b32.xlu0 %v2847_v57, %s9552_s29  ;;  %v498_v25 = vshll.u32 %v8960_v18, 16  ;;  %v2853_v26 = vrot.slane %v2851_v20, 1  ;;  %v185_v28 = vadd.f32 %v9818_v3, %v146_v4  ;;  %v3265_v29 = vsel %vm2357_vm2, %v3263_v51, %v3264_v7  ;;  %7098 = vmatprep.subr.bf16.mxu0 %v9544_v0  ;;  %v789_v20 = vld [vmem:[#allocation2 + $0x3c] sm:$0xf] }
  0x5a   :  { %v3747_v30 = vsel %vm14446_vm12, %v3742_v22, %v3746_v15  ;;  %v489_v31 = vrot.slane %v487_v23, 7  ;;  %v2858_v33 = vrot.slane %v2856_v21, 1  ;;  %v497_v34 = vrot.slane %v495_v41, 7  ;;  %9018 = vmatprep.subr.bf16.mxu1 %v9544_v0 }
  0x5b   :  { %3016 = vrot.lane.b32.xlu1 %v2835_v52, %s9552_s29  ;;  %v2854_v35 = vor.u32 %v2853_v26, %v2849_v19  ;;  %vm216_vm13 = vcmp.gt.f32.partialorder %v184_v6, 0.0  ;;  %v186_v43 = vadd.f32 %v9818_v3, %v147_v17  ;;  %v1963_v49 = vshll.u32 %v9960_v27, 16 }
  0x5c   :  { %v492_v38 = vor.u32 %v490_v24, %v489_v31  ;;  %v493_v40 = vrot.slane %v489_v31, 4  ;;  %v500_v45 = vor.u32 %v498_v25, %v497_v34  ;;  %v502_v46 = vrot.slane %v497_v34, 4  ;;  %7099 = vmatpush1.bf16.msra.mxu0 %v9149_v2  ;;  %9027 = vmatpush1.bf16.msra.mxu1 %v9149_v2 }
  0x5d   :  { %2120 = vrot.lane.b32.xlu0 %v1959_v5, %s9547_s20  ;;  %v9974_v50 = vadd.f32 %v9818_v3, %v148_v37  ;;  %v2859_v52 = vsel %vm14446_vm12, %v2854_v35, %v2858_v33  ;;  %vm217_vm14 = vcmp.gt.f32.partialorder %v185_v28, 0.0  ;;  %vm248_vm5 = vcmp.lt.f32.partialorder %v184_v6, 0.0  ;;  %7100 = vmatprep.subr.bf16.mxu0 %v9544_v0 }
  0x5e   :  { %v783_v51 = vsel %vm9856_vm4, %v492_v38, %v782_v32  ;;  %v501_v54 = vsel %vm9849_vm15, %v493_v40, %v500_v45  ;;  %v787_v55 = vsel %vm9880_vm9, %v502_v46, %v786_v42  ;;  %v1968_v56 = vshll.u32 %v9085_v36, 16  ;;  %9019 = vmatprep.subr.bf16.mxu1 %v9544_v0  ;;  %v793_v40 = vld [vmem:[#allocation2 + $0x44] sm:$0x1] }
  0x5f   :  { %2118 = vrot.lane.b32.xlu1 %v1947_v13, %s9547_s20  ;;  %784 = vst [vmem:[#allocation2 + $0x30] sm:$0xf] %v783_v51  ;;  %vm249_vm6 = vcmp.lt.f32.partialorder %v185_v28, 0.0  ;;  %785 = vst.msk [vmem:[#allocation2 + $0x34] sm:$0xf] %vm27_vm0, %v501_v54  ;;  %v1961_v57 = vshrl.u32 %v9960_v27, 16 }
  0x60   :  { %788 = vst [vmem:[#allocation2 + $0x38] sm:$0x1] %v787_v55  ;;  %v280_v58 = vsel %vm248_vm5, -1.0, %v9545_v10  ;;  %v281_v59 = vsel %vm249_vm6, -1.0, %v9545_v10  ;;  %v1965_v60 = vrot.slane %v1963_v49, 1  ;;  %vm250_vm7 = vcmp.lt.f32.partialorder %v186_v43, 0.0 }
  0x61   :  { %3309 = vrot.lane.b32.xlu0 %v3265_v29, %s9550_s23  ;;  %v312_v61 = vsel %vm216_vm13, 1.0, %v280_v58  ;;  %v313_v62 = vsel %vm217_vm14, 1.0, %v281_v59  ;;  %vm218_vm8 = vcmp.gt.f32.partialorder %v186_v43, 0.0  ;;  %vm251_vm1 = vcmp.lt.f32.partialorder %v9974_v50, 0.0  ;;  %v9154_v13 = vld [vmem:[%s14437_s1 + $0x10] sm:$0xff]   ;;  %v149_v42 = vld [vmem:[%s14435_s0 + $0x60] sm:$0xff] }
  0x62   :  { %v8961_v63 = vpack.c.bf16 %v312_v61, %v312_v61  ;;  %v8962_v1 = vpack.c.bf16 %v313_v62, %v313_v62  ;;  %v2367_v4 = vrot.slane %v9968_v47, 1  ;;  %v2368_v5 = vrot.slane %v9970_v48, 1  ;;  %7101 = vmatpush1.bf16.msra.mxu0 %v9154_v13  ;;  %9028 = vmatpush1.bf16.msra.mxu1 %v9154_v13 }
  0x63   :  { %3918 = vrot.lane.b32.xlu1 %v3747_v30, %s9551_s24  ;;  %v1970_v7 = vrot.slane %v1968_v56, 1  ;;  %v282_v8 = vsel %vm250_vm7, -1.0, %v9545_v10  ;;  %vm219_vm3 = vcmp.gt.f32.partialorder %v9974_v50, 0.0  ;;  %v283_v11 = vsel %vm251_vm1, -1.0, %v9545_v10  ;;  %7102 = vmatprep.subr.bf16.mxu0 %v9544_v0 }
  0x64   :  { %v504_v9 = vshrl.u32 %v8961_v63, 16  ;;  %v507_v14 = vshll.u32 %v8961_v63, 16  ;;  %v512_v15 = vshrl.u32 %v8962_v1, 16  ;;  %v515_v16 = vshll.u32 %v8962_v1, 16  ;;  %9020 = vmatprep.subr.bf16.mxu1 %v9544_v0 }
  0x65   :  { %v314_v18 = vsel %vm218_vm8, 1.0, %v282_v8  ;;  %v1966_v19 = vor.u32 %v1965_v60, %v1961_v57  ;;  %v315_v56 = vsel %vm219_vm3, 1.0, %v283_v11  ;;  %v10031_v60 = vadd.f32 %v9818_v3, %v149_v42 }
  0x66   :  { %v9075_v21 = vld [vmem:[#allocation2 + $0x30] sm:$0xff]   ;;  %v506_v22 = vrot.slane %v504_v9, 7  ;;  %v514_v30 = vrot.slane %v512_v15, 7  ;;  %v8963_v32 = vpack.c.bf16 %v314_v18, %v314_v18  ;;  %v2369_v61 = vsel %vm2357_vm2, %v2367_v4, %v2368_v5  ;;  %v796_v15 = vld [vmem:[#allocation2 + $0x48] sm:$0xf] }
  0x67   :  { %3020 = vrot.lane.b32.xlu1 %v2859_v52, %s9552_s29  ;;  %v9076_v23 = vld [vmem:[#allocation2 + $0x38] ss:$0 sps:$4 sm:$0x11]   ;;  %v9081_v24 = vld [vmem:[#allocation2 + $0x30] sm:$0xff]   ;;  %v3749_v6 = vshrl.u32 %v9075_v21, 16  ;;  %v3751_v17 = vshll.u32 %v9075_v21, 16  ;;  %v1971_v27 = vsel %vm14446_vm12, %v1966_v19, %v1970_v7  ;;  %v8964_v8 = vpack.c.bf16 %v315_v56, %v315_v56 }
  0x68   :  { %v509_v37 = vor.u32 %v507_v14, %v506_v22  ;;  %v3756_v41 = vshll.u32 %v9076_v23, 16  ;;  %v9082_v25 = vld [vmem:[#allocation2 + $0x30] sm:$0xff]   ;;  %v9083_v26 = vld [vmem:[#allocation2 + $0x38] ss:$0 sps:$4 sm:$0x11]   ;;  %v510_v28 = vrot.slane %v506_v22, 4  ;;  %v517_v45 = vor.u32 %v515_v16, %v514_v30 }
  0x69   :  { %v3753_v29 = vrot.slane %v3751_v17, 1  ;;  %v2861_v34 = vshrl.u32 %v9082_v25, 16  ;;  %v2863_v35 = vshll.u32 %v9082_v25, 16  ;;  %v2868_v36 = vshll.u32 %v9083_v26, 16  ;;  %v9088_v38 = vld [vmem:[#allocation2 + $0x30] sm:$0xff]   ;;  %v150_v52 = vld [vmem:[%s14435_s0 + $0x68] sm:$0xff] }
  0x6a   :  { %v790_v31 = vsel %vm9856_vm4, %v509_v37, %v789_v20  ;;  %v3758_v33 = vrot.slane %v3756_v41, 1  ;;  %v9087_v49 = vld [vmem:[#allocation2 + $0x30] sm:$0xff]   ;;  %v9089_v51 = vld [vmem:[#allocation2 + $0x38] ss:$0 sps:$4 sm:$0x11]   ;;  %v518_v54 = vsel %vm9849_vm15, %v510_v28, %v517_v45  ;;  %v519_v55 = vrot.slane %v514_v30, 4 }
  0x6b   :  { %3487 = vrot.lane.b32.xlu1 %v9081_v24, %s9548_s21  ;;  %791 = vst [vmem:[#allocation2 + $0x3c] sm:$0xf] %v790_v31  ;;  %v3754_v43 = vor.u32 %v3753_v29, %v3749_v6  ;;  %v2865_v46 = vrot.slane %v2863_v35, 1  ;;  %v2870_v57 = vrot.slane %v2868_v36, 1  ;;  %792 = vst.msk [vmem:[#allocation2 + $0x40] sm:$0xf] %vm27_vm0, %v518_v54  ;;  %v10042_v9 = vadd.f32 %v9818_v3, %v150_v52 }
  0x6c   :  { %v9090_v58 = vld [vmem:[#allocation2 + $0x30] sm:$0xfe]   ;;  %v521_v59 = vshrl.u32 %v8963_v32, 16  ;;  %v1975_v63 = vshll.u32 %v9088_v38, 16  ;;  %v794_v1 = vsel %vm9880_vm9, %v519_v55, %v793_v40  ;;  %v1980_v2 = vshll.u32 %v9089_v51, 16 }
  0x6d   :  { %v3759_v53 = vsel %vm14446_vm12, %v3754_v43, %v3758_v33  ;;  %v2866_v62 = vor.u32 %v2865_v46, %v2861_v34  ;;  %v9091_v50 = vld [vmem:[#allocation2 + $0x38] ss:$0 sps:$4 sm:$0x11]   ;;  %v3266_v7 = vrot.slane %v9090_v58, 1  ;;  %795 = vst [vmem:[#allocation2 + $0x44] sm:$0x1] %v794_v1 }
  0x6e   :  { %3920 = vrot.lane.b32.xlu0 %v3759_v53, %s9551_s24  ;;  %v3267_v48 = vrot.slane %v9091_v50, 1  ;;  %v523_v11 = vrot.slane %v521_v59, 7  ;;  %v1973_v47 = vshrl.u32 %v9088_v38, 16  ;;  %vm252_vm10 = vcmp.lt.f32.partialorder %v10031_v60, 0.0  ;;  %v9097_v19 = vld [vmem:[#allocation2 + $0x30] sm:$0xfe]  }
  0x6f   :  { %2122 = vrot.lane.b32.xlu1 %v1971_v27, %s9547_s20  ;;  %v2871_v4 = vsel %vm14446_vm12, %v2866_v62, %v2870_v57  ;;  %v1977_v5 = vrot.slane %v1975_v63, 1  ;;  %v524_v14 = vshll.u32 %v8963_v32, 16  ;;  %v1982_v16 = vrot.slane %v1980_v2, 1  ;;  %v9098_v20 = vld [vmem:[#allocation2 + $0x38] ss:$0 sps:$4 sm:$0x11]  }
  0x70   :  { %v3268_v13 = vsel %vm2357_vm2, %v3266_v7, %v3267_v48  ;;  %v529_v18 = vshrl.u32 %v8964_v8, 16  ;;  %v532_v3 = vshll.u32 %v8964_v8, 16  ;;  %vm253_vm11 = vcmp.lt.f32.partialorder %v10042_v9, 0.0  ;;  %v800_v25 = vld [vmem:[#allocation2 + $0x50] sm:$0x1] }
  0x71   :  { %v526_v21 = vor.u32 %v524_v14, %v523_v11  ;;  %v527_v24 = vrot.slane %v523_v11, 4  ;;  %v1978_v17 = vor.u32 %v1977_v5, %v1973_v47  ;;  %vm220_vm13 = vcmp.gt.f32.partialorder %v10031_v60, 0.0 }
  0x72   :  { %2412 = vrot.lane.b32.xlu0 %v2369_v61, %s9546_s15  ;;  %v9086_v22 = vld [vmem:[#allocation2 + $0x3c] sm:$0xff]   ;;  %v531_v6 = vrot.slane %v529_v18, 7  ;;  %v2370_v40 = vrot.slane %v9097_v19, 1  ;;  %v2371_v42 = vrot.slane %v9098_v20, 1  ;;  %vm221_vm14 = vcmp.gt.f32.partialorder %v10042_v9, 0.0 }
  0x73   :  { %2589 = vrot.lane.b32.xlu1 %v9087_v49, %s9549_s22  ;;  %v9093_v23 = vld [vmem:[#allocation2 + $0x3c] sm:$0xff]   ;;  %v797_v41 = vsel %vm9856_vm4, %v526_v21, %v796_v15  ;;  %v1983_v36 = vsel %vm14446_vm12, %v1978_v17, %v1982_v16  ;;  %v284_v54 = vsel %vm252_vm10, -1.0, %v9545_v10  ;;  %v285_v55 = vsel %vm253_vm11, -1.0, %v9545_v10  ;;  %v151_v17 = vld [vmem:[%s14435_s0 + $0x70] sm:$0xff] }
  0x74   :  { %v9094_v37 = vld [vmem:[#allocation2 + $0x44] ss:$0 sps:$4 sm:$0x11]   ;;  %v9101_v26 = vld [vmem:[#allocation2 + $0x3c] sm:$0xff]   ;;  %v3761_v27 = vshrl.u32 %v9093_v23, 16  ;;  %v3763_v28 = vshll.u32 %v9093_v23, 16  ;;  %v534_v29 = vor.u32 %v532_v3, %v531_v6  ;;  %v2372_v63 = vsel %vm2357_vm2, %v2370_v40, %v2371_v42 }
  0x75   :  { %798 = vst [vmem:[#allocation2 + $0x48] sm:$0xf] %v797_v41  ;;  %v3768_v30 = vshll.u32 %v9094_v37, 16  ;;  %v9095_v31 = vld [vmem:[#allocation2 + $0x3c] sm:$0xfe]   ;;  %v536_v35 = vrot.slane %v531_v6, 4 }
  0x76   :  { %3022 = vrot.lane.b32.xlu0 %v2871_v4, %s9552_s29  ;;  %v9096_v32 = vld [vmem:[#allocation2 + $0x44] ss:$0 sps:$4 sm:$0x11]   ;;  %v3765_v33 = vrot.slane %v3763_v28, 1  ;;  %v535_v34 = vsel %vm9849_vm15, %v527_v24, %v534_v29  ;;  %v2873_v49 = vshrl.u32 %v9101_v26, 16  ;;  %v2875_v51 = vshll.u32 %v9101_v26, 16 }
  0x77   :  { %3311 = vrot.lane.b32.xlu1 %v3268_v13, %s9550_s23  ;;  %v3770_v38 = vrot.slane %v3768_v30, 1  ;;  %799 = vst.msk [vmem:[#allocation2 + $0x4c] sm:$0xf] %vm27_vm0, %v535_v34  ;;  %v9102_v43 = vld [vmem:[#allocation2 + $0x44] ss:$0 sps:$4 sm:$0x11]   ;;  %v801_v46 = vsel %vm9880_vm9, %v536_v35, %v800_v25 }
  0x78   :  { %v3766_v45 = vor.u32 %v3765_v33, %v3761_v27  ;;  %802 = vst [vmem:[#allocation2 + $0x50] sm:$0x1] %v801_v46  ;;  %v2880_v52 = vshll.u32 %v9102_v43, 16  ;;  %v9108_v53 = vld [vmem:[#allocation2 + $0x3c] sm:$0xff]   ;;  %v3269_v58 = vrot.slane %v9095_v31, 1  ;;  %v3270_v59 = vrot.slane %v9096_v32, 1 }
  0x79   :  { %v9092_v56 = vld [vmem:[#allocation2 + $0x3c] sm:$0xff]   ;;  %v2877_v61 = vrot.slane %v2875_v51, 1  ;;  %v9104_v2 = vld [vmem:[#allocation2 + $0x44] ss:$0 sps:$4 sm:$0x11]   ;;  %v1985_v7 = vshrl.u32 %v9108_v53, 16 }
  0x7a   :  { %3489 = vrot.lane.b32.xlu0 %v9086_v22, %s9548_s21  ;;  %v3771_v57 = vsel %vm14446_vm12, %v3766_v45, %v3770_v38  ;;  %v9103_v62 = vld [vmem:[#allocation2 + $0x3c] sm:$0xfe]   ;;  %v2882_v1 = vrot.slane %v2880_v52, 1  ;;  %v9109_v8 = vld [vmem:[#allocation2 + $0x44] ss:$0 sps:$4 sm:$0x11]   ;;  %v3271_v11 = vsel %vm2357_vm2, %v3269_v58, %v3270_v59 }
  0x7b   :  { %3922 = vrot.lane.b32.xlu1 %v3771_v57, %s9551_s24  ;;  %v2878_v50 = vor.u32 %v2877_v61, %v2873_v49  ;;  %v1987_v48 = vshll.u32 %v9108_v53, 16  ;;  %v316_v4 = vsel %vm220_vm13, 1.0, %v284_v54  ;;  %v2373_v5 = vrot.slane %v9103_v62, 1  ;;  %v803_v31 = vld [vmem:[#allocation2 + $0x54] sm:$0xf]  ;;  %v152_v32 = vld [vmem:[%s14435_s0 + $0x78] sm:$0xff] }
  0x7c   :  { %v1992_v15 = vshll.u32 %v9109_v8, 16  ;;  %v8965_v16 = vpack.c.bf16 %v316_v4, %v316_v4  ;;  %v2374_v23 = vrot.slane %v9104_v2, 1  ;;  %v317_v25 = vsel %vm221_vm14, 1.0, %v285_v55  ;;  %v9158_v9 = vld [vmem:[%s14437_s1 + $0x18] sm:$0xff]   ;;  %v10098_v51 = vld [vmem:[%s14436_s2] ss:$0 sm:$0xff] }
  0x7d   :  { %v1989_v14 = vrot.slane %v1987_v48, 1  ;;  %v2883_v19 = vsel %vm14446_vm12, %v2878_v50, %v2882_v1  ;;  %v8966_v30 = vpack.c.bf16 %v317_v25, %v317_v25  ;;  %v807_v49 = vld [vmem:[#allocation2 + $0x5c] sm:$0x1]  ;;  %v190_v52 = vadd.f32 %v10098_v51, %v151_v17  ;;  %7103 = vmatpush1.bf16.msra.mxu0 %v9158_v9  ;;  %9029 = vmatpush1.bf16.msra.mxu1 %v9158_v9 }
  0x7e   :  { %2124 = vrot.lane.b32.xlu0 %v1983_v36, %s9547_s20  ;;  %v9099_v47 = vld [vmem:[#allocation2 + $0x48] sm:$0xff]   ;;  %v538_v26 = vshrl.u32 %v8965_v16, 16  ;;  %v1994_v29 = vrot.slane %v1992_v15, 1  ;;  %v541_v36 = vshll.u32 %v8965_v16, 16  ;;  %v191_v53 = vadd.f32 %v10098_v51, %v152_v32  ;;  %7104 = vmatprep.subr.bf16.mxu0 %v9544_v0 }
  0x7f   :  { %2414 = vrot.lane.b32.xlu1 %v2372_v63, %s9546_s15  ;;  %v9106_v13 = vld [vmem:[#allocation2 + $0x48] sm:$0xff]   ;;  %v9100_v18 = vld [vmem:[#allocation2 + $0x50] ss:$0 sps:$4 sm:$0x11]   ;;  %v3773_v3 = vshrl.u32 %v9099_v47, 16  ;;  %v3775_v20 = vshll.u32 %v9099_v47, 16  ;;  %v1990_v6 = vor.u32 %v1989_v14, %v1985_v7  ;;  %v2375_v54 = vsel %vm2357_vm2, %v2373_v5, %v2374_v23  ;;  %9021 = vmatprep.subr.bf16.mxu1 %v9544_v0 }
  0x80   :  { %v9107_v21 = vld [vmem:[#allocation2 + $0x50] ss:$0 sps:$4 sm:$0x11]   ;;  %v3780_v22 = vshll.u32 %v9100_v18, 16  ;;  %v9105_v24 = vld [vmem:[#allocation2 + $0x48] sm:$0xff]   ;;  %v2887_v60 = vshll.u32 %v9106_v13, 16 }
  0x81   :  { %v3777_v37 = vrot.slane %v3775_v20, 1  ;;  %v2885_v41 = vshrl.u32 %v9106_v13, 16  ;;  %v2892_v28 = vshll.u32 %v9107_v21, 16  ;;  %v540_v35 = vrot.slane %v538_v26, 7  ;;  %v10088_v38 = vld [vmem:[#allocation2 + $0x48] sm:$0xff]  }
  0x82   :  { %2591 = vrot.lane.b32.xlu0 %v9092_v56, %s9549_s22  ;;  %v3782_v27 = vrot.slane %v3780_v22, 1  ;;  %v2889_v34 = vrot.slane %v2887_v60, 1  ;;  %v546_v40 = vshrl.u32 %v8966_v30, 16  ;;  %v549_v42 = vshll.u32 %v8966_v30, 16  ;;  %v9111_v62 = vld [vmem:[#allocation2 + $0x48] sm:$0xff]  }
  0x83   :  { %3024 = vrot.lane.b32.xlu1 %v2883_v19, %s9552_s29  ;;  %v3778_v33 = vor.u32 %v3777_v37, %v3773_v3  ;;  %v543_v45 = vor.u32 %v541_v36, %v540_v35  ;;  %v9113_v46 = vld [vmem:[#allocation2 + $0x50] ss:$0 sps:$4 sm:$0x11]   ;;  %v1995_v55 = vsel %vm14446_vm12, %v1990_v6, %v1994_v29  ;;  %v544_v56 = vrot.slane %v540_v35, 4  ;;  %v9114_v50 = vld [vmem:[#allocation2 + $0x48] sm:$0xfe]  }
  0x84   :  { %v548_v57 = vrot.slane %v546_v40, 7  ;;  %v2890_v58 = vor.u32 %v2889_v34, %v2885_v41  ;;  %v2894_v59 = vrot.slane %v2892_v28, 1  ;;  %v1999_v63 = vshll.u32 %v10088_v38, 16  ;;  %v9115_v2 = vld [vmem:[#allocation2 + $0x50] ss:$0 sps:$4 sm:$0x11]  }
  0x85   :  { %v3783_v43 = vsel %vm14446_vm12, %v3778_v33, %v3782_v27  ;;  %v804_v61 = vsel %vm9856_vm4, %v543_v45, %v803_v31  ;;  %v2004_v8 = vshll.u32 %v9113_v46, 16  ;;  %vm222_vm5 = vcmp.gt.f32.partialorder %v190_v52, 0.0  ;;  %v10125_v20 = vld [vmem:[#allocation2 + $0x48] sm:$0xfe]   ;;  %v810_v27 = vld [vmem:[#allocation2 + $0x60] sm:$0xf] }
  0x86   :  { %3313 = vrot.lane.b32.xlu0 %v3271_v11, %s9550_s23  ;;  %v551_v1 = vor.u32 %v549_v42, %v548_v57  ;;  %805 = vst [vmem:[#allocation2 + $0x54] sm:$0xf] %v804_v61  ;;  %v553_v7 = vrot.slane %v548_v57, 4  ;;  %v3272_v11 = vrot.slane %v9114_v50, 1  ;;  %v3273_v47 = vrot.slane %v9115_v2, 1  ;;  %v154_v60 = vld [vmem:[%s14435_s0 + $0x88] sm:$0xff] }
  0x87   :  { %3491 = vrot.lane.b32.xlu1 %v9105_v24, %s9548_s21  ;;  %v2895_v5 = vsel %vm14446_vm12, %v2890_v58, %v2894_v59  ;;  %vm223_vm6 = vcmp.gt.f32.partialorder %v191_v53, 0.0  ;;  %vm254_vm7 = vcmp.lt.f32.partialorder %v190_v52, 0.0  ;;  %vm255_vm8 = vcmp.lt.f32.partialorder %v191_v53, 0.0  ;;  %v153_v24 = vld [vmem:[%s14435_s0 + $0x80] sm:$0xff]  ;;  %v814_v30 = vld [vmem:[#allocation2 + $0x68] sm:$0x1] }
  0x88   :  { %v552_v48 = vsel %vm9849_vm15, %v544_v56, %v551_v1  ;;  %v808_v4 = vsel %vm9880_vm9, %v553_v7, %v807_v49  ;;  %v286_v13 = vsel %vm254_vm7, -1.0, %v9545_v10  ;;  %v1997_v14 = vshrl.u32 %v10088_v38, 16  ;;  %v10134_v41 = vld [vmem:[#allocation2 + $0x50] ss:$0 sps:$4 sm:$0x11]  }
  0x89   :  { %806 = vst.msk [vmem:[#allocation2 + $0x58] sm:$0xf] %vm27_vm0, %v552_v48  ;;  %809 = vst [vmem:[#allocation2 + $0x5c] sm:$0x1] %v808_v4  ;;  %v2001_v15 = vrot.slane %v1999_v63, 1  ;;  %v287_v16 = vsel %vm255_vm8, -1.0, %v9545_v10  ;;  %v3274_v19 = vsel %vm2357_vm2, %v3272_v11, %v3273_v47  ;;  %v10139_v36 = vadd.f32 %v10098_v51, %v153_v24 }
  0x8a   :  { %3924 = vrot.lane.b32.xlu0 %v3783_v43, %s9551_s24  ;;  %v318_v18 = vsel %vm222_vm5, 1.0, %v286_v13  ;;  %v2006_v3 = vrot.slane %v2004_v8, 1  ;;  %v319_v21 = vsel %vm223_vm6, 1.0, %v287_v16  ;;  %v2376_v31 = vrot.slane %v10125_v20, 1 }
  0x8b   :  { %2126 = vrot.lane.b32.xlu1 %v1995_v55, %s9547_s20  ;;  %v8967_v22 = vpack.c.bf16 %v318_v18, %v318_v18  ;;  %v8968_v23 = vpack.c.bf16 %v319_v21, %v319_v21  ;;  %v2002_v37 = vor.u32 %v2001_v15, %v1997_v14  ;;  %v10142_v38 = vadd.f32 %v10098_v51, %v154_v60 }
  0x8c   :  { %v2377_v56 = vrot.slane %v10134_v41, 1  ;;  %vm224_vm1 = vcmp.gt.f32.partialorder %v10139_v36, 0.0  ;;  %vm256_vm10 = vcmp.lt.f32.partialorder %v10139_v36, 0.0  ;;  %v9167_v36 = vld [vmem:[%s14437_s1 + $0x28] sm:$0xff]   ;;  %vm14487_vm13 = vcmask 130048  }
  0x8d   :  { %v555_v6 = vshrl.u32 %v8967_v22, 16  ;;  %v558_v17 = vshll.u32 %v8967_v22, 16  ;;  %v563_v25 = vshrl.u32 %v8968_v23, 16  ;;  %v566_v26 = vshll.u32 %v8968_v23, 16  ;;  %v9162_v22 = vld [vmem:[%s14437_s1 + $0x20] sm:$0xff]  }
  0x8e   :  { %2416 = vrot.lane.b32.xlu0 %v2375_v54, %s9546_s15  ;;  %v2007_v40 = vsel %vm14446_vm12, %v2002_v37, %v2006_v3  ;;  %vm225_vm3 = vcmp.gt.f32.partialorder %v10142_v38, 0.0  ;;  %v2378_v23 = vsel %vm2357_vm2, %v2376_v31, %v2377_v56  ;;  %vm257_vm11 = vcmp.lt.f32.partialorder %v10142_v38, 0.0  ;;  %7105 = vmatpush1.bf16.msra.mxu0 %v9162_v22 }
  0x8f   :  { %2593 = vrot.lane.b32.xlu1 %v9111_v62, %s9549_s22  ;;  %v557_v29 = vrot.slane %v555_v6, 7  ;;  %v565_v32 = vrot.slane %v563_v25, 7  ;;  %9030 = vmatpush1.bf16.msra.mxu1 %v9162_v22  ;;  %vm2164_vm14 = vcmask 261248   ;;  %vm14444_vm5 = vcmask 392448  }
  0x90   :  { %v9110_v28 = vld [vmem:[#allocation2 + $0x54] sm:$0xff]   ;;  %v9118_v34 = vld [vmem:[#allocation2 + $0x5c] ss:$0 sps:$4 sm:$0x11]   ;;  %7106 = vmatprep.subr.bf16.mxu0 %v9544_v0  ;;  %9022 = vmatprep.subr.bf16.mxu1 %v9544_v0  ;;  %vm14443_vm6 = vcmask 523648  }
  0x91   :  { %v9117_v33 = vld [vmem:[#allocation2 + $0x54] sm:$0xff]   ;;  %v560_v35 = vor.u32 %v558_v17, %v557_v29  ;;  %v561_v9 = vrot.slane %v557_v29, 4  ;;  %v568_v43 = vor.u32 %v566_v26, %v565_v32  ;;  %v570_v45 = vrot.slane %v565_v32, 4  ;;  %v9120_v54 = vld [vmem:[#allocation2 + $0x5c] ss:$0 sps:$4 sm:$0x11]  }
  0x92   :  { %3026 = vrot.lane.b32.xlu0 %v2895_v5, %s9552_s29  ;;  %v9119_v42 = vld [vmem:[#allocation2 + $0x54] sm:$0xfe]   ;;  %v3785_v49 = vshrl.u32 %v9117_v33, 16  ;;  %v3787_v52 = vshll.u32 %v9117_v33, 16  ;;  %v3792_v53 = vshll.u32 %v9118_v34, 16  ;;  %v3276_v2 = vrot.slane %v9120_v54, 1  ;;  %7107 = vmatpush1.bf16.msra.mxu0 %v9167_v36 }
  0x93   :  { %3315 = vrot.lane.b32.xlu1 %v3274_v19, %s9550_s23  ;;  %v9116_v46 = vld [vmem:[#allocation2 + $0x54] sm:$0xff]   ;;  %v811_v55 = vsel %vm9856_vm4, %v560_v35, %v810_v27  ;;  %v569_v57 = vsel %vm9849_vm15, %v561_v9, %v568_v43  ;;  %v815_v58 = vsel %vm9880_vm9, %v570_v45, %v814_v30  ;;  %v3275_v50 = vrot.slane %v9119_v42, 1  ;;  %v9126_v1 = vld [vmem:[#allocation2 + $0x5c] ss:$0 sps:$4 sm:$0x11]   ;;  %v9144_v45 = vld [vmem:[#allocation2] sm:$0xff]   ;;  %7108 = vmatprep.subr.bf16.mxu0 %v9544_v0 }
  0x94   :  { %812 = vst [vmem:[#allocation2 + $0x60] sm:$0xf] %v811_v55  ;;  %v9125_v59 = vld [vmem:[#allocation2 + $0x54] sm:$0xff]   ;;  %v3789_v62 = vrot.slane %v3787_v52, 1  ;;  %v3794_v63 = vrot.slane %v3792_v53, 1  ;;  %v2904_v11 = vshll.u32 %v9126_v1, 16  ;;  %9031 = vmatpush1.bf16.msra.mxu1 %v9167_v36 }
  0x95   :  { %813 = vst.msk [vmem:[#allocation2 + $0x64] sm:$0xf] %vm27_vm0, %v569_v57  ;;  %816 = vst [vmem:[#allocation2 + $0x68] sm:$0x1] %v815_v58  ;;  %v2899_v7 = vshll.u32 %v9125_v59, 16  ;;  %v2897_v48 = vshrl.u32 %v9125_v59, 16  ;;  %v3277_v16 = vsel %vm2357_vm2, %v3275_v50, %v3276_v2  ;;  %9023 = vmatprep.subr.bf16.mxu1 %v9544_v0 }
  0x96   :  { %3493 = vrot.lane.b32.xlu0 %v9110_v28, %s9548_s21  ;;  %v3790_v8 = vor.u32 %v3789_v62, %v3785_v49  ;;  %v9127_v47 = vld [vmem:[#allocation2 + $0x54] sm:$0xfe]   ;;  %v2906_v14 = vrot.slane %v2904_v11, 1  ;;  %v9128_v18 = vld [vmem:[#allocation2 + $0x5c] ss:$0 sps:$4 sm:$0x11]  }
  0x97   :  { %v2901_v4 = vrot.slane %v2899_v7, 1  ;;  %v9132_v5 = vld [vmem:[#allocation2 + $0x54] sm:$0xff]   ;;  %v2379_v15 = vrot.slane %v9127_v47, 1  ;;  %v9133_v3 = vld [vmem:[#allocation2 + $0x5c] ss:$0 sps:$4 sm:$0x11]  }
  0x98   :  { %v3795_v13 = vsel %vm14446_vm12, %v3790_v8, %v3794_v63  ;;  %v2009_v19 = vshrl.u32 %v9132_v5, 16  ;;  %v2011_v20 = vshll.u32 %v9132_v5, 16  ;;  %v2016_v29 = vshll.u32 %v9133_v3, 16  ;;  %v10201_v7 = vld [vmem:[%s14436_s2] ss:$0 sm:$0xff]  ;;  %1731 = vst.msk [vmem:[#allocation3] sm:$0xff] %vm14487_vm13, %v9144_v45 }
  0x99   :  { %3926 = vrot.lane.b32.xlu1 %v3795_v13, %s9551_s24  ;;  %v2902_v24 = vor.u32 %v2901_v4, %v2897_v48  ;;  %v2380_v31 = vrot.slane %v9128_v18, 1  ;;  %v288_v32 = vsel %vm256_vm10, -1.0, %v9545_v10  ;;  %v289_v33 = vsel %vm257_vm11, -1.0, %v9545_v10  ;;  %v817_v11 = vld [vmem:[#allocation2 + $0x6c] sm:$0xf]  ;;  %v8365_v13 = vld [vmem:[%s14435_s0 + $0x100] sm:$0xff] }
  0x9a   :  { %2128 = vrot.lane.b32.xlu0 %v2007_v40, %s9547_s20  ;;  %v2013_v17 = vrot.slane %v2011_v20, 1  ;;  %v320_v52 = vsel %vm224_vm1, 1.0, %v288_v32  ;;  %v321_v53 = vsel %vm225_vm3, 1.0, %v289_v33  ;;  %v2018_v56 = vrot.slane %v2016_v29, 1  ;;  %v8366_v3 = vld [vmem:[%s14435_s0 + $0x108] sm:$0xff]  ;;  %v156_v20 = vld [vmem:[%s14435_s0 + $0x98] sm:$0xff] }
  0x9b   :  { %v2907_v26 = vsel %vm14446_vm12, %v2902_v24, %v2906_v14  ;;  %v8969_v57 = vpack.c.bf16 %v320_v52, %v320_v52  ;;  %v8970_v58 = vpack.c.bf16 %v321_v53, %v321_v53  ;;  %v2381_v62 = vsel %vm2357_vm2, %v2379_v15, %v2380_v31 }
  0x9c   :  { %v9123_v60 = vld [vmem:[#allocation2 + $0x60] sm:$0xff]   ;;  %v9124_v6 = vld [vmem:[#allocation2 + $0x68] ss:$0 sps:$4 sm:$0x11]   ;;  %v2014_v43 = vor.u32 %v2013_v17, %v2009_v19  ;;  %v155_v19 = vld [vmem:[%s14435_s0 + $0x90] sm:$0xff]  ;;  %v913_v31 = vadd.f32 %v10201_v7, %v8365_v13  ;;  %v914_v45 = vadd.f32 %v10201_v7, %v8366_v3  ;;  %v10259_v52 = vadd.f32 %v10098_v51, %v156_v20 }
  0x9d   :  { %2418 = vrot.lane.b32.xlu1 %v2378_v23, %s9546_s15  ;;  %v3797_v37 = vshrl.u32 %v9123_v60, 16  ;;  %v3799_v41 = vshll.u32 %v9123_v60, 16  ;;  %v3804_v25 = vshll.u32 %v9124_v6, 16  ;;  %v9130_v27 = vld [vmem:[#allocation2 + $0x60] sm:$0xff]   ;;  %v572_v50 = vshrl.u32 %v8969_v57, 16  ;;  %v10225_v6 = vld [vmem:[#allocation2 + $0xd8] sm:$0xff]  }
  0x9e   :  { %2595 = vrot.lane.b32.xlu0 %v9116_v46, %s9549_s22  ;;  %v9131_v28 = vld [vmem:[#allocation2 + $0x68] ss:$0 sps:$4 sm:$0x11]   ;;  %v9129_v40 = vld [vmem:[#allocation2 + $0x60] sm:$0xff]   ;;  %v2911_v42 = vshll.u32 %v9130_v27, 16  ;;  %v2909_v49 = vshrl.u32 %v9130_v27, 16  ;;  %v2019_v14 = vsel %vm14446_vm12, %v2014_v43, %v2018_v56 }
  0x9f   :  { %v3801_v30 = vrot.slane %v3799_v41, 1  ;;  %v3806_v35 = vrot.slane %v3804_v25, 1  ;;  %v2916_v9 = vshll.u32 %v9131_v28, 16  ;;  %v10188_v54 = vld [vmem:[#allocation2 + $0x60] sm:$0xff]   ;;  %v575_v1 = vshll.u32 %v8969_v57, 16 }
  0xa0   :  { %v2913_v55 = vrot.slane %v2911_v42, 1  ;;  %v10192_v63 = vld [vmem:[#allocation2 + $0x68] ss:$0 sps:$4 sm:$0x11]   ;;  %v580_v2 = vshrl.u32 %v8970_v58, 16  ;;  %v583_v48 = vshll.u32 %v8970_v58, 16 }
  0xa1   :  { %v3802_v46 = vor.u32 %v3801_v30, %v3797_v37  ;;  %3028 = vrot.lane.b32.xlu1 %v2907_v26, %s9552_s29  ;;  %v2918_v38 = vrot.slane %v2916_v9, 1  ;;  %v2023_v47 = vshll.u32 %v10188_v54, 16  ;;  %v574_v15 = vrot.slane %v572_v50, 7  ;;  %v9138_v18 = vld [vmem:[#allocation2 + $0x60] sm:$0xfe]   ;;  %v9176_v58 = vld [vmem:[#allocation2 + $0x18] sm:$0xff]  }
  0xa2   :  { %3317 = vrot.lane.b32.xlu0 %v3277_v16, %s9550_s23  ;;  %v2914_v8 = vor.u32 %v2913_v55, %v2909_v49  ;;  %v582_v16 = vrot.slane %v580_v2, 7  ;;  %v9135_v22 = vld [vmem:[#allocation2 + $0x60] sm:$0xff]   ;;  %v2028_v23 = vshll.u32 %v10192_v63, 16  ;;  %v9139_v24 = vld [vmem:[#allocation2 + $0x68] ss:$0 sps:$4 sm:$0x11]   ;;  %v10256_v49 = vadd.f32 %v10098_v51, %v155_v19 }
  0xa3   :  { %v3807_v59 = vsel %vm14446_vm12, %v3802_v46, %v3806_v35  ;;  %v821_v60 = vld [vmem:[#allocation2 + $0x74] sm:$0x1]  ;;  %v10227_v17 = vld [vmem:[#allocation2 + $0xe0] ss:$0 sps:$4 sm:$0x11]   ;;  %v577_v37 = vor.u32 %v575_v1, %v574_v15  ;;  %v578_v41 = vrot.slane %v574_v15, 4 }
  0xa4   :  { %v585_v25 = vor.u32 %v583_v48, %v582_v16  ;;  %v3278_v26 = vrot.slane %v9138_v18, 1  ;;  %v2919_v27 = vsel %vm14446_vm12, %v2914_v8, %v2918_v38  ;;  %v3279_v28 = vrot.slane %v9139_v24, 1  ;;  %v10233_v29 = vld [vmem:[#allocation2 + $0x60] sm:$0xfe]   ;;  %v10246_v42 = vld [vmem:[#allocation2 + $0xd8] sm:$0xfe]  }
  0xa5   :  { %3495 = vrot.lane.b32.xlu1 %v9129_v40, %s9548_s21  ;;  %v10235_v30 = vld [vmem:[#allocation2 + $0x68] ss:$0 sps:$4 sm:$0x11]   ;;  %v818_v33 = vsel %vm9856_vm4, %v577_v37, %v817_v11  ;;  %v587_v35 = vrot.slane %v582_v16, 4  ;;  %v2021_v40 = vshrl.u32 %v10188_v54, 16  ;;  %v2025_v53 = vrot.slane %v2023_v47, 1 }
  0xa6   :  { %3928 = vrot.lane.b32.xlu0 %v3807_v59, %s9551_s24  ;;  %v586_v32 = vsel %vm9849_vm15, %v578_v41, %v585_v25  ;;  %819 = vst [vmem:[#allocation2 + $0x6c] sm:$0xf] %v818_v33  ;;  %v10248_v9 = vld [vmem:[#allocation2 + $0xe0] ss:$0 sps:$4 sm:$0x11]   ;;  %v9171_v55 = vld [vmem:[%s14437_s1 + $0x30] sm:$0xff]   ;;  %v3280_v56 = vsel %vm2357_vm2, %v3278_v26, %v3279_v28 }
  0xa7   :  { %820 = vst.msk [vmem:[#allocation2 + $0x70] sm:$0xf] %vm27_vm0, %v586_v32  ;;  %v822_v54 = vsel %vm9880_vm9, %v587_v35, %v821_v60  ;;  %v4562_v51 = vshll.u32 %v10225_v6, 16  ;;  %v4567_v57 = vshll.u32 %v10227_v17, 16  ;;  %v2382_v59 = vrot.slane %v10233_v29, 1  ;;  %7109 = vmatpush1.bf16.msra.mxu0 %v9171_v55  ;;  %9032 = vmatpush1.bf16.msra.mxu1 %v9171_v55  ;;  %v9177_v38 = vld [vmem:[#allocation2 + $0xc] sm:$0xff]  }
  0xa8   :  { %823 = vst [vmem:[#allocation2 + $0x74] sm:$0x1] %v822_v54  ;;  %v4560_v63 = vshrl.u32 %v10225_v6, 16  ;;  %vm945_vm7 = vcmp.gt.f32.partialorder %v913_v31, 0.0  ;;  %v4991_v36 = vrot.slane %v10246_v42, 1  ;;  %vm946_vm8 = vcmp.gt.f32.partialorder %v914_v45, 0.0  ;;  %7110 = vmatprep.subr.bf16.mxu0 %v9544_v0  ;;  %9024 = vmatprep.subr.bf16.mxu1 %v9544_v0 }
  0xa9   :  { %2130 = vrot.lane.b32.xlu1 %v2019_v14, %s9547_s20  ;;  %vm977_vm1 = vcmp.lt.f32.partialorder %v913_v31, 0.0  ;;  %vm978_vm3 = vcmp.lt.f32.partialorder %v914_v45, 0.0  ;;  %1733 = vst.msk [vmem:[#allocation3 + $0x20] sm:$0xff] %vm14487_vm13, %v9176_v58  ;;  %v2026_v50 = vor.u32 %v2025_v53, %v2021_v40  ;;  %v4992_v1 = vrot.slane %v10248_v9, 1  ;;  %v9178_v48 = vld [vmem:[%s14437_s1 + $0x38] sm:$0xff]   ;;  %1732 = vst.msk [vmem:[#allocation3 + $0x10] sm:$0xff] %vm14487_vm13, %v9177_v38 }
  0xaa   :  { %2420 = vrot.lane.b32.xlu0 %v2381_v62, %s9546_s15  ;;  %v2383_v62 = vrot.slane %v10235_v30, 1  ;;  %v1009_v2 = vsel %vm977_vm1, -1.0, %v9545_v10  ;;  %v1010_v8 = vsel %vm978_vm3, -1.0, %v9545_v10  ;;  %v4564_v11 = vrot.slane %v4562_v51, 1  ;;  %v8367_v60 = vld [vmem:[%s14435_s0 + $0x110] sm:$0xff]  ;;  %v8368_v28 = vld [vmem:[%s14435_s0 + $0x118] sm:$0xff] }
  0xab   :  { %v4569_v47 = vrot.slane %v4567_v57, 1  ;;  %vm258_vm10 = vcmp.lt.f32.partialorder %v10256_v49, 0.0  ;;  %v1042_v15 = vsel %vm946_vm8, 1.0, %v1010_v8  ;;  %vm226_vm11 = vcmp.gt.f32.partialorder %v10256_v49, 0.0  ;;  %7111 = vmatpush1.bf16.msra.mxu0 %v9178_v48  ;;  %9033 = vmatpush1.bf16.msra.mxu1 %v9178_v48 }
  0xac   :  { %vm227_vm1 = vcmp.gt.f32.partialorder %v10259_v52, 0.0  ;;  %vm259_vm3 = vcmp.lt.f32.partialorder %v10259_v52, 0.0  ;;  %7112 = vmatprep.subr.bf16.mxu0 %v9544_v0  ;;  %9025 = vmatprep.subr.bf16.mxu1 %v9544_v0  ;;  %v290_v20 = vsel %vm258_vm10, -1.0, %v9545_v10  ;;  %v4565_v17 = vor.u32 %v4564_v11, %v4560_v63  ;;  %v1494_v11 = vld [vmem:[#allocation2 + $0xec] sm:$0x1] }
  0xad   :  { %v10152_v61 = vpop.permute.xlu0 %2406  ;;  %2597 = vrot.lane.b32.xlu1 %v9135_v22, %s9549_s22  ;;  %v8986_v25 = vpack.c.bf16 %v1042_v15, %v1042_v15  ;;  %v2384_v33 = vsel %vm2357_vm2, %v2382_v59, %v2383_v62  ;;  %v10323_v51 = vadd.f32 %v10201_v7, %v8367_v60  ;;  %v291_v59 = vsel %vm259_vm3, -1.0, %v9545_v10 }
  0xae   :  { %3030 = vrot.lane.b32.xlu0 %v2919_v27, %s9552_s29  ;;  %v9134_v14 = vld [vmem:[#allocation2 + $0x6c] sm:$0xff]   ;;  %v4570_v53 = vsel %vm14446_vm12, %v4565_v17, %v4569_v47  ;;  %v10336_v47 = vadd.f32 %v10201_v7, %v8368_v28  ;;  %v4993_v52 = vsel %vm2357_vm2, %v4991_v36, %v4992_v1  ;;  %vm3353_vm3 = vcmask 786048  }
  0xaf   :  { %v9142_v16 = vld [vmem:[#allocation2 + $0x6c] sm:$0xff]   ;;  %v9143_v3 = vld [vmem:[#allocation2 + $0x74] ss:$0 sps:$4 sm:$0x11]   ;;  %v1178_v63 = vshrl.u32 %v8986_v25, 16  ;;  %v1181_v48 = vshll.u32 %v8986_v25, 16 }
  0xb0   :  { %v3811_v24 = vshll.u32 %v9142_v16, 16  ;;  %v3816_v6 = vshll.u32 %v9143_v3, 16  ;;  %v9150_v37 = vld [vmem:[#allocation2 + $0x6c] sm:$0xff]   ;;  %v9151_v41 = vld [vmem:[#allocation2 + $0x74] ss:$0 sps:$4 sm:$0x11]  }
  0xb1   :  { %v10163_v21 = vpop.permute.xlu0 %2116  ;;  %3319 = vrot.lane.b32.xlu1 %v3280_v56, %s9550_s23  ;;  %v2921_v30 = vshrl.u32 %v9150_v37, 16  ;;  %v2923_v31 = vshll.u32 %v9150_v37, 16  ;;  %v2928_v40 = vshll.u32 %v9151_v41, 16  ;;  %v9155_v54 = vld [vmem:[#allocation2 + $0x6c] sm:$0xfe]   ;;  %v322_v3 = vsel %vm226_vm11, 1.0, %v290_v20 }
  0xb2   :  { %2165 = vst.msk [vmem:[#allocation3] sm:$0xff] %vm2164_vm14, %v10163_v21  ;;  %v2030_v21 = vrot.slane %v2028_v23, 1  ;;  %3497 = vrot.lane.b32.xlu0 %v9134_v14, %s9548_s21  ;;  %v3809_v23 = vshrl.u32 %v9142_v16, 16  ;;  %v3813_v0 = vrot.slane %v3811_v24, 1  ;;  %v3818_v29 = vrot.slane %v3816_v6, 1 }
  0xb3   :  { %2455 = vst.msk [vmem:[#allocation3] sm:$0xff] %vm14444_vm5, %v10152_v61  ;;  %v9156_v55 = vld [vmem:[#allocation2 + $0x74] ss:$0 sps:$4 sm:$0x11]   ;;  %v1490_v56 = vld [vmem:[#allocation2 + $0xe4] sm:$0xf]  ;;  %v8971_v24 = vpack.c.bf16 %v322_v3, %v322_v3 }
  0xb4   :  { %v2031_v22 = vsel %vm14446_vm12, %v2026_v50, %v2030_v21  ;;  %v3814_v35 = vor.u32 %v3813_v0, %v3809_v23  ;;  %v2925_v21 = vrot.slane %v2923_v31, 1  ;;  %v9146_v50 = vld [vmem:[#allocation2 + $0x6c] sm:$0xff]   ;;  %v2930_v8 = vrot.slane %v2928_v40, 1  ;;  %v10345_v60 = vld [vmem:[#allocation2 + $0x74] ss:$0 sps:$4 sm:$0x11]  }
  0xb5   :  { %v10181_v34 = vpop.permute.xlu0 %3485  ;;  %v10205_v4 = vpop.permute.xlu1 %2583  ;;  %v1180_v16 = vrot.slane %v1178_v63, 7  ;;  %v323_v23 = vsel %vm227_vm1, 1.0, %v291_v59  ;;  %v589_v20 = vshrl.u32 %v8971_v24, 16  ;;  %v592_v28 = vshll.u32 %v8971_v24, 16 }
  0xb6   :  { %2632 = vst.msk [vmem:[#allocation3] sm:$0xff] %vm14443_vm6, %v10205_v4  ;;  %v1041_v4 = vsel %vm945_vm7, 1.0, %v1009_v2  ;;  %2132 = vrot.lane.b32.xlu0 %v2031_v22, %s9547_s20  ;;  %v3819_v57 = vsel %vm14446_vm12, %v3814_v35, %v3818_v29  ;;  %v2926_v2 = vor.u32 %v2925_v21, %v2921_v30  ;;  %v3282_v22 = vrot.slane %v9156_v55, 1  ;;  %v10357_v29 = vld [vmem:[#allocation2 + $0x6c] sm:$0xff]  }
  0xb7   :  { %v8985_v19 = vpack.c.bf16 %v1041_v4, %v1041_v4  ;;  %3930 = vrot.lane.b32.xlu1 %v3819_v57, %s9551_s24  ;;  %v9182_v4 = vld [vmem:[%s14437_s1 + $0x40] sm:$0xff]   ;;  %v1183_v6 = vor.u32 %v1181_v48, %v1180_v16  ;;  %v8972_v37 = vpack.c.bf16 %v323_v23, %v323_v23  ;;  %v1185_v0 = vrot.slane %v1180_v16, 4 }
  0xb8   :  { %7113 = vmatpush1.bf16.msra.mxu0 %v9182_v4  ;;  %9034 = vmatpush1.bf16.msra.mxu1 %v9182_v4  ;;  %v2931_v49 = vsel %vm14446_vm12, %v2926_v2, %v2930_v8  ;;  %v591_v36 = vrot.slane %v589_v20, 7  ;;  %v2033_v1 = vshrl.u32 %v10357_v29, 16  ;;  %vm947_vm7 = vcmp.gt.f32.partialorder %v10323_v51, 0.0 }
  0xb9   :  { %v10207_v5 = vpop.permute.xlu0 %2587  ;;  %v1170_v32 = vshrl.u32 %v8985_v19, 16  ;;  %v1173_v45 = vshll.u32 %v8985_v19, 16  ;;  %v3281_v19 = vrot.slane %v9155_v54, 1  ;;  %v597_v31 = vshrl.u32 %v8972_v37, 16 }
  0xba   :  { %2422 = vrot.lane.b32.xlu0 %v2384_v33, %s9546_s15  ;;  %v1495_v9 = vsel %vm9880_vm9, %v1185_v0, %v1494_v11  ;;  %v824_v33 = vld [vmem:[#allocation2 + $0x78] sm:$0xf]  ;;  %vm948_vm8 = vcmp.gt.f32.partialorder %v10336_v47, 0.0  ;;  %vm979_vm10 = vcmp.lt.f32.partialorder %v10323_v51, 0.0  ;;  %vm980_vm11 = vcmp.lt.f32.partialorder %v10336_v47, 0.0 }
  0xbb   :  { %v1172_v58 = vrot.slane %v1170_v32, 7  ;;  %4751 = vrot.lane.b32.xlu1 %v4570_v53, %s9547_s20  ;;  %v600_v32 = vshll.u32 %v8972_v37, 16  ;;  %v3283_v42 = vsel %vm2357_vm2, %v3281_v19, %v3282_v22  ;;  %1496 = vst [vmem:[#allocation2 + $0xec] sm:$0x1] %v1495_v9  ;;  %v594_v35 = vor.u32 %v592_v28, %v591_v36  ;;  %v9197_v53 = vld [vmem:[#allocation2 + $0x24] sm:$0xff]  }
  0xbc   :  { %v595_v40 = vrot.slane %v591_v36, 4  ;;  %v1011_v55 = vsel %vm979_vm10, -1.0, %v9545_v10  ;;  %1734 = vst.msk [vmem:[#allocation3 + $0x30] sm:$0xff] %vm14487_vm13, %v9197_v53  ;;  %vm3064_vm1 = vcmask 654848   ;;  %v1501_v28 = vld [vmem:[#allocation2 + $0xf8] sm:$0x1] }
  0xbd   :  { %v10250_v43 = vpop.permute.xlu1 %3483  ;;  %v10253_v46 = vpop.permute.xlu0 %3305  ;;  %v1175_v14 = vor.u32 %v1173_v45, %v1172_v58  ;;  %v1176_v15 = vrot.slane %v1172_v58, 4  ;;  %v828_v45 = vld [vmem:[#allocation2 + $0x80] sm:$0x1]  ;;  %v825_v57 = vsel %vm9856_vm4, %v594_v35, %v824_v33  ;;  %v1043_v58 = vsel %vm947_vm7, 1.0, %v1011_v55 }
  0xbe   :  { %2599 = vrot.lane.b32.xlu0 %v9146_v50, %s9549_s22  ;;  %826 = vst [vmem:[#allocation2 + $0x78] sm:$0xf] %v825_v57  ;;  %v8987_v2 = vpack.c.bf16 %v1043_v58, %v1043_v58  ;;  %vm3531_vm7 = vcmask 917248   ;;  %v9173_v35 = vld [vmem:[#allocation2 + $0x74] ss:$0 sps:$4 sm:$0x11]  }
  0xbf   :  { %v1491_v17 = vsel %vm9856_vm4, %v1175_v14, %v1490_v56  ;;  %v1184_v30 = vsel %vm9849_vm15, %v1176_v15, %v1183_v6  ;;  %5039 = vrot.lane.b32.xlu1 %v4993_v52, %s9546_s15  ;;  %v1012_v56 = vsel %vm980_vm11, -1.0, %v9545_v10  ;;  %v1497_v6 = vld [vmem:[#allocation2 + $0xf0] sm:$0xf] }
  0xc0   :  { %1492 = vst [vmem:[#allocation2 + $0xe4] sm:$0xf] %v1491_v17  ;;  %1493 = vst.msk [vmem:[#allocation2 + $0xe8] sm:$0xf] %vm27_vm0, %v1184_v30  ;;  %v1044_v63 = vsel %vm948_vm8, 1.0, %v1012_v56  ;;  %vm14445_vm8 = vcmask 1048448  }
  0xc1   :  { %v10279_v61 = vpop.permute.xlu1 %2585  ;;  %v10293_v13 = vpop.permute.xlu0 %2408  ;;  %v8988_v48 = vpack.c.bf16 %v1044_v63, %v1044_v63  ;;  %v1187_v11 = vshrl.u32 %v8987_v2, 16  ;;  %v1190_v19 = vshll.u32 %v8987_v2, 16 }
  0xc2   :  { %3032 = vrot.lane.b32.xlu0 %v2931_v49, %s9552_s29  ;;  %v9161_v14 = vld [vmem:[#allocation2 + $0xec] ss:$0 sps:$4 sm:$0x11]  }
  0xc3   :  { %v5463_v16 = vshll.u32 %v9161_v14, 16  ;;  %v9166_v3 = vld [vmem:[#allocation2 + $0xec] ss:$0 sps:$4 sm:$0x11]   ;;  %v1195_v22 = vshrl.u32 %v8988_v48, 16  ;;  %v1198_v20 = vshll.u32 %v8988_v48, 16 }
  0xc4   :  { %v5888_v17 = vrot.slane %v9166_v3, 1  ;;  %v9181_v55 = vld [vmem:[#allocation2 + $0xec] ss:$0 sps:$4 sm:$0x11]  }
  0xc5   :  { %v10300_v18 = vpop.permute.xlu1 %3307  ;;  %v5465_v24 = vrot.slane %v5463_v16, 1  ;;  %v1197_v52 = vrot.slane %v1195_v22, 7 }
  0xc6   :  { %3321 = vrot.lane.b32.xlu0 %v3283_v42, %s9550_s23 }
  0xc7   :  { %v10314_v27 = vpop.permute.xlu0 %3916  ;;  %v9157_v51 = vld [vmem:[#allocation2 + $0xe4] sm:$0xff]   ;;  %v1202_v53 = vrot.slane %v1197_v52, 4 }
  0xc8   :  { %v9160_v4 = vld [vmem:[#allocation2 + $0xe4] sm:$0xff]   ;;  %5215 = vrot.lane.b32.xlu1 %v9157_v51, %s9549_s22 }
  0xc9   :  { %v10312_v26 = vpop.permute.xlu1 %2410  ;;  %v9165_v15 = vld [vmem:[#allocation2 + $0xe4] sm:$0xfe]   ;;  %v1502_v58 = vsel %vm9880_vm9, %v1202_v53, %v1501_v28  ;;  %v9186_v28 = vld [vmem:[#allocation2 + $0xec] ss:$0 sps:$4 sm:$0x11]  }
  0xca   :  { %v10420_v42 = vld [vmem:[#allocation2 + $0xe4] sm:$0xff]   ;;  %1503 = vst [vmem:[#allocation2 + $0xf8] sm:$0x1] %v1502_v58 }
  0xcb   :  { %v10331_v38 = vpop.permute.xlu0 %3018  ;;  %v4574_v56 = vshll.u32 %v10420_v42, 16  ;;  %v4572_v14 = vshrl.u32 %v10420_v42, 16  ;;  %v10455_v16 = vld [vmem:[#allocation2 + $0xe4] sm:$0xfe]  }
  0xcd   :  { %v10329_v62 = vpop.permute.xlu1 %3016 }
  0xce   :  { %3065 = vst.msk [vmem:[#allocation3] sm:$0xff] %vm3064_vm1, %v10329_v62  ;;  %v5456_v62 = vshrl.u32 %v9160_v4, 16 }
  0xcf   :  { %v2121_v41 = vpop.permute.xlu0 %2120  ;;  %3354 = vst.msk [vmem:[#allocation3] sm:$0xff] %vm3353_vm3, %v10253_v46  ;;  %v5887_v46 = vrot.slane %v9165_v15, 1  ;;  %v4576_v15 = vrot.slane %v4574_v56, 1 }
  0xd0   :  { %2167 = vst.msk [vmem:[#allocation3 + $0x20] sm:$0xff] %vm2164_vm14, %v2121_v41 }
  0xd1   :  { %v2119_v25 = vpop.permute.xlu1 %2118  ;;  %2457 = vst.msk [vmem:[#allocation3 + $0x20] sm:$0xff] %vm14444_vm5, %v10312_v26  ;;  %v599_v26 = vrot.slane %v597_v31, 7 }
  0xd2   :  { %2166 = vst.msk [vmem:[#allocation3 + $0x10] sm:$0xff] %vm2164_vm14, %v2119_v25 }
  0xd3   :  { %2456 = vst.msk [vmem:[#allocation3 + $0x10] sm:$0xff] %vm14444_vm5, %v10293_v13  ;;  %v602_v21 = vor.u32 %v600_v32, %v599_v26  ;;  %v604_v54 = vrot.slane %v599_v26, 4  ;;  %v3310_v47 = vpop.permute.xlu0 %3309  ;;  %v1200_v26 = vor.u32 %v1198_v20, %v1197_v52  ;;  %v9187_v20 = vld [vmem:[#allocation2 + $0x18] sm:$0xfe]  }
  0xd4   :  { %2634 = vst.msk [vmem:[#allocation3 + $0x20] sm:$0xff] %vm14443_vm6, %v10207_v5  ;;  %2633 = vst.msk [vmem:[#allocation3 + $0x10] sm:$0xff] %vm14443_vm6, %v10279_v61  ;;  %v2035_v5 = vshll.u32 %v10357_v29, 16  ;;  %v2040_v61 = vshll.u32 %v10345_v60, 16  ;;  %v4579_v29 = vshll.u32 %v9181_v55, 16  ;;  %v4157_v42 = vrot.slane %v9187_v20, 1 }
  0xd5   :  { %v3919_v13 = vpop.permute.xlu1 %3918  ;;  %v603_v59 = vsel %vm9849_vm15, %v595_v40, %v602_v21  ;;  %v829_v50 = vsel %vm9880_vm9, %v604_v54, %v828_v45  ;;  %3066 = vst.msk [vmem:[#allocation3 + $0x10] sm:$0xff] %vm3064_vm1, %v10331_v38  ;;  %v5458_v38 = vshll.u32 %v9160_v4, 16  ;;  %v157_v21 = vld [vmem:[%s14435_s0 + $0xa0] sm:$0xff]  ;;  %v2386_v4 = vrot.slane %v9173_v35, 1 }
  0xd6   :  { %827 = vst.msk [vmem:[#allocation2 + $0x7c] sm:$0xf] %vm27_vm0, %v603_v59  ;;  %830 = vst [vmem:[#allocation2 + $0x80] sm:$0x1] %v829_v50  ;;  %v2037_v49 = vrot.slane %v2035_v5, 1  ;;  %v2042_v36 = vrot.slane %v2040_v61, 1  ;;  %v5889_v5 = vsel %vm2357_vm2, %v5887_v46, %v5888_v17 }
  0xd7   :  { %3355 = vst.msk [vmem:[#allocation3 + $0x10] sm:$0xff] %vm3353_vm3, %v10300_v18  ;;  %v1189_v18 = vrot.slane %v1187_v11, 7  ;;  %v5460_v23 = vrot.slane %v5458_v38, 1 }
  0xd8   :  { %3532 = vst.msk [vmem:[#allocation3] sm:$0xff] %vm3531_vm7, %v10250_v43  ;;  %3533 = vst.msk [vmem:[#allocation3 + $0x10] sm:$0xff] %vm3531_vm7, %v10181_v34  ;;  %v2038_v60 = vor.u32 %v2037_v49, %v2033_v1  ;;  %v158_v1 = vld [vmem:[%s14435_s0 + $0xa8] sm:$0xff] }
  0xd9   :  { %v3021_v8 = vpop.permute.xlu1 %3020  ;;  %3965 = vst.msk [vmem:[#allocation3] sm:$0xff] %vm14445_vm8, %v10314_v27  ;;  %3966 = vst.msk [vmem:[#allocation3 + $0x10] sm:$0xff] %vm14445_vm8, %v3919_v13  ;;  %v1192_v37 = vor.u32 %v1190_v19, %v1189_v18  ;;  %v5461_v34 = vor.u32 %v5460_v23, %v5456_v62  ;;  %v1193_v27 = vrot.slane %v1189_v18, 4  ;;  %v9172_v13 = vld [vmem:[#allocation2 + $0x6c] sm:$0xfe]   ;;  %v4581_v18 = vrot.slane %v4579_v29, 1 }
  0xda   :  { %3067 = vst.msk [vmem:[#allocation3 + $0x20] sm:$0xff] %vm3064_vm1, %v3021_v8  ;;  %v10449_v8 = vld [vmem:[%s14436_s2] ss:$0 sm:$0xff]  ;;  %v2043_v11 = vsel %vm14446_vm12, %v2038_v60, %v2042_v36  ;;  %v4995_v29 = vrot.slane %v9186_v28, 1 }
  0xdb   :  { %3356 = vst.msk [vmem:[#allocation3 + $0x20] sm:$0xff] %vm3353_vm3, %v3310_v47  ;;  %v5466_v30 = vsel %vm14446_vm12, %v5461_v34, %v5465_v24  ;;  %v1498_v33 = vsel %vm9856_vm4, %v1192_v37, %v1497_v6  ;;  %v1201_v61 = vsel %vm9849_vm15, %v1193_v27, %v1200_v26  ;;  %v196_v51 = vadd.f32 %v10449_v8, %v157_v21  ;;  %v9175_v37 = vld [vmem:[#allocation2 + $0xf8] ss:$0 sps:$4 sm:$0x11]  }
  0xdc   :  { %5647 = vrot.lane.b32.xlu1 %v5466_v30, %s9552_s29  ;;  %1499 = vst [vmem:[#allocation2 + $0xf0] sm:$0xf] %v1498_v33  ;;  %1500 = vst.msk [vmem:[#allocation2 + $0xf4] sm:$0xf] %vm27_vm0, %v1201_v61  ;;  %v2385_v47 = vrot.slane %v9172_v13, 1  ;;  %v197_v46 = vadd.f32 %v10449_v8, %v158_v1  ;;  %v6360_v49 = vshll.u32 %v9175_v37, 16 }
  0xdd   :  { %v9159_v43 = vld [vmem:[#allocation2 + $0x78] sm:$0xff]   ;;  %v9164_v41 = vld [vmem:[#allocation2 + $0x80] ss:$0 sps:$4 sm:$0x11]   ;;  %v3488_v25 = vpop.permute.xlu1 %3487  ;;  %vm228_vm10 = vcmp.gt.f32.partialorder %v196_v51, 0.0 }
  0xde   :  { %v9163_v0 = vld [vmem:[#allocation2 + $0x78] sm:$0xff]   ;;  %3499 = vrot.lane.b32.xlu0 %v9159_v43, %s9548_s21  ;;  %3534 = vst.msk [vmem:[#allocation3 + $0x20] sm:$0xff] %vm3531_vm7, %v3488_v25  ;;  %v3828_v9 = vshll.u32 %v9164_v41, 16  ;;  %v9184_v2 = vld [vmem:[#allocation2 + $0x80] ss:$0 sps:$4 sm:$0x11]   ;;  %v2387_v43 = vsel %vm2357_vm2, %v2385_v47, %v2386_v4 }
  0xdf   :  { %v3821_v31 = vshrl.u32 %v9163_v0, 16  ;;  %v3823_v32 = vshll.u32 %v9163_v0, 16  ;;  %v9183_v50 = vld [vmem:[#allocation2 + $0x78] sm:$0xff]   ;;  %v2940_v38 = vshll.u32 %v9184_v2, 16  ;;  %v4994_v0 = vrot.slane %v10455_v16, 1 }
  0xe0   :  { %v3830_v45 = vrot.slane %v3828_v9, 1  ;;  %v3921_v63 = vpop.permute.xlu0 %3920  ;;  %5935 = vrot.lane.b32.xlu1 %v5889_v5, %s9550_s23  ;;  %v2935_v62 = vshll.u32 %v9183_v50, 16  ;;  %v2933_v19 = vshrl.u32 %v9183_v50, 16  ;;  %vm229_vm11 = vcmp.gt.f32.partialorder %v197_v46, 0.0  ;;  %v9179_v27 = vld [vmem:[#allocation2 + $0x78] sm:$0xff]  }
  0xe1   :  { %v3825_v40 = vrot.slane %v3823_v32, 1  ;;  %v2123_v54 = vpop.permute.xlu1 %2122  ;;  %3967 = vst.msk [vmem:[#allocation3 + $0x20] sm:$0xff] %vm14445_vm8, %v3921_v63  ;;  %v2942_v24 = vrot.slane %v2940_v38, 1  ;;  %v9188_v30 = vld [vmem:[#allocation2 + $0x20] ss:$0 sps:$4 sm:$0x11]  }
  0xe2   :  { %2168 = vst.msk [vmem:[#allocation3 + $0x30] sm:$0xff] %vm2164_vm14, %v2123_v54  ;;  %v2937_v22 = vrot.slane %v2935_v62, 1  ;;  %v6362_v9 = vrot.slane %v6360_v49, 1  ;;  %v4158_v26 = vrot.slane %v9188_v30, 1  ;;  %v9189_v33 = vld [vmem:[#allocation2 + $0x78] sm:$0xfe]  }
  0xe3   :  { %v3826_v57 = vor.u32 %v3825_v40, %v3821_v31  ;;  %v9170_v23 = vld [vmem:[#allocation2 + $0xf0] sm:$0xff]   ;;  %v4577_v40 = vor.u32 %v4576_v15, %v4572_v14  ;;  %v9190_v5 = vld [vmem:[#allocation2 + $0x80] ss:$0 sps:$4 sm:$0x11]   ;;  %v3284_v54 = vrot.slane %v9189_v33, 1 }
  0xe4   :  { %v2413_v3 = vpop.permute.xlu0 %2412  ;;  %v9174_v17 = vld [vmem:[#allocation2 + $0xf0] sm:$0xff]   ;;  %6112 = vrot.lane.b32.xlu1 %v9170_v23, %s9548_s21  ;;  %v2938_v52 = vor.u32 %v2937_v22, %v2933_v19  ;;  %v4159_v21 = vsel %vm2357_vm2, %v4157_v42, %v4158_v26  ;;  %v3285_v56 = vrot.slane %v9190_v5, 1  ;;  %v831_v4 = vld [vmem:[#allocation2 + $0x84] sm:$0xf]  ;;  %v10491_v19 = vld [vmem:[#allocation2 + $0x78] sm:$0xff]   ;;  %v4996_v23 = vsel %vm2357_vm2, %v4994_v0, %v4995_v29 }
  0xe5   :  { %v3831_v59 = vsel %vm14446_vm12, %v3826_v57, %v3830_v45  ;;  %v2590_v48 = vpop.permute.xlu1 %2589  ;;  %2458 = vst.msk [vmem:[#allocation3 + $0x30] sm:$0xff] %vm14444_vm5, %v2413_v3  ;;  %v6353_v41 = vshrl.u32 %v9174_v17, 16  ;;  %v6355_v25 = vshll.u32 %v9174_v17, 16  ;;  %v10467_v31 = vld [vmem:[#allocation2 + $0xf0] sm:$0xff]   ;;  %vm261_vm5 = vcmp.lt.f32.partialorder %v197_v46, 0.0  ;;  %v8369_v15 = vld [vmem:[%s14435_s0 + $0x120] sm:$0xff] }
  0xe6   :  { %3932 = vrot.lane.b32.xlu0 %v3831_v59, %s9551_s24  ;;  %2635 = vst.msk [vmem:[#allocation3 + $0x30] sm:$0xff] %vm14443_vm6, %v2590_v48  ;;  %vm260_vm6 = vcmp.lt.f32.partialorder %v196_v51, 0.0  ;;  %v2943_v45 = vsel %vm14446_vm12, %v2938_v52, %v2942_v24  ;;  %v293_v53 = vsel %vm261_vm5, -1.0, %v9545_v10  ;;  %v5470_v1 = vshll.u32 %v10467_v31, 16  ;;  %v6864_v62 = vld [vmem:[#allocation3] sm:$0xff]  ;;  %v8370_v5 = vld [vmem:[%s14435_s0 + $0x128] sm:$0xff] }
  0xe7   :  { %v6357_v32 = vrot.slane %v6355_v25, 1  ;;  %v292_v13 = vsel %vm260_vm6, -1.0, %v9545_v10  ;;  %v325_v61 = vsel %vm229_vm11, 1.0, %v293_v53  ;;  %4221 = vst.msk [vmem:[#allocation3 + $0x8] sm:$0xff] %vm14487_vm13, %v4159_v21  ;;  %v4582_v50 = vsel %vm14446_vm12, %v4577_v40, %v4581_v18  ;;  %v835_v16 = vld [vmem:[#allocation2 + $0x8c] sm:$0x1] }
  0xe8   :  { %v3023_v34 = vpop.permute.xlu0 %3022  ;;  %v324_v60 = vsel %vm228_vm10, 1.0, %v292_v13  ;;  %v8974_v58 = vpack.c.bf16 %v325_v61, %v325_v61  ;;  %v5468_v14 = vshrl.u32 %v10467_v31, 16  ;;  %v3286_v38 = vsel %vm2357_vm2, %v3284_v54, %v3285_v56  ;;  %v9200_v26 = vld [vmem:[#allocation2 + $0xf0] sm:$0xfe]   ;;  %v10524_v21 = vld [vmem:[%s14436_s2] ss:$0 sm:$0xff] }
  0xe9   :  { %v3312_v6 = vpop.permute.xlu1 %3311  ;;  %3068 = vst.msk [vmem:[#allocation3 + $0x30] sm:$0xff] %vm3064_vm1, %v3023_v34  ;;  %v6358_v35 = vor.u32 %v6357_v32, %v6353_v41  ;;  %v8973_v57 = vpack.c.bf16 %v324_v60, %v324_v60  ;;  %v5472_v18 = vrot.slane %v5470_v1, 1  ;;  %v2045_v25 = vshrl.u32 %v10491_v19, 16  ;;  %v9201_v33 = vld [vmem:[#allocation2 + $0xf8] ss:$0 sps:$4 sm:$0x11]  }
  0xea   :  { %2134 = vrot.lane.b32.xlu0 %v2043_v11, %s9547_s20  ;;  %3357 = vst.msk [vmem:[#allocation3 + $0x30] sm:$0xff] %vm3353_vm3, %v3312_v6  ;;  %v614_v48 = vshrl.u32 %v8974_v58, 16  ;;  %v9194_v11 = vld [vmem:[#allocation2 + $0xf8] ss:$0 sps:$4 sm:$0x11]   ;;  %v617_v47 = vshll.u32 %v8974_v58, 16  ;;  %v917_v31 = vadd.f32 %v10201_v7, %v8369_v15  ;;  %v918_v54 = vadd.f32 %v10524_v21, %v8370_v5 }
  0xeb   :  { %v6363_v55 = vsel %vm14446_vm12, %v6358_v35, %v6362_v9  ;;  %v606_v2 = vshrl.u32 %v8973_v57, 16  ;;  %v609_v51 = vshll.u32 %v8973_v57, 16  ;;  %v5475_v24 = vshll.u32 %v9194_v11, 16  ;;  %v9195_v6 = vld [vmem:[#allocation2 + $0x24] sm:$0xfe]   ;;  %v9207_v1 = vld [vmem:[#allocation2 + $0x30] sm:$0xff]  }
  0xec   :  { %v3490_v36 = vpop.permute.xlu0 %3489  ;;  %6544 = vrot.lane.b32.xlu1 %v6363_v55, %s9551_s24  ;;  %v616_v46 = vrot.slane %v614_v48, 7  ;;  %v4160_v52 = vrot.slane %v9195_v6, 1  ;;  %v5473_v35 = vor.u32 %v5472_v18, %v5468_v14  ;;  %v5890_v7 = vrot.slane %v9200_v26, 1  ;;  %v9203_v40 = vld [vmem:[#allocation2 + $0x80] ss:$0 sps:$4 sm:$0x11]  }
  0xed   :  { %3535 = vst.msk [vmem:[#allocation3 + $0x30] sm:$0xff] %vm3531_vm7, %v3490_v36  ;;  %v3923_v59 = vpop.permute.xlu1 %3922  ;;  %v608_v3 = vrot.slane %v606_v2, 7  ;;  %v5477_v9 = vrot.slane %v5475_v24, 1  ;;  %v5891_v53 = vrot.slane %v9201_v33, 1  ;;  %vm949_vm5 = vcmp.gt.f32.partialorder %v917_v31, 0.0  ;;  %v6866_v57 = vld [vmem:[#allocation3 + $0x10] sm:$0xff] }
  0xee   :  { %2424 = vrot.lane.b32.xlu0 %v2387_v43, %s9546_s15  ;;  %3968 = vst.msk [vmem:[#allocation3 + $0x30] sm:$0xff] %vm14445_vm8, %v3923_v59  ;;  %v9196_v43 = vld [vmem:[#allocation2 + $0x2c] ss:$0 sps:$4 sm:$0x11]   ;;  %v619_v41 = vor.u32 %v617_v47, %v616_v46  ;;  %v6865_v49 = vld [vmem:[#allocation3 + $0x8] sm:$0xff]  ;;  %v621_v28 = vrot.slane %v616_v46, 4 }
  0xef   :  { %v611_v37 = vor.u32 %v609_v51, %v608_v3  ;;  %v612_v34 = vrot.slane %v608_v3, 4  ;;  %v4161_v20 = vrot.slane %v9196_v43, 1  ;;  %8919 = vmatprep.mubr.msk.bf16.mxu0 %vm14487_vm13, %v6865_v49  ;;  %vm981_vm6 = vcmp.lt.f32.partialorder %v917_v31, 0.0  ;;  %v9205_v29 = vld [vmem:[#allocation2 + $0x30] sm:$0xfe]   ;;  %1735 = vst.msk [vmem:[#allocation3 + $0x40] sm:$0xff] %vm14487_vm13, %v9207_v1 }
  0xf0   :  { %v10479_v63 = vpop.permute.xlu0 %2124  ;;  %4753 = vrot.lane.b32.xlu1 %v4582_v50, %s9547_s20  ;;  %7129 = vmatmul.mubr.bf16.vlgmr.msra.gmra.mrb[0].mxu0 %v6864_v62  ;;  %v836_v36 = vsel %vm9880_vm9, %v621_v28, %v835_v16  ;;  %v2052_v60 = vshll.u32 %v9203_v40, 16  ;;  %v1013_v61 = vsel %vm981_vm6, -1.0, %v9545_v10  ;;  %v5478_v56 = vsel %vm14446_vm12, %v5473_v35, %v5477_v9  ;;  %v9206_v11 = vld [vmem:[#allocation2 + $0x38] ss:$0 sps:$4 sm:$0x11]   ;;  %v9213_v5 = vld [vmem:[#allocation2 + $0xf0] sm:$0xff]  }
  0xf1   :  { %v10499_v17 = vpop.permute.xlu1 %2414  ;;  %v620_v0 = vsel %vm9849_vm15, %v612_v34, %v619_v41  ;;  %v832_v30 = vsel %vm9856_vm4, %v611_v37, %v831_v4  ;;  %v4162_v42 = vsel %vm2357_vm2, %v4160_v52, %v4161_v20  ;;  %837 = vst [vmem:[#allocation2 + $0x8c] sm:$0x1] %v836_v36  ;;  %vm950_vm10 = vcmp.gt.f32.partialorder %v918_v54, 0.0  ;;  %2169 = vst.msk [vmem:[#allocation3 + $0x40] sm:$0xff] %vm2164_vm14, %v10479_v63  ;;  %v1504_v18 = vld [vmem:[#allocation2 + $0xfc] sm:$0xf] }
  0xf2   :  { %2601 = vrot.lane.b32.xlu0 %v9179_v27, %s9549_s22  ;;  %v9191_v27 = vld [vmem:[#allocation2 + $0xf0] sm:$0xff]   ;;  %833 = vst [vmem:[#allocation2 + $0x84] sm:$0xf] %v832_v30  ;;  %834 = vst.msk [vmem:[#allocation2 + $0x88] sm:$0xf] %vm27_vm0, %v620_v0  ;;  %vm982_vm11 = vcmp.lt.f32.partialorder %v918_v54, 0.0  ;;  %v5892_v46 = vsel %vm2357_vm2, %v5890_v7, %v5891_v53 }
  0xf3   :  { %4222 = vst.msk [vmem:[#allocation3 + $0x18] sm:$0xff] %vm14487_vm13, %v4162_v42  ;;  %v1045_v58 = vsel %vm949_vm5, 1.0, %v1013_v61  ;;  %v10530_v2 = vrot.slane %v2052_v60, 1  ;;  %v1014_v51 = vsel %vm982_vm11, -1.0, %v9545_v10  ;;  %vm14520_vm5 = vcmask 392448   ;;  %v6868_v53 = vld [vmem:[#allocation3 + $0x20] sm:$0xff] }
  0xf4   :  { %v10493_v22 = vpop.permute.xlu0 %2591  ;;  %5041 = vrot.lane.b32.xlu1 %v4996_v23, %s9546_s15  ;;  %v8989_v48 = vpack.c.bf16 %v1045_v58, %v1045_v58  ;;  %v1046_v4 = vsel %vm950_vm10, 1.0, %v1014_v51  ;;  %2459 = vst.msk [vmem:[#allocation3 + $0x40] sm:$0xff] %vm14520_vm5, %v10499_v17  ;;  %vm14521_vm6 = vcmask 523648   ;;  %v4164_v28 = vrot.slane %v9206_v11, 1  ;;  %v9208_v42 = vld [vmem:[#allocation2 + $0x78] sm:$0xfe]  }
  0xf5   :  { %v3025_v13 = vpop.permute.xlu1 %3024  ;;  %v8990_v15 = vpack.c.bf16 %v1046_v4, %v1046_v4  ;;  %2636 = vst.msk [vmem:[#allocation3 + $0x40] sm:$0xff] %vm14521_vm6, %v10493_v22  ;;  %v9209_v36 = vld [vmem:[#allocation2 + $0x80] ss:$0 sps:$4 sm:$0x11]   ;;  %v2388_v54 = vrot.slane %v9208_v42, 1  ;;  %v4586_v61 = vshll.u32 %v9213_v5, 16 }
  0xf6   :  { %3034 = vrot.lane.b32.xlu0 %v2943_v45, %s9552_s29  ;;  %v2047_v45 = vshll.u32 %v10491_v19, 16  ;;  %v1204_v62 = vshrl.u32 %v8989_v48, 16  ;;  %v1207_v6 = vshll.u32 %v8989_v48, 16  ;;  %3069 = vst.msk [vmem:[#allocation3 + $0x40] sm:$0xff] %vm3064_vm1, %v3025_v13  ;;  %v1508_v13 = vld [vmem:[#allocation2 + $0x104] sm:$0x1] }
  0xf7   :  { %v1212_v43 = vshrl.u32 %v8990_v15, 16  ;;  %v1215_v37 = vshll.u32 %v8990_v15, 16  ;;  %v9214_v19 = vld [vmem:[#allocation2 + $0xf8] ss:$0 sps:$4 sm:$0x11]   ;;  %v2389_v60 = vrot.slane %v9209_v36, 1 }
  0xf8   :  { %v10509_v32 = vpop.permute.xlu0 %3313  ;;  %5217 = vrot.lane.b32.xlu1 %v9191_v27, %s9549_s22  ;;  %v2049_v50 = vrot.slane %v2047_v45, 1  ;;  %v9199_v3 = vld [vmem:[#allocation2 + $0x8c] ss:$0 sps:$4 sm:$0x11]   ;;  %v1206_v24 = vrot.slane %v1204_v62, 7  ;;  %v4163_v27 = vrot.slane %v9205_v29, 1 }
  0xf9   :  { %v3492_v55 = vpop.permute.xlu1 %3491  ;;  %v9192_v47 = vld [vmem:[#allocation2 + $0x84] sm:$0xff]   ;;  %v3840_v49 = vshll.u32 %v9199_v3, 16  ;;  %v1214_v20 = vrot.slane %v1212_v43, 7  ;;  %3358 = vst.msk [vmem:[#allocation3 + $0x40] sm:$0xff] %vm3353_vm3, %v10509_v32  ;;  %v4584_v29 = vshrl.u32 %v9213_v5, 16  ;;  %v4588_v1 = vrot.slane %v4586_v61, 1 }
  0xfa   :  { %3323 = vrot.lane.b32.xlu0 %v3286_v38, %s9550_s23  ;;  %v6867_v14 = vld [vmem:[#allocation3 + $0x18] sm:$0xff]  ;;  %v1209_v17 = vor.u32 %v1207_v6, %v1206_v24  ;;  %v1210_v52 = vrot.slane %v1206_v24, 4  ;;  %3536 = vst.msk [vmem:[#allocation3 + $0x40] sm:$0xff] %vm3531_vm7, %v3492_v55  ;;  %v4165_v9 = vsel %vm2357_vm2, %v4163_v27, %v4164_v28  ;;  %v2050_v32 = vor.u32 %v2049_v50, %v2045_v25  ;;  %v10580_v4 = vld [vmem:[#allocation2 + $0xf0] sm:$0xfe]  }
  0xfb   :  { %8920 = vmatprep.mubr.msk.bf16.mxu0 %vm14487_vm13, %v6867_v14  ;;  %v9198_v38 = vld [vmem:[#allocation2 + $0x84] sm:$0xff]   ;;  %v3842_v0 = vrot.slane %v3840_v49, 1  ;;  %v1217_v30 = vor.u32 %v1215_v37, %v1214_v20  ;;  %v1219_v26 = vrot.slane %v1214_v20, 4  ;;  %4223 = vst.msk [vmem:[#allocation3 + $0x28] sm:$0xff] %vm14487_vm13, %v4165_v9  ;;  %v4997_v43 = vrot.slane %v10580_v4, 1  ;;  %v159_v20 = vld [vmem:[%s14435_s0 + $0xb0] sm:$0xff] }
  0xfc   :  { %v3925_v59 = vpop.permute.xlu0 %3924  ;;  %5649 = vrot.lane.b32.xlu1 %v5478_v56, %s9552_s29  ;;  %7137 = vmatmul.mubr.bf16.gmra.mrb[4].mxu0 %v6866_v57  ;;  %v3833_v34 = vshrl.u32 %v9198_v38, 16  ;;  %v3835_v41 = vshll.u32 %v9198_v38, 16  ;;  %v1505_v31 = vsel %vm9856_vm4, %v1209_v17, %v1504_v18  ;;  %v2055_v25 = vsel %vm14446_vm12, %v2050_v32, %v10530_v2  ;;  %v9215_v55 = vld [vmem:[#allocation2 + $0x84] sm:$0xff]   ;;  %v9216_v58 = vld [vmem:[#allocation2 + $0x8c] ss:$0 sps:$4 sm:$0x11]  }
  0xfd   :  { %v10546_v63 = vpop.permute.xlu1 %2126  ;;  %3969 = vst.msk [vmem:[#allocation3 + $0x40] sm:$0xff] %vm14445_vm8, %v3925_v59  ;;  %1506 = vst [vmem:[#allocation2 + $0xfc] sm:$0xf] %v1505_v31  ;;  %v1218_v35 = vsel %vm9849_vm15, %v1210_v52, %v1217_v30  ;;  %v1509_v7 = vsel %vm9880_vm9, %v1219_v26, %v1508_v13  ;;  %v4591_v57 = vshll.u32 %v9214_v19, 16  ;;  %v2945_v59 = vshrl.u32 %v9215_v55, 16  ;;  %v9212_v38 = vld [vmem:[#allocation2 + $0x84] sm:$0xff]  }
  0xfe   :  { %3501 = vrot.lane.b32.xlu0 %v9192_v47, %s9548_s21  ;;  %v3837_v16 = vrot.slane %v3835_v41, 1  ;;  %1507 = vst.msk [vmem:[#allocation2 + $0x100] sm:$0xf] %vm27_vm0, %v1218_v35  ;;  %1510 = vst [vmem:[#allocation2 + $0x104] sm:$0x1] %v1509_v7  ;;  %v2947_v50 = vshll.u32 %v9215_v55, 16  ;;  %v2390_v2 = vsel %vm2357_vm2, %v2388_v54, %v2389_v60  ;;  %v198_v30 = vadd.f32 %v10449_v8, %v159_v20 }
  0xff   :  { %v2952_v48 = vshll.u32 %v9216_v58, 16  ;;  %v10582_v14 = vld [vmem:[#allocation2 + $0xf8] ss:$0 sps:$4 sm:$0x11]   ;;  %v4593_v3 = vrot.slane %v4591_v57, 1  ;;  %v4589_v26 = vor.u32 %v4588_v1, %v4584_v29  ;;  %v9227_v29 = vld [vmem:[#allocation2 + $0x3c] sm:$0xff]  }
 0x100   :  { %v10542_v23 = vpop.permute.xlu0 %2416  ;;  %5937 = vrot.lane.b32.xlu1 %v5892_v46, %s9550_s23  ;;  %v3838_v33 = vor.u32 %v3837_v16, %v3833_v34  ;;  %v2949_v47 = vrot.slane %v2947_v50, 1  ;;  %v4998_v49 = vrot.slane %v10582_v14, 1  ;;  %v9219_v17 = vld [vmem:[#allocation2 + $0x3c] sm:$0xfe]   ;;  %v9221_v42 = vld [vmem:[#allocation2 + $0x84] sm:$0xfe]  }
 0x101   :  { %v10566_v40 = vpop.permute.xlu1 %2593  ;;  %v2954_v6 = vrot.slane %v2952_v48, 1  ;;  %v9220_v52 = vld [vmem:[#allocation2 + $0x44] ss:$0 sps:$4 sm:$0x11]   ;;  %v4166_v31 = vrot.slane %v9219_v17, 1  ;;  %v160_v13 = vld [vmem:[%s14435_s0 + $0xb8] sm:$0xff]  ;;  %v4594_v60 = vsel %vm14446_vm12, %v4589_v26, %v4593_v3 }
 0x102   :  { %v3843_v45 = vsel %vm14446_vm12, %v3838_v33, %v3842_v0  ;;  %v6869_v51 = vld [vmem:[#allocation3 + $0x28] sm:$0xff]  ;;  %v2950_v24 = vor.u32 %v2949_v47, %v2945_v59  ;;  %v4167_v9 = vrot.slane %v9220_v52, 1  ;;  %v9222_v32 = vld [vmem:[#allocation2 + $0x8c] ss:$0 sps:$4 sm:$0x11]   ;;  %v3287_v7 = vrot.slane %v9221_v42, 1 }
 0x103   :  { %3934 = vrot.lane.b32.xlu0 %v3843_v45, %s9551_s24  ;;  %8921 = vmatprep.mubr.msk.bf16.mxu0 %vm14487_vm13, %v6869_v51  ;;  %v199_v45 = vadd.f32 %v10449_v8, %v160_v13  ;;  %vm230_vm10 = vcmp.gt.f32.partialorder %v198_v30, 0.0  ;;  %vm262_vm11 = vcmp.lt.f32.partialorder %v198_v30, 0.0  ;;  %v6870_v48 = vld [vmem:[#allocation3 + $0x30] sm:$0xff]  ;;  %1736 = vst.msk [vmem:[#allocation3 + $0x50] sm:$0xff] %vm14487_vm13, %v9227_v29 }
 0x104   :  { %v10553_v22 = vpop.permute.xlu0 %3026  ;;  %7145 = vmatmul.mubr.bf16.gmra.mrb[8].mxu0 %v6868_v53  ;;  %v2955_v33 = vsel %vm14446_vm12, %v2950_v24, %v2954_v6  ;;  %v4168_v35 = vsel %vm2357_vm2, %v4166_v31, %v4167_v9  ;;  %v294_v54 = vsel %vm262_vm11, -1.0, %v9545_v10  ;;  %2170 = vst.msk [vmem:[#allocation3 + $0x50] sm:$0xff] %vm2164_vm14, %v10546_v63  ;;  %v10625_v3 = vld [vmem:[#allocation2 + $0x84] sm:$0xff]   ;;  %v838_v6 = vld [vmem:[#allocation2 + $0x90] sm:$0xf]  ;;  %vm14523_vm11 = vcmask 523648  }
 0x105   :  { %v10576_v11 = vpop.permute.xlu1 %3315  ;;  %v9204_v62 = vld [vmem:[#allocation2 + $0xfc] sm:$0xff]   ;;  %v9211_v18 = vld [vmem:[#allocation2 + $0x104] ss:$0 sps:$4 sm:$0x11]   ;;  %4224 = vst.msk [vmem:[#allocation3 + $0x38] sm:$0xff] %vm14487_vm13, %v4168_v35  ;;  %vm231_vm5 = vcmp.gt.f32.partialorder %v199_v45, 0.0 }
 0x106   :  { %v9210_v46 = vld [vmem:[#allocation2 + $0xfc] sm:$0xff]   ;;  %6114 = vrot.lane.b32.xlu1 %v9204_v62, %s9548_s21  ;;  %v6372_v41 = vshll.u32 %v9211_v18, 16  ;;  %vm263_vm6 = vcmp.lt.f32.partialorder %v199_v45, 0.0  ;;  %v326_v57 = vsel %vm230_vm10, 1.0, %v294_v54  ;;  %vm14522_vm10 = vcmask 392448  }
 0x107   :  { %2136 = vrot.lane.b32.xlu0 %v2055_v25, %s9547_s20  ;;  %v6365_v37 = vshrl.u32 %v9210_v46, 16  ;;  %v6367_v34 = vshll.u32 %v9210_v46, 16  ;;  %v3288_v25 = vrot.slane %v9222_v32, 1  ;;  %v9225_v8 = vld [vmem:[#allocation2 + $0xfc] sm:$0xff]   ;;  %v295_v55 = vsel %vm263_vm6, -1.0, %v9545_v10  ;;  %2460 = vst.msk [vmem:[#allocation3 + $0x50] sm:$0xff] %vm14522_vm10, %v10542_v23 }
 0x108   :  { %v10573_v56 = vpop.permute.xlu0 %3493  ;;  %v6374_v0 = vrot.slane %v6372_v41, 1  ;;  %v9226_v58 = vld [vmem:[#allocation2 + $0x104] ss:$0 sps:$4 sm:$0x11]   ;;  %v327_v1 = vsel %vm231_vm5, 1.0, %v295_v55  ;;  %v8975_v59 = vpack.c.bf16 %v326_v57, %v326_v57  ;;  %v5482_v50 = vshll.u32 %v9225_v8, 16 }
 0x109   :  { %v6369_v16 = vrot.slane %v6367_v34, 1  ;;  %v3289_v61 = vsel %vm2357_vm2, %v3287_v7, %v3288_v25  ;;  %v5480_v47 = vshrl.u32 %v9225_v8, 16  ;;  %v5487_v4 = vshll.u32 %v9226_v58, 16  ;;  %v8371_v34 = vld [vmem:[%s14435_s0 + $0x130] sm:$0xff]  ;;  %v842_v63 = vld [vmem:[#allocation2 + $0x98] sm:$0x1] }
 0x10a   :  { %v623_v14 = vshrl.u32 %v8975_v59, 16  ;;  %v626_v62 = vshll.u32 %v8975_v59, 16  ;;  %v4999_v46 = vsel %vm2357_vm2, %v4997_v43, %v4998_v49  ;;  %v9230_v20 = vld [vmem:[#allocation2 + $0xfc] sm:$0xfe]   ;;  %2637 = vst.msk [vmem:[#allocation3 + $0x50] sm:$0xff] %vm14523_vm11, %v10566_v40  ;;  %v919_v9 = vadd.f32 %v10524_v21, %v8371_v34  ;;  %v9237_v55 = vld [vmem:[#allocation2 + $0x48] sm:$0xff]  }
 0x10b   :  { %2426 = vrot.lane.b32.xlu0 %v2390_v2, %s9546_s15  ;;  %v10595_v28 = vpop.permute.xlu1 %3926  ;;  %v6370_v36 = vor.u32 %v6369_v16, %v6365_v37  ;;  %v8976_v2 = vpack.c.bf16 %v327_v1, %v327_v1  ;;  %v5489_v37 = vrot.slane %v5487_v4, 1  ;;  %v9231_v23 = vld [vmem:[#allocation2 + $0x104] ss:$0 sps:$4 sm:$0x11]   ;;  %3070 = vst.msk [vmem:[#allocation3 + $0x50] sm:$0xff] %vm3064_vm1, %v10553_v22  ;;  %v2059_v32 = vshll.u32 %v10625_v3, 16 }
 0x10c   :  { %v10584_v15 = vpop.permute.xlu0 %2128  ;;  %v6871_v17 = vld [vmem:[#allocation3 + $0x38] sm:$0xff]  ;;  %v625_v52 = vrot.slane %v623_v14, 7  ;;  %3359 = vst.msk [vmem:[#allocation3 + $0x50] sm:$0xff] %vm3353_vm3, %v10576_v11  ;;  %v8372_v25 = vld [vmem:[%s14435_s0 + $0x138] sm:$0xff]  ;;  %vm951_vm5 = vcmp.gt.f32.partialorder %v919_v9, 0.0  ;;  %vm983_vm6 = vcmp.lt.f32.partialorder %v919_v9, 0.0 }
 0x10d   :  { %v6375_v19 = vsel %vm14446_vm12, %v6370_v36, %v6374_v0  ;;  %v631_v18 = vshrl.u32 %v8976_v2, 16  ;;  %v634_v24 = vshll.u32 %v8976_v2, 16  ;;  %8922 = vmatprep.mubr.msk.bf16.mxu0 %vm14487_vm13, %v6871_v17  ;;  %v9223_v0 = vld [vmem:[#allocation2 + $0xfc] sm:$0xff]   ;;  %v9232_v36 = vld [vmem:[#allocation2 + $0x48] sm:$0xfe]   ;;  %3537 = vst.msk [vmem:[#allocation3 + $0x50] sm:$0xff] %vm3531_vm7, %v10573_v56 }
 0x10e   :  { %6546 = vrot.lane.b32.xlu1 %v6375_v19, %s9551_s24  ;;  %7153 = vmatmul.mubr.bf16.gmra.mrb[12].mxu0 %v6870_v48  ;;  %v628_v30 = vor.u32 %v626_v62, %v625_v52  ;;  %v629_v31 = vrot.slane %v625_v52, 4  ;;  %3970 = vst.msk [vmem:[#allocation3 + $0x50] sm:$0xff] %vm14445_vm8, %v10595_v28  ;;  %v4169_v35 = vrot.slane %v9232_v36, 1  ;;  %v9235_v7 = vld [vmem:[#allocation2 + $0x8c] ss:$0 sps:$4 sm:$0x11]  }
 0x10f   :  { %2603 = vrot.lane.b32.xlu0 %v9212_v38, %s9549_s22  ;;  %v10605_v5 = vpop.permute.xlu1 %2418  ;;  %v5484_v38 = vrot.slane %v5482_v50, 1  ;;  %v633_v49 = vrot.slane %v631_v18, 7  ;;  %v5893_v19 = vrot.slane %v9230_v20, 1  ;;  %v5894_v54 = vrot.slane %v9231_v23, 1  ;;  %v10670_v29 = vld [vmem:[#allocation2 + $0xfc] sm:$0xff]   ;;  %1737 = vst.msk [vmem:[#allocation3 + $0x60] sm:$0xff] %vm14487_vm13, %v9237_v55 }
 0x110   :  { %v10590_v27 = vpop.permute.xlu0 %2595  ;;  %v839_v22 = vsel %vm9856_vm4, %v628_v30, %v838_v6  ;;  %v2064_v8 = vshll.u32 %v9235_v7, 16  ;;  %v2061_v50 = vrot.slane %v2059_v32, 1  ;;  %2171 = vst.msk [vmem:[#allocation3 + $0x60] sm:$0xff] %vm2164_vm14, %v10584_v15  ;;  %v1511_v18 = vld [vmem:[#allocation2 + $0x108] sm:$0xf] }
 0x111   :  { %v5485_v16 = vor.u32 %v5484_v38, %v5480_v47  ;;  %v636_v40 = vor.u32 %v634_v24, %v633_v49  ;;  %v638_v42 = vrot.slane %v633_v49, 4  ;;  %840 = vst [vmem:[#allocation2 + $0x90] sm:$0xf] %v839_v22  ;;  %v5895_v2 = vsel %vm2357_vm2, %v5893_v19, %v5894_v54  ;;  %v1515_v23 = vld [vmem:[#allocation2 + $0x110] sm:$0x1] }
 0x112   :  { %4755 = vrot.lane.b32.xlu1 %v4594_v60, %s9547_s20  ;;  %v920_v60 = vadd.f32 %v10524_v21, %v8372_v25  ;;  %v2057_v21 = vshrl.u32 %v10625_v3, 16  ;;  %v2066_v38 = vrot.slane %v2064_v8, 1  ;;  %v4598_v3 = vshll.u32 %v10670_v29, 16  ;;  %v9244_v32 = vld [vmem:[#allocation2 + $0x104] ss:$0 sps:$4 sm:$0x11]  }
 0x113   :  { %3036 = vrot.lane.b32.xlu0 %v2955_v33, %s9552_s29  ;;  %v10618_v51 = vpop.permute.xlu1 %3028  ;;  %v9233_v33 = vld [vmem:[#allocation2 + $0x50] ss:$0 sps:$4 sm:$0x11]   ;;  %v637_v11 = vsel %vm9849_vm15, %v629_v31, %v636_v40  ;;  %v5490_v13 = vsel %vm14446_vm12, %v5485_v16, %v5489_v37  ;;  %v843_v56 = vsel %vm9880_vm9, %v638_v42, %v842_v63  ;;  %v9238_v40 = vld [vmem:[#allocation2 + $0x84] sm:$0xfe]   ;;  %v4596_v8 = vshrl.u32 %v10670_v29, 16 }
 0x114   :  { %v10609_v53 = vpop.permute.xlu0 %3317  ;;  %841 = vst.msk [vmem:[#allocation2 + $0x94] sm:$0xf] %vm27_vm0, %v637_v11  ;;  %844 = vst [vmem:[#allocation2 + $0x98] sm:$0x1] %v843_v56  ;;  %v4170_v28 = vrot.slane %v9233_v33, 1  ;;  %vm952_vm10 = vcmp.gt.f32.partialorder %v920_v60, 0.0  ;;  %v2062_v36 = vor.u32 %v2061_v50, %v2057_v21 }
 0x115   :  { %vm984_vm11 = vcmp.lt.f32.partialorder %v920_v60, 0.0  ;;  %v6872_v63 = vld [vmem:[#allocation3 + $0x40] sm:$0xff]  ;;  %v9239_v42 = vld [vmem:[#allocation2 + $0x8c] ss:$0 sps:$4 sm:$0x11]   ;;  %v161_v25 = vld [vmem:[%s14435_s0 + $0xc0] sm:$0xff] }
 0x116   :  { %5043 = vrot.lane.b32.xlu1 %v4999_v46, %s9546_s15  ;;  %v4171_v57 = vsel %vm2357_vm2, %v4169_v35, %v4170_v28  ;;  %v1016_v48 = vsel %vm984_vm11, -1.0, %v9545_v10  ;;  %v4603_v35 = vshll.u32 %v9244_v32, 16  ;;  %v2067_v54 = vsel %vm14446_vm12, %v2062_v36, %v2066_v38  ;;  %v9249_v38 = vld [vmem:[#allocation2 + $0x54] sm:$0xfe]  }
 0x117   :  { %3325 = vrot.lane.b32.xlu0 %v3289_v61, %s9550_s23  ;;  %v10637_v43 = vpop.permute.xlu1 %3495  ;;  %v1015_v61 = vsel %vm983_vm6, -1.0, %v9545_v10  ;;  %4225 = vst.msk [vmem:[#allocation3 + $0x48] sm:$0xff] %vm14487_vm13, %v4171_v57  ;;  %v1048_v47 = vsel %vm952_vm10, 1.0, %v1016_v48  ;;  %vm14525_vm6 = vcmask 523648   ;;  %v4600_v21 = vrot.slane %v4598_v3, 1 }
 0x118   :  { %v10633_v41 = vpop.permute.xlu0 %3928  ;;  %v1047_v58 = vsel %vm951_vm5, 1.0, %v1015_v61  ;;  %vm14524_vm5 = vcmask 392448   ;;  %v8992_v46 = vpack.c.bf16 %v1048_v47, %v1048_v47  ;;  %v10720_v61 = vld [vmem:[#allocation2 + $0xfc] sm:$0xfe]   ;;  %v10726_v48 = vrot.slane %v4603_v35, 1  ;;  %v162_v47 = vld [vmem:[%s14435_s0 + $0xc8] sm:$0xff] }
 0x119   :  { %v8991_v1 = vpack.c.bf16 %v1047_v58, %v1047_v58  ;;  %2461 = vst.msk [vmem:[#allocation3 + $0x60] sm:$0xff] %vm14524_vm5, %v10605_v5  ;;  %v2391_v58 = vrot.slane %v9238_v40, 1 }
 0x11a   :  { %5219 = vrot.lane.b32.xlu1 %v9223_v0, %s9549_s22  ;;  %2638 = vst.msk [vmem:[#allocation3 + $0x60] sm:$0xff] %vm14525_vm6, %v10590_v27  ;;  %v1229_v17 = vshrl.u32 %v8992_v46, 16  ;;  %v1232_v52 = vshll.u32 %v8992_v46, 16  ;;  %v9250_v46 = vld [vmem:[#allocation2 + $0x5c] ss:$0 sps:$4 sm:$0x11]  }
 0x11b   :  { %v10660_v45 = vpop.permute.xlu1 %2130  ;;  %v1221_v4 = vshrl.u32 %v8991_v1, 16  ;;  %v1224_v14 = vshll.u32 %v8991_v1, 16  ;;  %v9224_v24 = vld [vmem:[#allocation2 + $0x90] sm:$0xff]   ;;  %3071 = vst.msk [vmem:[#allocation3 + $0x60] sm:$0xff] %vm3064_vm1, %v10618_v51  ;;  %v2392_v1 = vrot.slane %v9239_v42, 1 }
 0x11c   :  { %v10648_v26 = vpop.permute.xlu0 %2420  ;;  %v9228_v6 = vld [vmem:[#allocation2 + $0x90] sm:$0xff]   ;;  %v9229_v37 = vld [vmem:[#allocation2 + $0x98] ss:$0 sps:$4 sm:$0x11]   ;;  %3360 = vst.msk [vmem:[#allocation3 + $0x60] sm:$0xff] %vm3353_vm3, %v10609_v53  ;;  %3503 = vrot.lane.b32.xlu0 %v9224_v24, %s9548_s21  ;;  %v1231_v53 = vrot.slane %v1229_v17, 7 }
 0x11d   :  { %v1223_v15 = vrot.slane %v1221_v4, 7  ;;  %3538 = vst.msk [vmem:[#allocation3 + $0x60] sm:$0xff] %vm3531_vm7, %v10637_v43  ;;  %v3845_v51 = vshrl.u32 %v9228_v6, 16  ;;  %v3847_v20 = vshll.u32 %v9228_v6, 16  ;;  %v3852_v49 = vshll.u32 %v9229_v37, 16  ;;  %v9245_v30 = vld [vmem:[#allocation2 + $0x90] sm:$0xff]  }
 0x11e   :  { %5651 = vrot.lane.b32.xlu1 %v5490_v13, %s9552_s29  ;;  %v6873_v16 = vld [vmem:[#allocation3 + $0x48] sm:$0xff]  ;;  %3971 = vst.msk [vmem:[#allocation3 + $0x60] sm:$0xff] %vm14445_vm8, %v10633_v41  ;;  %v1234_v22 = vor.u32 %v1232_v52, %v1231_v53  ;;  %v1236_v33 = vrot.slane %v1231_v53, 4  ;;  %v2959_v28 = vshll.u32 %v9245_v30, 16  ;;  %v2957_v50 = vshrl.u32 %v9245_v30, 16 }
 0x11f   :  { %v10684_v62 = vpop.permute.xlu1 %2597  ;;  %v1226_v5 = vor.u32 %v1224_v14, %v1223_v15  ;;  %v1227_v34 = vrot.slane %v1223_v15, 4  ;;  %8923 = vmatprep.mubr.msk.bf16.mxu0 %vm14487_vm13, %v6873_v16  ;;  %v3849_v43 = vrot.slane %v3847_v20, 1  ;;  %v3854_v9 = vrot.slane %v3852_v49, 1  ;;  %v9246_v7 = vld [vmem:[#allocation2 + $0x98] ss:$0 sps:$4 sm:$0x11]  }
 0x120   :  { %v10674_v59 = vpop.permute.xlu0 %3030  ;;  %7161 = vmatmul.mubr.bf16.gmra.mrb[16].mxu0 %v6872_v63  ;;  %v1516_v56 = vsel %vm9880_vm9, %v1236_v33, %v1515_v23  ;;  %v2964_v60 = vshll.u32 %v9246_v7, 16  ;;  %v2961_v29 = vrot.slane %v2959_v28, 1  ;;  %v5000_v14 = vrot.slane %v10720_v61, 1  ;;  %v9242_v63 = vld [vmem:[#allocation2 + $0x90] sm:$0xff]  }
 0x121   :  { %v1512_v0 = vsel %vm9856_vm4, %v1226_v5, %v1511_v18  ;;  %v3850_v11 = vor.u32 %v3849_v43, %v3845_v51  ;;  %v1235_v13 = vsel %vm9849_vm15, %v1227_v34, %v1234_v22  ;;  %1517 = vst [vmem:[#allocation2 + $0x110] sm:$0x1] %v1516_v56  ;;  %v10738_v18 = vld [vmem:[%s14436_s2] ss:$0 sm:$0xff]  ;;  %v2393_v24 = vsel %vm2357_vm2, %v2391_v58, %v2392_v1  ;;  %v9251_v16 = vld [vmem:[#allocation2 + $0x90] sm:$0xfe]  }
 0x122   :  { %5939 = vrot.lane.b32.xlu1 %v5895_v2, %s9550_s23  ;;  %1513 = vst [vmem:[#allocation2 + $0x108] sm:$0xf] %v1512_v0  ;;  %1514 = vst.msk [vmem:[#allocation2 + $0x10c] sm:$0xf] %vm27_vm0, %v1235_v13  ;;  %v2966_v4 = vrot.slane %v2964_v60, 1  ;;  %v200_v3 = vadd.f32 %v10738_v18, %v161_v25  ;;  %v201_v15 = vadd.f32 %v10738_v18, %v162_v47  ;;  %v4172_v34 = vrot.slane %v9249_v38, 1 }
 0x123   :  { %v10704_v31 = vpop.permute.xlu1 %3319  ;;  %v3855_v19 = vsel %vm14446_vm12, %v3850_v11, %v3854_v9  ;;  %v10728_v2 = vld [vmem:[#allocation2 + $0x104] ss:$0 sps:$4 sm:$0x11]   ;;  %v2962_v51 = vor.u32 %v2961_v29, %v2957_v50  ;;  %v4173_v49 = vrot.slane %v9250_v46, 1  ;;  %v4601_v33 = vor.u32 %v4600_v21, %v4596_v8  ;;  %v9257_v50 = vld [vmem:[#allocation2 + $0x54] sm:$0xff]  }
 0x124   :  { %v10697_v27 = vpop.permute.xlu0 %3497  ;;  %3936 = vrot.lane.b32.xlu0 %v3855_v19, %s9551_s24  ;;  %v5001_v20 = vrot.slane %v10728_v2, 1  ;;  %vm232_vm10 = vcmp.gt.f32.partialorder %v200_v3, 0.0  ;;  %vm233_vm11 = vcmp.gt.f32.partialorder %v201_v15, 0.0  ;;  %v9252_v43 = vld [vmem:[#allocation2 + $0x98] ss:$0 sps:$4 sm:$0x11]  }
 0x125   :  { %v4174_v30 = vsel %vm2357_vm2, %v4172_v34, %v4173_v49  ;;  %vm264_vm5 = vcmp.lt.f32.partialorder %v200_v3, 0.0  ;;  %vm265_vm6 = vcmp.lt.f32.partialorder %v201_v15, 0.0  ;;  %v2967_v56 = vsel %vm14446_vm12, %v2962_v51, %v2966_v4  ;;  %v6874_v58 = vld [vmem:[#allocation3 + $0x50] sm:$0xff]  ;;  %v845_v4 = vld [vmem:[#allocation2 + $0x9c] sm:$0xf]  ;;  %1738 = vst.msk [vmem:[#allocation3 + $0x70] sm:$0xff] %vm14487_vm13, %v9257_v50 }
 0x126   :  { %4226 = vst.msk [vmem:[#allocation3 + $0x58] sm:$0xff] %vm14487_vm13, %v4174_v30  ;;  %v296_v42 = vsel %vm264_vm5, -1.0, %v9545_v10  ;;  %v297_v32 = vsel %vm265_vm6, -1.0, %v9545_v10  ;;  %v3290_v28 = vrot.slane %v9251_v16, 1  ;;  %v3291_v25 = vrot.slane %v9252_v43, 1 }
 0x127   :  { %v328_v11 = vsel %vm232_vm10, 1.0, %v296_v42  ;;  %v329_v35 = vsel %vm233_vm11, 1.0, %v297_v32  ;;  %v4606_v38 = vsel %vm14446_vm12, %v4601_v33, %v10726_v48  ;;  %2172 = vst.msk [vmem:[#allocation3 + $0x70] sm:$0xff] %vm2164_vm14, %v10660_v45  ;;  %vm14526_vm10 = vcmask 392448   ;;  %v849_v49 = vld [vmem:[#allocation2 + $0xa4] sm:$0x1] }
 0x128   :  { %v10706_v41 = vpop.permute.xlu0 %2132  ;;  %2138 = vrot.lane.b32.xlu0 %v2067_v54, %s9547_s20  ;;  %v9241_v52 = vld [vmem:[#allocation2 + $0x110] ss:$0 sps:$4 sm:$0x11]   ;;  %v8977_v7 = vpack.c.bf16 %v328_v11, %v328_v11  ;;  %v8978_v54 = vpack.c.bf16 %v329_v35, %v329_v35  ;;  %v3292_v34 = vsel %vm2357_vm2, %v3290_v28, %v3291_v25  ;;  %2462 = vst.msk [vmem:[#allocation3 + $0x70] sm:$0xff] %vm14526_vm10, %v10648_v26  ;;  %vm14527_vm11 = vcmask 523648   ;;  %v8374_v11 = vld [vmem:[%s14435_s0 + $0x148] sm:$0xff] }
 0x129   :  { %v10724_v57 = vpop.permute.xlu1 %3930  ;;  %v9236_v5 = vld [vmem:[#allocation2 + $0x108] sm:$0xff]   ;;  %v6384_v0 = vshll.u32 %v9241_v52, 16  ;;  %v9256_v21 = vld [vmem:[#allocation2 + $0x110] ss:$0 sps:$4 sm:$0x11]   ;;  %2639 = vst.msk [vmem:[#allocation3 + $0x70] sm:$0xff] %vm14527_vm11, %v10684_v62  ;;  %v5002_v26 = vsel %vm2357_vm2, %v5000_v14, %v5001_v20 }
 0x12a   :  { %v9240_v17 = vld [vmem:[#allocation2 + $0x108] sm:$0xff]   ;;  %6116 = vrot.lane.b32.xlu1 %v9236_v5, %s9548_s21  ;;  %v640_v1 = vshrl.u32 %v8977_v7, 16  ;;  %v643_v8 = vshll.u32 %v8977_v7, 16  ;;  %v648_v47 = vshrl.u32 %v8978_v54, 16  ;;  %v651_v29 = vshll.u32 %v8978_v54, 16  ;;  %3072 = vst.msk [vmem:[#allocation3 + $0x70] sm:$0xff] %vm3064_vm1, %v10674_v59 }
 0x12b   :  { %v6377_v23 = vshrl.u32 %v9240_v17, 16  ;;  %v6379_v53 = vshll.u32 %v9240_v17, 16  ;;  %v6386_v40 = vrot.slane %v6384_v0, 1  ;;  %v10762_v19 = vld [vmem:[#allocation2 + $0x108] sm:$0xff]   ;;  %v5499_v51 = vshll.u32 %v9256_v21, 16  ;;  %v10787_v0 = vld [vmem:[#allocation2 + $0x90] sm:$0xff]  }
 0x12c   :  { %v10722_v55 = vpop.permute.xlu0 %2422  ;;  %2428 = vrot.lane.b32.xlu0 %v2393_v24, %s9546_s15  ;;  %v642_v46 = vrot.slane %v640_v1, 7  ;;  %v5494_v3 = vshll.u32 %v10762_v19, 16  ;;  %v650_v17 = vrot.slane %v648_v47, 7  ;;  %v5492_v52 = vshrl.u32 %v10762_v19, 16  ;;  %v9262_v45 = vld [vmem:[#allocation2 + $0x60] sm:$0xfe]  }
 0x12d   :  { %v10745_v37 = vpop.permute.xlu1 %4751  ;;  %v6381_v9 = vrot.slane %v6379_v53, 1  ;;  %v6875_v5 = vld [vmem:[#allocation3 + $0x58] sm:$0xff]  ;;  %v4175_v61 = vrot.slane %v9262_v45, 1  ;;  %3361 = vst.msk [vmem:[#allocation3 + $0x70] sm:$0xff] %vm3353_vm3, %v10704_v31  ;;  %v8373_v59 = vld [vmem:[%s14435_s0 + $0x140] sm:$0xff]  ;;  %v2071_v32 = vshll.u32 %v10787_v0, 16 }
 0x12e   :  { %8924 = vmatprep.mubr.msk.bf16.mxu0 %vm14487_vm13, %v6875_v5  ;;  %v645_v48 = vor.u32 %v643_v8, %v642_v46  ;;  %v653_v16 = vor.u32 %v651_v29, %v650_v17  ;;  %v10783_v53 = vld [vmem:[#allocation2 + $0x108] sm:$0xfe]   ;;  %v5496_v43 = vrot.slane %v5494_v3, 1  ;;  %v10806_v14 = vld [vmem:[#allocation2 + $0x110] ss:$0 sps:$4 sm:$0x11]  }
 0x12f   :  { %v6382_v13 = vor.u32 %v6381_v9, %v6377_v23  ;;  %7169 = vmatmul.mubr.bf16.gmra.mrb[20].mxu0 %v6874_v58  ;;  %v655_v23 = vrot.slane %v650_v17, 4  ;;  %v9263_v9 = vld [vmem:[#allocation2 + $0x68] ss:$0 sps:$4 sm:$0x11]   ;;  %3539 = vst.msk [vmem:[#allocation3 + $0x70] sm:$0xff] %vm3531_vm7, %v10697_v27  ;;  %v5501_v35 = vrot.slane %v5499_v51, 1 }
 0x130   :  { %v10743_v6 = vpop.permute.xlu0 %2599  ;;  %2605 = vrot.lane.b32.xlu0 %v9242_v63, %s9549_s22  ;;  %v646_v63 = vrot.slane %v642_v46, 4  ;;  %v846_v30 = vsel %vm9856_vm4, %v645_v48, %v845_v4  ;;  %v4176_v20 = vrot.slane %v9263_v9, 1  ;;  %v9253_v33 = vld [vmem:[#allocation2 + $0x108] sm:$0xff]   ;;  %v10816_v31 = vld [vmem:[#allocation2 + $0x98] ss:$0 sps:$4 sm:$0x11]  }
 0x131   :  { %v10755_v22 = vpop.permute.xlu1 %5039  ;;  %v6387_v60 = vsel %vm14446_vm12, %v6382_v13, %v6386_v40  ;;  %847 = vst [vmem:[#allocation2 + $0x9c] sm:$0xf] %v846_v30  ;;  %v850_v2 = vsel %vm9880_vm9, %v655_v23, %v849_v49  ;;  %v10825_v13 = vld [vmem:[%s14436_s2] ss:$0 sm:$0xff]  ;;  %3972 = vst.msk [vmem:[#allocation3 + $0x70] sm:$0xff] %vm14445_vm8, %v10724_v57  ;;  %v5896_v28 = vrot.slane %v10783_v53, 1 }
 0x132   :  { %6548 = vrot.lane.b32.xlu1 %v6387_v60, %s9551_s24  ;;  %v654_v62 = vsel %vm9849_vm15, %v646_v63, %v653_v16  ;;  %851 = vst [vmem:[#allocation2 + $0xa4] sm:$0x1] %v850_v2  ;;  %v921_v27 = vadd.f32 %v10825_v13, %v8373_v59  ;;  %v4177_v7 = vsel %vm2357_vm2, %v4175_v61, %v4176_v20  ;;  %v9267_v25 = vld [vmem:[#allocation2 + $0x60] sm:$0xff]   ;;  %v5897_v54 = vrot.slane %v10806_v14, 1  ;;  %v9275_v60 = vld [vmem:[#allocation2 + $0xd8] sm:$0xff]   ;;  %v10864_v45 = vld [vmem:[#allocation2 + $0x108] sm:$0xff]  }
 0x133   :  { %848 = vst.msk [vmem:[#allocation2 + $0xa0] sm:$0xf] %vm27_vm0, %v654_v62  ;;  %v922_v19 = vadd.f32 %v10825_v13, %v8374_v11  ;;  %v2069_v57 = vshrl.u32 %v10787_v0, 16  ;;  %v2073_v58 = vrot.slane %v2071_v32, 1  ;;  %v2076_v46 = vshll.u32 %v10816_v31, 16 }
 0x134   :  { %v10753_v36 = vpop.permute.xlu0 %3032  ;;  %3038 = vrot.lane.b32.xlu0 %v2967_v56, %s9552_s29  ;;  %v5497_v56 = vor.u32 %v5496_v43, %v5492_v52  ;;  %4227 = vst.msk [vmem:[#allocation3 + $0x68] sm:$0xff] %vm14487_vm13, %v4177_v7  ;;  %vm953_vm5 = vcmp.gt.f32.partialorder %v921_v27, 0.0  ;;  %vm985_vm6 = vcmp.lt.f32.partialorder %v921_v27, 0.0  ;;  %1739 = vst.msk [vmem:[#allocation3 + $0x80] sm:$0xff] %vm14487_vm13, %v9267_v25  ;;  %v1518_v16 = vld [vmem:[#allocation2 + $0x114] sm:$0xf] }
 0x135   :  { %vm954_vm10 = vcmp.gt.f32.partialorder %v922_v19, 0.0  ;;  %vm986_vm11 = vcmp.lt.f32.partialorder %v922_v19, 0.0  ;;  %v1017_v1 = vsel %vm985_vm6, -1.0, %v9545_v10  ;;  %2173 = vst.msk [vmem:[#allocation3 + $0x80] sm:$0xff] %vm2164_vm14, %v10706_v41  ;;  %vm14528_vm6 = vcmask 392448  }
 0x136   :  { %4757 = vrot.lane.b32.xlu1 %v4606_v38, %s9547_s20  ;;  %v1018_v8 = vsel %vm986_vm11, -1.0, %v9545_v10  ;;  %v5502_v21 = vsel %vm14446_vm12, %v5497_v56, %v5501_v35  ;;  %v1049_v50 = vsel %vm953_vm5, 1.0, %v1017_v1  ;;  %4367 = vst.msk [vmem:[#allocation3 + $0x100] sm:$0xff] %vm14487_vm13, %v9275_v60  ;;  %vm14529_vm5 = vcmask 523648   ;;  %v9268_v20 = vld [vmem:[#allocation2 + $0x90] sm:$0xfe]  }
 0x137   :  { %v1050_v47 = vsel %vm954_vm10, 1.0, %v1018_v8  ;;  %v8993_v3 = vpack.c.bf16 %v1049_v50, %v1049_v50  ;;  %2463 = vst.msk [vmem:[#allocation3 + $0x80] sm:$0xff] %vm14528_vm6, %v10722_v55  ;;  %vm14530_vm10 = vmmov %vm14528_vm6  ;;  %v6876_v55 = vld [vmem:[#allocation3 + $0x60] sm:$0xff]  ;;  %v2078_v43 = vrot.slane %v2076_v46, 1  ;;  %v2074_v14 = vor.u32 %v2073_v58, %v2069_v57  ;;  %v164_v1 = vld [vmem:[%s14435_s0 + $0xd8] sm:$0xff] }
 0x138   :  { %v10771_v24 = vpop.permute.xlu0 %3321  ;;  %3327 = vrot.lane.b32.xlu0 %v3292_v34, %s9550_s23  ;;  %v8994_v5 = vpack.c.bf16 %v1050_v47, %v1050_v47  ;;  %4799 = vst.msk [vmem:[#allocation3 + $0x100] sm:$0xff] %vm2164_vm14, %v10745_v37  ;;  %vm14531_vm11 = vmmov %vm14529_vm5  ;;  %v4610_v11 = vshll.u32 %v10864_v45, 16  ;;  %v2394_v19 = vrot.slane %v9268_v20, 1  ;;  %v163_v57 = vld [vmem:[%s14435_s0 + $0xd0] sm:$0xff]  ;;  %v4608_v58 = vshrl.u32 %v10864_v45, 16 }
 0x139   :  { %v9259_v17 = vld [vmem:[#allocation2 + $0xa4] ss:$0 sps:$4 sm:$0x11]   ;;  %2640 = vst.msk [vmem:[#allocation3 + $0x80] sm:$0xff] %vm14529_vm5, %v10743_v6  ;;  %v1238_v41 = vshrl.u32 %v8993_v3, 16  ;;  %v1241_v52 = vshll.u32 %v8993_v3, 16  ;;  %v2079_v7 = vsel %vm14446_vm12, %v2074_v14, %v2078_v43  ;;  %v202_v8 = vadd.f32 %v10738_v18, %v163_v57 }
 0x13a   :  { %v10773_v15 = vpop.permute.xlu1 %5215  ;;  %5045 = vrot.lane.b32.xlu1 %v5002_v26, %s9546_s15  ;;  %v9254_v38 = vld [vmem:[#allocation2 + $0x9c] sm:$0xff]   ;;  %5087 = vst.msk [vmem:[#allocation3 + $0x100] sm:$0xff] %vm14530_vm10, %v10755_v22  ;;  %v1246_v48 = vshrl.u32 %v8994_v5, 16  ;;  %v1249_v63 = vshll.u32 %v8994_v5, 16  ;;  %v3864_v51 = vshll.u32 %v9259_v17, 16  ;;  %v5898_v22 = vsel %vm2357_vm2, %v5896_v28, %v5897_v54 }
 0x13b   :  { %v9258_v34 = vld [vmem:[#allocation2 + $0x9c] sm:$0xff]   ;;  %3073 = vst.msk [vmem:[#allocation3 + $0x80] sm:$0xff] %vm3064_vm1, %v10753_v36  ;;  %v1240_v23 = vrot.slane %v1238_v41, 7  ;;  %v9269_v26 = vld [vmem:[#allocation2 + $0x98] ss:$0 sps:$4 sm:$0x11]  }
 0x13c   :  { %3505 = vrot.lane.b32.xlu0 %v9254_v38, %s9548_s21  ;;  %5263 = vst.msk [vmem:[#allocation3 + $0x100] sm:$0xff] %vm14531_vm11, %v10773_v15  ;;  %v3857_v37 = vshrl.u32 %v9258_v34, 16  ;;  %v3859_v6 = vshll.u32 %v9258_v34, 16  ;;  %v6877_v49 = vld [vmem:[#allocation3 + $0x68] sm:$0xff]  ;;  %v1248_v53 = vrot.slane %v1246_v48, 7  ;;  %v3866_v0 = vrot.slane %v3864_v51, 1 }
 0x13d   :  { %3362 = vst.msk [vmem:[#allocation3 + $0x80] sm:$0xff] %vm3353_vm3, %v10771_v24  ;;  %8925 = vmatprep.mubr.msk.bf16.mxu0 %vm14487_vm13, %v6877_v49  ;;  %v1522_v36 = vld [vmem:[#allocation2 + $0x11c] sm:$0x1]  ;;  %v1243_v9 = vor.u32 %v1241_v52, %v1240_v23  ;;  %v1244_v62 = vrot.slane %v1240_v23, 4  ;;  %v2395_v28 = vrot.slane %v9269_v26, 1  ;;  %v4612_v50 = vrot.slane %v4610_v11, 1 }
 0x13e   :  { %5221 = vrot.lane.b32.xlu1 %v9253_v33, %s9549_s22  ;;  %v3861_v15 = vrot.slane %v3859_v6, 1  ;;  %7177 = vmatmul.mubr.bf16.gmra.mrb[24].mxu0 %v6876_v55  ;;  %v1251_v2 = vor.u32 %v1249_v63, %v1248_v53  ;;  %v1253_v59 = vrot.slane %v1248_v53, 4  ;;  %v9276_v56 = vld [vmem:[#allocation2 + $0x9c] sm:$0xff]   ;;  %v9277_v35 = vld [vmem:[#allocation2 + $0xa4] ss:$0 sps:$4 sm:$0x11]  }
 0x13f   :  { %v1519_v33 = vsel %vm9856_vm4, %v1243_v9, %v1518_v16  ;;  %v2971_v54 = vshll.u32 %v9276_v56, 16  ;;  %v2976_v60 = vshll.u32 %v9277_v35, 16  ;;  %v2396_v38 = vsel %vm2357_vm2, %v2394_v19, %v2395_v28  ;;  %v9280_v5 = vld [vmem:[#allocation2 + $0x6c] sm:$0xfe]   ;;  %v9272_v17 = vld [vmem:[#allocation2 + $0x9c] sm:$0xff]  }
 0x140   :  { %v3862_v61 = vor.u32 %v3861_v15, %v3857_v37  ;;  %1520 = vst [vmem:[#allocation2 + $0x114] sm:$0xf] %v1519_v33  ;;  %v1523_v32 = vsel %vm9880_vm9, %v1253_v59, %v1522_v36  ;;  %vm234_vm6 = vcmp.gt.f32.partialorder %v202_v8, 0.0  ;;  %v4178_v63 = vrot.slane %v9280_v5, 1  ;;  %v10905_v37 = vld [vmem:[#allocation2 + $0x108] sm:$0xfe]  }
 0x141   :  { %1524 = vst [vmem:[#allocation2 + $0x11c] sm:$0x1] %v1523_v32  ;;  %v2973_v46 = vrot.slane %v2971_v54, 1  ;;  %v2978_v3 = vrot.slane %v2976_v60, 1  ;;  %vm266_vm10 = vcmp.lt.f32.partialorder %v202_v8, 0.0  ;;  %v5003_v33 = vrot.slane %v10905_v37, 1 }
 0x142   :  { %5653 = vrot.lane.b32.xlu1 %v5502_v21, %s9552_s29  ;;  %v3867_v31 = vsel %vm14446_vm12, %v3862_v61, %v3866_v0  ;;  %v9281_v6 = vld [vmem:[#allocation2 + $0x74] ss:$0 sps:$4 sm:$0x11]   ;;  %v9282_v53 = vld [vmem:[#allocation2 + $0x9c] sm:$0xfe]   ;;  %v298_v36 = vsel %vm266_vm10, -1.0, %v9545_v10  ;;  %v4613_v0 = vor.u32 %v4612_v50, %v4608_v58 }
 0x143   :  { %3938 = vrot.lane.b32.xlu0 %v3867_v31, %s9551_s24  ;;  %v4179_v23 = vrot.slane %v9281_v6, 1  ;;  %v9279_v26 = vld [vmem:[#allocation2 + $0x110] ss:$0 sps:$4 sm:$0x11]   ;;  %v330_v61 = vsel %vm234_vm6, 1.0, %v298_v36  ;;  %v8376_v37 = vld [vmem:[%s14435_s0 + $0x158] sm:$0xff] }
 0x144   :  { %v8375_v19 = vld [vmem:[%s14435_s0 + $0x150] sm:$0xff]  ;;  %v852_v50 = vld [vmem:[#allocation2 + $0xa8] sm:$0xf] }
 0x146   :  { %5941 = vrot.lane.b32.xlu1 %v5898_v22, %s9550_s23 }
 0x147   :  { %2140 = vrot.lane.b32.xlu0 %v2079_v7, %s9547_s20 }
 0x148   :  { %v9271_v48 = vld [vmem:[#allocation2 + $0x11c] ss:$0 sps:$4 sm:$0x11]  }
 0x149   :  { %v6396_v16 = vshll.u32 %v9271_v48, 16  ;;  %v9287_v7 = vld [vmem:[#allocation2 + $0x11c] ss:$0 sps:$4 sm:$0x11]  }
 0x14b   :  { %2430 = vrot.lane.b32.xlu0 %v2396_v38, %s9546_s15  ;;  %v6398_v15 = vrot.slane %v6396_v16, 1 }
 0x14e   :  { %v5648_v42 = vpop.permute.xlu1 %5647 }
 0x14f   :  { %5695 = vst.msk [vmem:[#allocation3 + $0x100] sm:$0xff] %vm3064_vm1, %v5648_v42  ;;  %v1252_v42 = vsel %vm9849_vm15, %v1244_v62, %v1251_v2  ;;  %2607 = vrot.lane.b32.xlu0 %v9272_v17, %s9549_s22  ;;  %v4180_v62 = vsel %vm2357_vm2, %v4178_v63, %v4179_v23  ;;  %v3293_v2 = vrot.slane %v9282_v53, 1  ;;  %v856_v17 = vld [vmem:[#allocation2 + $0xb0] sm:$0x1]  ;;  %v924_v53 = vadd.f32 %v10825_v13, %v8376_v37 }
 0x150   :  { %v10813_v40 = vpop.permute.xlu0 %3499  ;;  %1521 = vst.msk [vmem:[#allocation2 + $0x118] sm:$0xf] %vm27_vm0, %v1252_v42  ;;  %v8979_v42 = vpack.c.bf16 %v330_v61, %v330_v61  ;;  %v10949_v23 = vld [vmem:[#allocation2 + $0x11c] ss:$0 sps:$4 sm:$0x11]  }
 0x151   :  { %3540 = vst.msk [vmem:[#allocation3 + $0x80] sm:$0xff] %vm3531_vm7, %v10813_v40  ;;  %v9274_v40 = vld [vmem:[#allocation2 + $0x110] ss:$0 sps:$4 sm:$0x11]  }
 0x152   :  { %v5936_v4 = vpop.permute.xlu1 %5935  ;;  %v4615_v27 = vshll.u32 %v9274_v40, 16  ;;  %4228 = vst.msk [vmem:[#allocation3 + $0x78] sm:$0xff] %vm14487_vm13, %v4180_v62  ;;  %v660_v35 = vshll.u32 %v8979_v42, 16 }
 0x153   :  { %5983 = vst.msk [vmem:[#allocation3 + $0x100] sm:$0xff] %vm3353_vm3, %v5936_v4  ;;  %v203_v4 = vadd.f32 %v10738_v18, %v164_v1  ;;  %v5004_v1 = vrot.slane %v9279_v26, 1  ;;  %v10956_v26 = vld [vmem:[#allocation2 + $0xa4] ss:$0 sps:$4 sm:$0x11]  }
 0x154   :  { %v10896_v47 = vrot.slane %v4615_v27, 1 }
 0x155   :  { %vm235_vm5 = vcmp.gt.f32.partialorder %v203_v4, 0.0  ;;  %vm267_vm11 = vcmp.lt.f32.partialorder %v203_v4, 0.0  ;;  %v923_v4 = vadd.f32 %v10825_v13, %v8375_v19 }
 0x156   :  { %v6113_v30 = vpop.permute.xlu1 %6112  ;;  %v299_v43 = vsel %vm267_vm11, -1.0, %v9545_v10  ;;  %v4618_v58 = vsel %vm14446_vm12, %v4613_v0, %v10896_v47  ;;  %vm988_vm11 = vcmp.lt.f32.partialorder %v924_v53, 0.0 }
 0x157   :  { %6160 = vst.msk [vmem:[#allocation3 + $0x100] sm:$0xff] %vm3531_vm7, %v6113_v30  ;;  %v9266_v34 = vld [vmem:[#allocation2 + $0x114] sm:$0xff]   ;;  %v9283_v30 = vld [vmem:[#allocation2 + $0xa4] ss:$0 sps:$4 sm:$0x11]   ;;  %v331_v40 = vsel %vm235_vm5, 1.0, %v299_v43 }
 0x158   :  { %v3933_v29 = vpop.permute.xlu0 %3932  ;;  %6118 = vrot.lane.b32.xlu1 %v9266_v34, %s9548_s21  ;;  %v9270_v52 = vld [vmem:[#allocation2 + $0x114] sm:$0xff]   ;;  %v3294_v59 = vrot.slane %v9283_v30, 1  ;;  %v8980_v31 = vpack.c.bf16 %v331_v40, %v331_v40  ;;  %vm955_vm6 = vcmp.gt.f32.partialorder %v923_v4, 0.0  ;;  %vm956_vm5 = vcmp.gt.f32.partialorder %v924_v53, 0.0 }
 0x159   :  { %3973 = vst.msk [vmem:[#allocation3 + $0x80] sm:$0xff] %vm14445_vm8, %v3933_v29  ;;  %v2969_v29 = vshrl.u32 %v9276_v56, 16  ;;  %v6389_v22 = vshrl.u32 %v9270_v52, 16  ;;  %v6391_v49 = vshll.u32 %v9270_v52, 16  ;;  %v9286_v32 = vld [vmem:[#allocation2 + $0x114] sm:$0xff]   ;;  %v657_v56 = vshrl.u32 %v8979_v42, 16 }
 0x15a   :  { %v3295_v28 = vsel %vm2357_vm2, %v3293_v2, %v3294_v59  ;;  %v665_v54 = vshrl.u32 %v8980_v31, 16  ;;  %v668_v60 = vshll.u32 %v8980_v31, 16  ;;  %v5506_v57 = vshll.u32 %v9286_v32, 16  ;;  %v10935_v52 = vld [vmem:[#allocation2 + $0x9c] sm:$0xff]   ;;  %v6879_v47 = vld [vmem:[#allocation3 + $0x78] sm:$0xff]  ;;  %v9284_v36 = vld [vmem:[#allocation2 + $0x114] sm:$0xff]  }
 0x15b   :  { %v2974_v55 = vor.u32 %v2973_v46, %v2969_v29  ;;  %v6393_v45 = vrot.slane %v6391_v49, 1  ;;  %v659_v8 = vrot.slane %v657_v56, 7  ;;  %v5511_v29 = vshll.u32 %v9287_v7, 16  ;;  %v6878_v46 = vld [vmem:[#allocation3 + $0x70] sm:$0xff]  ;;  %8926 = vmatprep.mubr.msk.bf16.mxu0 %vm14487_vm13, %v6879_v47  ;;  %v10947_v16 = vld [vmem:[#allocation2 + $0x114] sm:$0xfe]  }
 0x15c   :  { %v10870_v24 = vpop.permute.xlu0 %2134  ;;  %v5504_v34 = vshrl.u32 %v9286_v32, 16  ;;  %v5508_v63 = vrot.slane %v5506_v57, 1  ;;  %7185 = vmatmul.mubr.bf16.gmra.mrb[28].mxu0 %v6878_v46  ;;  %vm987_vm10 = vcmp.lt.f32.partialorder %v923_v4, 0.0  ;;  %v2083_v30 = vshll.u32 %v10935_v52, 16  ;;  %v1525_v57 = vld [vmem:[#allocation2 + $0x120] sm:$0xf] }
 0x15d   :  { %v2979_v9 = vsel %vm14446_vm12, %v2974_v55, %v2978_v3  ;;  %v6394_v20 = vor.u32 %v6393_v45, %v6389_v22  ;;  %v662_v3 = vor.u32 %v660_v35, %v659_v8  ;;  %v663_v5 = vrot.slane %v659_v8, 4  ;;  %v1529_v4 = vld [vmem:[#allocation2 + $0x128] sm:$0x1] }
 0x15e   :  { %v6545_v21 = vpop.permute.xlu1 %6544  ;;  %3040 = vrot.lane.b32.xlu0 %v2979_v9, %s9552_s29  ;;  %v5005_v22 = vsel %vm2357_vm2, %v5003_v33, %v5004_v1  ;;  %v1019_v43 = vsel %vm987_vm10, -1.0, %v9545_v10  ;;  %v9295_v9 = vld [vmem:[#allocation2 + $0x6c] sm:$0xff]   ;;  %v5509_v2 = vor.u32 %v5508_v63, %v5504_v34  ;;  %v1020_v61 = vsel %vm988_vm11, -1.0, %v9545_v10  ;;  %v9296_v34 = vld [vmem:[#allocation2 + $0x9c] sm:$0xfe]  }
 0x15f   :  { %6592 = vst.msk [vmem:[#allocation3 + $0x100] sm:$0xff] %vm14445_vm8, %v6545_v21  ;;  %v6399_v27 = vsel %vm14446_vm12, %v6394_v20, %v6398_v15  ;;  %v667_v21 = vrot.slane %v665_v54, 7  ;;  %v853_v49 = vsel %vm9856_vm4, %v662_v3, %v852_v50  ;;  %v5513_v15 = vrot.slane %v5511_v29, 1 }
 0x160   :  { %v10885_v25 = vpop.permute.xlu0 %2424  ;;  %6550 = vrot.lane.b32.xlu1 %v6399_v27, %s9551_s24  ;;  %854 = vst [vmem:[#allocation2 + $0xa8] sm:$0xf] %v853_v49  ;;  %v1051_v20 = vsel %vm955_vm6, 1.0, %v1019_v43  ;;  %v1052_v59 = vsel %vm956_vm5, 1.0, %v1020_v61  ;;  %1740 = vst.msk [vmem:[#allocation3 + $0x90] sm:$0xff] %vm14487_vm13, %v9295_v9  ;;  %v5899_v33 = vrot.slane %v10947_v16, 1 }
 0x161   :  { %v670_v48 = vor.u32 %v668_v60, %v667_v21  ;;  %v672_v55 = vrot.slane %v667_v21, 4  ;;  %v8995_v40 = vpack.c.bf16 %v1051_v20, %v1051_v20  ;;  %v5900_v31 = vrot.slane %v10949_v23, 1  ;;  %2174 = vst.msk [vmem:[#allocation3 + $0x90] sm:$0xff] %vm2164_vm14, %v10870_v24 }
 0x162   :  { %v10907_v51 = vpop.permute.xlu1 %4753  ;;  %3329 = vrot.lane.b32.xlu0 %v3295_v28, %s9550_s23  ;;  %v2081_v32 = vshrl.u32 %v10935_v52, 16  ;;  %v8996_v27 = vpack.c.bf16 %v1052_v59, %v1052_v59  ;;  %v2085_v56 = vrot.slane %v2083_v30, 1  ;;  %v2088_v35 = vshll.u32 %v10956_v26, 16  ;;  %v10986_v52 = vld [vmem:[#allocation2 + $0x114] sm:$0xff]  }
 0x163   :  { %v671_v45 = vsel %vm9849_vm15, %v663_v5, %v670_v48  ;;  %v857_v0 = vsel %vm9880_vm9, %v672_v55, %v856_v17  ;;  %v1255_v7 = vshrl.u32 %v8995_v40, 16  ;;  %v1258_v19 = vshll.u32 %v8995_v40, 16  ;;  %v9300_v17 = vld [vmem:[#allocation2 + $0x78] sm:$0xfe]  }
 0x164   :  { %v10901_v41 = vpop.permute.xlu0 %2601  ;;  %4759 = vrot.lane.b32.xlu1 %v4618_v58, %s9547_s20  ;;  %855 = vst.msk [vmem:[#allocation2 + $0xac] sm:$0xf] %vm27_vm0, %v671_v45  ;;  %858 = vst [vmem:[#allocation2 + $0xb0] sm:$0x1] %v857_v0  ;;  %vm14532_vm6 = vcmask 392448   ;;  %v5514_v28 = vsel %vm14446_vm12, %v5509_v2, %v5513_v15  ;;  %v1263_v54 = vshrl.u32 %v8996_v27, 16  ;;  %v5901_v5 = vsel %vm2357_vm2, %v5899_v33, %v5900_v31 }
 0x165   :  { %2464 = vst.msk [vmem:[#allocation3 + $0x90] sm:$0xff] %vm14532_vm6, %v10885_v25  ;;  %v1266_v60 = vshll.u32 %v8996_v27, 16  ;;  %vm14533_vm5 = vcmask 523648   ;;  %v1257_v24 = vrot.slane %v1255_v7, 7  ;;  %v2090_v49 = vrot.slane %v2088_v35, 1  ;;  %v9305_v45 = vld [vmem:[#allocation2 + $0xe4] sm:$0xff]   ;;  %vm14534_vm10 = vmmov %vm14532_vm6 }
 0x166   :  { %v10920_v11 = vpop.permute.xlu1 %5041  ;;  %2641 = vst.msk [vmem:[#allocation3 + $0x90] sm:$0xff] %vm14533_vm5, %v10901_v41  ;;  %v1265_v29 = vrot.slane %v1263_v54, 7  ;;  %v9297_v48 = vld [vmem:[#allocation2 + $0xa4] ss:$0 sps:$4 sm:$0x11]   ;;  %v4181_v16 = vrot.slane %v9300_v17, 1  ;;  %v2086_v0 = vor.u32 %v2085_v56, %v2081_v32  ;;  %vm14535_vm11 = vmmov %vm14533_vm5 }
 0x167   :  { %v1260_v25 = vor.u32 %v1258_v19, %v1257_v24  ;;  %v1261_v50 = vrot.slane %v1257_v24, 4  ;;  %v9301_v55 = vld [vmem:[#allocation2 + $0x80] ss:$0 sps:$4 sm:$0x11]   ;;  %v4622_v30 = vshll.u32 %v10986_v52, 16  ;;  %4368 = vst.msk [vmem:[#allocation3 + $0x110] sm:$0xff] %vm14487_vm13, %v9305_v45 }
 0x168   :  { %v10915_v14 = vpop.permute.xlu0 %3034  ;;  %5047 = vrot.lane.b32.xlu1 %v5005_v22, %s9546_s15  ;;  %v1270_v63 = vrot.slane %v1265_v29, 4  ;;  %v9304_v26 = vld [vmem:[#allocation2 + $0x11c] ss:$0 sps:$4 sm:$0x11]   ;;  %v2397_v61 = vrot.slane %v9296_v34, 1  ;;  %4800 = vst.msk [vmem:[#allocation3 + $0x110] sm:$0xff] %vm2164_vm14, %v10907_v51  ;;  %v2091_v33 = vsel %vm14446_vm12, %v2086_v0, %v2090_v49 }
 0x169   :  { %3074 = vst.msk [vmem:[#allocation3 + $0x90] sm:$0xff] %vm3064_vm1, %v10915_v14  ;;  %v1526_v47 = vsel %vm9856_vm4, %v1260_v25, %v1525_v57  ;;  %v2398_v59 = vrot.slane %v9297_v48, 1  ;;  %v4620_v31 = vshrl.u32 %v10986_v52, 16  ;;  %v4624_v32 = vrot.slane %v4622_v30, 1  ;;  %v165_v51 = vld [vmem:[%s14435_s0 + $0xe0] sm:$0xff]  ;;  %v6880_v7 = vld [vmem:[#allocation3 + $0x80] sm:$0xff] }
 0x16a   :  { %v10941_v6 = vpop.permute.xlu1 %5217  ;;  %1527 = vst [vmem:[#allocation2 + $0x120] sm:$0xf] %v1526_v47  ;;  %v1530_v53 = vsel %vm9880_vm9, %v1270_v63, %v1529_v4  ;;  %5088 = vst.msk [vmem:[#allocation3 + $0x110] sm:$0xff] %vm14534_vm10, %v10920_v11  ;;  %v4627_v56 = vshll.u32 %v9304_v26, 16  ;;  %v11018_v19 = vld [vmem:[#allocation2 + $0x114] sm:$0xfe]   ;;  %v204_v57 = vadd.f32 %v10738_v18, %v165_v51 }
 0x16b   :  { %v9285_v58 = vld [vmem:[#allocation2 + $0xa8] sm:$0xff]   ;;  %v9289_v21 = vld [vmem:[#allocation2 + $0xb0] ss:$0 sps:$4 sm:$0x11]   ;;  %1531 = vst [vmem:[#allocation2 + $0x128] sm:$0x1] %v1530_v53 }
 0x16c   :  { %v10932_v38 = vpop.permute.xlu0 %3323  ;;  %5223 = vrot.lane.b32.xlu1 %v9284_v36, %s9549_s22  ;;  %v9288_v8 = vld [vmem:[#allocation2 + $0xa8] sm:$0xff]   ;;  %3507 = vrot.lane.b32.xlu0 %v9285_v58, %s9548_s21  ;;  %v3876_v14 = vshll.u32 %v9289_v21, 16  ;;  %v4182_v36 = vrot.slane %v9301_v55, 1  ;;  %v9307_v40 = vld [vmem:[#allocation2 + $0xb0] ss:$0 sps:$4 sm:$0x11]   ;;  %v2399_v58 = vsel %vm2357_vm2, %v2397_v61, %v2398_v59 }
 0x16d   :  { %3363 = vst.msk [vmem:[#allocation3 + $0x90] sm:$0xff] %vm3353_vm3, %v10932_v38  ;;  %v3869_v46 = vshrl.u32 %v9288_v8, 16  ;;  %v3871_v3 = vshll.u32 %v9288_v8, 16  ;;  %v1268_v38 = vor.u32 %v1266_v60, %v1265_v29  ;;  %v9306_v20 = vld [vmem:[#allocation2 + $0xa8] sm:$0xff]   ;;  %v2988_v35 = vshll.u32 %v9307_v40, 16  ;;  %v8377_v59 = vld [vmem:[%s14435_s0 + $0x160] sm:$0xff] }
 0x16e   :  { %v10964_v42 = vpop.permute.xlu1 %5649  ;;  %v3878_v22 = vrot.slane %v3876_v14, 1  ;;  %v4183_v9 = vsel %vm2357_vm2, %v4181_v16, %v4182_v36  ;;  %v2983_v27 = vshll.u32 %v9306_v20, 16  ;;  %5264 = vst.msk [vmem:[#allocation3 + $0x110] sm:$0xff] %vm14535_vm11, %v10941_v6  ;;  %v2981_v11 = vshrl.u32 %v9306_v20, 16  ;;  %v9302_v21 = vld [vmem:[#allocation2 + $0xa8] sm:$0xff]  }
 0x16f   :  { %v3873_v37 = vrot.slane %v3871_v3, 1  ;;  %v1269_v23 = vsel %vm9849_vm15, %v1261_v50, %v1268_v38  ;;  %4229 = vst.msk [vmem:[#allocation3 + $0x88] sm:$0xff] %vm14487_vm13, %v4183_v9  ;;  %v4629_v25 = vrot.slane %v4627_v56, 1  ;;  %v2990_v50 = vrot.slane %v2988_v35, 1  ;;  %v11035_v18 = vld [vmem:[%s14436_s2] ss:$0 sm:$0xff] }
 0x170   :  { %v3502_v62 = vpop.permute.xlu0 %3501  ;;  %5655 = vrot.lane.b32.xlu1 %v5514_v28, %s9552_s29  ;;  %1528 = vst.msk [vmem:[#allocation2 + $0x124] sm:$0xf] %vm27_vm0, %v1269_v23  ;;  %v166_v28 = vld [vmem:[%s14435_s0 + $0xe8] sm:$0xff]  ;;  %v2985_v60 = vrot.slane %v2983_v27, 1  ;;  %v5006_v14 = vrot.slane %v11018_v19, 1  ;;  %vm236_vm6 = vcmp.gt.f32.partialorder %v204_v57, 0.0 }
 0x171   :  { %3541 = vst.msk [vmem:[#allocation3 + $0x90] sm:$0xff] %vm3531_vm7, %v3502_v62  ;;  %v3874_v15 = vor.u32 %v3873_v37, %v3869_v46  ;;  %v9309_v29 = vld [vmem:[#allocation2 + $0x11c] ss:$0 sps:$4 sm:$0x11]   ;;  %v205_v4 = vadd.f32 %v11035_v18, %v166_v28  ;;  %v9310_v38 = vld [vmem:[#allocation2 + $0xf0] sm:$0xfe]  }
 0x172   :  { %v5938_v41 = vpop.permute.xlu1 %5937  ;;  %5696 = vst.msk [vmem:[#allocation3 + $0x110] sm:$0xff] %vm3064_vm1, %v10964_v42  ;;  %v5007_v34 = vrot.slane %v9309_v29, 1  ;;  %v9311_v63 = vld [vmem:[#allocation2 + $0xf8] ss:$0 sps:$4 sm:$0x11]   ;;  %v6784_v49 = vrot.slane %v9310_v38, 1 }
 0x173   :  { %v3879_v2 = vsel %vm14446_vm12, %v3874_v15, %v3878_v22  ;;  %5984 = vst.msk [vmem:[#allocation3 + $0x110] sm:$0xff] %vm3353_vm3, %v5938_v41  ;;  %vm237_vm5 = vcmp.gt.f32.partialorder %v205_v4, 0.0  ;;  %v4625_v22 = vor.u32 %v4624_v32, %v4620_v31  ;;  %v9312_v16 = vld [vmem:[#allocation2 + $0xa8] sm:$0xfe]   ;;  %vm268_vm10 = vcmp.lt.f32.partialorder %v204_v57, 0.0  ;;  %v6896_v57 = vld [vmem:[#allocation3 + $0x100] sm:$0xff] }
 0x174   :  { %5943 = vrot.lane.b32.xlu1 %v5901_v5, %s9550_s23  ;;  %3940 = vrot.lane.b32.xlu0 %v3879_v2, %s9551_s24  ;;  %v2986_v5 = vor.u32 %v2985_v60, %v2981_v11  ;;  %v6785_v53 = vrot.slane %v9311_v63, 1  ;;  %v9313_v36 = vld [vmem:[#allocation2 + $0xb0] ss:$0 sps:$4 sm:$0x11]   ;;  %v3296_v15 = vrot.slane %v9312_v16, 1  ;;  %vm269_vm11 = vcmp.lt.f32.partialorder %v205_v4, 0.0 }
 0x175   :  { %v3935_v1 = vpop.permute.xlu0 %3934  ;;  %v300_v0 = vsel %vm268_vm10, -1.0, %v9545_v10  ;;  %v3297_v30 = vrot.slane %v9313_v36, 1  ;;  %v301_v9 = vsel %vm269_vm11, -1.0, %v9545_v10  ;;  %v4630_v2 = vsel %vm14446_vm12, %v4625_v22, %v4629_v25  ;;  %v9317_v32 = vld [vmem:[#allocation2 + $0x128] ss:$0 sps:$4 sm:$0x11]  }
 0x176   :  { %3974 = vst.msk [vmem:[#allocation3 + $0x90] sm:$0xff] %vm14445_vm8, %v3935_v1  ;;  %v9299_v1 = vld [vmem:[#allocation2 + $0x128] ss:$0 sps:$4 sm:$0x11]   ;;  %v6881_v8 = vld [vmem:[#allocation3 + $0x88] sm:$0xff]  ;;  %v2991_v23 = vsel %vm14446_vm12, %v2986_v5, %v2990_v50  ;;  %v6786_v26 = vsel %vm2357_vm2, %v6784_v49, %v6785_v53  ;;  %v333_v61 = vsel %vm237_vm5, 1.0, %v301_v9  ;;  %v5008_v11 = vsel %vm2357_vm2, %v5006_v14, %v5007_v34 }
 0x177   :  { %v9294_v54 = vld [vmem:[#allocation2 + $0x120] sm:$0xff]   ;;  %v6408_v3 = vshll.u32 %v9299_v1, 16  ;;  %8927 = vmatprep.mubr.msk.bf16.mxu0 %vm14487_vm13, %v6881_v8  ;;  %6848 = vst.msk [vmem:[#allocation3 + $0x108] sm:$0xff] %vm14487_vm13, %v6786_v26  ;;  %v8982_v31 = vpack.c.bf16 %v333_v61, %v333_v61  ;;  %v3298_v51 = vsel %vm2357_vm2, %v3296_v15, %v3297_v30  ;;  %v925_v1 = vadd.f32 %v10825_v13, %v8377_v59  ;;  %v11076_v50 = vld [vmem:[#allocation2 + $0xa8] sm:$0xff]  }
 0x178   :  { %v6115_v62 = vpop.permute.xlu1 %6114  ;;  %2142 = vrot.lane.b32.xlu0 %v2091_v33, %s9547_s20  ;;  %v9298_v24 = vld [vmem:[#allocation2 + $0x120] sm:$0xff]   ;;  %6120 = vrot.lane.b32.xlu1 %v9294_v54, %s9548_s21  ;;  %v859_v54 = vld [vmem:[#allocation2 + $0xb4] sm:$0xf]  ;;  %v11089_v49 = vld [vmem:[#allocation2 + $0xb0] ss:$0 sps:$4 sm:$0x11]  }
 0x179   :  { %v10998_v43 = vpop.permute.xlu0 %2136  ;;  %6161 = vst.msk [vmem:[#allocation3 + $0x110] sm:$0xff] %vm3531_vm7, %v6115_v62  ;;  %v6401_v41 = vshrl.u32 %v9298_v24, 16  ;;  %v6403_v46 = vshll.u32 %v9298_v24, 16  ;;  %7193 = vmatmul.mubr.bf16.gmra.mrb[32].mxu0 %v6880_v7  ;;  %v6410_v52 = vrot.slane %v6408_v3, 1  ;;  %v11045_v55 = vld [vmem:[#allocation2 + $0x120] sm:$0xff]   ;;  %v332_v62 = vsel %vm236_vm6, 1.0, %v300_v0 }
 0x17a   :  { %v8981_v20 = vpack.c.bf16 %v332_v62, %v332_v62  ;;  %v5518_v27 = vshll.u32 %v11045_v55, 16  ;;  %v8378_v7 = vld [vmem:[%s14435_s0 + $0x168] sm:$0xff]  ;;  %v682_v19 = vshrl.u32 %v8982_v31, 16  ;;  %v685_v28 = vshll.u32 %v8982_v31, 16  ;;  %v9320_v25 = vld [vmem:[#allocation2 + $0x120] sm:$0xfe]  }
 0x17b   :  { %v6405_v17 = vrot.slane %v6403_v46, 1  ;;  %v5516_v60 = vshrl.u32 %v11045_v55, 16  ;;  %v5523_v24 = vshll.u32 %v9317_v32, 16  ;;  %v926_v29 = vadd.f32 %v10825_v13, %v8378_v7  ;;  %v9314_v4 = vld [vmem:[#allocation2 + $0x120] sm:$0xff]  }
 0x17c   :  { %2432 = vrot.lane.b32.xlu0 %v2399_v58, %s9546_s15  ;;  %v674_v56 = vshrl.u32 %v8981_v20, 16  ;;  %v677_v35 = vshll.u32 %v8981_v20, 16  ;;  %v5520_v58 = vrot.slane %v5518_v27, 1  ;;  %v684_v8 = vrot.slane %v682_v19, 7  ;;  %v1532_v27 = vld [vmem:[#allocation2 + $0x12c] sm:$0xf] }
 0x17d   :  { %v11024_v6 = vpop.permute.xlu0 %2426  ;;  %v6406_v37 = vor.u32 %v6405_v17, %v6401_v41  ;;  %v5525_v55 = vrot.slane %v5523_v24, 1  ;;  %v9321_v13 = vld [vmem:[#allocation2 + $0x128] ss:$0 sps:$4 sm:$0x11]   ;;  %vm957_vm6 = vcmp.gt.f32.partialorder %v925_v1, 0.0  ;;  %vm958_vm5 = vcmp.gt.f32.partialorder %v926_v29, 0.0 }
 0x17e   :  { %v6897_v5 = vld [vmem:[#allocation3 + $0x108] sm:$0xff]  ;;  %v687_v34 = vor.u32 %v685_v28, %v684_v8  ;;  %v689_v17 = vrot.slane %v684_v8, 4  ;;  %v5521_v63 = vor.u32 %v5520_v58, %v5516_v60  ;;  %vm989_vm10 = vcmp.lt.f32.partialorder %v925_v1, 0.0  ;;  %v9330_v1 = vld [vmem:[#allocation2 + $0x84] sm:$0xfe]  }
 0x17f   :  { %v6411_v45 = vsel %vm14446_vm12, %v6406_v37, %v6410_v52  ;;  %v9325_v52 = vld [vmem:[#allocation2 + $0x78] sm:$0xff]   ;;  %8935 = vmatprep.mubr.msk.bf16.mxu1 %vm14487_vm13, %v6897_v5  ;;  %v5902_v16 = vrot.slane %v9320_v25, 1  ;;  %vm990_vm11 = vcmp.lt.f32.partialorder %v926_v29, 0.0  ;;  %v1021_v53 = vsel %vm989_vm10, -1.0, %v9545_v10 }
 0x180   :  { %v6547_v42 = vpop.permute.xlu1 %6546  ;;  %2609 = vrot.lane.b32.xlu0 %v9302_v21, %s9549_s22  ;;  %6552 = vrot.lane.b32.xlu1 %v6411_v45, %s9551_s24  ;;  %v863_v21 = vld [vmem:[#allocation2 + $0xbc] sm:$0x1]  ;;  %1741 = vst.msk [vmem:[#allocation3 + $0xa0] sm:$0xff] %vm14487_vm13, %v9325_v52  ;;  %v1022_v36 = vsel %vm990_vm11, -1.0, %v9545_v10  ;;  %v1053_v45 = vsel %vm957_vm6, 1.0, %v1021_v53  ;;  %v5526_v15 = vsel %vm14446_vm12, %v5521_v63, %v5525_v55  ;;  %v5903_v0 = vrot.slane %v9321_v13, 1 }
 0x181   :  { %6593 = vst.msk [vmem:[#allocation3 + $0x110] sm:$0xff] %vm14445_vm8, %v6547_v42  ;;  %v11041_v47 = vpop.permute.xlu0 %2603  ;;  %v676_v42 = vrot.slane %v674_v56, 7  ;;  %7257 = vmatmul.mubr.bf16.vlgmr.msra.gmra.mrb[0].mxu1 %v6896_v57  ;;  %v864_v22 = vsel %vm9880_vm9, %v689_v17, %v863_v21  ;;  %vm14536_vm8 = vcmask 392448   ;;  %v1054_v26 = vsel %vm958_vm5, 1.0, %v1022_v36  ;;  %v1536_v56 = vld [vmem:[#allocation2 + $0x134] sm:$0x1] }
 0x182   :  { %865 = vst [vmem:[#allocation2 + $0xbc] sm:$0x1] %v864_v22  ;;  %2175 = vst.msk [vmem:[#allocation3 + $0xa0] sm:$0xff] %vm2164_vm14, %v10998_v43  ;;  %v8997_v30 = vpack.c.bf16 %v1053_v45, %v1053_v45  ;;  %vm14537_vm10 = vcmask 523648   ;;  %v8998_v62 = vpack.c.bf16 %v1054_v26, %v1054_v26  ;;  %v2100_v31 = vshll.u32 %v11089_v49, 16 }
 0x183   :  { %v679_v41 = vor.u32 %v677_v35, %v676_v42  ;;  %v680_v46 = vrot.slane %v676_v42, 4  ;;  %2465 = vst.msk [vmem:[#allocation3 + $0xa0] sm:$0xff] %vm14536_vm8, %v11024_v6  ;;  %v9335_v6 = vld [vmem:[#allocation2 + $0xf0] sm:$0xff]   ;;  %v11114_v35 = vld [vmem:[#allocation2 + $0x120] sm:$0xff]   ;;  %vm14538_vm6 = vmmov %vm14537_vm10  ;;  %vm14539_vm5 = vcmask 1048448  }
 0x184   :  { %v11043_v48 = vpop.permute.xlu1 %4755  ;;  %3042 = vrot.lane.b32.xlu0 %v2991_v23, %s9552_s29  ;;  %4761 = vrot.lane.b32.xlu1 %v4630_v2, %s9547_s20  ;;  %v2095_v23 = vshll.u32 %v11076_v50, 16  ;;  %2642 = vst.msk [vmem:[#allocation3 + $0xa0] sm:$0xff] %vm14537_vm10, %v11041_v47  ;;  %v2093_v2 = vshrl.u32 %v11076_v50, 16  ;;  %v1272_v61 = vshrl.u32 %v8997_v30, 16  ;;  %v1275_v20 = vshll.u32 %v8997_v30, 16  ;;  %vm14540_vm11 = vmmov %vm14539_vm5 }
 0x185   :  { %v11061_v40 = vpop.permute.xlu0 %3036  ;;  %v860_v38 = vsel %vm9856_vm4, %v679_v41, %v859_v54  ;;  %v688_v37 = vsel %vm9849_vm15, %v680_v46, %v687_v34  ;;  %v1280_v32 = vshrl.u32 %v8998_v62, 16  ;;  %v1283_v47 = vshll.u32 %v8998_v62, 16  ;;  %4369 = vst.msk [vmem:[#allocation3 + $0x120] sm:$0xff] %vm14487_vm13, %v9335_v6  ;;  %v9331_v25 = vld [vmem:[#allocation2 + $0x8c] ss:$0 sps:$4 sm:$0x11]  }
 0x186   :  { %861 = vst [vmem:[#allocation2 + $0xb4] sm:$0xf] %v860_v38  ;;  %862 = vst.msk [vmem:[#allocation2 + $0xb8] sm:$0xf] %vm27_vm0, %v688_v37  ;;  %v2097_v59 = vrot.slane %v2095_v23, 1  ;;  %v2102_v50 = vrot.slane %v2100_v31, 1 }
 0x187   :  { %3075 = vst.msk [vmem:[#allocation3 + $0xa0] sm:$0xff] %vm3064_vm1, %v11061_v40  ;;  %v1274_v40 = vrot.slane %v1272_v61, 7  ;;  %v4184_v41 = vrot.slane %v9330_v1, 1  ;;  %v9327_v5 = vld [vmem:[#allocation2 + $0xb0] ss:$0 sps:$4 sm:$0x11]  }
 0x188   :  { %v11063_v33 = vpop.permute.xlu1 %5043  ;;  %3331 = vrot.lane.b32.xlu0 %v3298_v51, %s9550_s23  ;;  %5049 = vrot.lane.b32.xlu1 %v5008_v11, %s9546_s15  ;;  %v5904_v51 = vsel %vm2357_vm2, %v5902_v16, %v5903_v0  ;;  %v1282_v11 = vrot.slane %v1280_v32, 7  ;;  %4801 = vst.msk [vmem:[#allocation3 + $0x120] sm:$0xff] %vm2164_vm14, %v11043_v48  ;;  %v4185_v34 = vrot.slane %v9331_v25, 1  ;;  %v4634_v17 = vshll.u32 %v11114_v35, 16 }
 0x189   :  { %v3326_v3 = vpop.permute.xlu0 %3325  ;;  %v9319_v28 = vld [vmem:[#allocation2 + $0xbc] ss:$0 sps:$4 sm:$0x11]   ;;  %v1277_v54 = vor.u32 %v1275_v20, %v1274_v40  ;;  %5089 = vst.msk [vmem:[#allocation3 + $0x120] sm:$0xff] %vm14536_vm8, %v11063_v33  ;;  %v1278_v42 = vrot.slane %v1274_v40, 4  ;;  %v2098_v63 = vor.u32 %v2097_v59, %v2093_v2  ;;  %v4632_v49 = vshrl.u32 %v11114_v35, 16 }
 0x18a   :  { %3364 = vst.msk [vmem:[#allocation3 + $0xa0] sm:$0xff] %vm3353_vm3, %v3326_v3  ;;  %v1285_v58 = vor.u32 %v1283_v47, %v1282_v11  ;;  %v1287_v24 = vrot.slane %v1282_v11, 4  ;;  %v3888_v21 = vshll.u32 %v9319_v28, 16  ;;  %v4186_v55 = vsel %vm2357_vm2, %v4184_v41, %v4185_v34  ;;  %v9334_v13 = vld [vmem:[#allocation2 + $0x128] ss:$0 sps:$4 sm:$0x11]  }
 0x18b   :  { %v1533_v33 = vsel %vm9856_vm4, %v1277_v54, %v1532_v27  ;;  %4230 = vst.msk [vmem:[#allocation3 + $0x98] sm:$0xff] %vm14487_vm13, %v4186_v55  ;;  %v4639_v16 = vshll.u32 %v9334_v13, 16  ;;  %v9337_v23 = vld [vmem:[#allocation2 + $0xbc] ss:$0 sps:$4 sm:$0x11]   ;;  %v2103_v45 = vsel %vm14446_vm12, %v2098_v63, %v2102_v50  ;;  %v2401_v0 = vrot.slane %v9327_v5, 1 }
 0x18c   :  { %v11079_v14 = vpop.permute.xlu1 %5219  ;;  %5225 = vrot.lane.b32.xlu1 %v9314_v4, %s9549_s22  ;;  %v1286_v29 = vsel %vm9849_vm15, %v1278_v42, %v1285_v58  ;;  %1534 = vst [vmem:[#allocation2 + $0x12c] sm:$0xf] %v1533_v33  ;;  %v1537_v4 = vsel %vm9880_vm9, %v1287_v24, %v1536_v56  ;;  %v3890_v3 = vrot.slane %v3888_v21, 1  ;;  %v6882_v2 = vld [vmem:[#allocation3 + $0x90] sm:$0xff]  ;;  %v3000_v59 = vshll.u32 %v9337_v23, 16 }
 0x18d   :  { %v9315_v7 = vld [vmem:[#allocation2 + $0xb4] sm:$0xff]   ;;  %5265 = vst.msk [vmem:[#allocation3 + $0x120] sm:$0xff] %vm14538_vm6, %v11079_v14  ;;  %v9326_v14 = vld [vmem:[#allocation2 + $0xa8] sm:$0xfe]   ;;  %1538 = vst [vmem:[#allocation2 + $0x134] sm:$0x1] %v1537_v4 }
 0x18e   :  { %v3504_v9 = vpop.permute.xlu0 %3503  ;;  %v9318_v19 = vld [vmem:[#allocation2 + $0xb4] sm:$0xff]   ;;  %3509 = vrot.lane.b32.xlu0 %v9315_v7, %s9548_s21  ;;  %1535 = vst.msk [vmem:[#allocation2 + $0x130] sm:$0xf] %vm27_vm0, %v1286_v29  ;;  %v4641_v61 = vrot.slane %v4639_v16, 1  ;;  %v9338_v35 = vld [vmem:[#allocation2 + $0x120] sm:$0xfe]  }
 0x18f   :  { %3542 = vst.msk [vmem:[#allocation3 + $0xa0] sm:$0xff] %vm3531_vm7, %v3504_v9  ;;  %v3881_v48 = vshrl.u32 %v9318_v19, 16  ;;  %v3883_v8 = vshll.u32 %v9318_v19, 16  ;;  %v9336_v37 = vld [vmem:[#allocation2 + $0xb4] sm:$0xff]   ;;  %v4636_v9 = vrot.slane %v4634_v17, 1  ;;  %v5009_v29 = vrot.slane %v9338_v35, 1 }
 0x190   :  { %v5652_v43 = vpop.permute.xlu1 %5651  ;;  %5657 = vrot.lane.b32.xlu1 %v5526_v15, %s9552_s29  ;;  %v2995_v53 = vshll.u32 %v9336_v37, 16  ;;  %v2400_v15 = vrot.slane %v9326_v14, 1  ;;  %v2993_v20 = vshrl.u32 %v9336_v37, 16  ;;  %v9339_v40 = vld [vmem:[#allocation2 + $0x128] ss:$0 sps:$4 sm:$0x11]  }
 0x191   :  { %5697 = vst.msk [vmem:[#allocation3 + $0x120] sm:$0xff] %vm3064_vm1, %v5652_v43  ;;  %v3885_v46 = vrot.slane %v3883_v8, 1  ;;  %v9332_v56 = vld [vmem:[#allocation2 + $0xb4] sm:$0xff]   ;;  %v9340_v19 = vld [vmem:[#allocation2 + $0xfc] sm:$0xfe]   ;;  %v4637_v58 = vor.u32 %v4636_v9, %v4632_v49  ;;  %v5010_v4 = vrot.slane %v9339_v40, 1 }
 0x192   :  { %v2997_v6 = vrot.slane %v2995_v53, 1  ;;  %v2402_v31 = vsel %vm2357_vm2, %v2400_v15, %v2401_v0  ;;  %v6787_v1 = vrot.slane %v9340_v19, 1  ;;  %v167_v8 = vld [vmem:[%s14435_s0 + $0xf0] sm:$0xff]  ;;  %v9343_v33 = vld [vmem:[#allocation2 + $0xbc] ss:$0 sps:$4 sm:$0x11]  }
 0x193   :  { %v3886_v38 = vor.u32 %v3885_v46, %v3881_v48  ;;  %v9342_v48 = vld [vmem:[#allocation2 + $0xb4] sm:$0xfe]   ;;  %v206_v25 = vadd.f32 %v11035_v18, %v167_v8  ;;  %v3300_v5 = vrot.slane %v9343_v33, 1  ;;  %v4642_v17 = vsel %vm14446_vm12, %v4637_v58, %v4641_v61  ;;  %v6898_v15 = vld [vmem:[#allocation3 + $0x110] sm:$0xff] }
 0x194   :  { %v5940_v57 = vpop.permute.xlu1 %5939  ;;  %5945 = vrot.lane.b32.xlu1 %v5904_v51, %s9550_s23  ;;  %v9329_v62 = vld [vmem:[#allocation2 + $0x134] ss:$0 sps:$4 sm:$0x11]   ;;  %v6883_v51 = vld [vmem:[#allocation3 + $0x98] sm:$0xff]  ;;  %v2998_v24 = vor.u32 %v2997_v6, %v2993_v20  ;;  %v3299_v41 = vrot.slane %v9342_v48, 1  ;;  %v168_v46 = vld [vmem:[%s14435_s0 + $0xf8] sm:$0xff]  ;;  %v5011_v23 = vsel %vm2357_vm2, %v5009_v29, %v5010_v4 }
 0x195   :  { %5985 = vst.msk [vmem:[#allocation3 + $0x120] sm:$0xff] %vm3353_vm3, %v5940_v57  ;;  %v3891_v22 = vsel %vm14446_vm12, %v3886_v38, %v3890_v3  ;;  %v9324_v30 = vld [vmem:[#allocation2 + $0x12c] sm:$0xff]   ;;  %v6420_v27 = vshll.u32 %v9329_v62, 16  ;;  %8928 = vmatprep.mubr.msk.bf16.mxu0 %vm14487_vm13, %v6883_v51  ;;  %v9341_v57 = vld [vmem:[#allocation2 + $0x104] ss:$0 sps:$4 sm:$0x11]   ;;  %v207_v34 = vadd.f32 %v11035_v18, %v168_v46 }
 0x196   :  { %v3937_v60 = vpop.permute.xlu0 %3936  ;;  %3942 = vrot.lane.b32.xlu0 %v3891_v22, %s9551_s24  ;;  %v9328_v43 = vld [vmem:[#allocation2 + $0x12c] sm:$0xff]   ;;  %7201 = vmatmul.mubr.bf16.gmra.mrb[36].mxu0 %v6882_v2  ;;  %v6788_v21 = vrot.slane %v9341_v57, 1  ;;  %vm238_vm10 = vcmp.gt.f32.partialorder %v206_v25, 0.0  ;;  %vm270_vm8 = vcmp.lt.f32.partialorder %v206_v25, 0.0  ;;  %v3301_v53 = vsel %vm2357_vm2, %v3299_v41, %v3300_v5  ;;  %v11196_v35 = vld [vmem:[%s14436_s2] ss:$0 sm:$0xff] }
 0x197   :  { %3975 = vst.msk [vmem:[#allocation3 + $0xa0] sm:$0xff] %vm14539_vm5, %v3937_v60  ;;  %v6413_v32 = vshrl.u32 %v9328_v43, 16  ;;  %v6415_v47 = vshll.u32 %v9328_v43, 16  ;;  %v6422_v11 = vrot.slane %v6420_v27, 1  ;;  %v3002_v60 = vrot.slane %v3000_v59, 1  ;;  %v9346_v63 = vld [vmem:[#allocation2 + $0x12c] sm:$0xff]  }
 0x198   :  { %6122 = vrot.lane.b32.xlu1 %v9324_v30, %s9548_s21  ;;  %v6789_v14 = vsel %vm2357_vm2, %v6787_v1, %v6788_v21  ;;  %vm239_vm6 = vcmp.gt.f32.partialorder %v207_v34, 0.0  ;;  %vm271_vm5 = vcmp.lt.f32.partialorder %v207_v34, 0.0  ;;  %v302_v13 = vsel %vm270_vm8, -1.0, %v9545_v10  ;;  %v9347_v37 = vld [vmem:[#allocation2 + $0x134] ss:$0 sps:$4 sm:$0x11]  }
 0x199   :  { %v6417_v7 = vrot.slane %v6415_v47, 1  ;;  %v3003_v38 = vsel %vm14446_vm12, %v2998_v24, %v3002_v60  ;;  %6849 = vst.msk [vmem:[#allocation3 + $0x118] sm:$0xff] %vm14487_vm13, %v6789_v14  ;;  %v303_v22 = vsel %vm271_vm5, -1.0, %v9545_v10  ;;  %v334_v49 = vsel %vm238_vm10, 1.0, %v302_v13  ;;  %v9350_v20 = vld [vmem:[#allocation2 + $0x12c] sm:$0xfe]  }
 0x19a   :  { %v11136_v52 = vpop.permute.xlu0 %2138  ;;  %2144 = vrot.lane.b32.xlu0 %v2103_v45, %s9547_s20  ;;  %v5530_v18 = vshll.u32 %v9346_v63, 16  ;;  %v8983_v45 = vpack.c.bf16 %v334_v49, %v334_v49  ;;  %v5528_v30 = vshrl.u32 %v9346_v63, 16  ;;  %v5535_v43 = vshll.u32 %v9347_v37, 16  ;;  %v11182_v62 = vld [vmem:[#allocation2 + $0x134] ss:$0 sps:$4 sm:$0x11]  }
 0x19b   :  { %v6418_v42 = vor.u32 %v6417_v7, %v6413_v32  ;;  %v9344_v6 = vld [vmem:[#allocation2 + $0x12c] sm:$0xff]   ;;  %v866_v19 = vld [vmem:[#allocation2 + $0xc0] sm:$0xf]  ;;  %v8380_v57 = vld [vmem:[%s14435_s0 + $0x178] sm:$0xff]  ;;  %v5905_v33 = vrot.slane %v9350_v20, 1  ;;  %v5906_v25 = vrot.slane %v11182_v62, 1 }
 0x19c   :  { %v6117_v36 = vpop.permute.xlu1 %6116  ;;  %v5532_v9 = vrot.slane %v5530_v18, 1  ;;  %v691_v2 = vshrl.u32 %v8983_v45, 16  ;;  %v694_v61 = vshll.u32 %v8983_v45, 16  ;;  %v8379_v32 = vld [vmem:[%s14435_s0 + $0x170] sm:$0xff]  ;;  %v5537_v60 = vrot.slane %v5535_v43, 1  ;;  %v9355_v48 = vld [vmem:[#allocation2 + $0x84] sm:$0xff]  }
 0x19d   :  { %6162 = vst.msk [vmem:[#allocation3 + $0x120] sm:$0xff] %vm3531_vm7, %v6117_v36  ;;  %v6423_v50 = vsel %vm14446_vm12, %v6418_v42, %v6422_v11  ;;  %v335_v36 = vsel %vm239_vm6, 1.0, %v303_v22  ;;  %v927_v7 = vadd.f32 %v11196_v35, %v8379_v32  ;;  %v870_v24 = vld [vmem:[#allocation2 + $0xc8] sm:$0x1]  ;;  %v928_v1 = vadd.f32 %v11196_v35, %v8380_v57  ;;  %v9365_v5 = vld [vmem:[#allocation2 + $0xfc] sm:$0xff]  }
 0x19e   :  { %v11145_v26 = vpop.permute.xlu0 %2428  ;;  %2434 = vrot.lane.b32.xlu0 %v2402_v31, %s9546_s15  ;;  %6554 = vrot.lane.b32.xlu1 %v6423_v50, %s9551_s24  ;;  %v8984_v0 = vpack.c.bf16 %v335_v36, %v335_v36  ;;  %v693_v40 = vrot.slane %v691_v2, 7  ;;  %1742 = vst.msk [vmem:[#allocation3 + $0xb0] sm:$0xff] %vm14487_vm13, %v9355_v48  ;;  %vm14541_vm5 = vcmask 392448   ;;  %4370 = vst.msk [vmem:[#allocation3 + $0x130] sm:$0xff] %vm14487_vm13, %v9365_v5  ;;  %v1543_v62 = vld [vmem:[#allocation2 + $0x140] sm:$0x1] }
 0x19f   :  { %vm991_vm10 = vcmp.lt.f32.partialorder %v927_v7, 0.0  ;;  %vm960_vm8 = vcmp.gt.f32.partialorder %v928_v1, 0.0  ;;  %2176 = vst.msk [vmem:[#allocation3 + $0xb0] sm:$0xff] %vm2164_vm14, %v11136_v52  ;;  %vm992_vm6 = vcmp.lt.f32.partialorder %v928_v1, 0.0 }
 0x1a0   :  { %v699_v59 = vshrl.u32 %v8984_v0, 16  ;;  %v702_v31 = vshll.u32 %v8984_v0, 16  ;;  %v6899_v51 = vld [vmem:[#allocation3 + $0x118] sm:$0xff]  ;;  %v696_v42 = vor.u32 %v694_v61, %v693_v40  ;;  %v697_v58 = vrot.slane %v693_v40, 4  ;;  %2466 = vst.msk [vmem:[#allocation3 + $0xb0] sm:$0xff] %vm14541_vm5, %v11145_v26 }
 0x1a1   :  { %8936 = vmatprep.mubr.msk.bf16.mxu1 %vm14487_vm13, %v6899_v51  ;;  %v1024_v63 = vsel %vm992_vm6, -1.0, %v9545_v10  ;;  %v5907_v26 = vsel %vm2357_vm2, %v5905_v33, %v5906_v25  ;;  %v9361_v45 = vld [vmem:[#allocation2 + $0x98] ss:$0 sps:$4 sm:$0x11]  }
 0x1a2   :  { %v11151_v54 = vpop.permute.xlu0 %2605  ;;  %2611 = vrot.lane.b32.xlu0 %v9332_v56, %s9549_s22  ;;  %4763 = vrot.lane.b32.xlu1 %v4642_v17, %s9547_s20  ;;  %v11191_v56 = vld [vmem:[#allocation2 + $0xb4] sm:$0xff]   ;;  %v701_v11 = vrot.slane %v699_v59, 7  ;;  %v867_v29 = vsel %vm9856_vm4, %v696_v42, %v866_v19  ;;  %v11218_v17 = vld [vmem:[#allocation2 + $0xbc] ss:$0 sps:$4 sm:$0x11]   ;;  %v1056_v52 = vsel %vm960_vm8, 1.0, %v1024_v63 }
 0x1a3   :  { %7265 = vmatmul.mubr.bf16.gmra.mrb[4].mxu1 %v6898_v15  ;;  %v2107_v4 = vshll.u32 %v11191_v56, 16  ;;  %868 = vst [vmem:[#allocation2 + $0xc0] sm:$0xf] %v867_v29  ;;  %v2105_v22 = vshrl.u32 %v11191_v56, 16  ;;  %v9000_v18 = vpack.c.bf16 %v1056_v52, %v1056_v52  ;;  %v1539_v0 = vld [vmem:[#allocation2 + $0x138] sm:$0xf] }
 0x1a4   :  { %v6549_v28 = vpop.permute.xlu1 %6548  ;;  %v704_v8 = vor.u32 %v702_v31, %v701_v11  ;;  %v706_v21 = vrot.slane %v701_v11, 4  ;;  %v4188_v2 = vrot.slane %v9361_v45, 1  ;;  %v9356_v51 = vld [vmem:[#allocation2 + $0xb4] sm:$0xfe]   ;;  %vm14546_vm8 = vsmask.f32 7424 }
 0x1a5   :  { %6594 = vst.msk [vmem:[#allocation3 + $0x120] sm:$0xff] %vm14540_vm11, %v6549_v28  ;;  %v5533_v28 = vor.u32 %v5532_v9, %v5528_v30  ;;  %vm959_vm11 = vcmp.gt.f32.partialorder %v927_v7, 0.0  ;;  %v2109_v49 = vrot.slane %v2107_v4, 1  ;;  %v1300_v15 = vshll.u32 %v9000_v18, 16  ;;  %v11242_v9 = vld [vmem:[#allocation2 + $0x12c] sm:$0xff]   ;;  %vm14547_vm6 = vmmov %vm14546_vm8 }
 0x1a6   :  { %v11172_v55 = vpop.permute.xlu0 %3038  ;;  %3044 = vrot.lane.b32.xlu0 %v3003_v38, %s9552_s29  ;;  %5051 = vrot.lane.b32.xlu1 %v5011_v23, %s9546_s15  ;;  %v705_v41 = vsel %vm9849_vm15, %v697_v58, %v704_v8  ;;  %v871_v14 = vsel %vm9880_vm9, %v706_v21, %v870_v24  ;;  %v1023_v38 = vsel %vm991_vm10, -1.0, %v9545_v10  ;;  %v9360_v23 = vld [vmem:[#allocation2 + $0x90] sm:$0xfe]   ;;  %vm14545_vm10 = vcmask 1048448  }
 0x1a7   :  { %v5538_v46 = vsel %vm14446_vm12, %v5533_v28, %v5537_v60  ;;  %869 = vst.msk [vmem:[#allocation2 + $0xc4] sm:$0xf] %vm27_vm0, %v705_v41  ;;  %872 = vst [vmem:[#allocation2 + $0xc8] sm:$0x1] %v871_v14  ;;  %v1055_v13 = vsel %vm959_vm11, 1.0, %v1023_v38  ;;  %vm14542_vm12 = vcmask 523648  }
 0x1a8   :  { %v11163_v3 = vpop.permute.xlu1 %4757  ;;  %2643 = vst.msk [vmem:[#allocation3 + $0xb0] sm:$0xff] %vm14542_vm12, %v11151_v54  ;;  %v8999_v37 = vpack.c.bf16 %v1055_v13, %v1055_v13  ;;  %vm14543_vm12 = vmmov %vm14541_vm5  ;;  %vm14544_vm11 = vcmask 523648   ;;  %v4187_v30 = vrot.slane %v9360_v23, 1  ;;  %v9357_v28 = vld [vmem:[#allocation2 + $0xbc] ss:$0 sps:$4 sm:$0x11]  }
 0x1a9   :  { %4802 = vst.msk [vmem:[#allocation3 + $0x130] sm:$0xff] %vm2164_vm14, %v11163_v3  ;;  %v9364_v58 = vld [vmem:[#allocation2 + $0x134] ss:$0 sps:$4 sm:$0x11]   ;;  %v4646_v24 = vshll.u32 %v11242_v9, 16  ;;  %v2403_v41 = vrot.slane %v9356_v51, 1  ;;  %vm14548_vm5 = vmmov %vm14545_vm10 }
 0x1aa   :  { %v3328_v47 = vpop.permute.xlu0 %3327  ;;  %3333 = vrot.lane.b32.xlu0 %v3301_v53, %s9550_s23  ;;  %5227 = vrot.lane.b32.xlu1 %v9344_v6, %s9549_s22  ;;  %3076 = vst.msk [vmem:[#allocation3 + $0xb0] sm:$0xff] %vm3064_vm1, %v11172_v55  ;;  %v2112_v53 = vshll.u32 %v11218_v17, 16  ;;  %v1289_v36 = vshrl.u32 %v8999_v37, 16  ;;  %v1292_v3 = vshll.u32 %v8999_v37, 16  ;;  %v1297_v55 = vshrl.u32 %v9000_v18, 16 }
 0x1ab   :  { %3365 = vst.msk [vmem:[#allocation3 + $0xb0] sm:$0xff] %vm3353_vm3, %v3328_v47  ;;  %v4189_v32 = vsel %vm2357_vm2, %v4187_v30, %v4188_v2  ;;  %v4651_v8 = vshll.u32 %v9364_v58, 16  ;;  %v4644_v14 = vshrl.u32 %v11242_v9, 16  ;;  %v2404_v17 = vrot.slane %v9357_v28, 1  ;;  %v9368_v18 = vld [vmem:[#allocation2 + $0x12c] sm:$0xfe]  }
 0x1ac   :  { %v11176_v16 = vpop.permute.xlu1 %5045  ;;  %v1291_v43 = vrot.slane %v1289_v36, 7  ;;  %v1299_v20 = vrot.slane %v1297_v55, 7  ;;  %4231 = vst.msk [vmem:[#allocation3 + $0xa8] sm:$0xff] %vm14487_vm13, %v4189_v32  ;;  %v2114_v29 = vrot.slane %v2112_v53, 1  ;;  %v4648_v13 = vrot.slane %v4646_v24, 1  ;;  %v8381_v32 = vld [vmem:[%s14435_s0 + $0x180] sm:$0xff] }
 0x1ad   :  { %5090 = vst.msk [vmem:[#allocation3 + $0x130] sm:$0xff] %vm14543_vm12, %v11176_v16  ;;  %v4653_v52 = vrot.slane %v4651_v8, 1  ;;  %v9369_v55 = vld [vmem:[#allocation2 + $0x134] ss:$0 sps:$4 sm:$0x11]   ;;  %vm14549_vm12 = vmmov %vm14547_vm6 }
 0x1ae   :  { %v3506_v34 = vpop.permute.xlu0 %3505  ;;  %5659 = vrot.lane.b32.xlu1 %v5538_v46, %s9552_s29  ;;  %v9345_v61 = vld [vmem:[#allocation2 + $0xc0] sm:$0xff]   ;;  %v9349_v59 = vld [vmem:[#allocation2 + $0xc8] ss:$0 sps:$4 sm:$0x11]   ;;  %v1294_v31 = vor.u32 %v1292_v3, %v1291_v43  ;;  %v1295_v47 = vrot.slane %v1291_v43, 4  ;;  %v1304_v40 = vrot.slane %v1299_v20, 4  ;;  %v2405_v3 = vsel %vm2357_vm2, %v2403_v41, %v2404_v17 }
 0x1af   :  { %3543 = vst.msk [vmem:[#allocation3 + $0xb0] sm:$0xff] %vm3531_vm7, %v3506_v34  ;;  %v9348_v6 = vld [vmem:[#allocation2 + $0xc0] sm:$0xff]   ;;  %3511 = vrot.lane.b32.xlu0 %v9345_v61, %s9548_s21  ;;  %v3900_v11 = vshll.u32 %v9349_v59, 16  ;;  %v9367_v4 = vld [vmem:[#allocation2 + $0xc8] ss:$0 sps:$4 sm:$0x11]  }
 0x1b0   :  { %v11187_v27 = vpop.permute.xlu1 %5221  ;;  %v3893_v56 = vshrl.u32 %v9348_v6, 16  ;;  %v3895_v7 = vshll.u32 %v9348_v6, 16  ;;  %v1540_v19 = vsel %vm9856_vm4, %v1294_v31, %v1539_v0  ;;  %v1544_v42 = vsel %vm9880_vm9, %v1304_v40, %v1543_v62  ;;  %v9366_v21 = vld [vmem:[#allocation2 + $0xc0] sm:$0xff]   ;;  %v6884_v46 = vld [vmem:[#allocation3 + $0xa0] sm:$0xff]  ;;  %v9370_v61 = vld [vmem:[#allocation2 + $0x108] sm:$0xfe]  }
 0x1b1   :  { %5266 = vst.msk [vmem:[#allocation3 + $0x130] sm:$0xff] %vm14544_vm11, %v11187_v27  ;;  %v1302_v27 = vor.u32 %v1300_v15, %v1299_v20  ;;  %1541 = vst [vmem:[#allocation2 + $0x138] sm:$0xf] %v1540_v19  ;;  %v3902_v48 = vrot.slane %v3900_v11, 1  ;;  %v3007_v5 = vshll.u32 %v9366_v21, 16  ;;  %v3005_v37 = vshrl.u32 %v9366_v21, 16 }
 0x1b2   :  { %5947 = vrot.lane.b32.xlu1 %v5907_v26, %s9550_s23  ;;  %v3897_v1 = vrot.slane %v3895_v7, 1  ;;  %1545 = vst [vmem:[#allocation2 + $0x140] sm:$0x1] %v1544_v42  ;;  %v3012_v26 = vshll.u32 %v9367_v4, 16  ;;  %v9362_v2 = vld [vmem:[#allocation2 + $0xc0] sm:$0xff]   ;;  %vm14550_vm11 = vmmov %vm14547_vm6 }
 0x1b3   :  { %v1303_v57 = vsel %vm9849_vm15, %v1295_v47, %v1302_v27  ;;  %v6885_v38 = vld [vmem:[#allocation3 + $0xa8] sm:$0xff]  ;;  %v9371_v20 = vld [vmem:[#allocation2 + $0x110] ss:$0 sps:$4 sm:$0x11]   ;;  %v6790_v47 = vrot.slane %v9370_v61, 1 }
 0x1b4   :  { %v5654_v50 = vpop.permute.xlu1 %5653  ;;  %1542 = vst.msk [vmem:[#allocation2 + $0x13c] sm:$0xf] %vm27_vm0, %v1303_v57  ;;  %v3898_v25 = vor.u32 %v3897_v1, %v3893_v56  ;;  %8929 = vmatprep.mubr.msk.bf16.mxu0 %vm14487_vm13, %v6885_v38  ;;  %v3014_v45 = vrot.slane %v3012_v26, 1  ;;  %v6791_v27 = vrot.slane %v9371_v20, 1  ;;  %v9372_v51 = vld [vmem:[#allocation2 + $0xc0] sm:$0xfe]   ;;  %v4649_v56 = vor.u32 %v4648_v13, %v4644_v14 }
 0x1b5   :  { %5698 = vst.msk [vmem:[#allocation3 + $0x130] sm:$0xff] %vm3064_vm1, %v5654_v50  ;;  %v3939_v16 = vpop.permute.xlu0 %3938  ;;  %v2110_v50 = vor.u32 %v2109_v49, %v2105_v22  ;;  %v11268_v22 = vld [vmem:[#allocation2 + $0xcc] sm:$0xff]   ;;  %7209 = vmatmul.mubr.bf16.gmra.mrb[40].mxu0 %v6884_v46  ;;  %v9373_v11 = vld [vmem:[#allocation2 + $0xc8] ss:$0 sps:$4 sm:$0x11]   ;;  %v5013_v57 = vrot.slane %v9369_v55, 1 }
 0x1b6   :  { %3976 = vst.msk [vmem:[#allocation3 + $0xb0] sm:$0xff] %vm14545_vm10, %v3939_v16  ;;  %v3903_v34 = vsel %vm14546_vm8, %v3898_v25, %v3902_v48  ;;  %v3905_v15 = vshrl.u32 %v11268_v22, 16  ;;  %v5012_v16 = vrot.slane %v9368_v18, 1  ;;  %v3907_v19 = vshll.u32 %v11268_v22, 16  ;;  %vm14551_vm10 = vmmov %vm14547_vm6  ;;  %v6900_v13 = vld [vmem:[#allocation3 + $0x120] sm:$0xff] }
 0x1b7   :  { %3944 = vrot.lane.b32.xlu0 %v3903_v34, %s9551_s24  ;;  %v2115_v49 = vsel %vm14547_vm6, %v2110_v50, %v2114_v29  ;;  %v6792_v42 = vsel %vm2357_vm2, %v6790_v47, %v6791_v27  ;;  %v3302_v1 = vrot.slane %v9372_v51, 1  ;;  %v3303_v21 = vrot.slane %v9373_v11, 1  ;;  %v9379_v34 = vld [vmem:[#allocation2 + $0xd4] ss:$0 sps:$4 sm:$0x11]  }
 0x1b8   :  { %v5942_v54 = vpop.permute.xlu1 %5941  ;;  %6850 = vst.msk [vmem:[#allocation3 + $0x128] sm:$0xff] %vm14487_vm13, %v6792_v42  ;;  %v929_v25 = vadd.f32 %v11196_v35, %v8381_v32  ;;  %v4654_v50 = vsel %vm14550_vm11, %v4649_v56, %v4653_v52  ;;  %v3909_v41 = vrot.slane %v3907_v19, 1  ;;  %v5014_v17 = vsel %vm2357_vm2, %v5012_v16, %v5013_v57  ;;  %v1546_v56 = vld [vmem:[#allocation2 + $0x144] sm:$0xf] }
 0x1b9   :  { %5986 = vst.msk [vmem:[#allocation3 + $0x130] sm:$0xff] %vm3353_vm3, %v5942_v54  ;;  %v11253_v60 = vpop.permute.xlu0 %2140  ;;  %v3009_v54 = vrot.slane %v3007_v5, 1  ;;  %v9359_v36 = vld [vmem:[#allocation2 + $0x140] ss:$0 sps:$4 sm:$0x11]   ;;  %vm14552_vm11 = vcmask 392448  }
 0x1ba   :  { %v6432_v9 = vshll.u32 %v9359_v36, 16  ;;  %v9377_v4 = vld [vmem:[#allocation2 + $0x140] ss:$0 sps:$4 sm:$0x11]   ;;  %vm961_vm8 = vcmp.gt.f32.partialorder %v929_v25, 0.0  ;;  %vm993_vm6 = vcmp.lt.f32.partialorder %v929_v25, 0.0 }
 0x1bb   :  { %v9354_v23 = vld [vmem:[#allocation2 + $0x138] sm:$0xff]   ;;  %2146 = vrot.lane.b32.xlu0 %v2115_v49, %s9547_s20  ;;  %v3010_v7 = vor.u32 %v3009_v54, %v3005_v37  ;;  %v5547_v5 = vshll.u32 %v9377_v4, 16  ;;  %v3912_v37 = vshll.u32 %v9379_v34, 16  ;;  %v11313_v54 = vld [vmem:[#allocation2 + $0x140] ss:$0 sps:$4 sm:$0x11]  }
 0x1bc   :  { %v9358_v53 = vld [vmem:[#allocation2 + $0x138] sm:$0xff]   ;;  %6124 = vrot.lane.b32.xlu1 %v9354_v23, %s9548_s21  ;;  %v6434_v31 = vrot.slane %v6432_v9, 1  ;;  %v3304_v23 = vsel %vm2357_vm2, %v3302_v1, %v3303_v21  ;;  %v9387_v27 = vld [vmem:[#allocation2 + $0x140] ss:$0 sps:$4 sm:$0x11]  }
 0x1bd   :  { %v11264_v63 = vpop.permute.xlu0 %2430  ;;  %v6425_v0 = vshrl.u32 %v9358_v53, 16  ;;  %v6427_v30 = vshll.u32 %v9358_v53, 16  ;;  %v11277_v6 = vld [vmem:[#allocation2 + $0x138] sm:$0xff]   ;;  %v3015_v29 = vsel %vm14551_vm10, %v3010_v7, %v3014_v45  ;;  %v1025_v53 = vsel %vm993_vm6, -1.0, %v9545_v10  ;;  %v9375_v45 = vld [vmem:[#allocation2 + $0xcc] sm:$0xff]  }
 0x1be   :  { %v5540_v58 = vshrl.u32 %v11277_v6, 16  ;;  %v5542_v48 = vshll.u32 %v11277_v6, 16  ;;  %v11308_v38 = vld [vmem:[#allocation2 + $0x138] sm:$0xfe]   ;;  %v5549_v55 = vrot.slane %v5547_v5, 1  ;;  %v3914_v9 = vrot.slane %v3912_v37, 1 }
 0x1bf   :  { %v6429_v59 = vrot.slane %v6427_v30, 1  ;;  %2436 = vrot.lane.b32.xlu0 %v2405_v3, %s9546_s15  ;;  %v6901_v18 = vld [vmem:[#allocation3 + $0x128] sm:$0xff]  ;;  %v9383_v30 = vld [vmem:[#allocation2 + $0x90] sm:$0xff]   ;;  %v5908_v16 = vrot.slane %v11308_v38, 1  ;;  %v4663_v42 = vshll.u32 %v9387_v27, 16  ;;  %vm14553_vm10 = vcmask 523648  }
 0x1c0   :  { %v5544_v52 = vrot.slane %v5542_v48, 1  ;;  %8937 = vmatprep.mubr.msk.bf16.mxu1 %vm14487_vm13, %v6901_v18  ;;  %v9374_v3 = vld [vmem:[#allocation2 + $0x138] sm:$0xff]   ;;  %1743 = vst.msk [vmem:[#allocation3 + $0xc0] sm:$0xff] %vm14487_vm13, %v9383_v30  ;;  %v9389_v25 = vld [vmem:[#allocation2 + $0xa4] ss:$0 sps:$4 sm:$0x11]  }
 0x1c1   :  { %v11275_v62 = vpop.permute.xlu0 %2607  ;;  %v6430_v40 = vor.u32 %v6429_v59, %v6425_v0  ;;  %v1057_v0 = vsel %vm961_vm8, 1.0, %v1025_v53  ;;  %7273 = vmatmul.mubr.bf16.gmra.mrb[8].mxu1 %v6900_v13  ;;  %v9386_v61 = vld [vmem:[#allocation2 + $0x138] sm:$0xff]   ;;  %v3910_v59 = vor.u32 %v3909_v41, %v3905_v15  ;;  %2177 = vst.msk [vmem:[#allocation3 + $0xc0] sm:$0xff] %vm2164_vm14, %v11253_v60  ;;  %v1550_v15 = vld [vmem:[#allocation2 + $0x14c] sm:$0x1] }
 0x1c2   :  { %v5545_v20 = vor.u32 %v5544_v52, %v5540_v58  ;;  %v4656_v7 = vshrl.u32 %v9386_v61, 16  ;;  %v4658_v11 = vshll.u32 %v9386_v61, 16  ;;  %2467 = vst.msk [vmem:[#allocation3 + $0xc0] sm:$0xff] %vm14552_vm11, %v11264_v63  ;;  %vm14554_vm8 = vsmask.f32 7424  ;;  %v8384_v53 = vld [vmem:[%s14435_s0 + $0x198] sm:$0xff] }
 0x1c3   :  { %v6435_v24 = vsel %vm14549_vm12, %v6430_v40, %v6434_v31  ;;  %2613 = vrot.lane.b32.xlu0 %v9362_v2, %s9549_s22  ;;  %v9001_v2 = vpack.c.bf16 %v1057_v0, %v1057_v0  ;;  %v5909_v31 = vrot.slane %v11313_v54, 1  ;;  %2644 = vst.msk [vmem:[#allocation3 + $0xc0] sm:$0xff] %vm14553_vm10, %v11275_v62  ;;  %v9388_v1 = vld [vmem:[#allocation2 + $0x9c] sm:$0xfe]   ;;  %vm14555_vm6 = vmmov %vm14554_vm8  ;;  %v8383_v54 = vld [vmem:[%s14435_s0 + $0x190] sm:$0xff] }
 0x1c4   :  { %6556 = vrot.lane.b32.xlu1 %v6435_v24, %s9551_s24  ;;  %v5550_v60 = vsel %vm14554_vm8, %v5545_v20, %v5549_v55  ;;  %v4660_v24 = vrot.slane %v4658_v11, 1  ;;  %v3915_v63 = vsel %vm14555_vm6, %v3910_v59, %v3914_v9  ;;  %v4190_v41 = vrot.slane %v9388_v1, 1  ;;  %v11344_v5 = vld [vmem:[#allocation2 + $0x140] ss:$0 sps:$4 sm:$0x11]  }
 0x1c5   :  { %v1306_v32 = vshrl.u32 %v9001_v2, 16  ;;  %v1309_v47 = vshll.u32 %v9001_v2, 16  ;;  %v5910_v34 = vsel %vm2357_vm2, %v5908_v16, %v5909_v31  ;;  %v11358_v18 = vld [vmem:[#allocation2 + $0x138] sm:$0xfe]   ;;  %v5016_v30 = vrot.slane %v11344_v5, 1  ;;  %v6886_v20 = vld [vmem:[#allocation3 + $0xb0] sm:$0xff] }
 0x1c6   :  { %v4661_v4 = vor.u32 %v4660_v24, %v4656_v7  ;;  %v5015_v0 = vrot.slane %v11358_v18, 1  ;;  %v9413_v2 = vld [vmem:[#allocation2 + $0x9c] sm:$0xff]  }
 0x1c7   :  { %3046 = vrot.lane.b32.xlu0 %v3015_v29, %s9552_s29  ;;  %v1308_v22 = vrot.slane %v1306_v32, 7  ;;  %1744 = vst.msk [vmem:[#allocation3 + $0xd0] sm:$0xff] %vm14487_vm13, %v9413_v2 }
 0x1c8   :  { %4765 = vrot.lane.b32.xlu1 %v4654_v50, %s9547_s20  ;;  %v9393_v50 = vld [vmem:[#allocation2 + $0x108] sm:$0xff]  }
 0x1c9   :  { %v1311_v48 = vor.u32 %v1309_v47, %v1308_v22  ;;  %v1312_v21 = vrot.slane %v1308_v22, 4  ;;  %4371 = vst.msk [vmem:[#allocation3 + $0x140] sm:$0xff] %vm14487_vm13, %v9393_v50 }
 0x1ca   :  { %v6119_v33 = vpop.permute.xlu1 %6118 }
 0x1cb   :  { %6163 = vst.msk [vmem:[#allocation3 + $0x130] sm:$0xff] %vm3531_vm7, %v6119_v33  ;;  %v8382_v33 = vld [vmem:[%s14435_s0 + $0x188] sm:$0xff]  ;;  %3335 = vrot.lane.b32.xlu0 %v3304_v23, %s9550_s23  ;;  %v9398_v23 = vld [vmem:[#allocation2 + $0x114] sm:$0xfe]  }
 0x1cc   :  { %v930_v46 = vadd.f32 %v11196_v35, %v8382_v33  ;;  %5053 = vrot.lane.b32.xlu1 %v5014_v17, %s9546_s15  ;;  %v4665_v33 = vrot.slane %v4663_v42, 1 }
 0x1ce   :  { %vm994_vm12 = vcmp.lt.f32.partialorder %v930_v46, 0.0 }
 0x1cf   :  { %v1026_v36 = vsel %vm994_vm12, -1.0, %v9545_v10  ;;  %3513 = vrot.lane.b32.xlu0 %v9375_v45, %s9548_s21  ;;  %vm14557_vm12 = vmmov %vm14552_vm11  ;;  %vm14558_vm11 = vcmask 1048448   ;;  %v932_v45 = vadd.f32 %v11196_v35, %v8384_v53 }
 0x1d0   :  { %v11292_v8 = vpop.permute.xlu0 %3040  ;;  %5229 = vrot.lane.b32.xlu1 %v9374_v3, %s9549_s22 }
 0x1d1   :  { %3077 = vst.msk [vmem:[#allocation3 + $0xc0] sm:$0xff] %vm3064_vm1, %v11292_v8  ;;  %v1547_v8 = vsel %vm9856_vm4, %v1311_v48, %v1546_v56  ;;  %v8386_v48 = vld [vmem:[%s14435_s0 + $0x1a8] sm:$0xff] }
 0x1d2   :  { %v6551_v43 = vpop.permute.xlu1 %6550  ;;  %1548 = vst [vmem:[#allocation2 + $0x144] sm:$0xf] %v1547_v8 }
 0x1d3   :  { %6595 = vst.msk [vmem:[#allocation3 + $0x130] sm:$0xff] %vm14548_vm5, %v6551_v43  ;;  %vm962_vm5 = vcmp.gt.f32.partialorder %v930_v46, 0.0  ;;  %v4191_v46 = vrot.slane %v9389_v25, 1  ;;  %3946 = vrot.lane.b32.xlu0 %v3915_v63, %s9551_s24  ;;  %v8385_v63 = vld [vmem:[%s14435_s0 + $0x1a0] sm:$0xff] }
 0x1d4   :  { %v3330_v26 = vpop.permute.xlu0 %3329  ;;  %v1058_v43 = vsel %vm962_vm5, 1.0, %v1026_v36  ;;  %5661 = vrot.lane.b32.xlu1 %v5550_v60, %s9552_s29  ;;  %vm14556_vm5 = vmmov %vm14555_vm6  ;;  %v6793_v36 = vrot.slane %v9398_v23, 1  ;;  %vm964_vm6 = vcmp.gt.f32.partialorder %v932_v45, 0.0 }
 0x1d5   :  { %v9002_v6 = vpack.c.bf16 %v1058_v43, %v1058_v43  ;;  %3366 = vst.msk [vmem:[#allocation3 + $0xc0] sm:$0xff] %vm3353_vm3, %v3330_v26  ;;  %v4666_v37 = vsel %vm14556_vm5, %v4661_v4, %v4665_v33  ;;  %v4192_v26 = vsel %vm2357_vm2, %v4190_v41, %v4191_v46 }
 0x1d6   :  { %v11285_v28 = vpop.permute.xlu1 %4759  ;;  %4232 = vst.msk [vmem:[#allocation3 + $0xb8] sm:$0xff] %vm14487_vm13, %v4192_v26 }
 0x1d7   :  { %v1314_v51 = vshrl.u32 %v9002_v6, 16  ;;  %v1317_v40 = vshll.u32 %v9002_v6, 16  ;;  %4803 = vst.msk [vmem:[#allocation3 + $0x140] sm:$0xff] %vm2164_vm14, %v11285_v28  ;;  %v9399_v28 = vld [vmem:[#allocation2 + $0x11c] ss:$0 sps:$4 sm:$0x11]   ;;  %4767 = vrot.lane.b32.xlu0 %v4666_v37, %s9547_s20 }
 0x1d8   :  { %5949 = vrot.lane.b32.xlu1 %v5910_v34, %s9550_s23  ;;  %v6794_v3 = vrot.slane %v9399_v28, 1 }
 0x1d9   :  { %v1316_v58 = vrot.slane %v1314_v51, 7 }
 0x1da   :  { %v11303_v14 = vpop.permute.xlu1 %5047  ;;  %v6795_v43 = vsel %vm2357_vm2, %v6793_v36, %v6794_v3  ;;  %v933_v36 = vadd.f32 %v11196_v35, %v8385_v63  ;;  %v934_v3 = vadd.f32 %v11196_v35, %v8386_v48 }
 0x1db   :  { %v1319_v62 = vor.u32 %v1317_v40, %v1316_v58  ;;  %v1321_v29 = vrot.slane %v1316_v58, 4  ;;  %5091 = vst.msk [vmem:[#allocation3 + $0x140] sm:$0xff] %vm14557_vm12, %v11303_v14  ;;  %v11374_v14 = vpop.f32.mrb[0].mxu0  ;;  %vm996_vm12 = vcmp.lt.f32.partialorder %v932_v45, 0.0 }
 0x1dc   :  { %v11384_v9 = vsel %vm14487_vm13, %v11374_v14, 0.0  ;;  %v7132_v16 = vpop.f32.mrb[1].mxu0  ;;  %6851 = vst.msk [vmem:[#allocation3 + $0x138] sm:$0xff] %vm14487_vm13, %v6795_v43  ;;  %v1028_v40 = vsel %vm996_vm12, -1.0, %v9545_v10  ;;  %vm14561_vm12 = vsmask.f32 7424 }
 0x1dd   :  { %v1320_v17 = vsel %vm9849_vm15, %v1312_v21, %v1319_v62  ;;  %v1551_v38 = vsel %vm9880_vm9, %v1321_v29, %v1550_v15  ;;  %v6887_v47 = vld [vmem:[#allocation3 + $0xb8] sm:$0xff]  ;;  %v5017_v29 = vsel %vm2357_vm2, %v5015_v0, %v5016_v30  ;;  %v1060_v8 = vsel %vm964_vm6, 1.0, %v1028_v40 }
 0x1de   :  { %v11310_v49 = vpop.permute.xlu1 %5223  ;;  %v3508_v19 = vpop.permute.xlu0 %3507  ;;  %1549 = vst.msk [vmem:[#allocation2 + $0x148] sm:$0xf] %vm27_vm0, %v1320_v17  ;;  %1552 = vst [vmem:[#allocation2 + $0x14c] sm:$0x1] %v1551_v38  ;;  %8930 = vmatprep.mubr.msk.bf16.mxu0 %vm14487_vm13, %v6887_v47  ;;  %v9004_v23 = vpack.c.bf16 %v1060_v8, %v1060_v8  ;;  %v1557_v47 = vld [vmem:[#allocation2 + $0x158] sm:$0x1] }
 0x1df   :  { %3544 = vst.msk [vmem:[#allocation3 + $0xc0] sm:$0xff] %vm3531_vm7, %v3508_v19  ;;  %7217 = vmatmul.mubr.bf16.gmra.mrb[44].mxu0 %v6886_v20  ;;  %vm965_vm6 = vcmp.gt.f32.partialorder %v933_v36, 0.0 }
 0x1e0   :  { %5267 = vst.msk [vmem:[#allocation3 + $0x140] sm:$0xff] %vm14553_vm10, %v11310_v49  ;;  %v931_v49 = vadd.f32 %v11196_v35, %v8383_v54  ;;  %v1334_v16 = vshll.u32 %v9004_v23, 16 }
 0x1e2   :  { %v5656_v57 = vpop.permute.xlu1 %5655  ;;  %vm963_vm8 = vcmp.gt.f32.partialorder %v931_v49, 0.0  ;;  %vm995_vm5 = vcmp.lt.f32.partialorder %v931_v49, 0.0 }
 0x1e3   :  { %5699 = vst.msk [vmem:[#allocation3 + $0x140] sm:$0xff] %vm3064_vm1, %v5656_v57  ;;  %v1027_v51 = vsel %vm995_vm5, -1.0, %v9545_v10  ;;  %v6902_v57 = vld [vmem:[#allocation3 + $0x130] sm:$0xff]  ;;  %v6903_v1 = vld [vmem:[#allocation3 + $0x138] sm:$0xff]  ;;  %vm14560_vm5 = vcmask 1048448  }
 0x1e4   :  { %8938 = vmatprep.mubr.msk.bf16.mxu1 %vm14487_vm13, %v6903_v1  ;;  %v1059_v41 = vsel %vm963_vm8, 1.0, %v1027_v51  ;;  %vm14562_vm8 = vmmov %vm14561_vm12 }
 0x1e5   :  { %v9382_v6 = vld [vmem:[#allocation2 + $0x144] sm:$0xff]   ;;  %v9385_v32 = vld [vmem:[#allocation2 + $0x14c] ss:$0 sps:$4 sm:$0x11]   ;;  %7281 = vmatmul.mubr.bf16.gmra.mrb[12].mxu1 %v6902_v57  ;;  %v9003_v18 = vpack.c.bf16 %v1059_v41, %v1059_v41 }
 0x1e6   :  { %v3941_v13 = vpop.permute.xlu0 %3940  ;;  %v5944_v52 = vpop.permute.xlu1 %5943  ;;  %v9384_v31 = vld [vmem:[#allocation2 + $0x144] sm:$0xff]   ;;  %6126 = vrot.lane.b32.xlu1 %v9382_v6, %s9548_s21  ;;  %v6444_v11 = vshll.u32 %v9385_v32, 16  ;;  %v9395_v60 = vld [vmem:[#allocation2 + $0x14c] ss:$0 sps:$4 sm:$0x11]  }
 0x1e7   :  { %3977 = vst.msk [vmem:[#allocation3 + $0xc0] sm:$0xff] %vm14558_vm11, %v3941_v13  ;;  %v9392_v27 = vld [vmem:[#allocation2 + $0x144] sm:$0xff]   ;;  %vm14559_vm11 = vcmask 392448   ;;  %v6437_v56 = vshrl.u32 %v9384_v31, 16  ;;  %v6439_v7 = vshll.u32 %v9384_v31, 16  ;;  %v5559_v25 = vshll.u32 %v9395_v60, 16 }
 0x1e8   :  { %5987 = vst.msk [vmem:[#allocation3 + $0x140] sm:$0xff] %vm3353_vm3, %v5944_v52  ;;  %v9394_v19 = vld [vmem:[#allocation2 + $0x144] sm:$0xff]   ;;  %5231 = vrot.lane.b32.xlu0 %v9392_v27, %s9549_s22  ;;  %v6446_v42 = vrot.slane %v6444_v11, 1  ;;  %v9397_v62 = vld [vmem:[#allocation2 + $0x14c] ss:$0 sps:$4 sm:$0x11]   ;;  %v7519_v13 = vmul.f32 %v11374_v14, %v11374_v14 }
 0x1e9   :  { %v6441_v15 = vrot.slane %v6439_v7, 1  ;;  %v5552_v58 = vshrl.u32 %v9394_v19, 16  ;;  %v5554_v24 = vshll.u32 %v9394_v19, 16  ;;  %v9396_v50 = vld [vmem:[#allocation2 + $0x144] sm:$0xfe]   ;;  %v5912_v38 = vrot.slane %v9397_v62, 1 }
 0x1ea   :  { %v2143_v55 = vpop.permute.xlu0 %2142  ;;  %v6121_v61 = vpop.permute.xlu1 %6120  ;;  %v11410_v46 = vld [vmem:[#allocation2 + $0x144] sm:$0xff]   ;;  %v5911_v17 = vrot.slane %v9396_v50, 1  ;;  %v5561_v26 = vrot.slane %v5559_v25, 1  ;;  %v1323_v49 = vshrl.u32 %v9003_v18, 16  ;;  %v1326_v45 = vshll.u32 %v9003_v18, 16  ;;  %v9423_v25 = vld [vmem:[#allocation2 + $0x114] sm:$0xff]  }
 0x1eb   :  { %6164 = vst.msk [vmem:[#allocation3 + $0x140] sm:$0xff] %vm3531_vm7, %v6121_v61  ;;  %v6442_v33 = vor.u32 %v6441_v15, %v6437_v56  ;;  %v5556_v4 = vrot.slane %v5554_v24, 1  ;;  %v11415_v52 = vpop.f32.mrb[2].mxu0  ;;  %v4670_v53 = vshll.u32 %v11410_v46, 16  ;;  %v4668_v2 = vshrl.u32 %v11410_v46, 16 }
 0x1ec   :  { %2178 = vst.msk [vmem:[#allocation3 + $0xd0] sm:$0xff] %vm2164_vm14, %v2143_v55  ;;  %v5913_v54 = vsel %vm2357_vm2, %v5911_v17, %v5912_v38  ;;  %v1331_v55 = vshrl.u32 %v9004_v23, 16  ;;  %v7135_v0 = vpop.f32.mrb[3].mxu0  ;;  %v11426_v43 = vld [vmem:[#allocation2 + $0x14c] ss:$0 sps:$4 sm:$0x11]   ;;  %v7520_v31 = vmul.f32 %v11415_v52, %v11415_v52 }
 0x1ed   :  { %v6447_v34 = vsel %vm14561_vm12, %v6442_v33, %v6446_v42  ;;  %v5557_v37 = vor.u32 %v5556_v4, %v5552_v58  ;;  %5951 = vrot.lane.b32.xlu0 %v5913_v54, %s9550_s23  ;;  %v7583_v61 = vsel %vm14487_vm13, %v7519_v13, 0.0  ;;  %v1325_v20 = vrot.slane %v1323_v49, 7  ;;  %v11437_v57 = vpop.f32.mrb[4].mxu0  ;;  %v9418_v58 = vld [vmem:[#allocation2 + $0xa8] sm:$0xfe]   ;;  %4372 = vst.msk [vmem:[#allocation3 + $0x150] sm:$0xff] %vm14487_vm13, %v9423_v25 }
 0x1ee   :  { %v2433_v59 = vpop.permute.xlu0 %2432  ;;  %6558 = vrot.lane.b32.xlu1 %v6447_v34, %s9551_s24  ;;  %v1333_v6 = vrot.slane %v1331_v55, 7  ;;  %v4672_v27 = vrot.slane %v4670_v53, 1  ;;  %v4675_v11 = vshll.u32 %v11426_v43, 16  ;;  %v9419_v24 = vld [vmem:[#allocation2 + $0xb0] ss:$0 sps:$4 sm:$0x11]   ;;  %v7521_v53 = vmul.f32 %v11437_v57, %v11437_v57 }
 0x1ef   :  { %2468 = vst.msk [vmem:[#allocation3 + $0xd0] sm:$0xff] %vm14559_vm11, %v2433_v59  ;;  %v5562_v35 = vsel %vm14562_vm8, %v5557_v37, %v5561_v26  ;;  %v1553_v59 = vld [vmem:[#allocation2 + $0x150] sm:$0xf]  ;;  %vm966_vm11 = vcmp.gt.f32.partialorder %v934_v3, 0.0  ;;  %v1328_v51 = vor.u32 %v1326_v45, %v1325_v20  ;;  %v1329_v40 = vrot.slane %v1325_v20, 4  ;;  %v7140_v41 = vpop.f32.mrb[5].mxu0 }
 0x1f0   :  { %v1336_v56 = vor.u32 %v1334_v16, %v1333_v6  ;;  %v1338_v7 = vrot.slane %v1333_v6, 4  ;;  %v11448_v63 = vld [vmem:[#allocation2 + $0x144] sm:$0xfe]   ;;  %v7386_v33 = vsel %vm14487_vm13, %v11415_v52, 0.0  ;;  %v7584_v4 = vsel %vm14487_vm13, %v7520_v31, 0.0  ;;  %v11459_v17 = vpop.f32.mrb[6].mxu0 }
 0x1f1   :  { %v1554_v15 = vsel %vm9856_vm4, %v1328_v51, %v1553_v59  ;;  %v7585_v8 = vadd.f32 %v7584_v4, %v7583_v61  ;;  %v4193_v46 = vrot.slane %v9418_v58, 1  ;;  %v7388_v34 = vsel %vm14487_vm13, %v11437_v57, 0.0  ;;  %v1560_v55 = vld [vmem:[#allocation2 + $0x15c] sm:$0xf]  ;;  %v1564_v6 = vld [vmem:[#allocation2 + $0x164] sm:$0x1] }
 0x1f2   :  { %v2610_v22 = vpop.permute.xlu0 %2609  ;;  %v6553_v21 = vpop.permute.xlu1 %6552  ;;  %5055 = vrot.lane.b32.xlu1 %v5017_v29, %s9546_s15  ;;  %v1558_v42 = vsel %vm9880_vm9, %v1338_v7, %v1557_v47  ;;  %1555 = vst [vmem:[#allocation2 + $0x150] sm:$0xf] %v1554_v15  ;;  %v7387_v29 = vadd.f32 %v7386_v33, %v11384_v9  ;;  %vm14563_vm12 = vcmask 392448   ;;  %vm14564_vm8 = vcmask 523648   ;;  %v11490_v41 = vld [vmem:[#allocation2 + $0x120] sm:$0xfe]  }
 0x1f3   :  { %2645 = vst.msk [vmem:[#allocation3 + $0xd0] sm:$0xff] %vm14553_vm10, %v2610_v22  ;;  %vm997_vm10 = vcmp.lt.f32.partialorder %v933_v36, 0.0  ;;  %v1337_v22 = vsel %vm9849_vm15, %v1329_v40, %v1336_v56  ;;  %1559 = vst [vmem:[#allocation2 + $0x158] sm:$0x1] %v1558_v42  ;;  %v7143_v9 = vpop.f32.mrb[7].mxu0  ;;  %v7390_v36 = vsel %vm14487_vm13, %v11459_v17, 0.0 }
 0x1f4   :  { %6596 = vst.msk [vmem:[#allocation3 + $0x140] sm:$0xff] %vm14560_vm5, %v6553_v21  ;;  %vm998_vm5 = vcmp.lt.f32.partialorder %v934_v3, 0.0  ;;  %v1029_v19 = vsel %vm997_vm10, -1.0, %v9545_v10  ;;  %v7389_v54 = vadd.f32 %v7388_v34, %v7387_v29  ;;  %v4673_v3 = vor.u32 %v4672_v27, %v4668_v2  ;;  %v9406_v0 = vld [vmem:[#allocation2 + $0x14c] ss:$0 sps:$4 sm:$0x11]  }
 0x1f5   :  { %v1030_v60 = vsel %vm998_vm5, -1.0, %v9545_v10  ;;  %1556 = vst.msk [vmem:[#allocation2 + $0x154] sm:$0xf] %vm27_vm0, %v1337_v22  ;;  %v1061_v48 = vsel %vm965_vm6, 1.0, %v1029_v19  ;;  %v7586_v16 = vsel %vm14487_vm13, %v7521_v53, 0.0  ;;  %v5019_v7 = vrot.slane %v9406_v0, 1 }
 0x1f6   :  { %v3043_v5 = vpop.permute.xlu0 %3042  ;;  %v11419_v28 = vpop.permute.xlu1 %4761  ;;  %5663 = vrot.lane.b32.xlu1 %v5562_v35, %s9552_s29  ;;  %v1062_v21 = vsel %vm966_vm11, 1.0, %v1030_v60  ;;  %v9005_v50 = vpack.c.bf16 %v1061_v48, %v1061_v48  ;;  %v11473_v43 = vadd.f32 %v7390_v36, %v7389_v54  ;;  %v11476_v59 = vadd.f32 %v7586_v16, %v7585_v8  ;;  %v8388_v0 = vld [vmem:[%s14435_s0 + $0x1b8] sm:$0xff] }
 0x1f7   :  { %3078 = vst.msk [vmem:[#allocation3 + $0xd0] sm:$0xff] %vm3064_vm1, %v3043_v5  ;;  %v9006_v62 = vpack.c.bf16 %v1062_v21, %v1062_v21  ;;  %v4194_v5 = vrot.slane %v9419_v24, 1  ;;  %vm14565_vm6 = vsmask.f32 7424  ;;  %vm14566_vm11 = vcmask 1048448  }
 0x1f8   :  { %v1340_v38 = vshrl.u32 %v9005_v50, 16  ;;  %v1343_v13 = vshll.u32 %v9005_v50, 16  ;;  %4804 = vst.msk [vmem:[#allocation3 + $0x150] sm:$0xff] %vm2164_vm14, %v11419_v28  ;;  %v4677_v28 = vrot.slane %v4675_v11, 1  ;;  %vm14567_vm10 = vmmov %vm14565_vm6 }
 0x1f9   :  { %v1348_v37 = vshrl.u32 %v9006_v62, 16  ;;  %v1351_v26 = vshll.u32 %v9006_v62, 16  ;;  %v4195_v23 = vsel %vm2357_vm2, %v4193_v46, %v4194_v5  ;;  %vm14568_vm5 = vmmov %vm14565_vm6 }
 0x1fa   :  { %v3332_v30 = vpop.permute.xlu0 %3331  ;;  %v5050_v32 = vpop.permute.xlu1 %5049  ;;  %v1342_v49 = vrot.slane %v1340_v38, 7  ;;  %4233 = vst.msk [vmem:[#allocation3 + $0xc8] sm:$0xff] %vm14487_vm13, %v4195_v23  ;;  %v9402_v27 = vld [vmem:[#allocation2 + $0x158] ss:$0 sps:$4 sm:$0x11]   ;;  %v4678_v56 = vsel %vm14565_vm6, %v4673_v3, %v4677_v28  ;;  %v8387_v28 = vld [vmem:[%s14435_s0 + $0x1b0] sm:$0xff]  ;;  %vm14571_vm6 = vmmov %vm14566_vm11 }
 0x1fb   :  { %3367 = vst.msk [vmem:[#allocation3 + $0xd0] sm:$0xff] %vm3353_vm3, %v3332_v30  ;;  %v1350_v45 = vrot.slane %v1348_v37, 7  ;;  %v5018_v30 = vrot.slane %v11448_v63, 1  ;;  %v6456_v15 = vshll.u32 %v9402_v27, 16  ;;  %v6888_v37 = vld [vmem:[#allocation3 + $0xc0] sm:$0xff] }
 0x1fc   :  { %5092 = vst.msk [vmem:[#allocation3 + $0x150] sm:$0xff] %vm14563_vm12, %v5050_v32  ;;  %v9400_v61 = vld [vmem:[#allocation2 + $0x150] sm:$0xff]   ;;  %v1345_v35 = vor.u32 %v1343_v13, %v1342_v49  ;;  %v1346_v2 = vrot.slane %v1342_v49, 4  ;;  %v9409_v60 = vld [vmem:[#allocation2 + $0x158] ss:$0 sps:$4 sm:$0x11]   ;;  %vm14569_vm12 = vmmov %vm14568_vm5 }
 0x1fd   :  { %v1353_v20 = vor.u32 %v1351_v26, %v1350_v45  ;;  %6128 = vrot.lane.b32.xlu1 %v9400_v61, %s9548_s21  ;;  %v9401_v47 = vld [vmem:[#allocation2 + $0x150] sm:$0xff]   ;;  %v1355_v11 = vrot.slane %v1350_v45, 4  ;;  %v6458_v63 = vrot.slane %v6456_v15, 1  ;;  %v5571_v25 = vshll.u32 %v9409_v60, 16  ;;  %v11521_v60 = vld [vmem:[%s14436_s2] ss:$0 sm:$0xff] }
 0x1fe   :  { %v5226_v1 = vpop.permute.xlu1 %5225  ;;  %v1561_v40 = vsel %vm9856_vm4, %v1345_v35, %v1560_v55  ;;  %v6449_v19 = vshrl.u32 %v9401_v47, 16  ;;  %v6451_v22 = vshll.u32 %v9401_v47, 16  ;;  %v9408_v42 = vld [vmem:[#allocation2 + $0x150] sm:$0xff]   ;;  %v9411_v4 = vld [vmem:[#allocation2 + $0x158] ss:$0 sps:$4 sm:$0x11]   ;;  %v5020_v23 = vsel %vm2357_vm2, %v5018_v30, %v5019_v7 }
 0x1ff   :  { %5268 = vst.msk [vmem:[#allocation3 + $0x150] sm:$0xff] %vm14564_vm8, %v5226_v1  ;;  %v1354_v51 = vsel %vm9849_vm15, %v1346_v2, %v1353_v20  ;;  %1562 = vst [vmem:[#allocation2 + $0x15c] sm:$0xf] %v1561_v40  ;;  %v1565_v58 = vsel %vm9880_vm9, %v1355_v11, %v1564_v6  ;;  %v9416_v24 = vld [vmem:[#allocation2 + $0x150] sm:$0xff]   ;;  %v5566_v21 = vshll.u32 %v9408_v42, 16  ;;  %v5564_v33 = vshrl.u32 %v9408_v42, 16 }
 0x200   :  { %v3510_v31 = vpop.permute.xlu0 %3509  ;;  %1563 = vst.msk [vmem:[#allocation2 + $0x160] sm:$0xf] %vm27_vm0, %v1354_v51  ;;  %v6453_v1 = vrot.slane %v6451_v22, 1  ;;  %v9407_v48 = vld [vmem:[#allocation2 + $0x150] sm:$0xff]   ;;  %1566 = vst [vmem:[#allocation2 + $0x164] sm:$0x1] %v1565_v58  ;;  %v935_v58 = vadd.f32 %v11521_v60, %v8387_v28 }
 0x201   :  { %3545 = vst.msk [vmem:[#allocation3 + $0xd0] sm:$0xff] %vm3531_vm7, %v3510_v31  ;;  %4769 = vrot.lane.b32.xlu1 %v4678_v56, %s9547_s20  ;;  %v5568_v62 = vrot.slane %v5566_v21, 1  ;;  %v9410_v29 = vld [vmem:[#allocation2 + $0x150] sm:$0xfe]   ;;  %v4680_v46 = vshrl.u32 %v9416_v24, 16  ;;  %v4682_v5 = vshll.u32 %v9416_v24, 16  ;;  %v936_v24 = vadd.f32 %v11521_v60, %v8388_v0  ;;  %vm14570_vm8 = vmmov %vm14568_vm5 }
 0x202   :  { %v5658_v18 = vpop.permute.xlu1 %5657  ;;  %v6454_v50 = vor.u32 %v6453_v1, %v6449_v19  ;;  %v5914_v38 = vrot.slane %v9410_v29, 1  ;;  %v5915_v13 = vrot.slane %v9411_v4, 1  ;;  %v5573_v26 = vrot.slane %v5571_v25, 1  ;;  %v9417_v3 = vld [vmem:[#allocation2 + $0x158] ss:$0 sps:$4 sm:$0x11]  }
 0x203   :  { %5700 = vst.msk [vmem:[#allocation3 + $0x150] sm:$0xff] %vm3064_vm1, %v5658_v18  ;;  %v4684_v9 = vrot.slane %v4682_v5, 1  ;;  %v7522_v18 = vmul.f32 %v11459_v17, %v11459_v17  ;;  %v5569_v54 = vor.u32 %v5568_v62, %v5564_v33  ;;  %v6889_v55 = vld [vmem:[#allocation3 + $0xc8] sm:$0xff]  ;;  %v4687_v35 = vshll.u32 %v9417_v3, 16  ;;  %v9420_v51 = vld [vmem:[#allocation2 + $0x150] sm:$0xfe]  }
 0x204   :  { %v6459_v34 = vsel %vm14567_vm10, %v6454_v50, %v6458_v63  ;;  %v5916_v53 = vsel %vm2357_vm2, %v5914_v38, %v5915_v13  ;;  %8931 = vmatprep.mubr.msk.bf16.mxu0 %vm14487_vm13, %v6889_v55  ;;  %v6796_v2 = vrot.slane %v11490_v41, 1  ;;  %v9429_v31 = vld [vmem:[#allocation2 + $0x128] ss:$0 sps:$4 sm:$0x11]   ;;  %v5021_v15 = vrot.slane %v9420_v51, 1  ;;  %v11535_v13 = vpop.f32.mrb[8].mxu0 }
 0x205   :  { %5233 = vrot.lane.b32.xlu1 %v9407_v48, %s9549_s22  ;;  %6560 = vrot.lane.b32.xlu0 %v6459_v34, %s9551_s24  ;;  %v7588_v6 = vsel %vm14487_vm13, %v7522_v18, 0.0  ;;  %v4689_v27 = vrot.slane %v4687_v35, 1  ;;  %v4685_v11 = vor.u32 %v4684_v9, %v4680_v46  ;;  %v9421_v19 = vld [vmem:[#allocation2 + $0x158] ss:$0 sps:$4 sm:$0x11]   ;;  %v6797_v4 = vrot.slane %v9429_v31, 1 }
 0x206   :  { %v5946_v32 = vpop.permute.xlu1 %5945  ;;  %7225 = vmatmul.mubr.bf16.gmra.mrb[48].mxu0 %v6888_v37  ;;  %v11516_v40 = vadd.f32 %v7588_v6, %v11476_v59  ;;  %v5022_v59 = vrot.slane %v9421_v19, 1  ;;  %vm968_vm10 = vcmp.gt.f32.partialorder %v936_v24, 0.0  ;;  %v7148_v18 = vpop.f32.mrb[9].mxu0  ;;  %v7392_v3 = vsel %vm14487_vm13, %v11535_v13, 0.0  ;;  %v6904_v19 = vld [vmem:[#allocation3 + $0x140] sm:$0xff] }
 0x207   :  { %5988 = vst.msk [vmem:[#allocation3 + $0x150] sm:$0xff] %vm3353_vm3, %v5946_v32  ;;  %v9414_v36 = vld [vmem:[#allocation2 + $0x15c] sm:$0xff]   ;;  %v9415_v45 = vld [vmem:[#allocation2 + $0x164] ss:$0 sps:$4 sm:$0x11]   ;;  %v5574_v32 = vsel %vm14568_vm5, %v5569_v54, %v5573_v26  ;;  %v4690_v50 = vsel %vm14570_vm8, %v4685_v11, %v4689_v27  ;;  %v6798_v38 = vsel %vm2357_vm2, %v6796_v2, %v6797_v4  ;;  %vm999_vm5 = vcmp.lt.f32.partialorder %v935_v58, 0.0 }
 0x208   :  { %v3943_v8 = vpop.permute.xlu0 %3942  ;;  %v6461_v30 = vshrl.u32 %v9414_v36, 16  ;;  %v6463_v61 = vshll.u32 %v9414_v36, 16  ;;  %v6468_v20 = vshll.u32 %v9415_v45, 16  ;;  %v9412_v56 = vld [vmem:[#allocation2 + $0x15c] sm:$0xff]   ;;  %v5023_v41 = vsel %vm2357_vm2, %v5021_v15, %v5022_v59  ;;  %6852 = vst.msk [vmem:[#allocation3 + $0x148] sm:$0xff] %vm14487_vm13, %v6798_v38  ;;  %v11548_v45 = vpop.f32.mrb[10].mxu0 }
 0x209   :  { %3978 = vst.msk [vmem:[#allocation3 + $0xd0] sm:$0xff] %vm14566_vm11, %v3943_v8  ;;  %5953 = vrot.lane.b32.xlu1 %v5916_v53, %s9550_s23  ;;  %5057 = vrot.lane.b32.xlu0 %v5020_v23, %s9546_s15  ;;  %v9424_v42 = vld [vmem:[#allocation2 + $0x15c] sm:$0xff]   ;;  %v9425_v1 = vld [vmem:[#allocation2 + $0x164] ss:$0 sps:$4 sm:$0x11]   ;;  %vm967_vm11 = vcmp.gt.f32.partialorder %v935_v58, 0.0  ;;  %v7393_v6 = vadd.f32 %v7392_v3, %v11473_v43 }
 0x20a   :  { %v6123_v49 = vpop.permute.xlu1 %6122  ;;  %v6465_v47 = vrot.slane %v6463_v61, 1  ;;  %v6470_v7 = vrot.slane %v6468_v20, 1  ;;  %v5576_v21 = vshrl.u32 %v9424_v42, 16  ;;  %v5578_v33 = vshll.u32 %v9424_v42, 16  ;;  %v9426_v29 = vld [vmem:[#allocation2 + $0x15c] sm:$0xfe]  }
 0x20b   :  { %6165 = vst.msk [vmem:[#allocation3 + $0x150] sm:$0xff] %vm3531_vm7, %v6123_v49  ;;  %v5583_v62 = vshll.u32 %v9425_v1, 16  ;;  %v9427_v46 = vld [vmem:[#allocation2 + $0x164] ss:$0 sps:$4 sm:$0x11]   ;;  %v5917_v34 = vrot.slane %v9426_v29, 1  ;;  %v7523_v49 = vmul.f32 %v11535_v13, %v11535_v13 }
 0x20c   :  { %v11506_v16 = vpop.permute.xlu0 %2144  ;;  %v6466_v22 = vor.u32 %v6465_v47, %v6461_v30  ;;  %v5580_v8 = vrot.slane %v5578_v33, 1  ;;  %v5918_v26 = vrot.slane %v9427_v46, 1  ;;  %v1031_v9 = vsel %vm999_vm5, -1.0, %v9545_v10  ;;  %v9422_v54 = vld [vmem:[#allocation2 + $0x15c] sm:$0xff]   ;;  %v7151_v2 = vpop.f32.mrb[11].mxu0  ;;  %v8390_v4 = vld [vmem:[%s14435_s0 + $0x1c8] sm:$0xff] }
 0x20d   :  { %5665 = vrot.lane.b32.xlu0 %v5574_v32, %s9552_s29  ;;  %v5585_v5 = vrot.slane %v5583_v62, 1  ;;  %v1063_v36 = vsel %vm967_vm11, 1.0, %v1031_v9  ;;  %v11554_v61 = vld [vmem:[#allocation2 + $0x15c] sm:$0xff]   ;;  %v11556_v35 = vld [vmem:[#allocation2 + $0x164] ss:$0 sps:$4 sm:$0x11]   ;;  %v938_v3 = vadd.f32 %v11521_v60, %v8390_v4 }
 0x20e   :  { %v6471_v48 = vsel %vm14569_vm12, %v6466_v22, %v6470_v7  ;;  %v5581_v37 = vor.u32 %v5580_v8, %v5576_v21  ;;  %vm1000_vm12 = vcmp.lt.f32.partialorder %v936_v24, 0.0  ;;  %v9007_v30 = vpack.c.bf16 %v1063_v36, %v1063_v36  ;;  %v11566_v7 = vld [vmem:[#allocation2 + $0x15c] sm:$0xfe]   ;;  %v1567_v15 = vld [vmem:[#allocation2 + $0x168] sm:$0xf] }
 0x20f   :  { %6562 = vrot.lane.b32.xlu1 %v6471_v48, %s9551_s24  ;;  %v1032_v53 = vsel %vm1000_vm12, -1.0, %v9545_v10  ;;  %v7590_v31 = vsel %vm14487_vm13, %v7523_v49, 0.0  ;;  %v7394_v32 = vsel %vm14487_vm13, %v11548_v45, 0.0  ;;  %v11571_v58 = vld [vmem:[#allocation2 + $0x164] ss:$0 sps:$4 sm:$0x11]   ;;  %v5919_v24 = vsel %vm2357_vm2, %v5917_v34, %v5918_v26 }
 0x210   :  { %v11526_v63 = vpop.permute.xlu0 %2434  ;;  %v6555_v25 = vpop.permute.xlu1 %6554  ;;  %v5586_v28 = vsel %vm14570_vm8, %v5581_v37, %v5585_v5  ;;  %v1064_v0 = vsel %vm968_vm10, 1.0, %v1032_v53  ;;  %v1357_v47 = vshrl.u32 %v9007_v30, 16  ;;  %v1360_v27 = vshll.u32 %v9007_v30, 16  ;;  %v8389_v21 = vld [vmem:[%s14435_s0 + $0x1c0] sm:$0xff]  ;;  %v6905_v33 = vld [vmem:[#allocation3 + $0x148] sm:$0xff]  ;;  %v9443_v38 = vld [vmem:[#allocation2 + $0xa8] sm:$0xff]  }
 0x211   :  { %6597 = vst.msk [vmem:[#allocation3 + $0x150] sm:$0xff] %vm14571_vm6, %v6555_v25  ;;  %6130 = vrot.lane.b32.xlu0 %v9412_v56, %s9548_s21  ;;  %v9008_v20 = vpack.c.bf16 %v1064_v0, %v1064_v0  ;;  %v7591_v51 = vadd.f32 %v7590_v31, %v11516_v40  ;;  %v7524_v56 = vmul.f32 %v11548_v45, %v11548_v45  ;;  %v1571_v40 = vld [vmem:[#allocation2 + $0x170] sm:$0x1]  ;;  %v4694_v48 = vshll.u32 %v11554_v61, 16  ;;  %v11591_v53 = vpop.f32.mrb[12].mxu0 }
 0x212   :  { %v7395_v42 = vadd.f32 %v7394_v32, %v7393_v6  ;;  %v1359_v59 = vrot.slane %v1357_v47, 7  ;;  %v4692_v62 = vshrl.u32 %v11554_v61, 16  ;;  %v4699_v29 = vshll.u32 %v11556_v35, 16  ;;  %8939 = vmatprep.mubr.msk.bf16.mxu1 %vm14487_vm13, %v6905_v33  ;;  %1745 = vst.msk [vmem:[#allocation3 + $0xe0] sm:$0xff] %vm14487_vm13, %v9443_v38  ;;  %v9448_v6 = vld [vmem:[#allocation2 + $0xb4] sm:$0xfe]  }
 0x213   :  { %5059 = vrot.lane.b32.xlu1 %v5023_v41, %s9546_s15  ;;  %v1365_v43 = vshrl.u32 %v9008_v20, 16  ;;  %v1368_v22 = vshll.u32 %v9008_v20, 16  ;;  %v7592_v1 = vsel %vm14487_vm13, %v7524_v56, 0.0  ;;  %v5024_v5 = vrot.slane %v11566_v7, 1  ;;  %7289 = vmatmul.mubr.bf16.gmra.mrb[16].mxu1 %v6904_v19  ;;  %2179 = vst.msk [vmem:[#allocation3 + $0xe0] sm:$0xff] %vm2164_vm14, %v11506_v16  ;;  %v9453_v56 = vld [vmem:[#allocation2 + $0x120] sm:$0xff]  }
 0x214   :  { %v11539_v23 = vpop.permute.xlu1 %4763  ;;  %v11550_v55 = vpop.permute.xlu0 %2611  ;;  %v1362_v8 = vor.u32 %v1360_v27, %v1359_v59  ;;  %v1363_v46 = vrot.slane %v1359_v59, 4  ;;  %v5025_v34 = vrot.slane %v11571_v58, 1  ;;  %v4696_v18 = vrot.slane %v4694_v48, 1  ;;  %4373 = vst.msk [vmem:[#allocation3 + $0x160] sm:$0xff] %vm14487_vm13, %v9453_v56 }
 0x215   :  { %4771 = vrot.lane.b32.xlu0 %v4690_v50, %s9547_s20  ;;  %v1367_v25 = vrot.slane %v1365_v43, 7  ;;  %v7593_v50 = vadd.f32 %v7592_v1, %v7591_v51  ;;  %v7396_v49 = vsel %vm14487_vm13, %v11591_v53, 0.0  ;;  %vm970_vm10 = vcmp.gt.f32.partialorder %v938_v3, 0.0  ;;  %v9449_v51 = vld [vmem:[#allocation2 + $0xbc] ss:$0 sps:$4 sm:$0x11]  }
 0x216   :  { %v1568_v36 = vsel %vm9856_vm4, %v1362_v8, %v1567_v15  ;;  %vm1002_vm5 = vcmp.lt.f32.partialorder %v938_v3, 0.0  ;;  %vm14572_vm12 = vcmask 392448   ;;  %v7397_v27 = vadd.f32 %v7396_v49, %v7395_v42  ;;  %4805 = vst.msk [vmem:[#allocation3 + $0x160] sm:$0xff] %vm2164_vm14, %v11539_v23 }
 0x217   :  { %5667 = vrot.lane.b32.xlu1 %v5586_v28, %s9552_s29  ;;  %v1370_v26 = vor.u32 %v1368_v22, %v1367_v25  ;;  %v1372_v9 = vrot.slane %v1367_v25, 4  ;;  %v7156_v28 = vpop.f32.mrb[13].mxu0  ;;  %1569 = vst [vmem:[#allocation2 + $0x168] sm:$0xf] %v1568_v36  ;;  %2469 = vst.msk [vmem:[#allocation3 + $0xe0] sm:$0xff] %vm14572_vm12, %v11526_v63  ;;  %v1034_v32 = vsel %vm1002_vm5, -1.0, %v9545_v10  ;;  %v7525_v16 = vmul.f32 %v11591_v53, %v11591_v53 }
 0x218   :  { %v11568_v11 = vpop.permute.xlu1 %5051  ;;  %v3045_v41 = vpop.permute.xlu0 %3044  ;;  %vm14573_vm8 = vcmask 523648   ;;  %v1066_v43 = vsel %vm970_vm10, 1.0, %v1034_v32  ;;  %vm14576_vm10 = vsmask.f32 7424 }
 0x219   :  { %5235 = vrot.lane.b32.xlu0 %v9422_v54, %s9549_s22  ;;  %v937_v54 = vadd.f32 %v11521_v60, %v8389_v21  ;;  %v1371_v0 = vsel %vm9849_vm15, %v1363_v46, %v1370_v26  ;;  %v1572_v30 = vsel %vm9880_vm9, %v1372_v9, %v1571_v40  ;;  %v11606_v35 = vpop.f32.mrb[14].mxu0  ;;  %2646 = vst.msk [vmem:[#allocation3 + $0xe0] sm:$0xff] %vm14573_vm8, %v11550_v55  ;;  %v4196_v40 = vrot.slane %v9448_v6, 1  ;;  %vm14577_vm5 = vmmov %vm14576_vm10 }
 0x21a   :  { %1570 = vst.msk [vmem:[#allocation2 + $0x16c] sm:$0xf] %vm27_vm0, %v1371_v0  ;;  %1573 = vst [vmem:[#allocation2 + $0x170] sm:$0x1] %v1572_v30  ;;  %v7159_v20 = vpop.f32.mrb[15].mxu0  ;;  %v7398_v63 = vsel %vm14487_vm13, %v11606_v35, 0.0  ;;  %v7526_v15 = vmul.f32 %v11606_v35, %v11606_v35  ;;  %v9010_v42 = vpack.c.bf16 %v1066_v43, %v1066_v43 }
 0x21b   :  { %vm969_vm6 = vcmp.gt.f32.partialorder %v937_v54, 0.0  ;;  %vm1001_vm11 = vcmp.lt.f32.partialorder %v937_v54, 0.0  ;;  %3079 = vst.msk [vmem:[#allocation3 + $0xe0] sm:$0xff] %vm3064_vm1, %v3045_v41  ;;  %v7399_v59 = vadd.f32 %v7398_v63, %v7397_v27  ;;  %v4701_v55 = vrot.slane %v4699_v29, 1  ;;  %v11628_v33 = vpop.f32.mrb[16].mxu0 }
 0x21c   :  { %v11588_v37 = vpop.permute.xlu1 %5227  ;;  %v1033_v2 = vsel %vm1001_vm11, -1.0, %v9545_v10  ;;  %v3334_v19 = vpop.permute.xlu0 %3333  ;;  %v7596_v21 = vsel %vm14487_vm13, %v7526_v15, 0.0  ;;  %v1382_v4 = vshrl.u32 %v9010_v42, 16  ;;  %v4197_v41 = vrot.slane %v9449_v51, 1  ;;  %v1574_v29 = vld [vmem:[#allocation2 + $0x174] sm:$0xf]  ;;  %vm14575_vm11 = vmmov %vm14573_vm8 }
 0x21d   :  { %5955 = vrot.lane.b32.xlu0 %v5919_v24, %s9550_s23  ;;  %v1065_v47 = vsel %vm969_vm6, 1.0, %v1033_v2  ;;  %v7594_v24 = vsel %vm14487_vm13, %v7525_v16, 0.0  ;;  %3368 = vst.msk [vmem:[#allocation3 + $0xe0] sm:$0xff] %vm3353_vm3, %v3334_v19  ;;  %vm14574_vm6 = vmmov %vm14572_vm12  ;;  %v7400_v8 = vsel %vm14487_vm13, %v11628_v33, 0.0  ;;  %v1578_v2 = vld [vmem:[#allocation2 + $0x17c] sm:$0x1] }
 0x21e   :  { %v9009_v22 = vpack.c.bf16 %v1065_v47, %v1065_v47  ;;  %v7595_v48 = vadd.f32 %v7594_v24, %v7593_v50  ;;  %5093 = vst.msk [vmem:[#allocation3 + $0x160] sm:$0xff] %vm14574_vm6, %v11568_v11  ;;  %v4697_v50 = vor.u32 %v4696_v18, %v4692_v62  ;;  %v11638_v26 = vadd.f32 %v7400_v8, %v7399_v59  ;;  %vm14579_vm8 = vmmov %vm14577_vm5 }
 0x21f   :  { %5269 = vst.msk [vmem:[#allocation3 + $0x160] sm:$0xff] %vm14575_vm11, %v11588_v37  ;;  %v4198_v54 = vsel %vm2357_vm2, %v4196_v40, %v4197_v41  ;;  %v1385_v37 = vshll.u32 %v9010_v42, 16  ;;  %v6890_v41 = vld [vmem:[#allocation3 + $0xd0] sm:$0xff]  ;;  %v7527_v8 = vmul.f32 %v11628_v33, %v11628_v33  ;;  %vm14578_vm12 = vcmask 1048448  }
 0x220   :  { %v5660_v31 = vpop.permute.xlu1 %5659  ;;  %v1374_v1 = vshrl.u32 %v9009_v22, 16  ;;  %v1377_v25 = vshll.u32 %v9009_v22, 16  ;;  %v11636_v38 = vadd.f32 %v7596_v21, %v7595_v48  ;;  %4234 = vst.msk [vmem:[#allocation3 + $0xd8] sm:$0xff] %vm14487_vm13, %v4198_v54  ;;  %v4702_v0 = vsel %vm14576_vm10, %v4697_v50, %v4701_v55  ;;  %v11652_v22 = vld [vmem:[#allocation2 + $0x12c] sm:$0xfe]   ;;  %vm14580_vm10 = vmmov %vm14578_vm12 }
 0x221   :  { %v9430_v23 = vld [vmem:[#allocation2 + $0x168] sm:$0xff]   ;;  %v3512_v11 = vpop.permute.xlu0 %3511  ;;  %5701 = vst.msk [vmem:[#allocation3 + $0x160] sm:$0xff] %vm3064_vm1, %v5660_v31  ;;  %v9432_v3 = vld [vmem:[#allocation2 + $0x170] ss:$0 sps:$4 sm:$0x11]   ;;  %v1384_v31 = vrot.slane %v1382_v4, 7 }
 0x222   :  { %v1376_v9 = vrot.slane %v1374_v1, 7  ;;  %v9431_v36 = vld [vmem:[#allocation2 + $0x168] sm:$0xff]   ;;  %3546 = vst.msk [vmem:[#allocation3 + $0xe0] sm:$0xff] %vm3531_vm7, %v3512_v11  ;;  %6132 = vrot.lane.b32.xlu1 %v9430_v23, %s9548_s21  ;;  %v6480_v28 = vshll.u32 %v9432_v3, 16  ;;  %v6799_v3 = vrot.slane %v11652_v22, 1  ;;  %v7598_v7 = vsel %vm14487_vm13, %v7527_v8, 0.0 }
 0x223   :  { %v6473_v18 = vshrl.u32 %v9431_v36, 16  ;;  %v6475_v49 = vshll.u32 %v9431_v36, 16  ;;  %v9438_v30 = vld [vmem:[#allocation2 + $0x168] sm:$0xff]   ;;  %v9439_v6 = vld [vmem:[#allocation2 + $0x170] ss:$0 sps:$4 sm:$0x11]   ;;  %v1387_v19 = vor.u32 %v1385_v37, %v1384_v31 }
 0x224   :  { %v5948_v46 = vpop.permute.xlu1 %5947  ;;  %v1379_v61 = vor.u32 %v1377_v25, %v1376_v9  ;;  %v1380_v62 = vrot.slane %v1376_v9, 4  ;;  %v9437_v20 = vld [vmem:[#allocation2 + $0x168] sm:$0xff]   ;;  %v6482_v27 = vrot.slane %v6480_v28, 1  ;;  %v5588_v16 = vshrl.u32 %v9438_v30, 16 }
 0x225   :  { %5989 = vst.msk [vmem:[#allocation3 + $0x160] sm:$0xff] %vm3353_vm3, %v5948_v46  ;;  %v6477_v47 = vrot.slane %v6475_v49, 1  ;;  %v5590_v51 = vshll.u32 %v9438_v30, 16  ;;  %v5595_v56 = vshll.u32 %v9439_v6, 16  ;;  %v1389_v43 = vrot.slane %v1384_v31, 4  ;;  %v9446_v55 = vld [vmem:[#allocation2 + $0x168] sm:$0xff]  }
 0x226   :  { %v1575_v32 = vsel %vm9856_vm4, %v1379_v61, %v1574_v29  ;;  %4773 = vrot.lane.b32.xlu1 %v4702_v0, %s9547_s20  ;;  %v9440_v42 = vld [vmem:[#allocation2 + $0x168] sm:$0xfe]   ;;  %v9441_v24 = vld [vmem:[#allocation2 + $0x170] ss:$0 sps:$4 sm:$0x11]   ;;  %v1388_v59 = vsel %vm9849_vm15, %v1380_v62, %v1387_v19  ;;  %v4704_v29 = vshrl.u32 %v9446_v55, 16  ;;  %v5026_v9 = vsel %vm2357_vm2, %v5024_v5, %v5025_v34 }
 0x227   :  { %1576 = vst [vmem:[#allocation2 + $0x174] sm:$0xf] %v1575_v32  ;;  %v6478_v63 = vor.u32 %v6477_v47, %v6473_v18  ;;  %v5592_v15 = vrot.slane %v5590_v51, 1  ;;  %v1579_v40 = vsel %vm9880_vm9, %v1389_v43, %v1578_v2  ;;  %v5920_v21 = vrot.slane %v9440_v42, 1  ;;  %1577 = vst.msk [vmem:[#allocation2 + $0x178] sm:$0xf] %vm27_vm0, %v1388_v59 }
 0x228   :  { %v5921_v25 = vrot.slane %v9441_v24, 1  ;;  %1580 = vst [vmem:[#allocation2 + $0x17c] sm:$0x1] %v1579_v40  ;;  %v6891_v4 = vld [vmem:[#allocation3 + $0xd8] sm:$0xff]  ;;  %v5597_v46 = vrot.slane %v5595_v56, 1  ;;  %v4706_v23 = vshll.u32 %v9446_v55, 16  ;;  %v11684_v5 = vadd.f32 %v7598_v7, %v11636_v38 }
 0x229   :  { %v3945_v1 = vpop.permute.xlu0 %3944  ;;  %v6483_v48 = vsel %vm14577_vm5, %v6478_v63, %v6482_v27  ;;  %v9447_v50 = vld [vmem:[#allocation2 + $0x170] ss:$0 sps:$4 sm:$0x11]   ;;  %v5593_v54 = vor.u32 %v5592_v15, %v5588_v16  ;;  %8932 = vmatprep.mubr.msk.bf16.mxu0 %vm14487_vm13, %v6891_v4  ;;  %v11675_v37 = vld [vmem:[#allocation2 + $0x168] sm:$0xfe]   ;;  %v8392_v30 = vld [vmem:[%s14435_s0 + $0x1d8] sm:$0xff] }
 0x22a   :  { %3979 = vst.msk [vmem:[#allocation3 + $0xe0] sm:$0xff] %vm14578_vm12, %v3945_v1  ;;  %6564 = vrot.lane.b32.xlu0 %v6483_v48, %s9551_s24  ;;  %5237 = vrot.lane.b32.xlu1 %v9437_v20, %s9549_s22  ;;  %v5922_v11 = vsel %vm2357_vm2, %v5920_v21, %v5921_v25  ;;  %v4711_v36 = vshll.u32 %v9447_v50, 16  ;;  %v11677_v18 = vld [vmem:[#allocation2 + $0x170] ss:$0 sps:$4 sm:$0x11]   ;;  %v4708_v58 = vrot.slane %v4706_v23, 1  ;;  %v940_v38 = vadd.f32 %v11521_v60, %v8392_v30 }
 0x22b   :  { %7233 = vmatmul.mubr.bf16.gmra.mrb[52].mxu0 %v6890_v41  ;;  %v8391_v34 = vld [vmem:[%s14435_s0 + $0x1d0] sm:$0xff]  ;;  %v5598_v49 = vsel %vm14579_vm8, %v5593_v54, %v5597_v46  ;;  %v5027_v0 = vrot.slane %v11675_v37, 1  ;;  %v7164_v20 = vpop.f32.mrb[17].mxu0  ;;  %v5028_v6 = vrot.slane %v11677_v18, 1 }
 0x22c   :  { %v4713_v28 = vrot.slane %v4711_v36, 1  ;;  %v939_v2 = vadd.f32 %v11521_v60, %v8391_v34  ;;  %v11697_v31 = vpop.f32.mrb[18].mxu0  ;;  %v4709_v51 = vor.u32 %v4708_v58, %v4704_v29  ;;  %vm972_vm11 = vcmp.gt.f32.partialorder %v940_v38, 0.0  ;;  %v9459_v46 = vld [vmem:[#allocation2 + $0x134] ss:$0 sps:$4 sm:$0x11]  }
 0x22d   :  { %v11673_v61 = vpop.permute.xlu0 %2146  ;;  %vm1004_vm8 = vcmp.lt.f32.partialorder %v940_v38, 0.0  ;;  %v6800_v18 = vrot.slane %v9459_v46, 1  ;;  %v7167_v58 = vpop.f32.mrb[19].mxu0  ;;  %v7402_v20 = vsel %vm14487_vm13, %v11697_v31, 0.0 }
 0x22e   :  { %v6125_v62 = vpop.permute.xlu1 %6124  ;;  %5061 = vrot.lane.b32.xlu0 %v5026_v9, %s9546_s15  ;;  %5957 = vrot.lane.b32.xlu1 %v5922_v11, %s9550_s23  ;;  %v9444_v47 = vld [vmem:[#allocation2 + $0x174] sm:$0xff]   ;;  %vm971_vm6 = vcmp.gt.f32.partialorder %v939_v2, 0.0  ;;  %v4714_v48 = vsel %vm14577_vm5, %v4709_v51, %v4713_v28  ;;  %vm1003_vm12 = vcmp.lt.f32.partialorder %v939_v2, 0.0  ;;  %v7528_v9 = vmul.f32 %v11697_v31, %v11697_v31 }
 0x22f   :  { %6166 = vst.msk [vmem:[#allocation3 + $0x160] sm:$0xff] %vm3531_vm7, %v6125_v62  ;;  %v9445_v27 = vld [vmem:[#allocation2 + $0x17c] ss:$0 sps:$4 sm:$0x11]   ;;  %v9442_v16 = vld [vmem:[#allocation2 + $0x174] sm:$0xff]   ;;  %v6485_v56 = vshrl.u32 %v9444_v47, 16 }
 0x230   :  { %v6487_v19 = vshll.u32 %v9444_v47, 16  ;;  %v6492_v43 = vshll.u32 %v9445_v27, 16  ;;  %v9454_v63 = vld [vmem:[#allocation2 + $0x174] sm:$0xff]   ;;  %v9455_v15 = vld [vmem:[#allocation2 + $0x17c] ss:$0 sps:$4 sm:$0x11]  }
 0x231   :  { %v11699_v32 = vpop.permute.xlu0 %2436  ;;  %v5600_v55 = vshrl.u32 %v9454_v63, 16  ;;  %v5602_v1 = vshll.u32 %v9454_v63, 16  ;;  %v5607_v21 = vshll.u32 %v9455_v15, 16  ;;  %v9456_v25 = vld [vmem:[#allocation2 + $0x174] sm:$0xfe]   ;;  %v1035_v23 = vsel %vm1003_vm12, -1.0, %v9545_v10 }
 0x232   :  { %5669 = vrot.lane.b32.xlu0 %v5598_v49, %s9552_s29  ;;  %v6489_v59 = vrot.slane %v6487_v19, 1  ;;  %v6494_v40 = vrot.slane %v6492_v43, 1  ;;  %v9457_v4 = vld [vmem:[#allocation2 + $0x17c] ss:$0 sps:$4 sm:$0x11]   ;;  %v5923_v29 = vrot.slane %v9456_v25, 1  ;;  %v5029_v49 = vsel %vm2357_vm2, %v5027_v0, %v5028_v6 }
 0x233   :  { %v5604_v8 = vrot.slane %v5602_v1, 1  ;;  %v5609_v50 = vrot.slane %v5607_v21, 1  ;;  %v9452_v62 = vld [vmem:[#allocation2 + $0x174] sm:$0xff]   ;;  %v5924_v37 = vrot.slane %v9457_v4, 1  ;;  %v1036_v7 = vsel %vm1004_vm8, -1.0, %v9545_v10  ;;  %v8393_v47 = vld [vmem:[%s14435_s0 + $0x1e0] sm:$0xff] }
 0x234   :  { %v6490_v41 = vor.u32 %v6489_v59, %v6485_v56  ;;  %v11716_v34 = vld [vmem:[#allocation2 + $0x174] sm:$0xff]   ;;  %v1067_v28 = vsel %vm971_vm6, 1.0, %v1035_v23  ;;  %v1068_v30 = vsel %vm972_vm11, 1.0, %v1036_v7  ;;  %v7403_v0 = vadd.f32 %v7402_v20, %v11638_v26  ;;  %v9464_v6 = vld [vmem:[#allocation2 + $0x17c] ss:$0 sps:$4 sm:$0x11]   ;;  %vm14582_vm6 = vmmov %vm14577_vm5 }
 0x235   :  { %v11702_v24 = vpop.permute.xlu0 %2613  ;;  %v5605_v27 = vor.u32 %v5604_v8, %v5600_v55  ;;  %v9011_v51 = vpack.c.bf16 %v1067_v28, %v1067_v28  ;;  %v9012_v56 = vpack.c.bf16 %v1068_v30, %v1068_v30  ;;  %v7600_v2 = vsel %vm14487_vm13, %v7528_v9, 0.0  ;;  %v1581_v21 = vld [vmem:[#allocation2 + $0x180] sm:$0xf]  ;;  %v8394_v25 = vld [vmem:[%s14435_s0 + $0x1e8] sm:$0xff] }
 0x236   :  { %v6557_v42 = vpop.permute.xlu1 %6556  ;;  %6134 = vrot.lane.b32.xlu0 %v9442_v16, %s9548_s21  ;;  %v6801_v16 = vsel %vm2357_vm2, %v6799_v3, %v6800_v18  ;;  %v4718_v38 = vshll.u32 %v11716_v34, 16  ;;  %v11742_v3 = vadd.f32 %v7600_v2, %v11684_v5  ;;  %v4723_v26 = vshll.u32 %v9464_v6, 16  ;;  %v1585_v4 = vld [vmem:[#allocation2 + $0x188] sm:$0x1]  ;;  %v6906_v18 = vld [vmem:[#allocation3 + $0x150] sm:$0xff] }
 0x237   :  { %6598 = vst.msk [vmem:[#allocation3 + $0x160] sm:$0xff] %vm14580_vm10, %v6557_v42  ;;  %vm14581_vm10 = vmmov %vm14577_vm5  ;;  %v1391_v43 = vshrl.u32 %v9011_v51, 16  ;;  %v1394_v63 = vshll.u32 %v9011_v51, 16  ;;  %v1399_v15 = vshrl.u32 %v9012_v56, 16  ;;  %v1402_v42 = vshll.u32 %v9012_v56, 16 }
 0x238   :  { %v6495_v36 = vsel %vm14581_vm10, %v6490_v41, %v6494_v40  ;;  %6853 = vst.msk [vmem:[#allocation3 + $0x158] sm:$0xff] %vm14487_vm13, %v6801_v16  ;;  %v941_v59 = vadd.f32 %v11521_v60, %v8393_v47  ;;  %v5610_v40 = vsel %vm14582_vm6, %v5605_v27, %v5609_v50  ;;  %v5925_v55 = vsel %vm2357_vm2, %v5923_v29, %v5924_v37  ;;  %v9473_v29 = vld [vmem:[#allocation2 + $0xb4] sm:$0xff]  }
 0x239   :  { %v11712_v11 = vpop.permute.xlu0 %3046  ;;  %6566 = vrot.lane.b32.xlu1 %v6495_v36, %s9551_s24  ;;  %v1393_v1 = vrot.slane %v1391_v43, 7  ;;  %v4716_v41 = vshrl.u32 %v11716_v34, 16  ;;  %v4720_v8 = vrot.slane %v4718_v38, 1  ;;  %v942_v5 = vadd.f32 %v11521_v60, %v8394_v25  ;;  %1746 = vst.msk [vmem:[#allocation3 + $0xf0] sm:$0xff] %vm14487_vm13, %v9473_v29  ;;  %v11773_v47 = vld [vmem:[#allocation2 + $0x174] sm:$0xfe]  }
 0x23a   :  { %v11710_v54 = vpop.permute.xlu1 %4765  ;;  %4775 = vrot.lane.b32.xlu0 %v4714_v48, %s9547_s20  ;;  %v1401_v48 = vrot.slane %v1399_v15, 7  ;;  %v11758_v7 = vrot.slane %v4723_v26, 1  ;;  %vm973_vm11 = vcmp.gt.f32.partialorder %v941_v59, 0.0  ;;  %vm1005_vm12 = vcmp.lt.f32.partialorder %v941_v59, 0.0  ;;  %2180 = vst.msk [vmem:[#allocation3 + $0xf0] sm:$0xff] %vm2164_vm14, %v11673_v61 }
 0x23b   :  { %v1396_v23 = vor.u32 %v1394_v63, %v1393_v1  ;;  %v1397_v9 = vrot.slane %v1393_v1, 4  ;;  %vm974_vm5 = vcmp.gt.f32.partialorder %v942_v5, 0.0  ;;  %v11771_v20 = vor.u32 %v4720_v8, %v4716_v41  ;;  %v9478_v63 = vld [vmem:[#allocation2 + $0xc0] sm:$0xfe]   ;;  %v1588_v29 = vld [vmem:[#allocation2 + $0x18c] sm:$0xf] }
 0x23c   :  { %v1404_v50 = vor.u32 %v1402_v42, %v1401_v48  ;;  %v1406_v36 = vrot.slane %v1401_v48, 4  ;;  %vm1006_vm8 = vcmp.lt.f32.partialorder %v942_v5, 0.0  ;;  %v1037_v27 = vsel %vm1005_vm12, -1.0, %v9545_v10 }
 0x23d   :  { %v11737_v22 = vpop.permute.xlu0 %3335  ;;  %5063 = vrot.lane.b32.xlu1 %v5029_v49, %s9546_s15  ;;  %v1582_v49 = vsel %vm9856_vm4, %v1396_v23, %v1581_v21  ;;  %v1038_v2 = vsel %vm1006_vm8, -1.0, %v9545_v10  ;;  %v1069_v6 = vsel %vm973_vm11, 1.0, %v1037_v27  ;;  %vm14583_vm10 = vcmask 392448   ;;  %v11796_v21 = vld [vmem:[#allocation2 + $0x17c] ss:$0 sps:$4 sm:$0x11]  }
 0x23e   :  { %v11735_v19 = vpop.permute.xlu1 %5053  ;;  %5239 = vrot.lane.b32.xlu0 %v9452_v62, %s9549_s22  ;;  %v11754_v62 = vpop.f32.mrb[20].mxu0  ;;  %v1405_v34 = vsel %vm9849_vm15, %v1397_v9, %v1404_v50  ;;  %v1586_v28 = vsel %vm9880_vm9, %v1406_v36, %v1585_v4  ;;  %1583 = vst [vmem:[#allocation2 + $0x180] sm:$0xf] %v1582_v49  ;;  %2470 = vst.msk [vmem:[#allocation3 + $0xf0] sm:$0xff] %vm14583_vm10, %v11699_v32  ;;  %v1070_v61 = vsel %vm974_vm5, 1.0, %v1038_v2  ;;  %vm14584_vm6 = vcmask 523648  }
 0x23f   :  { %v7172_v60 = vpop.f32.mrb[21].mxu0  ;;  %v6907_v58 = vld [vmem:[#allocation3 + $0x158] sm:$0xff]  ;;  %1584 = vst.msk [vmem:[#allocation2 + $0x184] sm:$0xf] %vm27_vm0, %v1405_v34  ;;  %1587 = vst [vmem:[#allocation2 + $0x188] sm:$0x1] %v1586_v28  ;;  %v7529_v43 = vmul.f32 %v11754_v62, %v11754_v62  ;;  %v9013_v15 = vpack.c.bf16 %v1069_v6, %v1069_v6  ;;  %v9014_v59 = vpack.c.bf16 %v1070_v61, %v1070_v61 }
 0x240   :  { %v11767_v30 = vpop.f32.mrb[22].mxu0  ;;  %8940 = vmatprep.mubr.msk.bf16.mxu1 %vm14487_vm13, %v6907_v58  ;;  %v7404_v16 = vsel %vm14487_vm13, %v11754_v62, 0.0  ;;  %2647 = vst.msk [vmem:[#allocation3 + $0xf0] sm:$0xff] %vm14584_vm6, %v11702_v24  ;;  %v4199_v32 = vrot.slane %v9478_v63, 1  ;;  %v5030_v50 = vrot.slane %v11773_v47, 1  ;;  %vm14585_vm11 = vmmov %vm14583_vm10  ;;  %vm14586_vm5 = vcmask 1048448  }
 0x241   :  { %v3514_v37 = vpop.permute.xlu0 %3513  ;;  %5671 = vrot.lane.b32.xlu1 %v5610_v40, %s9552_s29  ;;  %v7175_v51 = vpop.f32.mrb[23].mxu0  ;;  %7297 = vmatmul.mubr.bf16.gmra.mrb[20].mxu1 %v6906_v18  ;;  %v7405_v38 = vadd.f32 %v7404_v16, %v7403_v0  ;;  %v7406_v42 = vsel %vm14487_vm13, %v11767_v30, 0.0  ;;  %v7530_v26 = vmul.f32 %v11767_v30, %v11767_v30  ;;  %v9479_v40 = vld [vmem:[#allocation2 + $0xc8] ss:$0 sps:$4 sm:$0x11]   ;;  %v9483_v0 = vld [vmem:[#allocation2 + $0x12c] sm:$0xff]   ;;  %vm14587_vm12 = vmmov %vm14584_vm6 }
 0x242   :  { %v11752_v46 = vpop.permute.xlu1 %5229  ;;  %5959 = vrot.lane.b32.xlu0 %v5925_v55, %s9550_s23  ;;  %v7602_v55 = vsel %vm14487_vm13, %v7529_v43, 0.0  ;;  %3080 = vst.msk [vmem:[#allocation3 + $0xf0] sm:$0xff] %vm3064_vm1, %v11712_v11  ;;  %v1408_v25 = vshrl.u32 %v9013_v15, 16  ;;  %v1411_v4 = vshll.u32 %v9013_v15, 16  ;;  %v11801_v24 = vpop.f32.mrb[24].mxu0  ;;  %v1416_v5 = vshrl.u32 %v9014_v59, 16  ;;  %vm14590_vm6 = vmmov %vm14586_vm5 }
 0x243   :  { %v7407_v1 = vadd.f32 %v7406_v42, %v7405_v38  ;;  %v7603_v41 = vadd.f32 %v7602_v55, %v11742_v3  ;;  %v7604_v8 = vsel %vm14487_vm13, %v7530_v26, 0.0  ;;  %4374 = vst.msk [vmem:[#allocation3 + $0x170] sm:$0xff] %vm14487_vm13, %v9483_v0  ;;  %v1419_v23 = vshll.u32 %v9014_v59, 16  ;;  %v1592_v28 = vld [vmem:[#allocation2 + $0x194] sm:$0x1] }
 0x244   :  { %3369 = vst.msk [vmem:[#allocation3 + $0xf0] sm:$0xff] %vm3353_vm3, %v11737_v22  ;;  %v4200_v9 = vrot.slane %v9479_v40, 1  ;;  %v7408_v11 = vsel %vm14487_vm13, %v11801_v24, 0.0  ;;  %v1410_v36 = vrot.slane %v1408_v25, 7  ;;  %v1418_v60 = vrot.slane %v1416_v5, 7 }
 0x245   :  { %v3947_v48 = vpop.permute.xlu0 %3946  ;;  %4806 = vst.msk [vmem:[#allocation3 + $0x170] sm:$0xff] %vm2164_vm14, %v11710_v54  ;;  %v11811_v18 = vadd.f32 %v7604_v8, %v7603_v41  ;;  %v11815_v22 = vadd.f32 %v7408_v11, %v7407_v1  ;;  %vm14588_vm8 = vsmask.f32 7424  ;;  %v5031_v16 = vrot.slane %v11796_v21, 1  ;;  %v6892_v1 = vld [vmem:[#allocation3 + $0xe0] sm:$0xff] }
 0x246   :  { %v5662_v56 = vpop.permute.xlu1 %5661  ;;  %3547 = vst.msk [vmem:[#allocation3 + $0xf0] sm:$0xff] %vm3531_vm7, %v3514_v37  ;;  %v9460_v54 = vld [vmem:[#allocation2 + $0x180] sm:$0xff]   ;;  %v4201_v58 = vsel %vm2357_vm2, %v4199_v32, %v4200_v9  ;;  %v1413_v37 = vor.u32 %v1411_v4, %v1410_v36  ;;  %v1421_v49 = vor.u32 %v1419_v23, %v1418_v60  ;;  %v4726_v27 = vsel %vm14588_vm8, %v11771_v20, %v11758_v7  ;;  %v9469_v61 = vld [vmem:[#allocation2 + $0x188] ss:$0 sps:$4 sm:$0x11]   ;;  %vm14589_vm10 = vmmov %vm14588_vm8 }
 0x247   :  { %5094 = vst.msk [vmem:[#allocation3 + $0x170] sm:$0xff] %vm14585_vm11, %v11735_v19  ;;  %6136 = vrot.lane.b32.xlu1 %v9460_v54, %s9548_s21  ;;  %v9461_v34 = vld [vmem:[#allocation2 + $0x180] sm:$0xff]   ;;  %v9462_v19 = vld [vmem:[#allocation2 + $0x188] ss:$0 sps:$4 sm:$0x11]   ;;  %v1423_v42 = vrot.slane %v1418_v60, 4  ;;  %v7531_v4 = vmul.f32 %v11801_v24, %v11801_v24  ;;  %vm14591_vm11 = vmmov %vm14588_vm8 }
 0x248   :  { %3980 = vst.msk [vmem:[#allocation3 + $0xf0] sm:$0xff] %vm14586_vm5, %v3947_v48  ;;  %v1589_v51 = vsel %vm9856_vm4, %v1413_v37, %v1588_v29  ;;  %v6497_v2 = vshrl.u32 %v9461_v34, 16  ;;  %v6504_v6 = vshll.u32 %v9462_v19, 16  ;;  %v9467_v38 = vld [vmem:[#allocation2 + $0x180] sm:$0xff]   ;;  %v5619_v0 = vshll.u32 %v9469_v61, 16  ;;  %vm14592_vm5 = vmmov %vm14588_vm8 }
 0x249   :  { %5270 = vst.msk [vmem:[#allocation3 + $0x170] sm:$0xff] %vm14587_vm12, %v11752_v46  ;;  %v1414_v46 = vrot.slane %v1410_v36, 4  ;;  %v9468_v43 = vld [vmem:[#allocation2 + $0x180] sm:$0xff]   ;;  %1590 = vst [vmem:[#allocation2 + $0x18c] sm:$0xf] %v1589_v51  ;;  %v1593_v59 = vsel %vm9880_vm9, %v1423_v42, %v1592_v28  ;;  %v5032_v29 = vsel %vm2357_vm2, %v5030_v50, %v5031_v16  ;;  %v7606_v37 = vsel %vm14487_vm13, %v7531_v4, 0.0 }
 0x24a   :  { %v5950_v3 = vpop.permute.xlu1 %5949  ;;  %4235 = vst.msk [vmem:[#allocation3 + $0xe8] sm:$0xff] %vm14487_vm13, %v4201_v58  ;;  %v6506_v20 = vrot.slane %v6504_v6, 1  ;;  %v5612_v26 = vshrl.u32 %v9468_v43, 16  ;;  %v5614_v40 = vshll.u32 %v9468_v43, 16  ;;  %v9476_v55 = vld [vmem:[#allocation2 + $0x180] sm:$0xff]   ;;  %v5621_v5 = vrot.slane %v5619_v0, 1  ;;  %vm14593_vm8 = vmmov %vm14592_vm5 }
 0x24b   :  { %5702 = vst.msk [vmem:[#allocation3 + $0x170] sm:$0xff] %vm3064_vm1, %v5662_v56  ;;  %v6499_v56 = vshll.u32 %v9461_v34, 16  ;;  %v1422_v15 = vsel %vm9849_vm15, %v1414_v46, %v1421_v49  ;;  %4777 = vrot.lane.b32.xlu1 %v4726_v27, %s9547_s20  ;;  %v9470_v21 = vld [vmem:[#allocation2 + $0x180] sm:$0xfe]   ;;  %1594 = vst [vmem:[#allocation2 + $0x194] sm:$0x1] %v1593_v59  ;;  %v11853_v49 = vadd.f32 %v7606_v37, %v11811_v18 }
 0x24c   :  { %5990 = vst.msk [vmem:[#allocation3 + $0x170] sm:$0xff] %vm3353_vm3, %v5950_v3  ;;  %v5616_v48 = vrot.slane %v5614_v40, 1  ;;  %v9471_v25 = vld [vmem:[#allocation2 + $0x188] ss:$0 sps:$4 sm:$0x11]   ;;  %v5926_v23 = vrot.slane %v9470_v21, 1 }
 0x24d   :  { %v6501_v7 = vrot.slane %v6499_v56, 1  ;;  %1591 = vst.msk [vmem:[#allocation2 + $0x190] sm:$0xf] %vm27_vm0, %v1422_v15  ;;  %v11840_v41 = vld [vmem:[#allocation2 + $0x138] sm:$0xfe]   ;;  %v5927_v9 = vrot.slane %v9471_v25, 1  ;;  %v11871_v25 = vpop.permute.xlu0 %4767 }
 0x24e   :  { %v4728_v3 = vshrl.u32 %v9476_v55, 16  ;;  %v4730_v36 = vshll.u32 %v9476_v55, 16  ;;  %v5617_v54 = vor.u32 %v5616_v48, %v5612_v26  ;;  %v9477_v58 = vld [vmem:[#allocation2 + $0x188] ss:$0 sps:$4 sm:$0x11]   ;;  %v6802_v19 = vrot.slane %v11840_v41, 1 }
 0x24f   :  { %v6502_v32 = vor.u32 %v6501_v7, %v6497_v2  ;;  %5241 = vrot.lane.b32.xlu1 %v9467_v38, %s9549_s22  ;;  %v5928_v60 = vsel %vm2357_vm2, %v5926_v23, %v5927_v9  ;;  %v8395_v28 = vld [vmem:[%s14435_s0 + $0x1f0] sm:$0xff]  ;;  %v4735_v50 = vshll.u32 %v9477_v58, 16  ;;  %v9480_v56 = vld [vmem:[#allocation2 + $0x180] sm:$0xfe]   ;;  %v9543_v42 = vld [vmem:[%s14436_s2] ss:$0 sm:$0xff] }
 0x250   :  { %v4732_v16 = vrot.slane %v4730_v36, 1  ;;  %v5622_v46 = vsel %vm14591_vm11, %v5617_v54, %v5621_v5  ;;  %v5033_v15 = vrot.slane %v9480_v56, 1  ;;  %v943_v7 = vadd.f32 %v9543_v42, %v8395_v28  ;;  %v8396_v48 = vld [vmem:[%s14435_s0 + $0x1f8] sm:$0xff]  ;;  %v7180_v9 = vpop.f32.mrb[25].mxu0 }
 0x251   :  { %v6507_v8 = vsel %vm14589_vm10, %v6502_v32, %v6506_v20  ;;  %v6893_v11 = vld [vmem:[#allocation3 + $0xe8] sm:$0xff]  ;;  %v4737_v18 = vrot.slane %v4735_v50, 1  ;;  %v944_v21 = vadd.f32 %v9543_v42, %v8396_v48  ;;  %v11878_v37 = vpop.f32.mrb[26].mxu0 }
 0x252   :  { %6568 = vrot.lane.b32.xlu0 %v6507_v8, %s9551_s24  ;;  %8933 = vmatprep.mubr.msk.bf16.mxu0 %vm14487_vm13, %v6893_v11  ;;  %v9475_v27 = vld [vmem:[#allocation2 + $0x194] ss:$0 sps:$4 sm:$0x11]   ;;  %v4733_v40 = vor.u32 %v4732_v16, %v4728_v3  ;;  %vm975_vm12 = vcmp.gt.f32.partialorder %v943_v7, 0.0 }
 0x253   :  { %7241 = vmatmul.mubr.bf16.gmra.mrb[56].mxu0 %v6892_v1  ;;  %5961 = vrot.lane.b32.xlu1 %v5928_v60, %s9550_s23  ;;  %v6516_v43 = vshll.u32 %v9475_v27, 16  ;;  %v9485_v55 = vld [vmem:[#allocation2 + $0x194] ss:$0 sps:$4 sm:$0x11]   ;;  %vm976_vm10 = vcmp.gt.f32.partialorder %v944_v21, 0.0  ;;  %vm1008_vm11 = vcmp.lt.f32.partialorder %v944_v21, 0.0 }
 0x254   :  { %v9474_v47 = vld [vmem:[#allocation2 + $0x18c] sm:$0xff]   ;;  %v5631_v5 = vshll.u32 %v9485_v55, 16  ;;  %v4738_v11 = vsel %vm14593_vm8, %v4733_v40, %v4737_v18  ;;  %v9487_v36 = vld [vmem:[#allocation2 + $0x194] ss:$0 sps:$4 sm:$0x11]   ;;  %v1040_v16 = vsel %vm1008_vm11, -1.0, %v9545_v10  ;;  %vm14602_vm11 = vmmov %vm14592_vm5 }
 0x255   :  { %v6509_v51 = vshrl.u32 %v9474_v47, 16  ;;  %v6511_v2 = vshll.u32 %v9474_v47, 16  ;;  %v9484_v6 = vld [vmem:[#allocation2 + $0x18c] sm:$0xff]   ;;  %v6518_v26 = vrot.slane %v6516_v43, 1  ;;  %v5930_v47 = vrot.slane %v9487_v36, 1 }
 0x256   :  { %5065 = vrot.lane.b32.xlu0 %v5032_v29, %s9546_s15  ;;  %v9472_v38 = vld [vmem:[#allocation2 + $0x18c] sm:$0xff]   ;;  %v5624_v1 = vshrl.u32 %v9484_v6, 16  ;;  %v5626_v32 = vshll.u32 %v9484_v6, 16  ;;  %v9489_v29 = vld [vmem:[#allocation2 + $0x140] ss:$0 sps:$4 sm:$0x11]  }
 0x257   :  { %v6513_v61 = vrot.slane %v6511_v2, 1  ;;  %v9486_v23 = vld [vmem:[#allocation2 + $0x18c] sm:$0xfe]   ;;  %v5633_v60 = vrot.slane %v5631_v5, 1  ;;  %v6803_v50 = vrot.slane %v9489_v29, 1  ;;  %v1072_v6 = vsel %vm976_vm10, 1.0, %v1040_v16 }
 0x258   :  { %v6127_v63 = vpop.permute.xlu1 %6126  ;;  %v5628_v8 = vrot.slane %v5626_v32, 1  ;;  %v5929_v58 = vrot.slane %v9486_v23, 1  ;;  %v9482_v28 = vld [vmem:[#allocation2 + $0x18c] sm:$0xff]   ;;  %v9016_v43 = vpack.c.bf16 %v1072_v6, %v1072_v6  ;;  %v1599_v21 = vld [vmem:[#allocation2 + $0x1a0] sm:$0x1] }
 0x259   :  { %6167 = vst.msk [vmem:[#allocation3 + $0x170] sm:$0xff] %vm3531_vm7, %v6127_v63  ;;  %v9481_v63 = vld [vmem:[#allocation2 + $0x188] ss:$0 sps:$4 sm:$0x11]   ;;  %v6514_v59 = vor.u32 %v6513_v61, %v6509_v51  ;;  %v7183_v51 = vpop.f32.mrb[27].mxu0  ;;  %v6804_v18 = vsel %vm2357_vm2, %v6802_v19, %v6803_v50  ;;  %v7532_v61 = vmul.f32 %v11878_v37, %v11878_v37  ;;  %v11900_v42 = vld [vmem:[#allocation2 + $0x18c] sm:$0xff]  }
 0x25a   :  { %5673 = vrot.lane.b32.xlu0 %v5622_v46, %s9552_s29  ;;  %v5034_v0 = vrot.slane %v9481_v63, 1  ;;  %v5629_v54 = vor.u32 %v5628_v8, %v5624_v1  ;;  %v7410_v46 = vsel %vm14487_vm13, %v11878_v37, 0.0  ;;  %6854 = vst.msk [vmem:[#allocation3 + $0x168] sm:$0xff] %vm14487_vm13, %v6804_v18  ;;  %v11902_v40 = vpop.f32.mrb[28].mxu0  ;;  %v5931_v55 = vsel %vm2357_vm2, %v5929_v58, %v5930_v47  ;;  %v6908_v1 = vld [vmem:[#allocation3 + $0x160] sm:$0xff] }
 0x25b   :  { %v6519_v4 = vsel %vm14592_vm5, %v6514_v59, %v6518_v26  ;;  %v7411_v63 = vadd.f32 %v7410_v46, %v11815_v22  ;;  %v1436_v26 = vshll.u32 %v9016_v43, 16  ;;  %v1595_v59 = vld [vmem:[#allocation2 + $0x198] sm:$0xf]  ;;  %v7608_v22 = vsel %vm14487_vm13, %v7532_v61, 0.0  ;;  %v11911_v8 = vld [vmem:[#allocation2 + $0x18c] sm:$0xfe]  }
 0x25c   :  { %6570 = vrot.lane.b32.xlu1 %v6519_v4, %s9551_s24  ;;  %v5035_v3 = vsel %vm2357_vm2, %v5033_v15, %v5034_v0  ;;  %v5634_v2 = vsel %vm14592_vm5, %v5629_v54, %v5633_v60  ;;  %v9494_v15 = vld [vmem:[#allocation2 + $0x194] ss:$0 sps:$4 sm:$0x11]   ;;  %v7609_v4 = vadd.f32 %v7608_v22, %v11853_v49  ;;  %v4742_v5 = vshll.u32 %v11900_v42, 16  ;;  %v7188_v36 = vpop.f32.mrb[29].mxu0  ;;  %v11923_v46 = vld [vmem:[#allocation2 + $0x1a4] sm:$0xff]  }
 0x25d   :  { %v4747_v23 = vshll.u32 %v9494_v15, 16  ;;  %v11914_v9 = vld [vmem:[#allocation2 + $0x194] ss:$0 sps:$4 sm:$0x11]   ;;  %v4740_v50 = vshrl.u32 %v11900_v42, 16  ;;  %v5036_v39 = vrot.slane %v11911_v8, 1 }
 0x25e   :  { %6138 = vrot.lane.b32.xlu0 %v9472_v38, %s9548_s21  ;;  %v11894_v38 = vpop.permute.xlu0 %5231  ;;  %v11932_v6 = vld [vmem:[#allocation2 + $0x1ac] ss:$0 sps:$4 sm:$0x11]   ;;  %v9507_v61 = vld [vmem:[#allocation2 + $0x138] sm:$0xff]   ;;  %v9505_v42 = vld [vmem:[#allocation2 + $0xcc] sm:$0xfe]  }
 0x25f   :  { %v4749_v44 = vrot.slane %v4747_v23, 1  ;;  %4375 = vst.msk [vmem:[#allocation3 + $0x180] sm:$0xff] %vm14487_vm13, %v9507_v61  ;;  %v6533_v22 = vshrl.u32 %v11923_v46, 16 }
 0x260   :  { %v6559_v34 = vpop.permute.xlu1 %6558  ;;  %5067 = vrot.lane.b32.xlu1 %v5035_v3, %s9546_s15  ;;  %v7533_v3 = vmul.f32 %v11902_v40, %v11902_v40  ;;  %4807 = vst.msk [vmem:[#allocation3 + $0x180] sm:$0xff] %vm2164_vm14, %v11871_v25  ;;  %v9510_v25 = vld [vmem:[#allocation2 + $0x144] sm:$0xff]  }
 0x261   :  { %6599 = vst.msk [vmem:[#allocation3 + $0x170] sm:$0xff] %vm14590_vm6, %v6559_v34  ;;  %vm1007_vm6 = vcmp.lt.f32.partialorder %v943_v7, 0.0  ;;  %v1433_v7 = vshrl.u32 %v9016_v43, 16  ;;  %v6909_v47 = vld [vmem:[#allocation3 + $0x168] sm:$0xff]  ;;  %v4744_v43 = vrot.slane %v4742_v5, 1 }
 0x262   :  { %v1039_v27 = vsel %vm1007_vm6, -1.0, %v9545_v10  ;;  %4779 = vrot.lane.b32.xlu0 %v4738_v11, %s9547_s20  ;;  %v7412_v11 = vsel %vm14487_vm13, %v11902_v40, 0.0  ;;  %v5952_v29 = vpop.permute.xlu0 %5951  ;;  %v7610_v16 = vsel %vm14487_vm13, %v7533_v3, 0.0  ;;  %8941 = vmatprep.mubr.msk.bf16.mxu1 %vm14487_vm13, %v6909_v47  ;;  %v9508_v5 = vld [vmem:[#allocation2 + $0x144] sm:$0xfe]   ;;  %4376 = vst.msk [vmem:[#allocation3 + $0x190] sm:$0xff] %vm14487_vm13, %v9510_v25  ;;  %vm14601_vm6 = vmmov %vm14592_vm5 }
 0x263   :  { %v1071_v56 = vsel %vm975_vm12, 1.0, %v1039_v27  ;;  %v1435_v48 = vrot.slane %v1433_v7, 7  ;;  %v7413_v27 = vadd.f32 %v7412_v11, %v7411_v63  ;;  %7305 = vmatmul.mubr.bf16.gmra.mrb[24].mxu1 %v6908_v1  ;;  %v4745_v23 = vor.u32 %v4744_v43, %v4740_v50  ;;  %v9509_v3 = vld [vmem:[#allocation2 + $0x14c] ss:$0 sps:$4 sm:$0x11]  }
 0x264   :  { %v11865_v20 = vpop.permute.xlu1 %5055  ;;  %v9015_v10 = vpack.c.bf16 %v1071_v56, %v1071_v56  ;;  %5675 = vrot.lane.b32.xlu1 %v5634_v2, %s9552_s29  ;;  %v7611_v56 = vadd.f32 %v7610_v16, %v7609_v4  ;;  %v6806_v47 = vrot.slane %v9509_v3, 1 }
 0x265   :  { %v1438_v58 = vor.u32 %v1436_v26, %v1435_v48  ;;  %v9506_v26 = vld [vmem:[#allocation2 + $0xd4] ss:$0 sps:$4 sm:$0x11]  }
 0x266   :  { %v1425_v41 = vshrl.u32 %v9015_v10, 16  ;;  %v1428_v19 = vshll.u32 %v9015_v10, 16  ;;  %5243 = vrot.lane.b32.xlu0 %v9482_v28, %s9549_s22  ;;  %v1440_v28 = vrot.slane %v1435_v48, 4  ;;  %v11934_v10 = vpop.f32.mrb[30].mxu0  ;;  %v6540_v48 = vshll.u32 %v11932_v6, 16 }
 0x267   :  { %v7191_v63 = vpop.f32.mrb[31].mxu0  ;;  %v7414_v12 = vsel %vm14487_vm13, %v11934_v10, 0.0  ;;  %v7534_v15 = vmul.f32 %v11934_v10, %v11934_v10  ;;  %v4203_v4 = vrot.slane %v9506_v26, 1 }
 0x268   :  { %v11880_v34 = vpop.permute.xlu1 %5663  ;;  %v1427_v32 = vrot.slane %v1425_v41, 7  ;;  %v1600_v18 = vsel %vm9880_vm9, %v1440_v28, %v1599_v21  ;;  %v11943_v7 = vadd.f32 %v7414_v12, %v7413_v27  ;;  %vm14597_vm9 = vmmov %vm14592_vm5  ;;  %v11973_v6 = vpop.f32.mrb[32].mxu0 }
 0x269   :  { %1601 = vst [vmem:[#allocation2 + $0x1a0] sm:$0x1] %v1600_v18  ;;  %v7612_v1 = vsel %vm14487_vm13, %v7534_v15, 0.0 }
 0x26a   :  { %v1430_v54 = vor.u32 %v1428_v19, %v1427_v32  ;;  %v1431_v60 = vrot.slane %v1427_v32, 4  ;;  %5963 = vrot.lane.b32.xlu0 %v5931_v55, %s9550_s23  ;;  %v5037_v19 = vrot.slane %v11914_v9, 1  ;;  %v6535_v55 = vshll.u32 %v11923_v46, 16 }
 0x26b   :  { %v4202_v32 = vrot.slane %v9505_v42, 1  ;;  %v11952_v21 = vadd.f32 %v7612_v1, %v7611_v56  ;;  %v7535_v42 = vmul.f32 %v11973_v6, %v11973_v6 }
 0x26c   :  { %v1439_v51 = vsel %vm9849_vm15, %v1431_v60, %v1438_v58  ;;  %v1596_v2 = vsel %vm9856_vm4, %v1430_v54, %v1595_v59  ;;  %vm14595_vm15 = vcmask 523648   ;;  %v6805_v58 = vrot.slane %v9508_v5, 1 }
 0x26d   :  { %1597 = vst [vmem:[#allocation2 + $0x198] sm:$0xf] %v1596_v2  ;;  %1598 = vst.msk [vmem:[#allocation2 + $0x19c] sm:$0xf] %vm27_vm0, %v1439_v51  ;;  %vm14594_vm0 = vcmask 392448   ;;  %v4204_v11 = vsel %vm2357_vm2, %v4202_v32, %v4203_v4  ;;  %vm14596_vm4 = vcmask 1048448  }
 0x26e   :  { %5095 = vst.msk [vmem:[#allocation3 + $0x180] sm:$0xff] %vm14594_vm0, %v11865_v20  ;;  %v6537_v28 = vrot.slane %v6535_v55, 1  ;;  %vm14598_vm12 = vmmov %vm14594_vm0  ;;  %v6894_v2 = vld [vmem:[#allocation3 + $0xf0] sm:$0xff]  ;;  %v6807_v56 = vsel %vm2357_vm2, %v6805_v58, %v6806_v47  ;;  %v6542_v4 = vrot.slane %v6540_v48, 1  ;;  %v7416_v5 = vsel %vm14487_vm13, %v11973_v6, 0.0 }
 0x26f   :  { %v11904_v0 = vpop.permute.xlu1 %6128  ;;  %5271 = vst.msk [vmem:[#allocation3 + $0x180] sm:$0xff] %vm14595_vm15, %v11894_v38  ;;  %vm14599_vm8 = vmmov %vm14595_vm15  ;;  %v7417_v48 = vadd.f32 %v7416_v5, %v11943_v7 }
 0x270   :  { %5703 = vst.msk [vmem:[#allocation3 + $0x180] sm:$0xff] %vm3064_vm1, %v11880_v34  ;;  %v9492_v38 = vld [vmem:[#allocation2 + $0x1a0] ss:$0 sps:$4 sm:$0x11]   ;;  %v4750_v34 = vsel %vm14597_vm9, %v4745_v23, %v4749_v44  ;;  %v6538_v32 = vor.u32 %v6537_v28, %v6533_v22  ;;  %v7614_v23 = vsel %vm14487_vm13, %v7535_v42, 0.0  ;;  %vm14600_vm10 = vmmov %vm14596_vm4  ;;  %v9502_v42 = vld [vmem:[#allocation2 + $0x1a4] sm:$0xff]  }
 0x271   :  { %4236 = vst.msk [vmem:[#allocation3 + $0xf8] sm:$0xff] %vm14487_vm13, %v4204_v11  ;;  %v9499_v18 = vld [vmem:[#allocation2 + $0x1a0] ss:$0 sps:$4 sm:$0x11]   ;;  %6855 = vst.msk [vmem:[#allocation3 + $0x178] sm:$0xff] %vm14487_vm13, %v6807_v56  ;;  %v7196_v11 = vpop.f32.mrb[33].mxu0  ;;  %v7615_v58 = vadd.f32 %v7614_v23, %v11952_v21 }
 0x272   :  { %5991 = vst.msk [vmem:[#allocation3 + $0x180] sm:$0xff] %vm3353_vm3, %v5952_v29  ;;  %v5643_v12 = vshll.u32 %v9499_v18, 16  ;;  %v9501_v1 = vld [vmem:[#allocation2 + $0x1a0] ss:$0 sps:$4 sm:$0x11]   ;;  %v11991_v46 = vpop.f32.mrb[34].mxu0  ;;  %vm14603_vm15 = vmmov %vm14599_vm8 }
 0x273   :  { %v4770_v49 = vpop.permute.xlu1 %4769  ;;  %6168 = vst.msk [vmem:[#allocation3 + $0x180] sm:$0xff] %vm3531_vm7, %v11904_v0  ;;  %v6528_v0 = vshll.u32 %v9492_v38, 16  ;;  %v7536_v38 = vmul.f32 %v11991_v46, %v11991_v46  ;;  %v7199_v28 = vpop.f32.mrb[35].mxu0  ;;  %v9513_v56 = vld [vmem:[#allocation2 + $0x150] sm:$0xff]   ;;  %vm14605_vm9 = vmmov %vm14594_vm0 }
 0x274   :  { %v9490_v60 = vld [vmem:[#allocation2 + $0x198] sm:$0xff]   ;;  %4808 = vst.msk [vmem:[#allocation3 + $0x190] sm:$0xff] %vm2164_vm14, %v4770_v49  ;;  %v5645_v25 = vrot.slane %v5643_v12, 1  ;;  %v12006_v21 = vpop.f32.mrb[0].mxu1 }
 0x275   :  { %6140 = vrot.lane.b32.xlu1 %v9490_v60, %s9548_s21  ;;  %v9491_v20 = vld [vmem:[#allocation2 + $0x198] sm:$0xff]   ;;  %v6530_v63 = vrot.slane %v6528_v0, 1  ;;  %v6910_v60 = vld [vmem:[#allocation3 + $0x170] sm:$0xff]  ;;  %v7260_v18 = vpop.f32.mrb[1].mxu1  ;;  %4377 = vst.msk [vmem:[#allocation3 + $0x1a0] sm:$0xff] %vm14487_vm13, %v9513_v56 }
 0x276   :  { %v6521_v50 = vshrl.u32 %v9491_v20, 16  ;;  %v6523_v27 = vshll.u32 %v9491_v20, 16  ;;  %v9497_v16 = vld [vmem:[#allocation2 + $0x198] sm:$0xff]   ;;  %v7418_v20 = vsel %vm14487_vm13, %v11991_v46, 0.0 }
 0x277   :  { %v5234_v41 = vpop.permute.xlu1 %5233  ;;  %v6561_v59 = vpop.permute.xlu0 %6560  ;;  %v9498_v51 = vld [vmem:[#allocation2 + $0x198] sm:$0xff]   ;;  %v9515_v12 = vld [vmem:[#allocation2 + $0x164] ss:$0 sps:$4 sm:$0x11]  }
 0x278   :  { %6600 = vst.msk [vmem:[#allocation3 + $0x180] sm:$0xff] %vm14596_vm4, %v6561_v59  ;;  %v6525_v43 = vrot.slane %v6523_v27, 1  ;;  %v5636_v61 = vshrl.u32 %v9498_v51, 16  ;;  %v5638_v44 = vshll.u32 %v9498_v51, 16  ;;  %v6895_v15 = vld [vmem:[#allocation3 + $0xf8] sm:$0xff]  ;;  %v7616_v51 = vsel %vm14487_vm13, %v7536_v38, 0.0 }
 0x279   :  { %4781 = vrot.lane.b32.xlu1 %v4750_v34, %s9547_s20  ;;  %v9500_v55 = vld [vmem:[#allocation2 + $0x198] sm:$0xfe]   ;;  %8934 = vmatprep.mubr.msk.bf16.mxu0 %vm14487_vm13, %v6895_v15  ;;  %v9511_v34 = vld [vmem:[#allocation2 + $0x150] sm:$0xfe]   ;;  %v6911_v0 = vld [vmem:[#allocation3 + $0x178] sm:$0xff]  ;;  %v7617_v8 = vadd.f32 %v7616_v51, %v7615_v58 }
 0x27a   :  { %v6526_v26 = vor.u32 %v6525_v43, %v6521_v50  ;;  %v5640_v59 = vrot.slane %v5638_v44, 1  ;;  %7249 = vmatmul.mubr.bf16.gmra.mrb[60].mxu0 %v6894_v2  ;;  %v9512_v27 = vld [vmem:[#allocation2 + $0x158] ss:$0 sps:$4 sm:$0x11]   ;;  %v6808_v2 = vrot.slane %v9511_v34, 1  ;;  %8942 = vmatprep.mubr.msk.bf16.mxu1 %vm14487_vm13, %v6911_v0 }
 0x27b   :  { %v5058_v36 = vpop.permute.xlu0 %5057  ;;  %v5954_v54 = vpop.permute.xlu1 %5953  ;;  %v6809_v9 = vrot.slane %v9512_v27, 1  ;;  %7313 = vmatmul.mubr.bf16.gmra.mrb[28].mxu1 %v6910_v60  ;;  %v9514_v44 = vld [vmem:[#allocation2 + $0x15c] sm:$0xfe]   ;;  %v9522_v0 = vld [vmem:[#allocation2 + $0x174] sm:$0xff]  }
 0x27c   :  { %5096 = vst.msk [vmem:[#allocation3 + $0x190] sm:$0xff] %vm14598_vm12, %v5058_v36  ;;  %v6531_v3 = vsel %vm14601_vm6, %v6526_v26, %v6530_v63  ;;  %v5932_v36 = vrot.slane %v9500_v55, 1  ;;  %v5641_v50 = vor.u32 %v5640_v59, %v5636_v61  ;;  %v6812_v26 = vrot.slane %v9515_v12, 1  ;;  %v9516_v59 = vld [vmem:[#allocation2 + $0x15c] sm:$0xff]   ;;  %v12023_v55 = vpop.f32.mrb[36].mxu0  ;;  %vm14606_vm12 = vmmov %vm14599_vm8 }
 0x27d   :  { %5272 = vst.msk [vmem:[#allocation3 + $0x190] sm:$0xff] %vm14599_vm8, %v5234_v41  ;;  %5245 = vrot.lane.b32.xlu1 %v9497_v16, %s9549_s22  ;;  %6572 = vrot.lane.b32.xlu0 %v6531_v3, %s9551_s24  ;;  %v7419_v16 = vadd.f32 %v7418_v20, %v7417_v48  ;;  %v6810_v61 = vsel %vm2357_vm2, %v6808_v2, %v6809_v9  ;;  %v7204_v5 = vpop.f32.mrb[37].mxu0  ;;  %v9525_v12 = vld [vmem:[#allocation2 + $0x180] sm:$0xff]   ;;  %vm14607_vm8 = vmmov %vm14596_vm4 }
 0x27e   :  { %v5646_v63 = vsel %vm14592_vm5, %v5641_v50, %v5645_v25  ;;  %6856 = vst.msk [vmem:[#allocation3 + $0x188] sm:$0xff] %vm14487_vm13, %v6810_v61  ;;  %4378 = vst.msk [vmem:[#allocation3 + $0x1b0] sm:$0xff] %vm14487_vm13, %v9516_v59  ;;  %v12034_v3 = vpop.f32.mrb[38].mxu0  ;;  %v9517_v25 = vld [vmem:[#allocation2 + $0x168] sm:$0xfe]  }
 0x27f   :  { %v5666_v29 = vpop.permute.xlu0 %5665  ;;  %v7422_v60 = vsel %vm14487_vm13, %v12034_v3, 0.0  ;;  %v7207_v48 = vpop.f32.mrb[39].mxu0  ;;  %v6814_v34 = vrot.slane %v9517_v25, 1  ;;  %v6912_v50 = vld [vmem:[#allocation3 + $0x180] sm:$0xff]  ;;  %4380 = vst.msk [vmem:[#allocation3 + $0x1d0] sm:$0xff] %vm14487_vm13, %v9522_v0  ;;  %4381 = vst.msk [vmem:[#allocation3 + $0x1e0] sm:$0xff] %vm14487_vm13, %v9525_v12 }
 0x280   :  { %5704 = vst.msk [vmem:[#allocation3 + $0x190] sm:$0xff] %vm3064_vm1, %v5666_v29  ;;  %v5038_v29 = vsel %vm2357_vm2, %v5036_v39, %v5037_v19  ;;  %v12011_v39 = vpop.f32.mrb[2].mxu1  ;;  %v6543_v19 = vsel %vm14602_vm11, %v6538_v32, %v6542_v4  ;;  %v7420_v32 = vsel %vm14487_vm13, %v12023_v55, 0.0  ;;  %v7537_v4 = vmul.f32 %v12023_v55, %v12023_v55  ;;  %v9528_v59 = vld [vmem:[#allocation2 + $0x18c] sm:$0xff]   ;;  %v9523_v25 = vld [vmem:[#allocation2 + $0x180] sm:$0xfe]   ;;  %vm14611_vm6 = vmmov %vm14596_vm4 }
 0x281   :  { %v6563_v49 = vpop.permute.xlu1 %6562  ;;  %5992 = vst.msk [vmem:[#allocation3 + $0x190] sm:$0xff] %vm3353_vm3, %v5954_v54  ;;  %v5933_v54 = vrot.slane %v9501_v1, 1  ;;  %5069 = vrot.lane.b32.xlu0 %v5038_v29, %s9546_s15  ;;  %v7421_v11 = vadd.f32 %v7420_v32, %v7419_v16  ;;  %v9519_v29 = vld [vmem:[#allocation2 + $0x168] sm:$0xff]   ;;  %vm14612_vm11 = vmmov %vm14594_vm0 }
 0x282   :  { %4379 = vst.msk [vmem:[#allocation3 + $0x1c0] sm:$0xff] %vm14487_vm13, %v9519_v29  ;;  %4382 = vst.msk [vmem:[#allocation3 + $0x1f0] sm:$0xff] %vm14487_vm13, %v9528_v59  ;;  %v9527_v29 = vld [vmem:[#allocation2 + $0x194] ss:$0 sps:$4 sm:$0x11]  }
 0x283   :  { %v6131_v41 = vpop.permute.xlu0 %6130  ;;  %v5934_v7 = vsel %vm2357_vm2, %v5932_v36, %v5933_v54  ;;  %v9518_v36 = vld [vmem:[#allocation2 + $0x170] ss:$0 sps:$4 sm:$0x11]   ;;  %v7618_v54 = vsel %vm14487_vm13, %v7537_v4, 0.0  ;;  %v7423_v38 = vadd.f32 %v7422_v60, %v7421_v11 }
 0x284   :  { %6169 = vst.msk [vmem:[#allocation3 + $0x190] sm:$0xff] %vm3531_vm7, %v6131_v41  ;;  %5965 = vrot.lane.b32.xlu1 %v5934_v7, %s9550_s23  ;;  %v6811_v41 = vrot.slane %v9514_v44, 1  ;;  %v7619_v20 = vadd.f32 %v7618_v54, %v7617_v8  ;;  %v6815_v28 = vrot.slane %v9518_v36, 1  ;;  %v9520_v8 = vld [vmem:[#allocation2 + $0x174] sm:$0xfe]  }
 0x285   :  { %6601 = vst.msk [vmem:[#allocation3 + $0x190] sm:$0xff] %vm14600_vm10, %v6563_v49  ;;  %v5060_v22 = vpop.permute.xlu1 %5059  ;;  %v7263_v49 = vpop.f32.mrb[3].mxu1  ;;  %5677 = vrot.lane.b32.xlu0 %v5646_v63, %s9552_s29  ;;  %v6913_v16 = vld [vmem:[#allocation3 + $0x188] sm:$0xff]  ;;  %v6817_v63 = vrot.slane %v9520_v8, 1  ;;  %vm14609_vm10 = vmmov %vm14606_vm12 }
 0x286   :  { %v6813_v23 = vsel %vm2357_vm2, %v6811_v41, %v6812_v26  ;;  %v12042_v58 = vpop.f32.mrb[4].mxu1  ;;  %v6816_v2 = vsel %vm2357_vm2, %v6814_v34, %v6815_v28  ;;  %8943 = vmatprep.mubr.msk.bf16.mxu1 %vm14487_vm13, %v6913_v16  ;;  %v9521_v49 = vld [vmem:[#allocation2 + $0x17c] ss:$0 sps:$4 sm:$0x11]   ;;  %v9526_v28 = vld [vmem:[#allocation2 + $0x18c] sm:$0xfe]   ;;  %vm14613_vm5 = vmmov %vm14609_vm10 }
 0x287   :  { %v4772_v47 = vpop.permute.xlu0 %4771  ;;  %6857 = vst.msk [vmem:[#allocation3 + $0x198] sm:$0xff] %vm14487_vm13, %v6813_v23  ;;  %6858 = vst.msk [vmem:[#allocation3 + $0x1a8] sm:$0xff] %vm14487_vm13, %v6816_v2  ;;  %7321 = vmatmul.mubr.bf16.gmra.mrb[32].mxu1 %v6912_v50  ;;  %v9524_v36 = vld [vmem:[#allocation2 + $0x188] ss:$0 sps:$4 sm:$0x11]   ;;  %v6823_v50 = vrot.slane %v9526_v28, 1 }
 0x288   :  { %4809 = vst.msk [vmem:[#allocation3 + $0x1a0] sm:$0xff] %vm2164_vm14, %v4772_v47  ;;  %6574 = vrot.lane.b32.xlu1 %v6543_v19, %s9551_s24  ;;  %v7268_v47 = vpop.f32.mrb[5].mxu1  ;;  %v12050_v56 = vpop.f32.mrb[40].mxu0  ;;  %v9529_v16 = vld [vmem:[#allocation2 + $0x198] sm:$0xfe]  }
 0x289   :  { %v5668_v15 = vpop.permute.xlu1 %5667  ;;  %5097 = vst.msk [vmem:[#allocation3 + $0x1a0] sm:$0xff] %vm14594_vm0, %v5060_v22  ;;  %v7538_v22 = vmul.f32 %v12034_v3, %v12034_v3  ;;  %6142 = vrot.lane.b32.xlu0 %v9502_v42, %s9548_s21  ;;  %v12046_v27 = vpop.f32.mrb[6].mxu1  ;;  %v7424_v9 = vsel %vm14487_vm13, %v12050_v56, 0.0  ;;  %v7539_v19 = vmul.f32 %v12050_v56, %v12050_v56  ;;  %v6818_v42 = vrot.slane %v9521_v49, 1 }
 0x28a   :  { %v7271_v18 = vpop.f32.mrb[7].mxu1  ;;  %v7212_v44 = vpop.f32.mrb[41].mxu0 }
 0x28b   :  { %v5236_v43 = vpop.permute.xlu0 %5235  ;;  %v7620_v7 = vsel %vm14487_vm13, %v7538_v22, 0.0  ;;  %v7622_v61 = vsel %vm14487_vm13, %v7539_v19, 0.0  ;;  %v12060_v26 = vpop.f32.mrb[42].mxu0  ;;  %v6819_v23 = vsel %vm2357_vm2, %v6817_v63, %v6818_v42  ;;  %v6826_v19 = vrot.slane %v9529_v16, 1  ;;  %v9531_v63 = vld [vmem:[#allocation2 + $0x1a4] sm:$0xfe]  }
 0x28c   :  { %5273 = vst.msk [vmem:[#allocation3 + $0x1a0] sm:$0xff] %vm14603_vm15, %v5236_v43  ;;  %v7621_v51 = vadd.f32 %v7620_v7, %v7619_v20  ;;  %v7425_v43 = vadd.f32 %v7424_v9, %v7423_v38  ;;  %v7426_v32 = vsel %vm14487_vm13, %v12060_v26, 0.0  ;;  %v7540_v4 = vmul.f32 %v12060_v26, %v12060_v26  ;;  %v7215_v5 = vpop.f32.mrb[43].mxu0  ;;  %v6914_v54 = vld [vmem:[#allocation3 + $0x190] sm:$0xff] }
 0x28d   :  { %5705 = vst.msk [vmem:[#allocation3 + $0x1a0] sm:$0xff] %vm3064_vm1, %v5668_v15  ;;  %v6820_v20 = vrot.slane %v9523_v25, 1  ;;  %v6821_v38 = vrot.slane %v9524_v36, 1  ;;  %v6824_v7 = vrot.slane %v9527_v29, 1  ;;  %v6829_v42 = vrot.slane %v9531_v63, 1 }
 0x28e   :  { %v6915_v15 = vld [vmem:[#allocation3 + $0x198] sm:$0xff]  ;;  %v7623_v41 = vadd.f32 %v7622_v61, %v7621_v51  ;;  %v12070_v11 = vadd.f32 %v7426_v32, %v7425_v43  ;;  %6859 = vst.msk [vmem:[#allocation3 + $0x1b8] sm:$0xff] %vm14487_vm13, %v6819_v23  ;;  %v7624_v60 = vsel %vm14487_vm13, %v7540_v4, 0.0  ;;  %v6917_v22 = vld [vmem:[#allocation3 + $0x1a8] sm:$0xff] }
 0x28f   :  { %v5956_v1 = vpop.permute.xlu0 %5955  ;;  %8944 = vmatprep.mubr.msk.bf16.mxu1 %vm14487_vm13, %v6915_v15  ;;  %v6822_v47 = vsel %vm2357_vm2, %v6820_v20, %v6821_v38  ;;  %v9530_v51 = vld [vmem:[#allocation2 + $0x1a0] ss:$0 sps:$4 sm:$0x11]   ;;  %v6825_v8 = vsel %vm2357_vm2, %v6823_v50, %v6824_v7  ;;  %v9532_v61 = vld [vmem:[#allocation2 + $0x1ac] ss:$0 sps:$4 sm:$0x11]  }
 0x290   :  { %5993 = vst.msk [vmem:[#allocation3 + $0x1a0] sm:$0xff] %vm3353_vm3, %v5956_v1  ;;  %v12075_v48 = vadd.f32 %v7624_v60, %v7623_v41  ;;  %7329 = vmatmul.mubr.bf16.gmra.mrb[36].mxu1 %v6914_v54  ;;  %v6827_v49 = vrot.slane %v9530_v51, 1  ;;  %v6830_v41 = vrot.slane %v9532_v61, 1 }
 0x291   :  { %8945 = vmatprep.mubr.msk.bf16.mxu1 %vm14487_vm13, %v6917_v22  ;;  %6860 = vst.msk [vmem:[#allocation3 + $0x1c8] sm:$0xff] %vm14487_vm13, %v6822_v47  ;;  %6861 = vst.msk [vmem:[#allocation3 + $0x1d8] sm:$0xff] %vm14487_vm13, %v6825_v8 }
 0x292   :  { %v6828_v12 = vsel %vm2357_vm2, %v6826_v19, %v6827_v49  ;;  %v6831_v32 = vsel %vm2357_vm2, %v6829_v42, %v6830_v41  ;;  %vm14608_vm2 = vmmov %vm14594_vm0 }
 0x293   :  { %6862 = vst.msk [vmem:[#allocation3 + $0x1e8] sm:$0xff] %vm14487_vm13, %v6828_v12  ;;  %6863 = vst.msk [vmem:[#allocation3 + $0x1f8] sm:$0xff] %vm14487_vm13, %v6831_v32 }
 0x294   :  { %v6133_v1 = vpop.permute.xlu1 %6132  ;;  %v12082_v18 = vpop.f32.mrb[8].mxu1  ;;  %vm14614_vm0 = vmmov %vm14596_vm4 }
 0x295   :  { %6170 = vst.msk [vmem:[#allocation3 + $0x1a0] sm:$0xff] %vm3531_vm7, %v6133_v1  ;;  %v7276_v9 = vpop.f32.mrb[9].mxu1  ;;  %v6919_v1 = vld [vmem:[#allocation3 + $0x1b8] sm:$0xff]  ;;  %vm14615_vm15 = vmmov %vm14608_vm2 }
 0x296   :  { %v12086_v43 = vpop.f32.mrb[10].mxu1 }
 0x297   :  { %14604 = vst [vmem:[#allocation4_spill] sm:$0xff] %v12086_v43  ;;  %v7279_v15 = vpop.f32.mrb[11].mxu1 }
 0x298   :  { %v4774_v34 = vpop.permute.xlu1 %4773  ;;  %v6921_v20 = vld [vmem:[#allocation3 + $0x1c8] sm:$0xff]  ;;  %v6923_v32 = vld [vmem:[#allocation3 + $0x1d8] sm:$0xff] }
 0x299   :  { %4810 = vst.msk [vmem:[#allocation3 + $0x1b0] sm:$0xff] %vm2164_vm14, %v4774_v34 }
 0x29c   :  { %v6565_v0 = vpop.permute.xlu0 %6564  ;;  %v5238_v2 = vpop.permute.xlu1 %5237 }
 0x29d   :  { %6602 = vst.msk [vmem:[#allocation3 + $0x1a0] sm:$0xff] %vm14596_vm4, %v6565_v0  ;;  %vm14616_vm4 = vmmov %vm14613_vm5 }
 0x2a0   :  { %v5062_v44 = vpop.permute.xlu0 %5061  ;;  %v5958_v59 = vpop.permute.xlu1 %5957 }
 0x2a1   :  { %5098 = vst.msk [vmem:[#allocation3 + $0x1b0] sm:$0xff] %vm14605_vm9, %v5062_v44  ;;  %vm14618_vm9 = vmmov %vm14614_vm0 }
 0x2a2   :  { %5274 = vst.msk [vmem:[#allocation3 + $0x1b0] sm:$0xff] %vm14606_vm12, %v5238_v2  ;;  %vm14619_vm12 = vmmov %vm14608_vm2 }
 0x2a4   :  { %v5670_v4 = vpop.permute.xlu0 %5669  ;;  %v6916_v5 = vld [vmem:[#allocation3 + $0x1a0] sm:$0xff] }
 0x2a5   :  { %5706 = vst.msk [vmem:[#allocation3 + $0x1b0] sm:$0xff] %vm3064_vm1, %v5670_v4  ;;  %7337 = vmatmul.mubr.bf16.gmra.mrb[40].mxu1 %v6916_v5 }
 0x2a6   :  { %5994 = vst.msk [vmem:[#allocation3 + $0x1b0] sm:$0xff] %vm3353_vm3, %v5958_v59  ;;  %8946 = vmatprep.mubr.msk.bf16.mxu1 %vm14487_vm13, %v6919_v1 }
 0x2a8   :  { %v6135_v23 = vpop.permute.xlu0 %6134 }
 0x2a9   :  { %6171 = vst.msk [vmem:[#allocation3 + $0x1b0] sm:$0xff] %vm3531_vm7, %v6135_v23 }
 0x2ab   :  { %v6567_v25 = vpop.permute.xlu1 %6566 }
 0x2ac   :  { %v4776_v36 = vpop.permute.xlu0 %4775  ;;  %6603 = vst.msk [vmem:[#allocation3 + $0x1b0] sm:$0xff] %vm14607_vm8, %v6567_v25  ;;  %vm14620_vm8 = vmmov %vm14616_vm4 }
 0x2ad   :  { %4811 = vst.msk [vmem:[#allocation3 + $0x1c0] sm:$0xff] %vm2164_vm14, %v4776_v36 }
 0x2af   :  { %v5064_v54 = vpop.permute.xlu1 %5063 }
 0x2b0   :  { %v5240_v60 = vpop.permute.xlu0 %5239  ;;  %5099 = vst.msk [vmem:[#allocation3 + $0x1c0] sm:$0xff] %vm14608_vm2, %v5064_v54 }
 0x2b1   :  { %5275 = vst.msk [vmem:[#allocation3 + $0x1c0] sm:$0xff] %vm14609_vm10, %v5240_v60 }
 0x2b2   :  { %v12102_v22 = vpop.f32.mrb[44].mxu0 }
 0x2b3   :  { %v7428_v38 = vsel %vm14487_vm13, %v12102_v22, 0.0  ;;  %v7541_v34 = vmul.f32 %v12102_v22, %v12102_v22  ;;  %v7220_v28 = vpop.f32.mrb[45].mxu0  ;;  %v5672_v47 = vpop.permute.xlu1 %5671  ;;  %v6918_v29 = vld [vmem:[#allocation3 + $0x1b0] sm:$0xff] }
 0x2b4   :  { %v7429_v50 = vadd.f32 %v7428_v38, %v12070_v11  ;;  %5707 = vst.msk [vmem:[#allocation3 + $0x1c0] sm:$0xff] %vm3064_vm1, %v5672_v47  ;;  %v5960_v7 = vpop.permute.xlu0 %5959  ;;  %7345 = vmatmul.mubr.bf16.gmra.mrb[44].mxu1 %v6918_v29  ;;  %v12111_v16 = vpop.f32.mrb[46].mxu0 }
 0x2b5   :  { %v7626_v0 = vsel %vm14487_vm13, %v7541_v34, 0.0  ;;  %5995 = vst.msk [vmem:[#allocation3 + $0x1c0] sm:$0xff] %vm3353_vm3, %v5960_v7  ;;  %8947 = vmatprep.mubr.msk.bf16.mxu1 %vm14487_vm13, %v6921_v20  ;;  %v7430_v2 = vsel %vm14487_vm13, %v12111_v16, 0.0  ;;  %v7542_v11 = vmul.f32 %v12111_v16, %v12111_v16  ;;  %v7223_v8 = vpop.f32.mrb[47].mxu0 }
 0x2b6   :  { %v7627_v51 = vadd.f32 %v7626_v0, %v12075_v48  ;;  %v7431_v19 = vadd.f32 %v7430_v2, %v7429_v50  ;;  %v6925_v8 = vld [vmem:[#allocation3 + $0x1e8] sm:$0xff] }
 0x2b7   :  { %v7628_v63 = vsel %vm14487_vm13, %v7542_v11, 0.0 }
 0x2b8   :  { %v12120_v9 = vpop.f32.mrb[12].mxu1  ;;  %v7629_v44 = vadd.f32 %v7628_v63, %v7627_v51 }
 0x2b9   :  { %14610 = vst [vmem:[#allocation5_spill] sm:$0xff] %v12120_v9  ;;  %v7284_v49 = vpop.f32.mrb[13].mxu1  ;;  %v6137_v15 = vpop.permute.xlu1 %6136 }
 0x2ba   :  { %v12123_v61 = vpop.f32.mrb[14].mxu1  ;;  %6172 = vst.msk [vmem:[#allocation3 + $0x1c0] sm:$0xff] %vm3531_vm7, %v6137_v15 }
 0x2bb   :  { %v7287_v12 = vpop.f32.mrb[15].mxu1 }
 0x2bd   :  { %v4778_v48 = vpop.permute.xlu1 %4777 }
 0x2be   :  { %4812 = vst.msk [vmem:[#allocation3 + $0x1d0] sm:$0xff] %vm2164_vm14, %v4778_v48 }
 0x2c1   :  { %v5242_v41 = vpop.permute.xlu1 %5241 }
 0x2c4   :  { %v6569_v42 = vpop.permute.xlu0 %6568 }
 0x2c5   :  { %6604 = vst.msk [vmem:[#allocation3 + $0x1c0] sm:$0xff] %vm14611_vm6, %v6569_v42  ;;  %v5962_v1 = vpop.permute.xlu1 %5961 }
 0x2c8   :  { %v5066_v59 = vpop.permute.xlu0 %5065 }
 0x2c9   :  { %5100 = vst.msk [vmem:[#allocation3 + $0x1d0] sm:$0xff] %vm14612_vm11, %v5066_v59 }
 0x2ca   :  { %5276 = vst.msk [vmem:[#allocation3 + $0x1d0] sm:$0xff] %vm14613_vm5, %v5242_v41 }
 0x2cc   :  { %v5674_v4 = vpop.permute.xlu0 %5673  ;;  %v6920_v5 = vld [vmem:[#allocation3 + $0x1c0] sm:$0xff] }
 0x2cd   :  { %5708 = vst.msk [vmem:[#allocation3 + $0x1d0] sm:$0xff] %vm3064_vm1, %v5674_v4  ;;  %7353 = vmatmul.mubr.bf16.gmra.mrb[48].mxu1 %v6920_v5 }
 0x2ce   :  { %5996 = vst.msk [vmem:[#allocation3 + $0x1d0] sm:$0xff] %vm3353_vm3, %v5962_v1  ;;  %8948 = vmatprep.mubr.msk.bf16.mxu1 %vm14487_vm13, %v6923_v32  ;;  %v6571_v25 = vpop.permute.xlu1 %6570 }
 0x2d0   :  { %v6139_v23 = vpop.permute.xlu0 %6138 }
 0x2d1   :  { %6173 = vst.msk [vmem:[#allocation3 + $0x1d0] sm:$0xff] %vm3531_vm7, %v6139_v23 }
 0x2d2   :  { %6605 = vst.msk [vmem:[#allocation3 + $0x1d0] sm:$0xff] %vm14614_vm0, %v6571_v25  ;;  %v5068_v60 = vpop.permute.xlu1 %5067  ;;  %v6927_v25 = vld [vmem:[#allocation3 + $0x1f8] sm:$0xff] }
 0x2d4   :  { %v4780_v54 = vpop.permute.xlu0 %4779 }
 0x2d5   :  { %4813 = vst.msk [vmem:[#allocation3 + $0x1e0] sm:$0xff] %vm2164_vm14, %v4780_v54 }
 0x2d6   :  { %5101 = vst.msk [vmem:[#allocation3 + $0x1e0] sm:$0xff] %vm14615_vm15, %v5068_v60  ;;  %v5676_v11 = vpop.permute.xlu1 %5675 }
 0x2d8   :  { %v5244_v2 = vpop.permute.xlu0 %5243 }
 0x2d9   :  { %v12135_v36 = vpop.f32.mrb[48].mxu0  ;;  %5277 = vst.msk [vmem:[#allocation3 + $0x1e0] sm:$0xff] %vm14616_vm4, %v5244_v2 }
 0x2da   :  { %v7432_v20 = vsel %vm14487_vm13, %v12135_v36, 0.0  ;;  %v7543_v38 = vmul.f32 %v12135_v36, %v12135_v36  ;;  %v7228_v28 = vpop.f32.mrb[49].mxu0  ;;  %5709 = vst.msk [vmem:[#allocation3 + $0x1e0] sm:$0xff] %vm3064_vm1, %v5676_v11 }
 0x2db   :  { %v7433_v34 = vadd.f32 %v7432_v20, %v7431_v19  ;;  %v12144_v29 = vpop.f32.mrb[50].mxu0  ;;  %v6922_v19 = vld [vmem:[#allocation3 + $0x1d0] sm:$0xff] }
 0x2dc   :  { %v7630_v47 = vsel %vm14487_vm13, %v7543_v38, 0.0  ;;  %v7434_v7 = vsel %vm14487_vm13, %v12144_v29, 0.0  ;;  %v7544_v0 = vmul.f32 %v12144_v29, %v12144_v29  ;;  %v7231_v51 = vpop.f32.mrb[51].mxu0  ;;  %7361 = vmatmul.mubr.bf16.gmra.mrb[52].mxu1 %v6922_v19  ;;  %v5964_v12 = vpop.permute.xlu0 %5963 }
 0x2dd   :  { %v7631_v50 = vadd.f32 %v7630_v47, %v7629_v44  ;;  %v7435_v49 = vadd.f32 %v7434_v7, %v7433_v34  ;;  %8949 = vmatprep.mubr.msk.bf16.mxu1 %vm14487_vm13, %v6925_v8  ;;  %5997 = vst.msk [vmem:[#allocation3 + $0x1e0] sm:$0xff] %vm3353_vm3, %v5964_v12 }
 0x2de   :  { %v7632_v63 = vsel %vm14487_vm13, %v7544_v0, 0.0 }
 0x2df   :  { %v7633_v44 = vadd.f32 %v7632_v63, %v7631_v50 }
 0x2e6   :  { %v12155_v15 = vpop.f32.mrb[16].mxu1 }
 0x2e7   :  { %v7292_v48 = vpop.f32.mrb[17].mxu1  ;;  %v6141_v42 = vpop.permute.xlu1 %6140 }
 0x2e8   :  { %v12157_v41 = vpop.f32.mrb[18].mxu1  ;;  %6174 = vst.msk [vmem:[#allocation3 + $0x1e0] sm:$0xff] %vm3531_vm7, %v6141_v42 }
 0x2e9   :  { %14617 = vst [vmem:[#allocation6_spill] sm:$0xff] %v12157_v41  ;;  %v7295_v59 = vpop.f32.mrb[19].mxu1 }
 0x2eb   :  { %v4782_v1 = vpop.permute.xlu1 %4781 }
 0x2ec   :  { %4814 = vst.msk [vmem:[#allocation3 + $0x1f0] sm:$0xff] %vm2164_vm14, %v4782_v1  ;;  %vm14621_vm14 = vmmov %vm14614_vm0 }
 0x2ef   :  { %v5246_v32 = vpop.permute.xlu1 %5245  ;;  %v6573_v4 = vpop.permute.xlu0 %6572 }
 0x2f0   :  { %6606 = vst.msk [vmem:[#allocation3 + $0x1e0] sm:$0xff] %vm14618_vm9, %v6573_v4 }
 0x2f3   :  { %v5070_v5 = vpop.permute.xlu0 %5069 }
 0x2f4   :  { %5102 = vst.msk [vmem:[#allocation3 + $0x1f0] sm:$0xff] %vm14619_vm12, %v5070_v5 }
 0x2f5   :  { %5278 = vst.msk [vmem:[#allocation3 + $0x1f0] sm:$0xff] %vm14620_vm8, %v5246_v32 }
 0x2f6   :  { %v5966_v23 = vpop.permute.xlu1 %5965 }
 0x2f7   :  { %v6924_v54 = vld [vmem:[#allocation3 + $0x1e0] sm:$0xff]  ;;  %v5678_v60 = vpop.permute.xlu0 %5677 }
 0x2f8   :  { %7369 = vmatmul.mubr.bf16.gmra.mrb[56].mxu1 %v6924_v54  ;;  %5710 = vst.msk [vmem:[#allocation3 + $0x1f0] sm:$0xff] %vm3064_vm1, %v5678_v60 }
 0x2f9   :  { %5998 = vst.msk [vmem:[#allocation3 + $0x1f0] sm:$0xff] %vm3353_vm3, %v5966_v23  ;;  %8950 = vmatprep.mubr.msk.bf16.mxu1 %vm14487_vm13, %v6927_v25 }
 0x2fa   :  { %v6575_v20 = vpop.permute.xlu1 %6574 }
 0x2fb   :  { %v6143_v34 = vpop.permute.xlu0 %6142 }
 0x2fc   :  { %6175 = vst.msk [vmem:[#allocation3 + $0x1f0] sm:$0xff] %vm3531_vm7, %v6143_v34 }
 0x2fd   :  { %6607 = vst.msk [vmem:[#allocation3 + $0x1f0] sm:$0xff] %vm14621_vm14, %v6575_v20 }
 0x2fe   :  { %v12167_v38 = vpop.f32.mrb[52].mxu0 }
 0x2ff   :  { %v7436_v28 = vsel %vm14487_vm13, %v12167_v38, 0.0  ;;  %v7545_v47 = vmul.f32 %v12167_v38, %v12167_v38  ;;  %v7236_v50 = vpop.f32.mrb[53].mxu0 }
 0x300   :  { %v7437_v7 = vadd.f32 %v7436_v28, %v7435_v49  ;;  %v12174_v0 = vpop.f32.mrb[54].mxu0 }
 0x301   :  { %v7634_v51 = vsel %vm14487_vm13, %v7545_v47, 0.0  ;;  %v7438_v2 = vsel %vm14487_vm13, %v12174_v0, 0.0  ;;  %v7546_v11 = vmul.f32 %v12174_v0, %v12174_v0  ;;  %v7239_v8 = vpop.f32.mrb[55].mxu0 }
 0x302   :  { %v7635_v19 = vadd.f32 %v7634_v51, %v7633_v44  ;;  %v7439_v63 = vadd.f32 %v7438_v2, %v7437_v7 }
 0x303   :  { %v7636_v12 = vsel %vm14487_vm13, %v7546_v11, 0.0 }
 0x304   :  { %v7637_v48 = vadd.f32 %v7636_v12, %v7635_v19  ;;  %v6926_v42 = vld [vmem:[#allocation3 + $0x1f0] sm:$0xff] }
 0x305   :  { %7377 = vmatmul.mubr.bf16.gmra.mrb[60].mxu1 %v6926_v42 }
 0x314   :  { %v12183_v49 = vpop.f32.mrb[20].mxu1 }
 0x315   :  { %14622 = vst [vmem:[#allocation7_spill] sm:$0xff] %v12183_v49  ;;  %v7300_v59 = vpop.f32.mrb[21].mxu1 }
 0x316   :  { %v12185_v1 = vpop.f32.mrb[22].mxu1 }
 0x317   :  { %v7303_v32 = vpop.f32.mrb[23].mxu1 }
 0x326   :  { %v12187_v4 = vpop.f32.mrb[56].mxu0 }
 0x327   :  { %v7440_v5 = vsel %vm14487_vm13, %v12187_v4, 0.0  ;;  %v7547_v44 = vmul.f32 %v12187_v4, %v12187_v4  ;;  %v7244_v23 = vpop.f32.mrb[57].mxu0 }
 0x328   :  { %v7441_v25 = vadd.f32 %v7440_v5, %v7439_v63  ;;  %v12193_v54 = vpop.f32.mrb[58].mxu0  ;;  %v7551_v5 = vmul.f32 %v12006_v21, %v12006_v21 }
 0x329   :  { %v7638_v60 = vsel %vm14487_vm13, %v7547_v44, 0.0  ;;  %v7442_v20 = vsel %vm14487_vm13, %v12193_v54, 0.0  ;;  %v7548_v34 = vmul.f32 %v12193_v54, %v12193_v54  ;;  %v7247_v28 = vpop.f32.mrb[59].mxu0 }
 0x32a   :  { %v7639_v47 = vadd.f32 %v7638_v60, %v7637_v48  ;;  %v7443_v50 = vadd.f32 %v7442_v20, %v7441_v25  ;;  %v7448_v28 = vsel %vm14487_vm13, %v12006_v21, 0.0 }
 0x32b   :  { %v7640_v7 = vsel %vm14487_vm13, %v7548_v34, 0.0 }
 0x32c   :  { %v7641_v51 = vadd.f32 %v7640_v7, %v7639_v47  ;;  %v7552_v47 = vmul.f32 %v12011_v39, %v12011_v39 }
 0x336   :  { %v12201_v2 = vpop.f32.mrb[24].mxu1 }
 0x337   :  { %14623 = vst [vmem:[#allocation8_spill] sm:$0xff] %v12201_v2  ;;  %v7308_v11 = vpop.f32.mrb[25].mxu1 }
 0x338   :  { %v12203_v8 = vpop.f32.mrb[26].mxu1 }
 0x339   :  { %14624 = vst [vmem:[#allocation9_spill] sm:$0xff] %v12203_v8  ;;  %v7311_v19 = vpop.f32.mrb[27].mxu1 }
 0x34d   :  { %v12205_v63 = vpop.f32.mrb[60].mxu0 }
 0x34e   :  { %v7444_v12 = vsel %vm14487_vm13, %v12205_v63, 0.0  ;;  %v7549_v42 = vmul.f32 %v12205_v63, %v12205_v63  ;;  %v7252_v59 = vpop.f32.mrb[61].mxu0  ;;  %v12225_v19 = vpop.f32.mrb[28].mxu1 }
 0x34f   :  { %v7445_v48 = vadd.f32 %v7444_v12, %v7443_v50  ;;  %v12211_v32 = vpop.f32.mrb[62].mxu0  ;;  %14625 = vst [vmem:[#allocation10_spill] sm:$0xff] %v12225_v19  ;;  %v7646_v12 = vsel %vm14487_vm13, %v7551_v5, 0.0  ;;  %v7316_v59 = vpop.f32.mrb[29].mxu1 }
 0x350   :  { %v7642_v44 = vsel %vm14487_vm13, %v7549_v42, 0.0  ;;  %v7446_v23 = vsel %vm14487_vm13, %v12211_v32, 0.0  ;;  %v7550_v25 = vmul.f32 %v12211_v32, %v12211_v32  ;;  %v7255_v60 = vpop.f32.mrb[63].mxu0  ;;  %v7450_v42 = vsel %vm14487_vm13, %v12011_v39, 0.0 }
 0x351   :  { %v7643_v20 = vadd.f32 %v7642_v44, %v7641_v51  ;;  %v7447_v34 = vadd.f32 %v7446_v23, %v7445_v48  ;;  %v7553_v51 = vmul.f32 %v12042_v58, %v12042_v58  ;;  %v12232_v23 = vpop.f32.mrb[30].mxu1  ;;  %v7648_v60 = vsel %vm14487_vm13, %v7552_v47, 0.0 }
 0x352   :  { %v7644_v50 = vsel %vm14487_vm13, %v7550_v25, 0.0  ;;  %14626 = vst [vmem:[#allocation11_spill] sm:$0xff] %v12232_v23  ;;  %v7452_v25 = vsel %vm14487_vm13, %v12042_v58, 0.0  ;;  %v7319_v5 = vpop.f32.mrb[31].mxu1  ;;  %v7454_v59 = vsel %vm14487_vm13, %v12046_v27, 0.0 }
 0x353   :  { %v7449_v7 = vadd.f32 %v7448_v28, %v7447_v34  ;;  %v7645_v11 = vadd.f32 %v7644_v50, %v7643_v20  ;;  %v7554_v20 = vmul.f32 %v12046_v27, %v12046_v27  ;;  %v7650_v50 = vsel %vm14487_vm13, %v7553_v51, 0.0 }
 0x354   :  { %v7556_v5 = vmul.f32 %v12086_v43, %v12086_v43 }
 0x355   :  { %v7451_v48 = vadd.f32 %v7450_v42, %v7449_v7  ;;  %v7647_v44 = vadd.f32 %v7646_v12, %v7645_v11  ;;  %v7555_v7 = vmul.f32 %v12082_v18, %v12082_v18  ;;  %v7652_v47 = vsel %vm14487_vm13, %v7554_v20, 0.0 }
 0x356   :  { %v7456_v42 = vsel %vm14487_vm13, %v12082_v18, 0.0  ;;  %v7656_v20 = vsel %vm14487_vm13, %v7556_v5, 0.0 }
 0x357   :  { %v7453_v34 = vadd.f32 %v7452_v25, %v7451_v48  ;;  %v7649_v28 = vadd.f32 %v7648_v60, %v7647_v44  ;;  %v7654_v51 = vsel %vm14487_vm13, %v7555_v7, 0.0  ;;  %v7458_v60 = vsel %vm14487_vm13, %v12086_v43, 0.0 }
 0x358   :  { %v7557_v25 = vmul.f32 %v12120_v9, %v12120_v9  ;;  %v7462_v43 = vsel %vm14487_vm13, %v12123_v61, 0.0 }
 0x359   :  { %v7455_v11 = vadd.f32 %v7454_v59, %v7453_v34  ;;  %v7651_v12 = vadd.f32 %v7650_v50, %v7649_v28  ;;  %v7460_v50 = vsel %vm14487_vm13, %v12120_v9, 0.0  ;;  %v7558_v59 = vmul.f32 %v12123_v61, %v12123_v61 }
 0x35b   :  { %v7457_v48 = vadd.f32 %v7456_v42, %v7455_v11  ;;  %v7653_v44 = vadd.f32 %v7652_v47, %v7651_v12  ;;  %v12259_v11 = vpop.f32.mrb[32].mxu1  ;;  %v7658_v42 = vsel %vm14487_vm13, %v7557_v25, 0.0  ;;  %v7660_v9 = vsel %vm14487_vm13, %v7558_v59, 0.0 }
 0x35c   :  { %14627 = vst [vmem:[#allocation12_spill] sm:$0xff] %v12259_v11  ;;  %v7324_v47 = vpop.f32.mrb[33].mxu1 }
 0x35d   :  { %v7459_v34 = vadd.f32 %v7458_v60, %v7457_v48  ;;  %v7655_v28 = vadd.f32 %v7654_v51, %v7653_v44  ;;  %v7559_v48 = vmul.f32 %v12155_v15, %v12155_v15  ;;  %v12266_v5 = vpop.f32.mrb[34].mxu1  ;;  %v7466_v47 = vsel %vm14487_vm13, %v12157_v41, 0.0 }
 0x35e   :  { %14628 = vst [vmem:[#allocation13_spill] sm:$0xff] %v12266_v5  ;;  %v7327_v60 = vpop.f32.mrb[35].mxu1 }
 0x35f   :  { %v7461_v12 = vadd.f32 %v7460_v50, %v7459_v34  ;;  %v7657_v7 = vadd.f32 %v7656_v20, %v7655_v28  ;;  %v7464_v34 = vsel %vm14487_vm13, %v12155_v15, 0.0  ;;  %v7560_v28 = vmul.f32 %v12157_v41, %v12157_v41 }
 0x360   :  { %v7662_v50 = vsel %vm14487_vm13, %v7559_v48, 0.0  ;;  %v7562_v60 = vmul.f32 %v12185_v1, %v12185_v1  ;;  %v7470_v41 = vsel %vm14487_vm13, %v12185_v1, 0.0 }
 0x361   :  { %v7659_v44 = vadd.f32 %v7658_v42, %v7657_v7  ;;  %v7463_v51 = vadd.f32 %v7462_v43, %v7461_v12  ;;  %v7561_v7 = vmul.f32 %v12183_v49, %v12183_v49  ;;  %v7664_v59 = vsel %vm14487_vm13, %v7560_v28, 0.0 }
 0x362   :  { %v7468_v42 = vsel %vm14487_vm13, %v12183_v49, 0.0  ;;  %v7668_v49 = vsel %vm14487_vm13, %v7562_v60, 0.0 }
 0x363   :  { %v7465_v25 = vadd.f32 %v7464_v34, %v7463_v51  ;;  %v7661_v20 = vadd.f32 %v7660_v9, %v7659_v44  ;;  %v12283_v51 = vpop.f32.mrb[36].mxu1  ;;  %v7666_v34 = vsel %vm14487_vm13, %v7561_v7, 0.0 }
 0x364   :  { %14629 = vst [vmem:[#allocation14_spill] sm:$0xff] %v12283_v51  ;;  %v7332_v44 = vpop.f32.mrb[37].mxu1 }
 0x365   :  { %v7467_v43 = vadd.f32 %v7466_v47, %v7465_v25  ;;  %v7663_v12 = vadd.f32 %v7662_v50, %v7661_v20  ;;  %v7563_v25 = vmul.f32 %v12201_v2, %v12201_v2  ;;  %v12290_v28 = vpop.f32.mrb[38].mxu1  ;;  %v7474_v44 = vsel %vm14487_vm13, %v12203_v8, 0.0 }
 0x366   :  { %14630 = vst [vmem:[#allocation15_spill] sm:$0xff] %v12290_v28  ;;  %v7335_v47 = vpop.f32.mrb[39].mxu1 }
 0x367   :  { %v7469_v9 = vadd.f32 %v7468_v42, %v7467_v43  ;;  %v7665_v48 = vadd.f32 %v7664_v59, %v7663_v12  ;;  %v7472_v43 = vsel %vm14487_vm13, %v12201_v2, 0.0  ;;  %v7564_v12 = vmul.f32 %v12203_v8, %v12203_v8 }
 0x368   :  { %v7670_v42 = vsel %vm14487_vm13, %v7563_v25, 0.0  ;;  %v7566_v47 = vmul.f32 %v12232_v23, %v12232_v23 }
 0x369   :  { %v7471_v20 = vadd.f32 %v7470_v41, %v7469_v9  ;;  %v7667_v50 = vadd.f32 %v7666_v34, %v7665_v48  ;;  %v7565_v41 = vmul.f32 %v12225_v19, %v12225_v19  ;;  %v7672_v60 = vsel %vm14487_vm13, %v7564_v12, 0.0 }
 0x36a   :  { %v7476_v34 = vsel %vm14487_vm13, %v12225_v19, 0.0  ;;  %v7676_v12 = vsel %vm14487_vm13, %v7566_v47, 0.0 }
 0x36b   :  { %v7473_v7 = vadd.f32 %v7472_v43, %v7471_v20  ;;  %v7669_v59 = vadd.f32 %v7668_v49, %v7667_v50  ;;  %v7674_v25 = vsel %vm14487_vm13, %v7565_v41, 0.0  ;;  %v7478_v50 = vsel %vm14487_vm13, %v12232_v23, 0.0 }
 0x36c   :  { %v7567_v43 = vmul.f32 %v12259_v11, %v12259_v11  ;;  %v7482_v23 = vsel %vm14487_vm13, %v12266_v5, 0.0 }
 0x36d   :  { %v7475_v9 = vadd.f32 %v7474_v44, %v7473_v7  ;;  %v7671_v48 = vadd.f32 %v7670_v42, %v7669_v59  ;;  %v7480_v42 = vsel %vm14487_vm13, %v12259_v11, 0.0  ;;  %v7568_v44 = vmul.f32 %v12266_v5, %v12266_v5 }
 0x36f   :  { %v7477_v20 = vadd.f32 %v7476_v34, %v7475_v9  ;;  %v7673_v49 = vadd.f32 %v7672_v60, %v7671_v48  ;;  %v7678_v34 = vsel %vm14487_vm13, %v7567_v43, 0.0  ;;  %v7680_v11 = vsel %vm14487_vm13, %v7568_v44, 0.0 }
 0x371   :  { %v7675_v7 = vadd.f32 %v7674_v25, %v7673_v49  ;;  %v7479_v59 = vadd.f32 %v7478_v50, %v7477_v20  ;;  %v7569_v20 = vmul.f32 %v12283_v51, %v12283_v51 }
 0x373   :  { %v7677_v48 = vadd.f32 %v7676_v12, %v7675_v7  ;;  %v7481_v41 = vadd.f32 %v7480_v42, %v7479_v59  ;;  %v7484_v7 = vsel %vm14487_vm13, %v12283_v51, 0.0  ;;  %v7570_v59 = vmul.f32 %v12290_v28, %v12290_v28 }
 0x375   :  { %v7679_v49 = vadd.f32 %v7678_v34, %v7677_v48  ;;  %v7483_v25 = vadd.f32 %v7482_v23, %v7481_v41  ;;  %v7486_v48 = vsel %vm14487_vm13, %v12290_v28, 0.0 }
 0x377   :  { %v7681_v12 = vadd.f32 %v7680_v11, %v7679_v49  ;;  %v7485_v42 = vadd.f32 %v7484_v7, %v7483_v25 }
 0x378   :  { %v12317_v9 = vpop.f32.mrb[40].mxu1 }
 0x379   :  { %14631 = vst [vmem:[#allocation16_spill] sm:$0xff] %v12317_v9  ;;  %v7340_v60 = vpop.f32.mrb[41].mxu1  ;;  %v7571_v43 = vmul.f32 %v12317_v9, %v12317_v9  ;;  %v7488_v23 = vsel %vm14487_vm13, %v12317_v9, 0.0  ;;  %v7487_v34 = vadd.f32 %v7486_v48, %v7485_v42 }
 0x37a   :  { %v12324_v47 = vpop.f32.mrb[42].mxu1  ;;  %v7682_v60 = vsel %vm14487_vm13, %v7569_v20, 0.0 }
 0x37b   :  { %14632 = vst [vmem:[#allocation17_spill] sm:$0xff] %v12324_v47  ;;  %v7343_v50 = vpop.f32.mrb[43].mxu1  ;;  %v7572_v44 = vmul.f32 %v12324_v47, %v12324_v47  ;;  %v7683_v41 = vadd.f32 %v7682_v60, %v7681_v12  ;;  %v7686_v51 = vsel %vm14487_vm13, %v7571_v43, 0.0  ;;  %v7490_v11 = vsel %vm14487_vm13, %v12324_v47, 0.0 }
 0x37c   :  { %v7684_v50 = vsel %vm14487_vm13, %v7570_v59, 0.0  ;;  %v7489_v20 = vadd.f32 %v7488_v23, %v7487_v34 }
 0x37d   :  { %v7685_v49 = vadd.f32 %v7684_v50, %v7683_v41  ;;  %v7688_v25 = vsel %vm14487_vm13, %v7572_v44, 0.0 }
 0x37e   :  { %v7491_v28 = vadd.f32 %v7490_v11, %v7489_v20 }
 0x37f   :  { %v7687_v7 = vadd.f32 %v7686_v51, %v7685_v49 }
 0x381   :  { %v7689_v5 = vadd.f32 %v7688_v25, %v7687_v7 }
 0x387   :  { %v12345_v9 = vpop.f32.mrb[44].mxu1 }
 0x388   :  { %14633 = vst [vmem:[#allocation18_spill] sm:$0xff] %v12345_v9  ;;  %v7492_v12 = vsel %vm14487_vm13, %v12345_v9, 0.0  ;;  %v7573_v59 = vmul.f32 %v12345_v9, %v12345_v9  ;;  %v7348_v42 = vpop.f32.mrb[45].mxu1 }
 0x389   :  { %v7493_v43 = vadd.f32 %v7492_v12, %v7491_v28  ;;  %v12351_v60 = vpop.f32.mrb[46].mxu1 }
 0x38a   :  { %14634 = vst [vmem:[#allocation19_spill] sm:$0xff] %v12351_v60  ;;  %v7690_v48 = vsel %vm14487_vm13, %v7573_v59, 0.0  ;;  %v7494_v23 = vsel %vm14487_vm13, %v12351_v60, 0.0  ;;  %v7574_v51 = vmul.f32 %v12351_v60, %v12351_v60  ;;  %v7351_v44 = vpop.f32.mrb[47].mxu1 }
 0x38b   :  { %v7691_v41 = vadd.f32 %v7690_v48, %v7689_v5  ;;  %v7495_v34 = vadd.f32 %v7494_v23, %v7493_v43 }
 0x38c   :  { %v7692_v50 = vsel %vm14487_vm13, %v7574_v51, 0.0 }
 0x38d   :  { %v7693_v11 = vadd.f32 %v7692_v50, %v7691_v41 }
 0x3a0   :  { %v12359_v49 = vpop.f32.mrb[48].mxu1 }
 0x3a1   :  { %14635 = vst [vmem:[#allocation20_spill] sm:$0xff] %v12359_v49  ;;  %v7496_v28 = vsel %vm14487_vm13, %v12359_v49, 0.0  ;;  %v7575_v20 = vmul.f32 %v12359_v49, %v12359_v49  ;;  %v7356_v25 = vpop.f32.mrb[49].mxu1 }
 0x3a2   :  { %v7497_v7 = vadd.f32 %v7496_v28, %v7495_v34  ;;  %v12365_v12 = vpop.f32.mrb[50].mxu1 }
 0x3a3   :  { %14636 = vst [vmem:[#allocation21_spill] sm:$0xff] %v12365_v12  ;;  %v7694_v59 = vsel %vm14487_vm13, %v7575_v20, 0.0  ;;  %v7498_v5 = vsel %vm14487_vm13, %v12365_v12, 0.0  ;;  %v7576_v42 = vmul.f32 %v12365_v12, %v12365_v12  ;;  %v7359_v43 = vpop.f32.mrb[51].mxu1 }
 0x3a4   :  { %v7695_v48 = vadd.f32 %v7694_v59, %v7693_v11  ;;  %v7499_v23 = vadd.f32 %v7498_v5, %v7497_v7 }
 0x3a5   :  { %v7696_v51 = vsel %vm14487_vm13, %v7576_v42, 0.0 }
 0x3a6   :  { %v7697_v44 = vadd.f32 %v7696_v51, %v7695_v48 }
 0x3af   :  { %v12373_v41 = vpop.f32.mrb[52].mxu1 }
 0x3b0   :  { %14637 = vst [vmem:[#allocation22_spill] sm:$0xff] %v12373_v41  ;;  %v7500_v34 = vsel %vm14487_vm13, %v12373_v41, 0.0  ;;  %v7577_v50 = vmul.f32 %v12373_v41, %v12373_v41  ;;  %v7364_v28 = vpop.f32.mrb[53].mxu1 }
 0x3b1   :  { %v7501_v20 = vadd.f32 %v7500_v34, %v7499_v23  ;;  %v12379_v25 = vpop.f32.mrb[54].mxu1 }
 0x3b2   :  { %14638 = vst [vmem:[#allocation23_spill] sm:$0xff] %v12379_v25  ;;  %v7698_v12 = vsel %vm14487_vm13, %v7577_v50, 0.0  ;;  %v7502_v11 = vsel %vm14487_vm13, %v12379_v25, 0.0  ;;  %v7578_v7 = vmul.f32 %v12379_v25, %v12379_v25  ;;  %v7367_v59 = vpop.f32.mrb[55].mxu1 }
 0x3b3   :  { %v7699_v5 = vadd.f32 %v7698_v12, %v7697_v44  ;;  %v7503_v42 = vadd.f32 %v7502_v11, %v7501_v20 }
 0x3b4   :  { %v7700_v43 = vsel %vm14487_vm13, %v7578_v7, 0.0 }
 0x3b5   :  { %v7701_v48 = vadd.f32 %v7700_v43, %v7699_v5 }
 0x3cb   :  { %v12387_v51 = vpop.f32.mrb[56].mxu1 }
 0x3cc   :  { %14639 = vst [vmem:[#allocation24_spill] sm:$0xff] %v12387_v51  ;;  %v7504_v23 = vsel %vm14487_vm13, %v12387_v51, 0.0  ;;  %v7579_v34 = vmul.f32 %v12387_v51, %v12387_v51  ;;  %v7372_v50 = vpop.f32.mrb[57].mxu1 }
 0x3cd   :  { %v7505_v28 = vadd.f32 %v7504_v23, %v7503_v42  ;;  %v12393_v41 = vpop.f32.mrb[58].mxu1 }
 0x3ce   :  { %14640 = vst [vmem:[#allocation25_spill] sm:$0xff] %v12393_v41  ;;  %v7702_v25 = vsel %vm14487_vm13, %v7579_v34, 0.0  ;;  %v7506_v12 = vsel %vm14487_vm13, %v12393_v41, 0.0  ;;  %v7580_v44 = vmul.f32 %v12393_v41, %v12393_v41  ;;  %v7375_v20 = vpop.f32.mrb[59].mxu1 }
 0x3cf   :  { %v7703_v11 = vadd.f32 %v7702_v25, %v7701_v48  ;;  %v7507_v7 = vadd.f32 %v7506_v12, %v7505_v28 }
 0x3d0   :  { %v7704_v59 = vsel %vm14487_vm13, %v7580_v44, 0.0 }
 0x3d1   :  { %v7705_v5 = vadd.f32 %v7704_v59, %v7703_v11 }
 0x3d8   :  { %v12401_v43 = vpop.f32.mrb[60].mxu1 }
 0x3d9   :  { %14641 = vst [vmem:[#allocation26_spill] sm:$0xff] %v12401_v43  ;;  %v7508_v42 = vsel %vm14487_vm13, %v12401_v43, 0.0  ;;  %v7581_v23 = vmul.f32 %v12401_v43, %v12401_v43  ;;  %v7380_v34 = vpop.f32.mrb[61].mxu1 }
 0x3da   :  { %v7509_v50 = vadd.f32 %v7508_v42, %v7507_v7  ;;  %v12407_v51 = vpop.f32.mrb[62].mxu1 }
 0x3db   :  { %14642 = vst [vmem:[#allocation27_spill] sm:$0xff] %v12407_v51  ;;  %v7706_v41 = vsel %vm14487_vm13, %v7581_v23, 0.0  ;;  %v7510_v25 = vsel %vm14487_vm13, %v12407_v51, 0.0  ;;  %v7582_v48 = vmul.f32 %v12407_v51, %v12407_v51  ;;  %v7383_v28 = vpop.f32.mrb[63].mxu1 }
 0x3dc   :  { %v7707_v12 = vadd.f32 %v7706_v41, %v7705_v5  ;;  %v7511_v44 = vadd.f32 %v7510_v25, %v7509_v50  ;;  %v7727_v50 = vlaneseq }
 0x3dd   :  { %v7708_v20 = vsel %vm14487_vm13, %v7582_v48, 0.0  ;;  %v7721_v48 = vld [vmem:[%s14438_s3] sm:$0x1] }
 0x3de   :  { %v7512_v11 = vrot.slane %v7511_v44, 4  ;;  %v7709_v59 = vadd.f32 %v7708_v20, %v7707_v12  ;;  %v12415_v25 = vshrl.u32 %v7727_v50, 7 }
 0x3e0   :  { %v7513_v43 = vadd.f32 %v7512_v11, %v7511_v44  ;;  %v7710_v34 = vrot.slane %v7709_v59, 4  ;;  %v14643_v11 = vld [vmem:[#allocation4_spill] sm:$0xff] }
 0x3e2   :  { %v7514_v7 = vrot.slane %v7513_v43, 2  ;;  %v7711_v42 = vadd.f32 %v7710_v34, %v7709_v59  ;;  %v14644_v59 = vld [vmem:[#allocation5_spill] sm:$0xff]  ;;  %v14645_v34 = vld [vmem:[#allocation6_spill] sm:$0xff] }
 0x3e4   :  { %v7515_v49 = vadd.f32 %v7514_v7, %v7513_v43  ;;  %v7712_v60 = vrot.slane %v7711_v42, 2  ;;  %v14471_v43 = vsub.s32 0, %v12415_v25  ;;  %v14646_v7 = vld [vmem:[#allocation7_spill] sm:$0xff] }
 0x3e6   :  { %v7516_v23 = vrot.slane %v7515_v49, 1  ;;  %v7713_v9 = vadd.f32 %v7712_v60, %v7711_v42 }
 0x3e8   :  { %v7517_v47 = vadd.f32 %v7516_v23, %v7515_v49  ;;  %v7714_v19 = vrot.slane %v7713_v9, 1 }
 0x3ea   :  { %v7518_v8 = vmul.f32 0.001953125, %v7517_v47  ;;  %v7715_v2 = vadd.f32 %v7714_v19, %v7713_v9  ;;  %v12424_v19 = vld [vmem:[%s14439_s4] sm:$0x1]  ;;  %v14660_v47 = vld [vmem:[#allocation17_spill] sm:$0xff] }
 0x3ec   :  { %v7716_v51 = vmul.f32 0.001953125, %v7715_v2  ;;  %v7717_v28 = vmul.f32 %v7518_v8, %v7518_v8 }
 0x3ee   :  { %v7718_v41 = vsub.f32 %v7716_v51, %v7717_v28  ;;  %v14647_v28 = vld [vmem:[#allocation8_spill] sm:$0xff] }
 0x3f0   :  { %v7719_v5 = vadd.f32 1e-05, %v7718_v41  ;;  %v14648_v41 = vld [vmem:[#allocation9_spill] sm:$0xff] }
 0x3f2   :  { %9533 = vrsqrt.f32 %v7719_v5  ;;  %v14649_v5 = vld [vmem:[#allocation10_spill] sm:$0xff] }
 0x3fc   :  { %v9534_v12 = vpop.eup %9533 }
 0x3fd   :  { %v7722_v60 = vmul.f32 %v9534_v12, %v7721_v48  ;;  %v14650_v48 = vld [vmem:[#allocation11_spill] sm:$0xff] }
 0x3ff   :  { %v12426_v2 = vmul.f32 %v7722_v60, %v7518_v8  ;;  %v12430_v9 = vrot.slane %v7722_v60, %v14471_v43  ;;  %v14651_v60 = vld [vmem:[#allocation12_spill] sm:$0xff]  ;;  %v14662_v43 = vld [vmem:[#allocation18_spill] sm:$0xff] }
 0x401   :  { %v12436_v49 = vmul.f32 %v12430_v9, %v11374_v14  ;;  %v12440_v51 = vmul.f32 %v12430_v9, %v11415_v52  ;;  %v12444_v44 = vmul.f32 %v12430_v9, %v11437_v57  ;;  %v12448_v8 = vmul.f32 %v12430_v9, %v11459_v17 }
 0x402   :  { %v12452_v20 = vmul.f32 %v12430_v9, %v11535_v13  ;;  %v12456_v14 = vmul.f32 %v12430_v9, %v11548_v45  ;;  %v12460_v52 = vmul.f32 %v12430_v9, %v11591_v53  ;;  %v12464_v57 = vmul.f32 %v12430_v9, %v11606_v35 }
 0x403   :  { %v12468_v17 = vmul.f32 %v12430_v9, %v11628_v33  ;;  %v12472_v13 = vmul.f32 %v12430_v9, %v11697_v31  ;;  %v12476_v45 = vmul.f32 %v12430_v9, %v11754_v62  ;;  %v12480_v53 = vmul.f32 %v12430_v9, %v11767_v30 }
 0x404   :  { %v12484_v35 = vmul.f32 %v12430_v9, %v11801_v24  ;;  %v12488_v33 = vmul.f32 %v12430_v9, %v11878_v37  ;;  %v12492_v31 = vmul.f32 %v12430_v9, %v11902_v40  ;;  %v12496_v62 = vmul.f32 %v12430_v9, %v11934_v10 }
 0x405   :  { %v12500_v30 = vmul.f32 %v12430_v9, %v11973_v6  ;;  %v12504_v24 = vmul.f32 %v12430_v9, %v11991_v46  ;;  %v12508_v37 = vmul.f32 %v12430_v9, %v12023_v55  ;;  %v12512_v40 = vmul.f32 %v12430_v9, %v12034_v3 }
 0x406   :  { %v12516_v10 = vmul.f32 %v12430_v9, %v12050_v56  ;;  %v12520_v6 = vmul.f32 %v12430_v9, %v12060_v26  ;;  %v12524_v46 = vmul.f32 %v12430_v9, %v12102_v22  ;;  %v12528_v55 = vmul.f32 %v12430_v9, %v12111_v16 }
 0x407   :  { %v12532_v3 = vmul.f32 %v12430_v9, %v12135_v36  ;;  %v12536_v56 = vmul.f32 %v12430_v9, %v12144_v29  ;;  %v12540_v26 = vmul.f32 %v12430_v9, %v12167_v38  ;;  %v12544_v22 = vmul.f32 %v12430_v9, %v12174_v0 }
 0x408   :  { %v12548_v16 = vmul.f32 %v12430_v9, %v12187_v4  ;;  %v12552_v36 = vmul.f32 %v12430_v9, %v12193_v54  ;;  %v12556_v29 = vmul.f32 %v12430_v9, %v12205_v63  ;;  %v12560_v38 = vmul.f32 %v12430_v9, %v12211_v32 }
 0x409   :  { %v12564_v0 = vmul.f32 %v12430_v9, %v12006_v21  ;;  %v12568_v4 = vmul.f32 %v12430_v9, %v12011_v39  ;;  %v12572_v54 = vmul.f32 %v12430_v9, %v12042_v58  ;;  %v12576_v63 = vmul.f32 %v12430_v9, %v12046_v27 }
 0x40a   :  { %v12580_v32 = vmul.f32 %v12430_v9, %v12082_v18  ;;  %v12584_v21 = vmul.f32 %v12430_v9, %v14643_v11  ;;  %v12588_v39 = vmul.f32 %v12430_v9, %v14644_v59  ;;  %v12592_v58 = vmul.f32 %v12430_v9, %v12123_v61  ;;  %v14652_v11 = vld [vmem:[#allocation13_spill] sm:$0xff] }
 0x40b   :  { %v12596_v27 = vmul.f32 %v12430_v9, %v12155_v15  ;;  %v12600_v18 = vmul.f32 %v12430_v9, %v14645_v34  ;;  %v12604_v42 = vmul.f32 %v12430_v9, %v14646_v7  ;;  %v12608_v23 = vmul.f32 %v12430_v9, %v12185_v1  ;;  %v14654_v34 = vld [vmem:[#allocation14_spill] sm:$0xff] }
 0x40c   :  { %v12612_v61 = vmul.f32 %v12430_v9, %v14647_v28  ;;  %v12616_v15 = vmul.f32 %v12430_v9, %v14648_v41  ;;  %v12620_v50 = vmul.f32 %v12430_v9, %v14649_v5  ;;  %v12624_v12 = vmul.f32 %v12430_v9, %v14650_v48  ;;  %v14656_v28 = vld [vmem:[#allocation15_spill] sm:$0xff]  ;;  %v14658_v5 = vld [vmem:[#allocation16_spill] sm:$0xff] }
 0x40d   :  { %v12628_v1 = vmul.f32 %v12430_v9, %v14651_v60  ;;  %v12632_v59 = vmul.f32 %v12430_v9, %v14652_v11  ;;  %v12636_v7 = vmul.f32 %v12430_v9, %v14654_v34  ;;  %v12640_v41 = vmul.f32 %v12430_v9, %v14656_v28 }
 0x40e   :  { %v12644_v48 = vmul.f32 %v12430_v9, %v14658_v5  ;;  %v12648_v60 = vmul.f32 %v12430_v9, %v14660_v47  ;;  %v12652_v11 = vmul.f32 %v12430_v9, %v14662_v43 }
 0x40f   :  { %14653 = vst [vmem:[#allocation4_spill] sm:$0xff] %v12632_v59  ;;  %14655 = vst [vmem:[#allocation5_spill] sm:$0xff] %v12636_v7  ;;  %v14664_v59 = vld [vmem:[#allocation19_spill] sm:$0xff]  ;;  %v14666_v7 = vld [vmem:[#allocation20_spill] sm:$0xff] }
 0x410   :  { %14657 = vst [vmem:[#allocation6_spill] sm:$0xff] %v12640_v41  ;;  %14659 = vst [vmem:[#allocation7_spill] sm:$0xff] %v12644_v48  ;;  %v12656_v34 = vmul.f32 %v12430_v9, %v14664_v59  ;;  %v12660_v28 = vmul.f32 %v12430_v9, %v14666_v7  ;;  %v14668_v41 = vld [vmem:[#allocation21_spill] sm:$0xff]  ;;  %v14670_v48 = vld [vmem:[#allocation22_spill] sm:$0xff] }
 0x411   :  { %14661 = vst [vmem:[#allocation8_spill] sm:$0xff] %v12648_v60  ;;  %14663 = vst [vmem:[#allocation9_spill] sm:$0xff] %v12652_v11  ;;  %v12664_v5 = vmul.f32 %v12430_v9, %v14668_v41  ;;  %v12668_v47 = vmul.f32 %v12430_v9, %v14670_v48  ;;  %v14672_v60 = vld [vmem:[#allocation23_spill] sm:$0xff]  ;;  %v14674_v11 = vld [vmem:[#allocation24_spill] sm:$0xff] }
 0x412   :  { %14665 = vst [vmem:[#allocation10_spill] sm:$0xff] %v12656_v34  ;;  %14667 = vst [vmem:[#allocation11_spill] sm:$0xff] %v12660_v28  ;;  %v12672_v43 = vmul.f32 %v12430_v9, %v14672_v60  ;;  %v12676_v59 = vmul.f32 %v12430_v9, %v14674_v11  ;;  %v14675_v34 = vld [vmem:[#allocation25_spill] sm:$0xff]  ;;  %v14676_v28 = vld [vmem:[#allocation26_spill] sm:$0xff]  ;;  %v14679_v60 = vsub.f32 %v12424_v19, %v12426_v2 }
 0x413   :  { %14669 = vst [vmem:[#allocation12_spill] sm:$0xff] %v12664_v5  ;;  %14671 = vst [vmem:[#allocation13_spill] sm:$0xff] %v12668_v47  ;;  %v12680_v7 = vmul.f32 %v12430_v9, %v14675_v34  ;;  %v12684_v41 = vmul.f32 %v12430_v9, %v14676_v28  ;;  %v14677_v5 = vld [vmem:[#allocation27_spill] sm:$0xff]  ;;  %v14678_v47 = vsub.s32 0, %v12415_v25 }
 0x414   :  { %14673 = vst [vmem:[#allocation14_spill] sm:$0xff] %v12672_v43  ;;  %v12688_v48 = vmul.f32 %v12430_v9, %v14677_v5 }
 0x415   :  { %v12695_v43 = vrot.slane %v14679_v60, %v14678_v47 }
 0x417   :  { %v12699_v11 = vadd.f32 %v12695_v43, %v12436_v49  ;;  %v12703_v34 = vadd.f32 %v12695_v43, %v12440_v51  ;;  %v12707_v28 = vadd.f32 %v12695_v43, %v12444_v44  ;;  %v12711_v25 = vadd.f32 %v12695_v43, %v12448_v8  ;;  %v14699_v5 = vld [vmem:[#allocation6_spill] sm:$0xff]  ;;  %v14701_v47 = vld [vmem:[#allocation7_spill] sm:$0xff] }
 0x418   :  { %v12715_v19 = vadd.f32 %v12695_v43, %v12452_v20  ;;  %v12719_v2 = vadd.f32 %v12695_v43, %v12456_v14  ;;  %v12723_v9 = vadd.f32 %v12695_v43, %v12460_v52  ;;  %v12727_v49 = vadd.f32 %v12695_v43, %v12464_v57  ;;  %v14703_v60 = vld [vmem:[#allocation8_spill] sm:$0xff] }
 0x419   :  { %v12731_v51 = vadd.f32 %v12695_v43, %v12468_v17  ;;  %v12735_v44 = vadd.f32 %v12695_v43, %v12472_v13  ;;  %v12739_v8 = vadd.f32 %v12695_v43, %v12476_v45  ;;  %v12743_v20 = vadd.f32 %v12695_v43, %v12480_v53 }
 0x41a   :  { %v12747_v14 = vadd.f32 %v12695_v43, %v12484_v35  ;;  %v12751_v52 = vadd.f32 %v12695_v43, %v12488_v33  ;;  %v12755_v57 = vadd.f32 %v12695_v43, %v12492_v31  ;;  %v12759_v17 = vadd.f32 %v12695_v43, %v12496_v62 }
 0x41b   :  { %v12763_v13 = vadd.f32 %v12695_v43, %v12500_v30  ;;  %v12767_v45 = vadd.f32 %v12695_v43, %v12504_v24  ;;  %v12771_v53 = vadd.f32 %v12695_v43, %v12508_v37  ;;  %v12775_v35 = vadd.f32 %v12695_v43, %v12512_v40 }
 0x41c   :  { %v12779_v33 = vadd.f32 %v12695_v43, %v12516_v10  ;;  %v12783_v31 = vadd.f32 %v12695_v43, %v12520_v6  ;;  %v12787_v62 = vadd.f32 %v12695_v43, %v12524_v46  ;;  %v12791_v30 = vadd.f32 %v12695_v43, %v12528_v55 }
 0x41d   :  { %v12795_v24 = vadd.f32 %v12695_v43, %v12532_v3  ;;  %v12799_v37 = vadd.f32 %v12695_v43, %v12536_v56  ;;  %v12803_v40 = vadd.f32 %v12695_v43, %v12540_v26  ;;  %v12807_v10 = vadd.f32 %v12695_v43, %v12544_v22 }
 0x41e   :  { %v12811_v6 = vadd.f32 %v12695_v43, %v12548_v16  ;;  %v12815_v46 = vadd.f32 %v12695_v43, %v12552_v36  ;;  %v12819_v55 = vadd.f32 %v12695_v43, %v12556_v29  ;;  %v12823_v3 = vadd.f32 %v12695_v43, %v12560_v38 }
 0x41f   :  { %v12827_v56 = vadd.f32 %v12695_v43, %v12564_v0  ;;  %v12831_v26 = vadd.f32 %v12695_v43, %v12568_v4  ;;  %v12835_v22 = vadd.f32 %v12695_v43, %v12572_v54  ;;  %v12839_v16 = vadd.f32 %v12695_v43, %v12576_v63 }
 0x420   :  { %v12843_v36 = vadd.f32 %v12695_v43, %v12580_v32  ;;  %v12847_v29 = vadd.f32 %v12695_v43, %v12584_v21  ;;  %v12851_v38 = vadd.f32 %v12695_v43, %v12588_v39  ;;  %v12855_v0 = vadd.f32 %v12695_v43, %v12592_v58 }
 0x421   :  { %14680 = vst [vmem:[#allocation15_spill] sm:$0xff] %v12835_v22  ;;  %14681 = vst [vmem:[#allocation16_spill] sm:$0xff] %v12839_v16  ;;  %v12859_v4 = vadd.f32 %v12695_v43, %v12596_v27  ;;  %v12863_v54 = vadd.f32 %v12695_v43, %v12600_v18  ;;  %v12867_v63 = vadd.f32 %v12695_v43, %v12604_v42  ;;  %v14695_v42 = vld [vmem:[#allocation4_spill] sm:$0xff]  ;;  %v7890_v16 = vld [vmem:[%s14435_s0 + $0xc0] sm:$0xff] }
 0x422   :  { %14682 = vst [vmem:[#allocation17_spill] sm:$0xff] %v12843_v36  ;;  %14683 = vst [vmem:[#allocation18_spill] sm:$0xff] %v12847_v29  ;;  %v12871_v32 = vadd.f32 %v12695_v43, %v12608_v23  ;;  %v12875_v21 = vadd.f32 %v12695_v43, %v12612_v61  ;;  %v12879_v39 = vadd.f32 %v12695_v43, %v12616_v15  ;;  %v14697_v61 = vld [vmem:[#allocation5_spill] sm:$0xff]  ;;  %v7891_v22 = vld [vmem:[%s14435_s0 + $0xc8] sm:$0xff] }
 0x423   :  { %14684 = vst [vmem:[#allocation19_spill] sm:$0xff] %v12851_v38  ;;  %14685 = vst [vmem:[#allocation20_spill] sm:$0xff] %v12855_v0  ;;  %v12883_v58 = vadd.f32 %v12695_v43, %v12620_v50  ;;  %v12887_v27 = vadd.f32 %v12695_v43, %v12624_v12  ;;  %v12891_v18 = vadd.f32 %v12695_v43, %v12628_v1 }
 0x424   :  { %14686 = vst [vmem:[#allocation21_spill] sm:$0xff] %v12859_v4  ;;  %14687 = vst [vmem:[#allocation22_spill] sm:$0xff] %v12863_v54  ;;  %v12895_v23 = vadd.f32 %v12695_v43, %v14695_v42  ;;  %v12899_v15 = vadd.f32 %v12695_v43, %v14697_v61  ;;  %v12903_v50 = vadd.f32 %v12695_v43, %v14699_v5  ;;  %v7888_v54 = vld [vmem:[%s14435_s0 + $0xb0] sm:$0xff]  ;;  %v7889_v4 = vld [vmem:[%s14435_s0 + $0xb8] sm:$0xff] }
 0x425   :  { %14688 = vst [vmem:[#allocation23_spill] sm:$0xff] %v12867_v63  ;;  %14689 = vst [vmem:[#allocation24_spill] sm:$0xff] %v12871_v32  ;;  %v12907_v12 = vadd.f32 %v12695_v43, %v14701_v47  ;;  %v12911_v1 = vadd.f32 %v12695_v43, %v14703_v60  ;;  %v7886_v32 = vld [vmem:[%s14435_s0 + $0xa0] sm:$0xff]  ;;  %v7887_v63 = vld [vmem:[%s14435_s0 + $0xa8] sm:$0xff] }
 0x426   :  { %14690 = vst [vmem:[#allocation25_spill] sm:$0xff] %v12875_v21  ;;  %14691 = vst [vmem:[#allocation26_spill] sm:$0xff] %v12879_v39  ;;  %v7884_v39 = vld [vmem:[%s14435_s0 + $0x90] sm:$0xff]  ;;  %v7885_v21 = vld [vmem:[%s14435_s0 + $0x98] sm:$0xff] }
 0x427   :  { %14692 = vst [vmem:[#allocation27_spill] sm:$0xff] %v12883_v58  ;;  %14693 = vst [vmem:[#allocation28_spill] sm:$0xff] %v12887_v27  ;;  %v7882_v27 = vld [vmem:[%s14435_s0 + $0x80] sm:$0xff]  ;;  %v7883_v58 = vld [vmem:[%s14435_s0 + $0x88] sm:$0xff] }
 0x428   :  { %14694 = vst [vmem:[#allocation29_spill] sm:$0xff] %v12891_v18  ;;  %14696 = vst [vmem:[#allocation4_spill] sm:$0xff] %v12895_v23  ;;  %v14705_v18 = vld [vmem:[#allocation9_spill] sm:$0xff]  ;;  %v14707_v23 = vld [vmem:[#allocation10_spill] sm:$0xff] }
 0x429   :  { %14698 = vst [vmem:[#allocation5_spill] sm:$0xff] %v12899_v15  ;;  %14700 = vst [vmem:[#allocation6_spill] sm:$0xff] %v12903_v50  ;;  %v12915_v42 = vadd.f32 %v12695_v43, %v14705_v18  ;;  %v12919_v61 = vadd.f32 %v12695_v43, %v14707_v23  ;;  %v14709_v15 = vld [vmem:[#allocation11_spill] sm:$0xff]  ;;  %v14711_v50 = vld [vmem:[#allocation12_spill] sm:$0xff]  ;;  %v12939_v23 = vadd.f32 %v12695_v43, %v12676_v59 }
 0x42a   :  { %14702 = vst [vmem:[#allocation7_spill] sm:$0xff] %v12907_v12  ;;  %14704 = vst [vmem:[#allocation8_spill] sm:$0xff] %v12911_v1  ;;  %v12923_v5 = vadd.f32 %v12695_v43, %v14709_v15  ;;  %v12927_v47 = vadd.f32 %v12695_v43, %v14711_v50  ;;  %v14713_v12 = vld [vmem:[#allocation13_spill] sm:$0xff]  ;;  %v14715_v1 = vld [vmem:[#allocation14_spill] sm:$0xff]  ;;  %v12943_v15 = vadd.f32 %v12695_v43, %v12680_v7 }
 0x42b   :  { %14706 = vst [vmem:[#allocation9_spill] sm:$0xff] %v12915_v42  ;;  %14708 = vst [vmem:[#allocation10_spill] sm:$0xff] %v12919_v61  ;;  %v12931_v60 = vadd.f32 %v12695_v43, %v14713_v12  ;;  %v12935_v18 = vadd.f32 %v12695_v43, %v14715_v1  ;;  %v12947_v50 = vadd.f32 %v12695_v43, %v12684_v41  ;;  %v7866_v1 = vld [vmem:[%s14435_s0] sm:$0xff]  ;;  %v7867_v59 = vld [vmem:[%s14435_s0 + $0x8] sm:$0xff] }
 0x42c   :  { %14710 = vst [vmem:[#allocation11_spill] sm:$0xff] %v12923_v5  ;;  %14712 = vst [vmem:[#allocation12_spill] sm:$0xff] %v12927_v47  ;;  %v12951_v12 = vadd.f32 %v12695_v43, %v12688_v48  ;;  %v7868_v7 = vld [vmem:[%s14435_s0 + $0x10] sm:$0xff]  ;;  %v7869_v41 = vld [vmem:[%s14435_s0 + $0x18] sm:$0xff]  ;;  %v13026_v0 = vadd.f32 %v7866_v1, %v12699_v11  ;;  %v13029_v38 = vadd.f32 %v7867_v59, %v12703_v34 }
 0x42d   :  { %14714 = vst [vmem:[#allocation13_spill] sm:$0xff] %v12931_v60  ;;  %14716 = vst [vmem:[#allocation14_spill] sm:$0xff] %v12935_v18  ;;  %v7870_v43 = vld [vmem:[%s14435_s0 + $0x20] sm:$0xff]  ;;  %v7871_v48 = vld [vmem:[%s14435_s0 + $0x28] sm:$0xff]  ;;  %v13032_v29 = vadd.f32 %v7868_v7, %v12707_v28  ;;  %v13035_v36 = vadd.f32 %v7869_v41, %v12711_v25 }
 0x42e   :  { %14717 = vst [vmem:[#allocation30_spill] sm:$0xff] %v12939_v23  ;;  %14718 = vst [vmem:[#allocation31_spill] sm:$0xff] %v12943_v15  ;;  %v7874_v15 = vld [vmem:[%s14435_s0 + $0x40] sm:$0xff]  ;;  %v7875_v23 = vld [vmem:[%s14435_s0 + $0x48] sm:$0xff]  ;;  %v13050_v28 = vadd.f32 %v7870_v43, %v12715_v19  ;;  %v13053_v25 = vadd.f32 %v7871_v48, %v12719_v2  ;;  %vm7994_vm1 = vcmp.ge.f32.partialorder %v13026_v0, 0.0  ;;  %vm7995_vm3 = vcmp.ge.f32.partialorder %v13029_v38, 0.0 }
 0x42f   :  { %14719 = vst [vmem:[#allocation32_spill] sm:$0xff] %v12947_v50  ;;  %14720 = vst [vmem:[#allocation33_spill] sm:$0xff] %v12951_v12  ;;  %v7872_v12 = vld [vmem:[%s14435_s0 + $0x30] sm:$0xff]  ;;  %v7873_v50 = vld [vmem:[%s14435_s0 + $0x38] sm:$0xff]  ;;  %vm7996_vm7 = vcmp.ge.f32.partialorder %v13032_v29, 0.0  ;;  %vm7997_vm2 = vcmp.ge.f32.partialorder %v13035_v36, 0.0 }
 0x430   :  { %v7876_v18 = vld [vmem:[%s14435_s0 + $0x50] sm:$0xff]  ;;  %v7877_v60 = vld [vmem:[%s14435_s0 + $0x58] sm:$0xff]  ;;  %v7878_v47 = vld [vmem:[%s14435_s0 + $0x60] sm:$0xff]  ;;  %v13056_v1 = vadd.f32 %v7872_v12, %v12723_v9  ;;  %v13059_v59 = vadd.f32 %v7873_v50, %v12727_v49  ;;  %v13074_v9 = vadd.f32 %v7874_v15, %v12731_v51  ;;  %v13077_v49 = vadd.f32 %v7875_v23, %v12735_v44 }
 0x431   :  { %v7879_v5 = vld [vmem:[%s14435_s0 + $0x68] sm:$0xff]  ;;  %v7880_v61 = vld [vmem:[%s14435_s0 + $0x70] sm:$0xff]  ;;  %v7881_v42 = vld [vmem:[%s14435_s0 + $0x78] sm:$0xff]  ;;  %v13080_v50 = vadd.f32 %v7876_v18, %v12739_v8  ;;  %v13083_v12 = vadd.f32 %v7877_v60, %v12743_v20  ;;  %v13098_v8 = vadd.f32 %v7878_v47, %v12747_v14  ;;  %vm7998_vm10 = vcmp.ge.f32.partialorder %v13050_v28, 0.0 }
 0x432   :  { %v7892_v11 = vld [vmem:[%s14435_s0 + $0xd0] sm:$0xff]  ;;  %v7893_v34 = vld [vmem:[%s14435_s0 + $0xd8] sm:$0xff]  ;;  %v7894_v7 = vld [vmem:[%s14435_s0 + $0xe0] sm:$0xff]  ;;  %v13101_v20 = vadd.f32 %v7879_v5, %v12751_v52  ;;  %v13104_v60 = vadd.f32 %v7880_v61, %v12755_v57  ;;  %v13107_v18 = vadd.f32 %v7881_v42, %v12759_v17  ;;  %v13122_v57 = vadd.f32 %v7882_v27, %v12763_v13 }
 0x433   :  { %v7895_v41 = vld [vmem:[%s14435_s0 + $0xe8] sm:$0xff]  ;;  %v7896_v19 = vld [vmem:[%s14435_s0 + $0xf0] sm:$0xff]  ;;  %v7897_v2 = vld [vmem:[%s14435_s0 + $0xf8] sm:$0xff]  ;;  %v13125_v17 = vadd.f32 %v7883_v58, %v12767_v45  ;;  %v13128_v42 = vadd.f32 %v7884_v39, %v12771_v53  ;;  %v13131_v61 = vadd.f32 %v7885_v21, %v12775_v35  ;;  %v13143_v45 = vadd.f32 %v7886_v32, %v12779_v33 }
 0x434   :  { %v7898_v43 = vld [vmem:[%s14435_s0 + $0x100] sm:$0xff]  ;;  %v7899_v48 = vld [vmem:[%s14435_s0 + $0x108] sm:$0xff]  ;;  %v7900_v51 = vld [vmem:[%s14435_s0 + $0x110] sm:$0xff]  ;;  %14721 = vst [vmem:[#allocation34_spill] sm:$0xff] %v13101_v20  ;;  %v13146_v53 = vadd.f32 %v7887_v63, %v12783_v31  ;;  %v13149_v35 = vadd.f32 %v7888_v54, %v12787_v62  ;;  %v13152_v21 = vadd.f32 %v7889_v4, %v12791_v30  ;;  %v13164_v31 = vadd.f32 %v7890_v16, %v12795_v24 }
 0x435   :  { %v7901_v44 = vld [vmem:[%s14435_s0 + $0x118] sm:$0xff]  ;;  %14722 = vst [vmem:[#allocation35_spill] sm:$0xff] %v13104_v60  ;;  %14723 = vst [vmem:[#allocation36_spill] sm:$0xff] %v13107_v18  ;;  %v7902_v23 = vld [vmem:[%s14435_s0 + $0x120] sm:$0xff]  ;;  %v13167_v62 = vadd.f32 %v7891_v22, %v12799_v37  ;;  %v13170_v30 = vadd.f32 %v7892_v11, %v12803_v40  ;;  %v13173_v4 = vadd.f32 %v7893_v34, %v12807_v10  ;;  %vm7999_vm6 = vcmp.ge.f32.partialorder %v13053_v25, 0.0 }
 0x436   :  { %v7903_v15 = vld [vmem:[%s14435_s0 + $0x128] sm:$0xff]  ;;  %v7904_v14 = vld [vmem:[%s14435_s0 + $0x130] sm:$0xff]  ;;  %v7905_v52 = vld [vmem:[%s14435_s0 + $0x138] sm:$0xff]  ;;  %14724 = vst [vmem:[#allocation37_spill] sm:$0xff] %v13122_v57  ;;  %v13185_v37 = vadd.f32 %v7894_v7, %v12811_v6  ;;  %v13188_v40 = vadd.f32 %v7895_v41, %v12815_v46  ;;  %v13191_v10 = vadd.f32 %v7896_v19, %v12819_v55  ;;  %v13194_v22 = vadd.f32 %v7897_v2, %v12823_v3 }
 0x437   :  { %14725 = vst [vmem:[#allocation38_spill] sm:$0xff] %v13125_v17  ;;  %14726 = vst [vmem:[#allocation39_spill] sm:$0xff] %v13128_v42  ;;  %v7906_v5 = vld [vmem:[%s14435_s0 + $0x140] sm:$0xff]  ;;  %v7907_v47 = vld [vmem:[%s14435_s0 + $0x148] sm:$0xff]  ;;  %v13206_v46 = vadd.f32 %v7898_v43, %v12827_v56  ;;  %v13209_v55 = vadd.f32 %v7899_v48, %v12831_v26  ;;  %vm8000_vm11 = vcmp.ge.f32.partialorder %v13056_v1, 0.0  ;;  %vm8001_vm5 = vcmp.ge.f32.partialorder %v13059_v59, 0.0 }
 0x438   :  { %14727 = vst [vmem:[#allocation40_spill] sm:$0xff] %v13131_v61  ;;  %v7908_v13 = vld [vmem:[%s14435_s0 + $0x150] sm:$0xff]  ;;  %14728 = vst [vmem:[#allocation41_spill] sm:$0xff] %v13143_v45  ;;  %v7909_v39 = vld [vmem:[%s14435_s0 + $0x158] sm:$0xff]  ;;  %vm8002_vm0 = vcmp.ge.f32.partialorder %v13074_v9, 0.0  ;;  %vm8003_vm15 = vcmp.ge.f32.partialorder %v13077_v49, 0.0 }
 0x439   :  { %14729 = vst [vmem:[#allocation42_spill] sm:$0xff] %v13146_v53  ;;  %14730 = vst [vmem:[#allocation43_spill] sm:$0xff] %v13149_v35  ;;  %v7910_v58 = vld [vmem:[%s14435_s0 + $0x160] sm:$0xff]  ;;  %v7911_v33 = vld [vmem:[%s14435_s0 + $0x168] sm:$0xff]  ;;  %vm8004_vm4 = vcmp.ge.f32.partialorder %v13080_v50, 0.0  ;;  %vm8005_vm9 = vcmp.ge.f32.partialorder %v13083_v12, 0.0 }
 0x43a   :  { %14731 = vst [vmem:[#allocation44_spill] sm:$0xff] %v13152_v21  ;;  %14732 = vst [vmem:[#allocation45_spill] sm:$0xff] %v13164_v31  ;;  %v7912_v54 = vld [vmem:[%s14435_s0 + $0x170] sm:$0xff]  ;;  %v7913_v63 = vld [vmem:[%s14435_s0 + $0x178] sm:$0xff] }
 0x43b   :  { %v7914_v24 = vld [vmem:[%s14435_s0 + $0x180] sm:$0xff]  ;;  %v7915_v16 = vld [vmem:[%s14435_s0 + $0x188] sm:$0xff]  ;;  %v7916_v32 = vld [vmem:[%s14435_s0 + $0x190] sm:$0xff]  ;;  %14733 = vst [vmem:[#allocation46_spill] sm:$0xff] %v13206_v46 }
 0x43c   :  { %v7917_v6 = vld [vmem:[%s14435_s0 + $0x198] sm:$0xff]  ;;  %v14734_v3 = vld [vmem:[#allocation15_spill] sm:$0xff]  ;;  %v14736_v11 = vld [vmem:[#allocation16_spill] sm:$0xff] }
 0x43d   :  { %v13212_v27 = vadd.f32 %v7900_v51, %v14734_v3  ;;  %v13215_v34 = vadd.f32 %v7901_v44, %v14736_v11  ;;  %v7918_v7 = vld [vmem:[%s14435_s0 + $0x1a0] sm:$0xff]  ;;  %v7919_v41 = vld [vmem:[%s14435_s0 + $0x1a8] sm:$0xff]  ;;  %v7920_v56 = vld [vmem:[%s14435_s0 + $0x1b0] sm:$0xff] }
 0x43e   :  { %v14738_v26 = vld [vmem:[#allocation17_spill] sm:$0xff]  ;;  %v14740_v2 = vld [vmem:[#allocation18_spill] sm:$0xff]  ;;  %v14742_v48 = vld [vmem:[#allocation19_spill] sm:$0xff] }
 0x43f   :  { %14735 = vst [vmem:[#allocation15_spill] sm:$0xff] %v13212_v27  ;;  %14737 = vst [vmem:[#allocation16_spill] sm:$0xff] %v13215_v34  ;;  %v13227_v19 = vadd.f32 %v7902_v23, %v14738_v26  ;;  %v13230_v43 = vadd.f32 %v7903_v15, %v14740_v2  ;;  %v13233_v51 = vadd.f32 %v7904_v14, %v14742_v48  ;;  %v14744_v44 = vld [vmem:[#allocation20_spill] sm:$0xff]  ;;  %v7921_v11 = vld [vmem:[%s14435_s0 + $0x1b8] sm:$0xff] }
 0x440   :  { %v13236_v3 = vadd.f32 %v7905_v52, %v14744_v44  ;;  %v7922_v34 = vld [vmem:[%s14435_s0 + $0x1c0] sm:$0xff]  ;;  %v7923_v23 = vld [vmem:[%s14435_s0 + $0x1c8] sm:$0xff]  ;;  %v14746_v15 = vld [vmem:[#allocation21_spill] sm:$0xff] }
 0x441   :  { %14739 = vst [vmem:[#allocation17_spill] sm:$0xff] %v13227_v19  ;;  %14741 = vst [vmem:[#allocation18_spill] sm:$0xff] %v13230_v43  ;;  %v13248_v26 = vadd.f32 %v7906_v5, %v14746_v15  ;;  %v14748_v14 = vld [vmem:[#allocation22_spill] sm:$0xff]  ;;  %v14750_v52 = vld [vmem:[#allocation23_spill] sm:$0xff] }
 0x442   :  { %14743 = vst [vmem:[#allocation19_spill] sm:$0xff] %v13233_v51  ;;  %14745 = vst [vmem:[#allocation20_spill] sm:$0xff] %v13236_v3  ;;  %v13251_v2 = vadd.f32 %v7907_v47, %v14748_v14  ;;  %v13254_v48 = vadd.f32 %v7908_v13, %v14750_v52  ;;  %v14752_v44 = vld [vmem:[#allocation24_spill] sm:$0xff]  ;;  %v7925_v43 = vld [vmem:[%s14435_s0 + $0x1d8] sm:$0xff] }
 0x443   :  { %14747 = vst [vmem:[#allocation21_spill] sm:$0xff] %v13248_v26  ;;  %v13257_v3 = vadd.f32 %v7909_v39, %v14752_v44  ;;  %v7924_v51 = vld [vmem:[%s14435_s0 + $0x1d0] sm:$0xff]  ;;  %v7926_v5 = vld [vmem:[%s14435_s0 + $0x1e0] sm:$0xff]  ;;  %v14754_v47 = vld [vmem:[#allocation25_spill] sm:$0xff] }
 0x444   :  { %14749 = vst [vmem:[#allocation22_spill] sm:$0xff] %v13251_v2  ;;  %14751 = vst [vmem:[#allocation23_spill] sm:$0xff] %v13254_v48  ;;  %v13269_v15 = vadd.f32 %v7910_v58, %v14754_v47  ;;  %v14756_v13 = vld [vmem:[#allocation26_spill] sm:$0xff]  ;;  %v14758_v39 = vld [vmem:[#allocation27_spill] sm:$0xff] }
 0x445   :  { %14753 = vst [vmem:[#allocation24_spill] sm:$0xff] %v13257_v3  ;;  %v13272_v14 = vadd.f32 %v7911_v33, %v14756_v13  ;;  %v13275_v52 = vadd.f32 %v7912_v54, %v14758_v39  ;;  %v14760_v44 = vld [vmem:[#allocation28_spill] sm:$0xff]  ;;  %v7927_v48 = vld [vmem:[%s14435_s0 + $0x1e8] sm:$0xff]  ;;  %v7929_v58 = vld [vmem:[%s14435_s0 + $0x1f8] sm:$0xff] }
 0x446   :  { %14755 = vst [vmem:[#allocation25_spill] sm:$0xff] %v13269_v15  ;;  %v13278_v3 = vadd.f32 %v7913_v63, %v14760_v44  ;;  %v7928_v2 = vld [vmem:[%s14435_s0 + $0x1f0] sm:$0xff]  ;;  %v14762_v33 = vld [vmem:[#allocation29_spill] sm:$0xff]  ;;  %v14765_v44 = vld [vmem:[#allocation6_spill] sm:$0xff] }
 0x447   :  { %14757 = vst [vmem:[#allocation26_spill] sm:$0xff] %v13272_v14  ;;  %14759 = vst [vmem:[#allocation27_spill] sm:$0xff] %v13275_v52  ;;  %v13290_v47 = vadd.f32 %v7914_v24, %v14762_v33  ;;  %v14763_v54 = vld [vmem:[#allocation4_spill] sm:$0xff]  ;;  %v14764_v63 = vld [vmem:[#allocation5_spill] sm:$0xff] }
 0x448   :  { %14761 = vst [vmem:[#allocation28_spill] sm:$0xff] %v13278_v3  ;;  %v13293_v13 = vadd.f32 %v7915_v16, %v14763_v54  ;;  %v13296_v39 = vadd.f32 %v7916_v32, %v14764_v63  ;;  %v13299_v3 = vadd.f32 %v7917_v6, %v14765_v44  ;;  %v14766_v52 = vld [vmem:[#allocation7_spill] sm:$0xff]  ;;  %v14767_v15 = vld [vmem:[#allocation8_spill] sm:$0xff]  ;;  %v14768_v19 = vld [vmem:[#allocation9_spill] sm:$0xff] }
 0x449   :  { %v13302_v14 = vadd.f32 %v7918_v7, %v14766_v52  ;;  %v13305_v26 = vadd.f32 %v7919_v41, %v14767_v15  ;;  %v13308_v27 = vadd.f32 %v7920_v56, %v14768_v19  ;;  %v14769_v24 = vld [vmem:[#allocation10_spill] sm:$0xff]  ;;  %v14771_v32 = vld [vmem:[#allocation11_spill] sm:$0xff]  ;;  %v14772_v54 = vld [vmem:[#allocation12_spill] sm:$0xff] }
 0x44a   :  { %v13311_v33 = vadd.f32 %v7921_v11, %v14769_v24  ;;  %v13316_v16 = vld [vmem:[%s14440_s5] ss:$0 sm:$0xff]  ;;  %v13319_v6 = vadd.f32 %v7922_v34, %v14771_v32  ;;  %v13322_v7 = vadd.f32 %v7923_v23, %v14772_v54  ;;  %v14773_v52 = vld [vmem:[#allocation13_spill] sm:$0xff]  ;;  %v14776_v63 = vld [vmem:[#allocation31_spill] sm:$0xff]  ;;  %vm8043_vm13 = vcmp.ge.f32.partialorder %v13293_v13, 0.0 }
 0x44b   :  { %v13325_v41 = vadd.f32 %v7924_v51, %v14773_v52  ;;  %v14774_v15 = vld [vmem:[#allocation14_spill] sm:$0xff]  ;;  %v13334_v44 = vadd.f32 %v7927_v48, %v14776_v63  ;;  %v14777_v24 = vld [vmem:[#allocation32_spill] sm:$0xff]  ;;  %v14778_v34 = vld [vmem:[#allocation33_spill] sm:$0xff]  ;;  %v13344_v23 = vmul.f32 %v13316_v16, %v13026_v0  ;;  %v13352_v51 = vmul.f32 %v13316_v16, %v13032_v29 }
 0x44c   :  { %14770 = vst [vmem:[#allocation29_spill] sm:$0xff] %v13311_v33  ;;  %v13328_v56 = vadd.f32 %v7925_v43, %v14774_v15  ;;  %v14775_v19 = vld [vmem:[#allocation30_spill] sm:$0xff]  ;;  %v13337_v33 = vadd.f32 %v7928_v2, %v14777_v24  ;;  %v13340_v32 = vadd.f32 %v7929_v58, %v14778_v34  ;;  %v13348_v43 = vmul.f32 %v13316_v16, %v13029_v38 }
 0x44d   :  { %v13331_v11 = vadd.f32 %v7926_v5, %v14775_v19  ;;  %v13356_v48 = vmul.f32 %v13316_v16, %v13035_v36  ;;  %v13360_v2 = vmul.f32 %v13316_v16, %v13050_v28  ;;  %v13364_v5 = vmul.f32 %v13316_v16, %v13053_v25 }
 0x44e   :  { %v13368_v58 = vmul.f32 %v13316_v16, %v13056_v1  ;;  %v13372_v54 = vmul.f32 %v13316_v16, %v13059_v59  ;;  %v13376_v52 = vmul.f32 %v13316_v16, %v13074_v9  ;;  %v13380_v15 = vmul.f32 %v13316_v16, %v13077_v49 }
 0x44f   :  { %v13384_v19 = vmul.f32 %v13316_v16, %v13080_v50  ;;  %v13388_v63 = vmul.f32 %v13316_v16, %v13083_v12  ;;  %v13392_v24 = vmul.f32 %v13316_v16, %v13098_v8  ;;  %v13396_v34 = vmul.f32 %v13316_v16, %v13101_v20 }
 0x450   :  { %14779 = vst [vmem:[#allocation4_spill] sm:$0xff] %v13376_v52  ;;  %14780 = vst [vmem:[#allocation5_spill] sm:$0xff] %v13380_v15  ;;  %v13400_v52 = vmul.f32 %v13316_v16, %v13104_v60  ;;  %v13404_v15 = vmul.f32 %v13316_v16, %v13107_v18  ;;  %vm8044_vm14 = vcmp.ge.f32.partialorder %v13296_v39, 0.0 }
 0x451   :  { %14781 = vst [vmem:[#allocation6_spill] sm:$0xff] %v13384_v19  ;;  %14782 = vst [vmem:[#allocation7_spill] sm:$0xff] %v13388_v63  ;;  %v13408_v19 = vmul.f32 %v13316_v16, %v13122_v57  ;;  %v13412_v63 = vmul.f32 %v13316_v16, %v13125_v17 }
 0x452   :  { %14783 = vst [vmem:[#allocation8_spill] sm:$0xff] %v13392_v24  ;;  %14784 = vst [vmem:[#allocation9_spill] sm:$0xff] %v13396_v34  ;;  %v13416_v24 = vmul.f32 %v13316_v16, %v13128_v42  ;;  %v13420_v34 = vmul.f32 %v13316_v16, %v13131_v61 }
 0x453   :  { %14785 = vst [vmem:[#allocation10_spill] sm:$0xff] %v13400_v52  ;;  %14786 = vst [vmem:[#allocation11_spill] sm:$0xff] %v13404_v15 }
 0x454   :  { %14787 = vst [vmem:[#allocation12_spill] sm:$0xff] %v13408_v19  ;;  %14788 = vst [vmem:[#allocation13_spill] sm:$0xff] %v13412_v63  ;;  %v13428_v19 = vmul.f32 %v13316_v16, %v13143_v45  ;;  %v13432_v63 = vmul.f32 %v13316_v16, %v13146_v53 }
 0x455   :  { %14789 = vst [vmem:[#allocation14_spill] sm:$0xff] %v13416_v24  ;;  %14790 = vst [vmem:[#allocation30_spill] sm:$0xff] %v13420_v34  ;;  %v13436_v24 = vmul.f32 %v13316_v16, %v13149_v35  ;;  %v13440_v34 = vmul.f32 %v13316_v16, %v13152_v21 }
 0x456   :  { %14791 = vst [vmem:[#allocation31_spill] sm:$0xff] %v13428_v19  ;;  %14792 = vst [vmem:[#allocation32_spill] sm:$0xff] %v13432_v63  ;;  %v13448_v19 = vmul.f32 %v13316_v16, %v13164_v31  ;;  %v13452_v63 = vmul.f32 %v13316_v16, %v13167_v62 }
 0x457   :  { %14793 = vst [vmem:[#allocation33_spill] sm:$0xff] %v13436_v24  ;;  %14794 = vst [vmem:[#allocation47_spill] sm:$0xff] %v13440_v34  ;;  %v13456_v24 = vmul.f32 %v13316_v16, %v13170_v30  ;;  %v13460_v34 = vmul.f32 %v13316_v16, %v13173_v4 }
 0x458   :  { %14795 = vst [vmem:[#allocation48_spill] sm:$0xff] %v13448_v19  ;;  %14796 = vst [vmem:[#allocation49_spill] sm:$0xff] %v13452_v63  ;;  %v13468_v19 = vmul.f32 %v13316_v16, %v13185_v37  ;;  %v13472_v63 = vmul.f32 %v13316_v16, %v13188_v40 }
 0x459   :  { %14797 = vst [vmem:[#allocation50_spill] sm:$0xff] %v13456_v24  ;;  %14798 = vst [vmem:[#allocation51_spill] sm:$0xff] %v13460_v34  ;;  %v13476_v24 = vmul.f32 %v13316_v16, %v13191_v10  ;;  %v13480_v34 = vmul.f32 %v13316_v16, %v13194_v22 }
 0x45a   :  { %14799 = vst [vmem:[#allocation52_spill] sm:$0xff] %v13468_v19  ;;  %14800 = vst [vmem:[#allocation53_spill] sm:$0xff] %v13472_v63  ;;  %v13488_v19 = vmul.f32 %v13316_v16, %v13206_v46  ;;  %v13492_v63 = vmul.f32 %v13316_v16, %v13209_v55 }
 0x45b   :  { %14801 = vst [vmem:[#allocation54_spill] sm:$0xff] %v13476_v24  ;;  %14802 = vst [vmem:[#allocation55_spill] sm:$0xff] %v13480_v34  ;;  %v14805_v24 = vld [vmem:[#allocation15_spill] sm:$0xff]  ;;  %v14807_v34 = vld [vmem:[#allocation16_spill] sm:$0xff] }
 0x45c   :  { %14803 = vst [vmem:[#allocation56_spill] sm:$0xff] %v13488_v19  ;;  %14804 = vst [vmem:[#allocation57_spill] sm:$0xff] %v13492_v63  ;;  %v13496_v15 = vmul.f32 %v13316_v16, %v14805_v24  ;;  %v13500_v52 = vmul.f32 %v13316_v16, %v14807_v34  ;;  %v14809_v19 = vld [vmem:[#allocation17_spill] sm:$0xff]  ;;  %v14811_v63 = vld [vmem:[#allocation18_spill] sm:$0xff] }
 0x45d   :  { %v13508_v18 = vmul.f32 %v13316_v16, %v14809_v19  ;;  %v13512_v60 = vmul.f32 %v13316_v16, %v14811_v63 }
 0x45e   :  { %14806 = vst [vmem:[#allocation15_spill] sm:$0xff] %v13496_v15  ;;  %14808 = vst [vmem:[#allocation16_spill] sm:$0xff] %v13500_v52  ;;  %v14813_v15 = vld [vmem:[#allocation19_spill] sm:$0xff]  ;;  %v14815_v52 = vld [vmem:[#allocation20_spill] sm:$0xff] }
 0x45f   :  { %14810 = vst [vmem:[#allocation17_spill] sm:$0xff] %v13508_v18  ;;  %14812 = vst [vmem:[#allocation18_spill] sm:$0xff] %v13512_v60  ;;  %v13516_v20 = vmul.f32 %v13316_v16, %v14813_v15  ;;  %v13520_v57 = vmul.f32 %v13316_v16, %v14815_v52  ;;  %v14817_v18 = vld [vmem:[#allocation21_spill] sm:$0xff]  ;;  %v14819_v60 = vld [vmem:[#allocation22_spill] sm:$0xff] }
 0x460   :  { %v13528_v61 = vmul.f32 %v13316_v16, %v14817_v18  ;;  %v13532_v42 = vmul.f32 %v13316_v16, %v14819_v60 }
 0x461   :  { %14814 = vst [vmem:[#allocation19_spill] sm:$0xff] %v13516_v20  ;;  %14816 = vst [vmem:[#allocation20_spill] sm:$0xff] %v13520_v57  ;;  %v14821_v20 = vld [vmem:[#allocation23_spill] sm:$0xff]  ;;  %v14823_v57 = vld [vmem:[#allocation24_spill] sm:$0xff] }
 0x462   :  { %14818 = vst [vmem:[#allocation21_spill] sm:$0xff] %v13528_v61  ;;  %14820 = vst [vmem:[#allocation22_spill] sm:$0xff] %v13532_v42  ;;  %v13536_v17 = vmul.f32 %v13316_v16, %v14821_v20  ;;  %v13540_v45 = vmul.f32 %v13316_v16, %v14823_v57  ;;  %v14825_v61 = vld [vmem:[#allocation25_spill] sm:$0xff]  ;;  %v14827_v42 = vld [vmem:[#allocation26_spill] sm:$0xff] }
 0x463   :  { %v13548_v21 = vmul.f32 %v13316_v16, %v14825_v61  ;;  %v13552_v35 = vmul.f32 %v13316_v16, %v14827_v42  ;;  %vm8038_vm12 = vcmp.ge.f32.partialorder %v14825_v61, 0.0  ;;  %vm8039_vm8 = vcmp.ge.f32.partialorder %v14827_v42, 0.0 }
 0x464   :  { %14822 = vst [vmem:[#allocation23_spill] sm:$0xff] %v13536_v17  ;;  %14824 = vst [vmem:[#allocation24_spill] sm:$0xff] %v13540_v45  ;;  %v14829_v17 = vld [vmem:[#allocation27_spill] sm:$0xff]  ;;  %v14831_v45 = vld [vmem:[#allocation28_spill] sm:$0xff] }
 0x465   :  { %14826 = vst [vmem:[#allocation25_spill] sm:$0xff] %v13548_v21  ;;  %14828 = vst [vmem:[#allocation26_spill] sm:$0xff] %v13552_v35  ;;  %v13556_v53 = vmul.f32 %v13316_v16, %v14829_v17  ;;  %v13560_v31 = vmul.f32 %v13316_v16, %v14831_v45  ;;  %v13568_v21 = vmul.f32 %v13316_v16, %v13290_v47 }
 0x466   :  { %v13572_v35 = vmul.f32 %v13316_v16, %v13293_v13 }
 0x467   :  { %14830 = vst [vmem:[#allocation27_spill] sm:$0xff] %v13556_v53  ;;  %14832 = vst [vmem:[#allocation28_spill] sm:$0xff] %v13560_v31  ;;  %v13576_v53 = vmul.f32 %v13316_v16, %v13296_v39  ;;  %v13580_v31 = vmul.f32 %v13316_v16, %v13299_v3 }
 0x468   :  { %14833 = vst [vmem:[#allocation58_spill] sm:$0xff] %v13568_v21  ;;  %14834 = vst [vmem:[#allocation59_spill] sm:$0xff] %v13572_v35  ;;  %v13588_v21 = vmul.f32 %v13316_v16, %v13302_v14  ;;  %v13592_v35 = vmul.f32 %v13316_v16, %v13305_v26 }
 0x469   :  { %14835 = vst [vmem:[#allocation60_spill] sm:$0xff] %v13576_v53  ;;  %14836 = vst [vmem:[#allocation61_spill] sm:$0xff] %v13580_v31  ;;  %v13596_v53 = vmul.f32 %v13316_v16, %v13308_v27  ;;  %v14840_v31 = vld [vmem:[#allocation29_spill] sm:$0xff] }
 0x46a   :  { %14837 = vst [vmem:[#allocation62_spill] sm:$0xff] %v13588_v21  ;;  %14838 = vst [vmem:[#allocation63_spill] sm:$0xff] %v13592_v35  ;;  %v13600_v46 = vmul.f32 %v13316_v16, %v14840_v31  ;;  %v13608_v21 = vmul.f32 %v13316_v16, %v13319_v6  ;;  %v13612_v35 = vmul.f32 %v13316_v16, %v13322_v7 }
 0x46b   :  { %14839 = vst [vmem:[#allocation64_spill] sm:$0xff] %v13596_v53  ;;  %v13616_v53 = vmul.f32 %v13316_v16, %v13325_v41 }
 0x46c   :  { %14841 = vst [vmem:[#allocation29_spill] sm:$0xff] %v13600_v46  ;;  %14842 = vst [vmem:[#allocation65_spill] sm:$0xff] %v13608_v21  ;;  %v13620_v46 = vmul.f32 %v13316_v16, %v13328_v56  ;;  %v13628_v21 = vmul.f32 %v13316_v16, %v13331_v11 }
 0x46d   :  { %14843 = vst [vmem:[#allocation66_spill] sm:$0xff] %v13612_v35  ;;  %14844 = vst [vmem:[#allocation67_spill] sm:$0xff] %v13616_v53  ;;  %v13632_v35 = vmul.f32 %v13316_v16, %v13334_v44  ;;  %v13636_v53 = vmul.f32 %v13316_v16, %v13337_v33 }
 0x46e   :  { %14845 = vst [vmem:[#allocation68_spill] sm:$0xff] %v13620_v46  ;;  %v13640_v46 = vmul.f32 %v13316_v16, %v13340_v32  ;;  %v13656_v16 = vsel %vm7995_vm3, %v13029_v38, %v13348_v43  ;;  %vm8045_vm3 = vcmp.ge.f32.partialorder %v13299_v3, 0.0  ;;  %v13690_v38 = vsel %vm8000_vm11, %v13056_v1, %v13368_v58  ;;  %v14850_v1 = vld [vmem:[#allocation5_spill] sm:$0xff]  ;;  %v14860_v58 = vld [vmem:[#allocation35_spill] sm:$0xff] }
 0x46f   :  { %14846 = vst [vmem:[#allocation69_spill] sm:$0xff] %v13632_v35  ;;  %14847 = vst [vmem:[#allocation70_spill] sm:$0xff] %v13636_v53  ;;  %v13650_v35 = vsel %vm7994_vm1, %v13026_v0, %v13344_v23  ;;  %v13668_v53 = vsel %vm7997_vm2, %v13035_v36, %v13356_v48  ;;  %vm8042_vm1 = vcmp.ge.f32.partialorder %v13290_v47, 0.0  ;;  %v13684_v36 = vsel %vm7999_vm6, %v13053_v25, %v13364_v5  ;;  %v14851_v23 = vld [vmem:[#allocation6_spill] sm:$0xff] }
 0x470   :  { %14848 = vst [vmem:[#allocation71_spill] sm:$0xff] %v13640_v46  ;;  %v13662_v46 = vsel %vm7996_vm7, %v13032_v29, %v13352_v51  ;;  %v13678_v29 = vsel %vm7998_vm10, %v13050_v28, %v13360_v2  ;;  %v13696_v0 = vsel %vm8001_vm5, %v13059_v59, %v13372_v54  ;;  %vm8046_vm7 = vcmp.ge.f32.partialorder %v13302_v14, 0.0  ;;  %v14849_v28 = vld [vmem:[#allocation4_spill] sm:$0xff]  ;;  %v14852_v51 = vld [vmem:[#allocation7_spill] sm:$0xff]  ;;  %v14856_v2 = vld [vmem:[#allocation34_spill] sm:$0xff] }
 0x471   :  { %vm8047_vm2 = vcmp.ge.f32.partialorder %v13305_v26, 0.0  ;;  %vm8048_vm10 = vcmp.ge.f32.partialorder %v13308_v27, 0.0  ;;  %v13706_v25 = vsel %vm8002_vm0, %v13074_v9, %v14849_v28  ;;  %v13712_v59 = vsel %vm8003_vm15, %v13077_v49, %v14850_v1  ;;  %v14853_v9 = vld [vmem:[#allocation8_spill] sm:$0xff]  ;;  %v14859_v5 = vld [vmem:[#allocation10_spill] sm:$0xff]  ;;  %v14863_v28 = vld [vmem:[#allocation11_spill] sm:$0xff] }
 0x472   :  { %v13718_v43 = vsel %vm8004_vm4, %v13080_v50, %v14851_v23  ;;  %v13724_v48 = vsel %vm8005_vm9, %v13083_v12, %v14852_v51  ;;  %vm14854_vm6 = vcmp.ge.f32.partialorder %v13098_v8, 0.0  ;;  %v14855_v50 = vld [vmem:[#allocation9_spill] sm:$0xff]  ;;  %vm14857_vm4 = vcmp.ge.f32.partialorder %v14856_v2, 0.0  ;;  %v14864_v1 = vld [vmem:[#allocation36_spill] sm:$0xff] }
 0x473   :  { %v13734_v49 = vsel %vm14854_vm6, %v13098_v8, %v14853_v9  ;;  %v13740_v12 = vsel %vm14857_vm4, %v14856_v2, %v14855_v50  ;;  %vm14861_vm9 = vcmp.ge.f32.partialorder %v14860_v58, 0.0  ;;  %vm14865_vm15 = vcmp.ge.f32.partialorder %v14864_v1, 0.0  ;;  %v14867_v8 = vld [vmem:[#allocation12_spill] sm:$0xff]  ;;  %v14868_v51 = vld [vmem:[#allocation37_spill] sm:$0xff]  ;;  %v14872_v2 = vld [vmem:[#allocation38_spill] sm:$0xff] }
 0x474   :  { %14858 = vst [vmem:[#allocation4_spill] sm:$0xff] %v13740_v12  ;;  %v13746_v54 = vsel %vm14861_vm9, %v14860_v58, %v14859_v5  ;;  %v13752_v23 = vsel %vm14865_vm15, %v14864_v1, %v14863_v28  ;;  %vm8054_vm6 = vcmp.ge.f32.partialorder %v13331_v11, 0.0  ;;  %vm8055_vm0 = vcmp.ge.f32.partialorder %v13334_v44, 0.0  ;;  %v14871_v50 = vld [vmem:[#allocation13_spill] sm:$0xff]  ;;  %v14875_v58 = vld [vmem:[#allocation14_spill] sm:$0xff]  ;;  %v14876_v28 = vld [vmem:[#allocation39_spill] sm:$0xff] }
 0x475   :  { %14862 = vst [vmem:[#allocation5_spill] sm:$0xff] %v13746_v54  ;;  %14866 = vst [vmem:[#allocation6_spill] sm:$0xff] %v13752_v23  ;;  %vm8056_vm5 = vcmp.ge.f32.partialorder %v13337_v33, 0.0  ;;  %vm14869_vm11 = vcmp.ge.f32.partialorder %v14868_v51, 0.0  ;;  %vm14873_vm9 = vcmp.ge.f32.partialorder %v14872_v2, 0.0  ;;  %vm14877_vm15 = vcmp.ge.f32.partialorder %v14876_v28, 0.0 }
 0x476   :  { %v13762_v9 = vsel %vm14869_vm11, %v14868_v51, %v14867_v8  ;;  %v13768_v5 = vsel %vm14873_vm9, %v14872_v2, %v14871_v50  ;;  %v13774_v1 = vsel %vm14877_vm15, %v14876_v28, %v14875_v58  ;;  %v14879_v23 = vld [vmem:[#allocation30_spill] sm:$0xff]  ;;  %v14880_v54 = vld [vmem:[#allocation40_spill] sm:$0xff]  ;;  %v14883_v8 = vld [vmem:[#allocation31_spill] sm:$0xff] }
 0x477   :  { %14870 = vst [vmem:[#allocation7_spill] sm:$0xff] %v13762_v9  ;;  %14874 = vst [vmem:[#allocation8_spill] sm:$0xff] %v13768_v5  ;;  %vm14881_vm4 = vcmp.ge.f32.partialorder %v14880_v54, 0.0  ;;  %v14884_v51 = vld [vmem:[#allocation41_spill] sm:$0xff]  ;;  %v14887_v50 = vld [vmem:[#allocation32_spill] sm:$0xff] }
 0x478   :  { %14878 = vst [vmem:[#allocation9_spill] sm:$0xff] %v13774_v1  ;;  %v13780_v12 = vsel %vm14881_vm4, %v14880_v54, %v14879_v23  ;;  %vm14885_vm11 = vcmp.ge.f32.partialorder %v14884_v51, 0.0  ;;  %v14888_v2 = vld [vmem:[#allocation42_spill] sm:$0xff]  ;;  %v14890_v58 = vld [vmem:[#allocation33_spill] sm:$0xff]  ;;  %v14891_v28 = vld [vmem:[#allocation43_spill] sm:$0xff] }
 0x479   :  { %14882 = vst [vmem:[#allocation34_spill] sm:$0xff] %v13780_v12  ;;  %v13786_v9 = vsel %vm14885_vm11, %v14884_v51, %v14883_v8  ;;  %vm14889_vm9 = vcmp.ge.f32.partialorder %v14888_v2, 0.0  ;;  %vm14892_vm15 = vcmp.ge.f32.partialorder %v14891_v28, 0.0  ;;  %v14893_v54 = vld [vmem:[#allocation47_spill] sm:$0xff]  ;;  %v14894_v23 = vld [vmem:[#allocation44_spill] sm:$0xff]  ;;  %v14897_v51 = vld [vmem:[#allocation45_spill] sm:$0xff] }
 0x47a   :  { %14886 = vst [vmem:[#allocation10_spill] sm:$0xff] %v13786_v9  ;;  %v13792_v5 = vsel %vm14889_vm9, %v14888_v2, %v14887_v50  ;;  %v13798_v1 = vsel %vm14892_vm15, %v14891_v28, %v14890_v58  ;;  %vm14895_vm4 = vcmp.ge.f32.partialorder %v14894_v23, 0.0  ;;  %v14896_v8 = vld [vmem:[#allocation48_spill] sm:$0xff]  ;;  %vm14898_vm11 = vcmp.ge.f32.partialorder %v14897_v51, 0.0  ;;  %v14899_v50 = vld [vmem:[#allocation49_spill] sm:$0xff]  ;;  %v14901_v58 = vld [vmem:[#allocation50_spill] sm:$0xff] }
 0x47b   :  { %v13804_v12 = vsel %vm14895_vm4, %v14894_v23, %v14893_v54  ;;  %v13810_v9 = vsel %vm14898_vm11, %v14897_v51, %v14896_v8  ;;  %vm14900_vm9 = vcmp.ge.f32.partialorder %v13167_v62, 0.0  ;;  %vm14902_vm15 = vcmp.ge.f32.partialorder %v13170_v30, 0.0  ;;  %v14903_v54 = vld [vmem:[#allocation51_spill] sm:$0xff]  ;;  %v14905_v8 = vld [vmem:[#allocation52_spill] sm:$0xff] }
 0x47c   :  { %v13816_v2 = vsel %vm14900_vm9, %v13167_v62, %v14899_v50  ;;  %v13822_v28 = vsel %vm14902_vm15, %v13170_v30, %v14901_v58  ;;  %vm14904_vm4 = vcmp.ge.f32.partialorder %v13173_v4, 0.0  ;;  %vm14906_vm11 = vcmp.ge.f32.partialorder %v13185_v37, 0.0  ;;  %v14908_v62 = vld [vmem:[#allocation53_spill] sm:$0xff]  ;;  %v14910_v30 = vld [vmem:[#allocation54_spill] sm:$0xff] }
 0x47d   :  { %v13828_v23 = vsel %vm14904_vm4, %v13173_v4, %v14903_v54  ;;  %v13834_v51 = vsel %vm14906_vm11, %v13185_v37, %v14905_v8  ;;  %vm14909_vm9 = vcmp.ge.f32.partialorder %v13188_v40, 0.0  ;;  %vm14911_vm15 = vcmp.ge.f32.partialorder %v13191_v10, 0.0  ;;  %v14912_v4 = vld [vmem:[#allocation55_spill] sm:$0xff]  ;;  %v14914_v37 = vld [vmem:[#allocation56_spill] sm:$0xff]  ;;  %v14915_v8 = vld [vmem:[#allocation46_spill] sm:$0xff] }
 0x47e   :  { %14907 = vst [vmem:[#allocation35_spill] sm:$0xff] %v13834_v51  ;;  %v13840_v50 = vsel %vm14909_vm9, %v13188_v40, %v14908_v62  ;;  %v13846_v58 = vsel %vm14911_vm15, %v13191_v10, %v14910_v30  ;;  %vm14913_vm4 = vcmp.ge.f32.partialorder %v13194_v22, 0.0  ;;  %vm14916_vm11 = vcmp.ge.f32.partialorder %v14915_v8, 0.0  ;;  %v14917_v40 = vld [vmem:[#allocation57_spill] sm:$0xff]  ;;  %v14919_v10 = vld [vmem:[#allocation15_spill] sm:$0xff] }
 0x47f   :  { %v13852_v54 = vsel %vm14913_vm4, %v13194_v22, %v14912_v4  ;;  %v13858_v51 = vsel %vm14916_vm11, %v14915_v8, %v14914_v37  ;;  %vm14918_vm9 = vcmp.ge.f32.partialorder %v13209_v55, 0.0  ;;  %vm14920_vm15 = vcmp.ge.f32.partialorder %v14805_v24, 0.0  ;;  %v14921_v22 = vld [vmem:[#allocation16_spill] sm:$0xff]  ;;  %v14923_v37 = vld [vmem:[#allocation17_spill] sm:$0xff] }
 0x480   :  { %v13864_v62 = vsel %vm14918_vm9, %v13209_v55, %v14917_v40  ;;  %v13870_v30 = vsel %vm14920_vm15, %v14805_v24, %v14919_v10  ;;  %vm14922_vm4 = vcmp.ge.f32.partialorder %v14807_v34, 0.0  ;;  %vm14924_vm11 = vcmp.ge.f32.partialorder %v14809_v19, 0.0  ;;  %v14925_v55 = vld [vmem:[#allocation18_spill] sm:$0xff]  ;;  %v14927_v24 = vld [vmem:[#allocation19_spill] sm:$0xff] }
 0x481   :  { %v13876_v4 = vsel %vm14922_vm4, %v14807_v34, %v14921_v22  ;;  %v13882_v8 = vsel %vm14924_vm11, %v14809_v19, %v14923_v37  ;;  %vm14926_vm9 = vcmp.ge.f32.partialorder %v14811_v63, 0.0  ;;  %vm14928_vm15 = vcmp.ge.f32.partialorder %v14813_v15, 0.0  ;;  %v14929_v34 = vld [vmem:[#allocation20_spill] sm:$0xff]  ;;  %v14931_v19 = vld [vmem:[#allocation21_spill] sm:$0xff] }
 0x482   :  { %v13888_v40 = vsel %vm14926_vm9, %v14811_v63, %v14925_v55  ;;  %v13894_v10 = vsel %vm14928_vm15, %v14813_v15, %v14927_v24  ;;  %vm14930_vm4 = vcmp.ge.f32.partialorder %v14815_v52, 0.0  ;;  %vm14932_vm11 = vcmp.ge.f32.partialorder %v14817_v18, 0.0  ;;  %v14933_v63 = vld [vmem:[#allocation22_spill] sm:$0xff]  ;;  %v14935_v15 = vld [vmem:[#allocation23_spill] sm:$0xff] }
 0x483   :  { %v13900_v22 = vsel %vm14930_vm4, %v14815_v52, %v14929_v34  ;;  %v13906_v37 = vsel %vm14932_vm11, %v14817_v18, %v14931_v19  ;;  %vm14934_vm9 = vcmp.ge.f32.partialorder %v14819_v60, 0.0  ;;  %vm14936_vm15 = vcmp.ge.f32.partialorder %v14821_v20, 0.0  ;;  %v14937_v52 = vld [vmem:[#allocation24_spill] sm:$0xff]  ;;  %v14939_v18 = vld [vmem:[#allocation25_spill] sm:$0xff] }
 0x484   :  { %v13912_v55 = vsel %vm14934_vm9, %v14819_v60, %v14933_v63  ;;  %v13918_v24 = vsel %vm14936_vm15, %v14821_v20, %v14935_v15  ;;  %vm14938_vm4 = vcmp.ge.f32.partialorder %v14823_v57, 0.0  ;;  %v13930_v19 = vsel %vm8038_vm12, %v14825_v61, %v14939_v18  ;;  %v14940_v60 = vld [vmem:[#allocation26_spill] sm:$0xff]  ;;  %v14941_v20 = vld [vmem:[#allocation27_spill] sm:$0xff] }
 0x485   :  { %v13924_v34 = vsel %vm14938_vm4, %v14823_v57, %v14937_v52  ;;  %v13936_v63 = vsel %vm8039_vm8, %v14827_v42, %v14940_v60  ;;  %vm14942_vm11 = vcmp.ge.f32.partialorder %v14829_v17, 0.0  ;;  %v14943_v57 = vld [vmem:[#allocation28_spill] sm:$0xff]  ;;  %vm14944_vm9 = vcmp.ge.f32.partialorder %v14831_v45, 0.0  ;;  %v14945_v61 = vld [vmem:[#allocation58_spill] sm:$0xff]  ;;  %v14946_v42 = vld [vmem:[#allocation59_spill] sm:$0xff] }
 0x486   :  { %v13942_v15 = vsel %vm14942_vm11, %v14829_v17, %v14941_v20  ;;  %v13948_v52 = vsel %vm14944_vm9, %v14831_v45, %v14943_v57  ;;  %v13954_v18 = vsel %vm8042_vm1, %v13290_v47, %v14945_v61  ;;  %v13960_v60 = vsel %vm8043_vm13, %v13293_v13, %v14946_v42  ;;  %v14947_v17 = vld [vmem:[#allocation60_spill] sm:$0xff]  ;;  %v14948_v45 = vld [vmem:[#allocation61_spill] sm:$0xff]  ;;  %v14949_v47 = vld [vmem:[#allocation62_spill] sm:$0xff] }
 0x487   :  { %v13966_v20 = vsel %vm8044_vm14, %v13296_v39, %v14947_v17  ;;  %v13972_v57 = vsel %vm8045_vm3, %v13299_v3, %v14948_v45  ;;  %v13978_v61 = vsel %vm8046_vm7, %v13302_v14, %v14949_v47  ;;  %v14950_v13 = vld [vmem:[#allocation63_spill] sm:$0xff]  ;;  %v14951_v39 = vld [vmem:[#allocation64_spill] sm:$0xff]  ;;  %v14952_v3 = vld [vmem:[#allocation29_spill] sm:$0xff]  ;;  %vm14953_vm13 = vcmp.ge.f32.partialorder %v14840_v31, 0.0 }
 0x488   :  { %v13984_v42 = vsel %vm8047_vm2, %v13305_v26, %v14950_v13  ;;  %v13990_v17 = vsel %vm8048_vm10, %v13308_v27, %v14951_v39  ;;  %v13996_v45 = vsel %vm14953_vm13, %v14840_v31, %v14952_v3  ;;  %v14001_v14 = vld [vmem:[%s14441_s6] ss:$0 sm:$0xff]  ;;  %v14955_v47 = vld [vmem:[#allocation65_spill] sm:$0xff]  ;;  %vm14956_vm12 = vcmp.ge.f32.partialorder %v13319_v6, 0.0  ;;  %v14959_v39 = vld [vmem:[#allocation67_spill] sm:$0xff] }
 0x489   :  { %14954 = vst [vmem:[#allocation11_spill] sm:$0xff] %v13996_v45  ;;  %v14007_v26 = vsel %vm14956_vm12, %v13319_v6, %v14955_v47  ;;  %v14957_v13 = vld [vmem:[#allocation66_spill] sm:$0xff]  ;;  %vm14958_vm8 = vcmp.ge.f32.partialorder %v13322_v7, 0.0  ;;  %vm14960_vm14 = vcmp.ge.f32.partialorder %v13325_v41, 0.0  ;;  %v14961_v3 = vld [vmem:[#allocation68_spill] sm:$0xff]  ;;  %vm14962_vm1 = vcmp.ge.f32.partialorder %v13328_v56, 0.0 }
 0x48a   :  { %v14013_v27 = vsel %vm14958_vm8, %v13322_v7, %v14957_v13  ;;  %v14019_v31 = vsel %vm14960_vm14, %v13325_v41, %v14959_v39  ;;  %v14025_v45 = vsel %vm14962_vm1, %v13328_v56, %v14961_v3  ;;  %v14031_v6 = vsel %vm8054_vm6, %v13331_v11, %v13628_v21  ;;  %v14963_v7 = vld [vmem:[#allocation69_spill] sm:$0xff]  ;;  %v14964_v41 = vld [vmem:[#allocation70_spill] sm:$0xff]  ;;  %v14965_v56 = vld [vmem:[#allocation71_spill] sm:$0xff] }
 0x48b   :  { %v14037_v47 = vsel %vm8055_vm0, %v13334_v44, %v14963_v7  ;;  %v14043_v13 = vsel %vm8056_vm5, %v13337_v33, %v14964_v41  ;;  %vm14966_vm3 = vcmp.ge.f32.partialorder %v13340_v32, 0.0  ;;  %v8200_v21 = vadd.f32 %v14001_v14, %v13650_v35 }
 0x48c   :  { %v14049_v39 = vsel %vm14966_vm3, %v13340_v32, %v14965_v56  ;;  %v8201_v11 = vadd.f32 %v14001_v14, %v13656_v16  ;;  %v8202_v44 = vadd.f32 %v14001_v14, %v13662_v46  ;;  %v8203_v3 = vadd.f32 %v14001_v14, %v13668_v53  ;;  %v14979_v56 = vld [vmem:[#allocation8_spill] sm:$0xff] }
 0x48d   :  { %v8204_v33 = vadd.f32 %v14001_v14, %v13678_v29  ;;  %v8205_v7 = vadd.f32 %v14001_v14, %v13684_v36  ;;  %v8206_v32 = vadd.f32 %v14001_v14, %v13690_v38  ;;  %v8207_v35 = vadd.f32 %v14001_v14, %v13696_v0  ;;  %v14971_v38 = vld [vmem:[#allocation4_spill] sm:$0xff] }
 0x48e   :  { %v8208_v16 = vadd.f32 %v14001_v14, %v13706_v25  ;;  %v8209_v46 = vadd.f32 %v14001_v14, %v13712_v59  ;;  %v8210_v53 = vadd.f32 %v14001_v14, %v13718_v43  ;;  %v8211_v29 = vadd.f32 %v14001_v14, %v13724_v48  ;;  %v14972_v25 = vld [vmem:[#allocation5_spill] sm:$0xff]  ;;  %v14973_v43 = vld [vmem:[#allocation6_spill] sm:$0xff] }
 0x48f   :  { %vm14967_vm7 = vcmask 130048   ;;  %v8212_v36 = vadd.f32 %v14001_v14, %v13734_v49  ;;  %v8213_v0 = vadd.f32 %v14001_v14, %v14971_v38  ;;  %v8214_v59 = vadd.f32 %v14001_v14, %v14972_v25  ;;  %v14978_v49 = vld [vmem:[#allocation7_spill] sm:$0xff] }
 0x490   :  { %8264 = vst.msk [vmem:[%s14442_s7] sm:$0xff] %vm14967_vm7, %v8200_v21  ;;  %vm14968_vm2 = vmmov %vm14967_vm7  ;;  %v8215_v48 = vadd.f32 %v14001_v14, %v14973_v43  ;;  %v8216_v41 = vadd.f32 %v14001_v14, %v14978_v49  ;;  %v8217_v21 = vadd.f32 %v14001_v14, %v14979_v56 }
 0x491   :  { %8265 = vst.msk [vmem:[%s14442_s7 + $0x8] sm:$0xff] %vm14968_vm2, %v8201_v11  ;;  %vm14969_vm10 = vmmov %vm14968_vm2  ;;  %v14980_v11 = vld [vmem:[#allocation9_spill] sm:$0xff] }
 0x492   :  { %8266 = vst.msk [vmem:[%s14442_s7 + $0x10] sm:$0xff] %vm14969_vm10, %v8202_v44  ;;  %vm14970_vm5 = vmmov %vm14968_vm2  ;;  %v8218_v44 = vadd.f32 %v14001_v14, %v14980_v11 }
 0x493   :  { %8267 = vst.msk [vmem:[%s14442_s7 + $0x18] sm:$0xff] %vm14970_vm5, %v8203_v3  ;;  %vm14974_vm0 = vmmov %vm14968_vm2  ;;  %v14981_v3 = vld [vmem:[#allocation34_spill] sm:$0xff] }
 0x494   :  { %8268 = vst.msk [vmem:[%s14442_s7 + $0x20] sm:$0xff] %vm14974_vm0, %v8204_v33  ;;  %vm14975_vm6 = vmmov %vm14974_vm0  ;;  %v8219_v33 = vadd.f32 %v14001_v14, %v14981_v3 }
 0x495   :  { %8269 = vst.msk [vmem:[%s14442_s7 + $0x28] sm:$0xff] %vm14975_vm6, %v8205_v7  ;;  %vm14976_vm15 = vmmov %vm14974_vm0  ;;  %v14986_v7 = vld [vmem:[#allocation10_spill] sm:$0xff] }
 0x496   :  { %8270 = vst.msk [vmem:[%s14442_s7 + $0x30] sm:$0xff] %vm14976_vm15, %v8206_v32  ;;  %vm14977_vm4 = vmmov %vm14974_vm0  ;;  %v8220_v32 = vadd.f32 %v14001_v14, %v14986_v7 }
 0x497   :  { %8271 = vst.msk [vmem:[%s14442_s7 + $0x38] sm:$0xff] %vm14977_vm4, %v8207_v35  ;;  %vm14982_vm11 = vmmov %vm14974_vm0  ;;  %v8221_v35 = vadd.f32 %v14001_v14, %v13792_v5  ;;  %v8225_v5 = vadd.f32 %v14001_v14, %v13816_v2 }
 0x498   :  { %8272 = vst.msk [vmem:[%s14442_s7 + $0x40] sm:$0xff] %vm14982_vm11, %v8208_v16  ;;  %vm14983_vm9 = vmmov %vm14974_vm0  ;;  %v8222_v16 = vadd.f32 %v14001_v14, %v13798_v1  ;;  %v8226_v1 = vadd.f32 %v14001_v14, %v13822_v28  ;;  %v8229_v28 = vadd.f32 %v14001_v14, %v13840_v50  ;;  %v8232_v50 = vadd.f32 %v14001_v14, %v13858_v51 }
 0x499   :  { %8273 = vst.msk [vmem:[%s14442_s7 + $0x48] sm:$0xff] %vm14983_vm9, %v8209_v46  ;;  %vm14984_vm13 = vmmov %vm14974_vm0  ;;  %v8223_v46 = vadd.f32 %v14001_v14, %v13804_v12  ;;  %v8224_v12 = vadd.f32 %v14001_v14, %v13810_v9  ;;  %v14995_v9 = vld [vmem:[#allocation35_spill] sm:$0xff]  ;;  %v8236_v51 = vadd.f32 %v14001_v14, %v13882_v8  ;;  %v8240_v8 = vadd.f32 %v14001_v14, %v13906_v37 }
 0x49a   :  { %8274 = vst.msk [vmem:[%s14442_s7 + $0x50] sm:$0xff] %vm14984_vm13, %v8210_v53  ;;  %vm14985_vm12 = vmmov %vm14974_vm0  ;;  %v8227_v53 = vadd.f32 %v14001_v14, %v13828_v23  ;;  %v8228_v2 = vadd.f32 %v14001_v14, %v14995_v9  ;;  %v8230_v23 = vadd.f32 %v14001_v14, %v13846_v58  ;;  %v8233_v58 = vadd.f32 %v14001_v14, %v13864_v62 }
 0x49b   :  { %8275 = vst.msk [vmem:[%s14442_s7 + $0x58] sm:$0xff] %vm14985_vm12, %v8211_v29  ;;  %vm14987_vm8 = vmmov %vm14974_vm0  ;;  %v8231_v29 = vadd.f32 %v14001_v14, %v13852_v54  ;;  %v8234_v54 = vadd.f32 %v14001_v14, %v13870_v30  ;;  %v8237_v62 = vadd.f32 %v14001_v14, %v13888_v40  ;;  %v8238_v30 = vadd.f32 %v14001_v14, %v13894_v10 }
 0x49c   :  { %8276 = vst.msk [vmem:[%s14442_s7 + $0x60] sm:$0xff] %vm14987_vm8, %v8212_v36  ;;  %vm14988_vm14 = vmmov %vm14974_vm0  ;;  %v8235_v36 = vadd.f32 %v14001_v14, %v13876_v4  ;;  %v8239_v4 = vadd.f32 %v14001_v14, %v13900_v22  ;;  %v8241_v40 = vadd.f32 %v14001_v14, %v13912_v55  ;;  %v8242_v10 = vadd.f32 %v14001_v14, %v13918_v24 }
 0x49d   :  { %8277 = vst.msk [vmem:[%s14442_s7 + $0x68] sm:$0xff] %vm14988_vm14, %v8213_v0  ;;  %vm14989_vm1 = vmmov %vm14974_vm0  ;;  %v8243_v22 = vadd.f32 %v14001_v14, %v13924_v34  ;;  %v8244_v37 = vadd.f32 %v14001_v14, %v13930_v19  ;;  %v8245_v55 = vadd.f32 %v14001_v14, %v13936_v63  ;;  %v8246_v24 = vadd.f32 %v14001_v14, %v13942_v15 }
 0x49e   :  { %8278 = vst.msk [vmem:[%s14442_s7 + $0x70] sm:$0xff] %vm14989_vm1, %v8214_v59  ;;  %vm14990_vm3 = vmmov %vm14974_vm0  ;;  %v8247_v34 = vadd.f32 %v14001_v14, %v13948_v52  ;;  %v8248_v19 = vadd.f32 %v14001_v14, %v13954_v18  ;;  %v8249_v63 = vadd.f32 %v14001_v14, %v13960_v60  ;;  %v8250_v15 = vadd.f32 %v14001_v14, %v13966_v20 }
 0x49f   :  { %8279 = vst.msk [vmem:[%s14442_s7 + $0x78] sm:$0xff] %vm14990_vm3, %v8215_v48  ;;  %vm14991_vm7 = vmmov %vm14974_vm0  ;;  %v8251_v52 = vadd.f32 %v14001_v14, %v13972_v57  ;;  %v8252_v18 = vadd.f32 %v14001_v14, %v13978_v61  ;;  %v8253_v60 = vadd.f32 %v14001_v14, %v13984_v42  ;;  %v8254_v20 = vadd.f32 %v14001_v14, %v13990_v17  ;;  %v15018_v57 = vld [vmem:[#allocation11_spill] sm:$0xff] }
 0x4a0   :  { %8280 = vst.msk [vmem:[%s14442_s7 + $0x80] sm:$0xff] %vm14991_vm7, %v8216_v41  ;;  %vm14992_vm2 = vmmov %vm14974_vm0  ;;  %v8255_v38 = vadd.f32 %v14001_v14, %v15018_v57  ;;  %v8256_v61 = vadd.f32 %v14001_v14, %v14007_v26  ;;  %v8257_v42 = vadd.f32 %v14001_v14, %v14013_v27  ;;  %v8258_v17 = vadd.f32 %v14001_v14, %v14019_v31 }
 0x4a1   :  { %8281 = vst.msk [vmem:[%s14442_s7 + $0x88] sm:$0xff] %vm14992_vm2, %v8217_v21  ;;  %vm14993_vm10 = vmmov %vm14974_vm0  ;;  %v8259_v0 = vadd.f32 %v14001_v14, %v14025_v45  ;;  %v8260_v45 = vadd.f32 %v14001_v14, %v14031_v6  ;;  %v8261_v26 = vadd.f32 %v14001_v14, %v14037_v47  ;;  %v8262_v27 = vadd.f32 %v14001_v14, %v14043_v13 }
 0x4a2   :  { %8282 = vst.msk [vmem:[%s14442_s7 + $0x90] sm:$0xff] %vm14993_vm10, %v8218_v44  ;;  %vm14994_vm5 = vmmov %vm14974_vm0  ;;  %v8263_v31 = vadd.f32 %v14001_v14, %v14049_v39 }
 0x4a3   :  { %8283 = vst.msk [vmem:[%s14442_s7 + $0x98] sm:$0xff] %vm14994_vm5, %v8219_v33  ;;  %vm14996_vm6 = vmmov %vm14974_vm0 }
 0x4a4   :  { %8284 = vst.msk [vmem:[%s14442_s7 + $0xa0] sm:$0xff] %vm14974_vm0, %v8220_v32  ;;  %vm14997_vm15 = vmmov %vm14974_vm0 }
 0x4a5   :  { %8285 = vst.msk [vmem:[%s14442_s7 + $0xa8] sm:$0xff] %vm14996_vm6, %v8221_v35  ;;  %vm14998_vm4 = vmmov %vm14974_vm0 }
 0x4a6   :  { %8286 = vst.msk [vmem:[%s14442_s7 + $0xb0] sm:$0xff] %vm14997_vm15, %v8222_v16  ;;  %vm14999_vm11 = vmmov %vm14974_vm0 }
 0x4a7   :  { %8287 = vst.msk [vmem:[%s14442_s7 + $0xb8] sm:$0xff] %vm14998_vm4, %v8223_v46  ;;  %vm15000_vm9 = vmmov %vm14974_vm0 }
 0x4a8   :  { %8288 = vst.msk [vmem:[%s14442_s7 + $0xc0] sm:$0xff] %vm14999_vm11, %v8224_v12  ;;  %vm15001_vm13 = vmmov %vm14974_vm0 }
 0x4a9   :  { %8289 = vst.msk [vmem:[%s14442_s7 + $0xc8] sm:$0xff] %vm15000_vm9, %v8225_v5  ;;  %vm15002_vm12 = vmmov %vm14974_vm0 }
 0x4aa   :  { %8290 = vst.msk [vmem:[%s14442_s7 + $0xd0] sm:$0xff] %vm15001_vm13, %v8226_v1  ;;  %vm15003_vm8 = vmmov %vm14974_vm0 }
 0x4ab   :  { %8291 = vst.msk [vmem:[%s14442_s7 + $0xd8] sm:$0xff] %vm15002_vm12, %v8227_v53  ;;  %vm15004_vm14 = vmmov %vm14974_vm0 }
 0x4ac   :  { %8292 = vst.msk [vmem:[%s14442_s7 + $0xe0] sm:$0xff] %vm15003_vm8, %v8228_v2  ;;  %vm15005_vm1 = vmmov %vm14974_vm0 }
 0x4ad   :  { %8293 = vst.msk [vmem:[%s14442_s7 + $0xe8] sm:$0xff] %vm15004_vm14, %v8229_v28  ;;  %vm15006_vm3 = vmmov %vm14974_vm0 }
 0x4ae   :  { %8294 = vst.msk [vmem:[%s14442_s7 + $0xf0] sm:$0xff] %vm15005_vm1, %v8230_v23  ;;  %vm15007_vm7 = vmmov %vm14974_vm0 }
 0x4af   :  { %8295 = vst.msk [vmem:[%s14442_s7 + $0xf8] sm:$0xff] %vm15006_vm3, %v8231_v29  ;;  %vm15008_vm2 = vmmov %vm14974_vm0 }
 0x4b0   :  { %8296 = vst.msk [vmem:[%s14442_s7 + $0x100] sm:$0xff] %vm15007_vm7, %v8232_v50  ;;  %vm15009_vm10 = vmmov %vm14974_vm0 }
 0x4b1   :  { %8297 = vst.msk [vmem:[%s14442_s7 + $0x108] sm:$0xff] %vm15008_vm2, %v8233_v58  ;;  %vm15010_vm5 = vmmov %vm14974_vm0 }
 0x4b2   :  { %8298 = vst.msk [vmem:[%s14442_s7 + $0x110] sm:$0xff] %vm15009_vm10, %v8234_v54  ;;  %vm15011_vm6 = vmmov %vm14974_vm0 }
 0x4b3   :  { %8299 = vst.msk [vmem:[%s14442_s7 + $0x118] sm:$0xff] %vm15010_vm5, %v8235_v36  ;;  %vm15012_vm15 = vmmov %vm14974_vm0 }
 0x4b4   :  { %8300 = vst.msk [vmem:[%s14442_s7 + $0x120] sm:$0xff] %vm14974_vm0, %v8236_v51  ;;  %vm15013_vm4 = vmmov %vm14974_vm0 }
 0x4b5   :  { %8301 = vst.msk [vmem:[%s14442_s7 + $0x128] sm:$0xff] %vm15011_vm6, %v8237_v62  ;;  %vm15014_vm11 = vmmov %vm14974_vm0 }
 0x4b6   :  { %8302 = vst.msk [vmem:[%s14442_s7 + $0x130] sm:$0xff] %vm15012_vm15, %v8238_v30  ;;  %vm15015_vm9 = vmmov %vm14974_vm0 }
 0x4b7   :  { %8303 = vst.msk [vmem:[%s14442_s7 + $0x138] sm:$0xff] %vm15013_vm4, %v8239_v4  ;;  %vm15016_vm13 = vmmov %vm14974_vm0 }
 0x4b8   :  { %8304 = vst.msk [vmem:[%s14442_s7 + $0x140] sm:$0xff] %vm15014_vm11, %v8240_v8  ;;  %vm15017_vm12 = vmmov %vm14974_vm0 }
 0x4b9   :  { %8305 = vst.msk [vmem:[%s14442_s7 + $0x148] sm:$0xff] %vm15015_vm9, %v8241_v40  ;;  %vm15019_vm8 = vmmov %vm14974_vm0 }
 0x4ba   :  { %8306 = vst.msk [vmem:[%s14442_s7 + $0x150] sm:$0xff] %vm15016_vm13, %v8242_v10  ;;  %vm15020_vm14 = vmmov %vm14974_vm0 }
 0x4bb   :  { %8307 = vst.msk [vmem:[%s14442_s7 + $0x158] sm:$0xff] %vm15017_vm12, %v8243_v22  ;;  %vm15021_vm1 = vmmov %vm14974_vm0 }
 0x4bc   :  { %8308 = vst.msk [vmem:[%s14442_s7 + $0x160] sm:$0xff] %vm15019_vm8, %v8244_v37  ;;  %vm15022_vm3 = vmmov %vm14974_vm0 }
 0x4bd   :  { %8309 = vst.msk [vmem:[%s14442_s7 + $0x168] sm:$0xff] %vm15020_vm14, %v8245_v55  ;;  %vm15023_vm7 = vmmov %vm14974_vm0 }
 0x4be   :  { %8310 = vst.msk [vmem:[%s14442_s7 + $0x170] sm:$0xff] %vm15021_vm1, %v8246_v24  ;;  %vm15024_vm2 = vmmov %vm14974_vm0 }
 0x4bf   :  { %8311 = vst.msk [vmem:[%s14442_s7 + $0x178] sm:$0xff] %vm15022_vm3, %v8247_v34  ;;  %vm15025_vm10 = vmmov %vm14974_vm0 }
 0x4c0   :  { %8312 = vst.msk [vmem:[%s14442_s7 + $0x180] sm:$0xff] %vm15023_vm7, %v8248_v19  ;;  %vm15026_vm5 = vmmov %vm14974_vm0 }
 0x4c1   :  { %8313 = vst.msk [vmem:[%s14442_s7 + $0x188] sm:$0xff] %vm15024_vm2, %v8249_v63  ;;  %vm15027_vm6 = vmmov %vm14974_vm0 }
 0x4c2   :  { %8314 = vst.msk [vmem:[%s14442_s7 + $0x190] sm:$0xff] %vm15025_vm10, %v8250_v15  ;;  %vm15028_vm15 = vmmov %vm14974_vm0 }
 0x4c3   :  { %8315 = vst.msk [vmem:[%s14442_s7 + $0x198] sm:$0xff] %vm15026_vm5, %v8251_v52  ;;  %vm15029_vm4 = vmmov %vm14974_vm0 }
 0x4c4   :  { %8316 = vst.msk [vmem:[%s14442_s7 + $0x1a0] sm:$0xff] %vm14974_vm0, %v8252_v18  ;;  %vm15030_vm11 = vmmov %vm14974_vm0 }
 0x4c5   :  { %8317 = vst.msk [vmem:[%s14442_s7 + $0x1a8] sm:$0xff] %vm15027_vm6, %v8253_v60  ;;  %vm15031_vm9 = vmmov %vm14974_vm0 }
 0x4c6   :  { %8318 = vst.msk [vmem:[%s14442_s7 + $0x1b0] sm:$0xff] %vm15028_vm15, %v8254_v20  ;;  %vm15032_vm13 = vmmov %vm14974_vm0 }
 0x4c7   :  { %8319 = vst.msk [vmem:[%s14442_s7 + $0x1b8] sm:$0xff] %vm15029_vm4, %v8255_v38  ;;  %vm15033_vm12 = vmmov %vm14974_vm0 }
 0x4c8   :  { %8320 = vst.msk [vmem:[%s14442_s7 + $0x1c0] sm:$0xff] %vm15030_vm11, %v8256_v61  ;;  %vm15034_vm8 = vmmov %vm14974_vm0 }
 0x4c9   :  { %8321 = vst.msk [vmem:[%s14442_s7 + $0x1c8] sm:$0xff] %vm15031_vm9, %v8257_v42  ;;  %vm15035_vm14 = vmmov %vm14974_vm0 }
 0x4ca   :  { %8322 = vst.msk [vmem:[%s14442_s7 + $0x1d0] sm:$0xff] %vm15032_vm13, %v8258_v17  ;;  %vm15036_vm1 = vmmov %vm14974_vm0 }
 0x4cb   :  { %8323 = vst.msk [vmem:[%s14442_s7 + $0x1d8] sm:$0xff] %vm15033_vm12, %v8259_v0  ;;  %vm15037_vm3 = vmmov %vm14974_vm0 }
 0x4cc   :  { %8324 = vst.msk [vmem:[%s14442_s7 + $0x1e0] sm:$0xff] %vm15034_vm8, %v8260_v45 }
 0x4cd   :  { %8325 = vst.msk [vmem:[%s14442_s7 + $0x1e8] sm:$0xff] %vm15035_vm14, %v8261_v26 }
 0x4ce   :  { %8326 = vst.msk [vmem:[%s14442_s7 + $0x1f0] sm:$0xff] %vm15036_vm1, %v8262_v27 }
 0x4cf   :  { %8327 = vst.msk [vmem:[%s14442_s7 + $0x1f8] sm:$0xff] %vm15037_vm3, %v8263_v31 }

</bundles_post_ra>
